<compile_context>
chip_gen: v5e
topology: v5e:2x2
jax: 0.10.0
libtpu: 0.0.40
codegen_flags: <defaults>
</compile_context>

<pallas_src>
import functools

import numpy as np

import jax
import jax.numpy as jnp
from jax import lax
from jax.experimental import pallas as pl
from jax.experimental.pallas import tpu as pltpu

_LANE = 128


def _round_up(x, m):
    return ((x + m - 1) // m) * m


# ---------------------------------------------------------------------------
# The single fused kernel (conv1+pool, conv2+pool, fc1, fc2, fc3)
# ---------------------------------------------------------------------------
def _lenet_kernel(x_ref, t1e_ref, t1o_ref, b1_ref, t2e_ref, t2o_ref, b2_ref,
                  wf1_ref, bf1_ref, wf2_ref, bf2_ref, wf3_ref, bf3_ref,
                  o_ref):
    tb = x_ref.shape[0] // 24
    x = x_ref[...]                                       # (TB*24, 140) bf16

    # ---- conv1 (1->20, 5x5) : ONE K=140 contraction per output-column parity.
    # rows = (b, oh); even/odd output columns kept separate so the 2x2 W-pool
    # below is a plain elementwise max (no lane relayout).
    y_e = jnp.dot(x, t1e_ref[...], preferred_element_type=jnp.float32)
    y_o = jnp.dot(x, t1o_ref[...], preferred_element_type=jnp.float32)
    y = jnp.maximum(y_e, y_o)                            # W-pool   (TB*24, 240)
    y = y.reshape(tb * 12, 2, 240)
    y = jnp.maximum(y[:, 0, :], y[:, 1, :])              # H-pool   (TB*12, 240)
    p1 = jnp.maximum(y + b1_ref[...], 0.0)               # bias + ReLU (shared)
    p1 = p1.reshape(tb, 12, 240)                         # (b, ih) x (iw*20 + ci)

    # ---- conv2 (20->50, 5x5) : 5 dots of K=240 (w-taps x cin folded into
    # per-di block-Toeplitz weights), even/odd output columns separate.
    acc_e = jnp.zeros((tb * 8, 200), jnp.float32)
    acc_o = jnp.zeros((tb * 8, 200), jnp.float32)
    for di in range(5):
        s = p1[:, di:di + 8, :].reshape(tb * 8, 240).astype(jnp.bfloat16)
        acc_e = acc_e + jnp.dot(s, t2e_ref[di], preferred_element_type=jnp.float32)
        acc_o = acc_o + jnp.dot(s, t2o_ref[di], preferred_element_type=jnp.float32)
    y2 = jnp.maximum(acc_e, acc_o)                       # W-pool   (TB*8, 200)
    y2 = y2.reshape(tb * 4, 2, 200)
    y2 = jnp.maximum(y2[:, 0, :], y2[:, 1, :])           # H-pool   (TB*4, 200)
    p2 = jnp.maximum(y2 + b2_ref[...], 0.0)
    p2 = p2.reshape(tb, 4, 200)                          # (b, h) x (w*50 + c)

    # ---- fc1 (800 -> 500) + relu : K=800 done as 4 K=200 dots (one per pooled
    # row h); the torch NCHW flatten permutation is folded into wf1's packing.
    acc1 = jnp.zeros((tb, 500), jnp.float32)
    for hh in range(4):
        acc1 = acc1 + jnp.dot(p2[:, hh, :].astype(jnp.bfloat16), wf1_ref[hh],
                              preferred_element_type=jnp.float32)
    h1 = jnp.maximum(acc1 + bf1_ref[...], 0.0).astype(jnp.bfloat16)   # (TB, 500)

    # ---- fc2 (500 -> 100) + relu
    h2 = jnp.dot(h1, wf2_ref[...], preferred_element_type=jnp.float32)
    h2 = jnp.maximum(h2 + bf2_ref[...], 0.0).astype(jnp.bfloat16)     # (TB, 100)

    # ---- fc3 (100 -> out_dim), no activation (matches the PyTorch forward)
    out = jnp.dot(h2, wf3_ref[...], preferred_element_type=jnp.float32)
    o_ref[...] = (out + bf3_ref[...]).astype(o_ref.dtype)


# ---------------------------------------------------------------------------
# One-time weight packing (numpy): PyTorch layout -> block-Toeplitz bf16 mats
# ---------------------------------------------------------------------------
def pack_params(p):
    w1 = np.asarray(p["conv1_w"], np.float32)    # (20, 1, 5, 5)
    b1 = np.asarray(p["conv1_b"], np.float32)    # (20,)
    w2 = np.asarray(p["conv2_w"], np.float32)    # (50, 20, 5, 5)
    b2 = np.asarray(p["conv2_b"], np.float32)    # (50,)
    f1 = np.asarray(p["fc1_w"], np.float32)      # (500, 800)
    f2 = np.asarray(p["fc2_w"], np.float32)      # (100, 500)
    f3 = np.asarray(p["fc3_w"], np.float32)      # (out_dim, 100)
    out_dim = f3.shape[0]
    n3 = _round_up(out_dim, _LANE)

    # conv1 block-Toeplitz (140, 480): row = di*28 + iw, col = ow*20 + co.
    t1 = np.zeros((5 * 28, 24 * 20), np.float32)
    for di in range(5):
        for dj in range(5):
            for ow in range(24):
                t1[di * 28 + ow + dj, ow * 20:(ow + 1) * 20] = w1[:, 0, di, dj]
    t1 = t1.reshape(140, 12, 2, 20)
    t1e = t1[:, :, 0, :].reshape(140, 240)       # even output columns
    t1o = t1[:, :, 1, :].reshape(140, 240)       # odd  output columns

    # conv2 per-di block-Toeplitz (5, 240, 400): row = iw*20 + ci, col = ow*50 + co.
    t2 = np.zeros((5, 12 * 20, 8 * 50), np.float32)
    for di in range(5):
        for dj in range(5):
            for ow in range(8):
                iw = ow + dj
                t2[di, iw * 20:(iw + 1) * 20, ow * 50:(ow + 1) * 50] = \
                    w2[:, :, di, dj].T
    t2 = t2.reshape(5, 240, 4, 2, 50)
    t2e = t2[:, :, :, 0, :].reshape(5, 240, 200)
    t2o = t2[:, :, :, 1, :].reshape(5, 240, 200)

    # fc1 (500, 800) with torch flatten index c*16 + h*4 + w  ->  (4, 200, 500)
    # indexed [h, w*50 + c, o]  (folds the flatten permutation).
    wf1 = np.transpose(f1.reshape(500, 50, 4, 4), (2, 3, 1, 0)).reshape(4, 200, 500)

    wf3 = np.zeros((100, n3), np.float32)
    wf3[:, :out_dim] = f3.T
    bf3 = np.zeros((n3,), np.float32)
    bf3[:out_dim] = np.asarray(p["fc3_b"], np.float32)

    bf = jnp.bfloat16
    packed = {
        "t1e": jnp.asarray(t1e, bf),
        "t1o": jnp.asarray(t1o, bf),
        "b1": jnp.asarray(np.tile(b1, 12).reshape(1, 240), jnp.float32),
        "t2e": jnp.asarray(t2e, bf),
        "t2o": jnp.asarray(t2o, bf),
        "b2": jnp.asarray(np.tile(b2, 4).reshape(1, 200), jnp.float32),
        "wf1": jnp.asarray(wf1, bf),
        "bf1": jnp.asarray(np.asarray(p["fc1_b"], np.float32).reshape(1, 500)),
        "wf2": jnp.asarray(f2.T, bf),
        "bf2": jnp.asarray(np.asarray(p["fc2_b"], np.float32).reshape(1, 100)),
        "wf3": jnp.asarray(wf3, bf),
        "bf3": jnp.asarray(bf3.reshape(1, n3), jnp.float32),
    }
    return packed, out_dim


_WEIGHT_ORDER = ("t1e", "t1o", "b1", "t2e", "t2o", "b2",
                 "wf1", "bf1", "wf2", "bf2", "wf3", "bf3")


# ---------------------------------------------------------------------------
# Host wrapper: one fused pallas_call, batch-tiled grid
# ---------------------------------------------------------------------------
def lenet_forward(x_nchw, packed, out_dim, *, batch_tile=32):
    b = x_nchw.shape[0]
    n3 = packed["wf3"].shape[1]

    # batch_tile: 32 fits comfortably in every generation's VMEM budget
    # (per-tile live data ~6 MiB << 48 MiB); keep >=2 grid steps when the
    # batch allows it so v7x's two TensorCores both get work.
    tile = min(batch_tile, max(8, _round_up(b, 8)))
    if _round_up(b, tile) // tile < 2 and b >= 16:
        tile = max(8, _round_up((b + 1) // 2, 8))
    b_pad = _round_up(b, tile)
    grid = b_pad // tile

    # Build the conv1 row-im2col view in bf16 (halves input DMA bytes and makes
    # conv1 a single K=140 dot with zero in-kernel relayout):
    # rows = (b, oh), cols = di*28 + w  ==  x[b, 0, oh+di, w].
    x = x_nchw[:, 0, :, :].astype(jnp.bfloat16)                   # (B, 28, 28)
    x = jnp.pad(x, ((0, b_pad - b), (0, 0), (0, 0)))
    xr = jnp.concatenate([x[:, di:di + 24, :] for di in range(5)], axis=-1)
    xr = xr.reshape(b_pad * 24, 5 * 28)                           # (B_pad*24, 140)

    def const_spec(shape):          # same block every grid step -> resident
        nd = len(shape)
        return pl.BlockSpec(shape, lambda i, _nd=nd: (0,) * _nd)

    in_specs = [pl.BlockSpec((tile * 24, 140), lambda i: (i, 0))]
    in_specs += [const_spec(packed[k].shape) for k in _WEIGHT_ORDER]

    out = pl.pallas_call(
        _lenet_kernel,
        out_shape=jax.ShapeDtypeStruct((b_pad, n3), jnp.float32),
        grid=(grid,),
        in_specs=in_specs,
        out_specs=pl.BlockSpec((tile, n3), lambda i: (i, 0)),
        compiler_params=pltpu.CompilerParams(
            dimension_semantics=("parallel",),
            vmem_limit_bytes=48 * 1024 * 1024),
    )(xr, *[packed[k] for k in _WEIGHT_ORDER])

    return out[:b, :out_dim]


# ---------------------------------------------------------------------------
# Pure-JAX reference (PyTorch-layout params, f32) for the correctness check
# ---------------------------------------------------------------------------
def reference_forward(x_nchw, p):
    def conv_relu(x, w, bias):
        y = lax.conv_general_dilated(
            x, w, (1, 1), "VALID",
            dimension_numbers=("NCHW", "OIHW", "NCHW"))
        return jax.nn.relu(y + bias.reshape(1, -1, 1, 1))

    def pool(x):
        return lax.reduce_window(x, -jnp.inf, lax.max,
                                 (1, 1, 2, 2), (1, 1, 2, 2), "VALID")

    y = pool(conv_relu(x_nchw, p["conv1_w"], p["conv1_b"]))
    y = pool(conv_relu(y, p["conv2_w"], p["conv2_b"]))
    f = y.reshape(y.shape[0], -1)            # NCHW flatten == torch .view
    f = jax.nn.relu(f @ p["fc1_w"].T + p["fc1_b"])
    f = jax.nn.relu(f @ p["fc2_w"].T + p["fc2_b"])
    return f @ p["fc3_w"].T + p["fc3_b"]     # no activation, matches forward()


# ---------------------------------------------------------------------------
def init_params(key, out_dim):
    ks = jax.random.split(key, 10)
    scale = 0.05

    def w(k, shape):
        return (scale * jax.random.normal(k, shape)).astype(jnp.float32)

    return {
        # PyTorch layouts: conv (Cout, Cin, K, K), linear (out, in)
        "conv1_w": w(ks[0], (20, 1, 5, 5)),   "conv1_b": w(ks[1], (20,)),
        "conv2_w": w(ks[2], (50, 20, 5, 5)),  "conv2_b": w(ks[3], (50,)),
        "fc1_w": w(ks[4], (500, 4 * 4 * 50)), "fc1_b": w(ks[5], (500,)),
        "fc2_w": w(ks[6], (100, 500)),        "fc2_b": w(ks[7], (100,)),
        "fc3_w": w(ks[8], (out_dim, 100)),    "fc3_b": w(ks[9], (out_dim,)),
        # fc4 exists in the PyTorch module but forward() never uses it.
    }


if __name__ == "__main__":
    OUT_DIM = 64
    BATCH = 2

    key = jax.random.PRNGKey(0)
    k_x, k_p = jax.random.split(key)
    x = jax.random.normal(k_x, (BATCH, 1, 28, 28), dtype=jnp.float32)
    params = init_params(k_p, OUT_DIM)

    packed, out_dim = pack_params(params)
    fwd = jax.jit(functools.partial(lenet_forward, out_dim=out_dim))

    out = jax.block_until_ready(fwd(x, packed))
    assert out.shape == (BATCH, OUT_DIM), out.shape

    ref = jax.block_until_ready(reference_forward(x, params))
    err = jnp.max(jnp.abs(out - ref))
    # bf16 MXU inputs with f32 accumulation -> small mismatch vs. f32 reference
    assert jnp.allclose(out, ref, rtol=2e-2, atol=2e-2), f"max abs err {err}"

    print("KERNEL_OK")
</pallas_src>

<mosaic_0001>
module attributes {stable_mosaic.version = 11 : i64} {
  func.func @_lenet_kernel(%arg0: i32, %arg1: memref<192x140xbf16, #tpu.memory_space<vmem>>, %arg2: memref<140x240xbf16, #tpu.memory_space<vmem>>, %arg3: memref<140x240xbf16, #tpu.memory_space<vmem>>, %arg4: memref<1x240xf32, #tpu.memory_space<vmem>>, %arg5: memref<5x240x200xbf16, #tpu.memory_space<vmem>>, %arg6: memref<5x240x200xbf16, #tpu.memory_space<vmem>>, %arg7: memref<1x200xf32, #tpu.memory_space<vmem>>, %arg8: memref<4x200x500xbf16, #tpu.memory_space<vmem>>, %arg9: memref<1x500xf32, #tpu.memory_space<vmem>>, %arg10: memref<500x100xbf16, #tpu.memory_space<vmem>>, %arg11: memref<1x100xf32, #tpu.memory_space<vmem>>, %arg12: memref<100x128xbf16, #tpu.memory_space<vmem>>, %arg13: memref<1x128xf32, #tpu.memory_space<vmem>>, %arg14: memref<8x128xf32, #tpu.memory_space<vmem>>) attributes {dimension_semantics = [#tpu.dimension_semantics<parallel>], iteration_bounds = array<i64: 1>, scalar_prefetch = 0 : i64, scratch_operands = 0 : i64, tpu.core_type = #tpu.core_type<tc>, window_params = [{transform_indices = @transform_0, window_bounds = array<i64: 192, 140>}, {pipeline_mode = #tpu.pipeline_mode<synchronous>, transform_indices = @transform_1, window_bounds = array<i64: 140, 240>}, {pipeline_mode = #tpu.pipeline_mode<synchronous>, transform_indices = @transform_2, window_bounds = array<i64: 140, 240>}, {pipeline_mode = #tpu.pipeline_mode<synchronous>, transform_indices = @transform_3, window_bounds = array<i64: 1, 240>}, {pipeline_mode = #tpu.pipeline_mode<synchronous>, transform_indices = @transform_4, window_bounds = array<i64: 5, 240, 200>}, {pipeline_mode = #tpu.pipeline_mode<synchronous>, transform_indices = @transform_5, window_bounds = array<i64: 5, 240, 200>}, {pipeline_mode = #tpu.pipeline_mode<synchronous>, transform_indices = @transform_6, window_bounds = array<i64: 1, 200>}, {pipeline_mode = #tpu.pipeline_mode<synchronous>, transform_indices = @transform_7, window_bounds = array<i64: 4, 200, 500>}, {pipeline_mode = #tpu.pipeline_mode<synchronous>, transform_indices = @transform_8, window_bounds = array<i64: 1, 500>}, {pipeline_mode = #tpu.pipeline_mode<synchronous>, transform_indices = @transform_9, window_bounds = array<i64: 500, 100>}, {pipeline_mode = #tpu.pipeline_mode<synchronous>, transform_indices = @transform_10, window_bounds = array<i64: 1, 100>}, {pipeline_mode = #tpu.pipeline_mode<synchronous>, transform_indices = @transform_11, window_bounds = array<i64: 100, 128>}, {pipeline_mode = #tpu.pipeline_mode<synchronous>, transform_indices = @transform_12, window_bounds = array<i64: 1, 128>}, {transform_indices = @transform_13, window_bounds = array<i64: 8, 128>}]} {
    %c0 = arith.constant 0 : index
    %c0_0 = arith.constant 0 : index
    %0 = vector.load %arg1[%c0, %c0_0] : memref<192x140xbf16, #tpu.memory_space<vmem>>, vector<192x140xbf16>
    %c0_1 = arith.constant 0 : index
    %c0_2 = arith.constant 0 : index
    %1 = vector.load %arg2[%c0_1, %c0_2] : memref<140x240xbf16, #tpu.memory_space<vmem>>, vector<140x240xbf16>
    %cst = arith.constant dense<0.000000e+00> : vector<192x240xf32>
    %2 = tpu.matmul %0, %1, %cst {dimension_numbers = #tpu.dot_dimension_numbers<[1], [0], [0], [1], [0, 0, 1, 1], [], []>} : vector<192x140xbf16>, vector<140x240xbf16>, vector<192x240xf32> -> vector<192x240xf32>
    %c0_3 = arith.constant 0 : index
    %c0_4 = arith.constant 0 : index
    %3 = vector.load %arg3[%c0_3, %c0_4] : memref<140x240xbf16, #tpu.memory_space<vmem>>, vector<140x240xbf16>
    %cst_5 = arith.constant dense<0.000000e+00> : vector<192x240xf32>
    %4 = tpu.matmul %0, %3, %cst_5 {dimension_numbers = #tpu.dot_dimension_numbers<[1], [0], [0], [1], [0, 0, 1, 1], [], []>} : vector<192x140xbf16>, vector<140x240xbf16>, vector<192x240xf32> -> vector<192x240xf32>
    %5 = arith.maximumf %2, %4 : vector<192x240xf32>
    %6 = vector.shape_cast %5 : vector<192x240xf32> to vector<96x2x240xf32>
    %7 = vector.extract_strided_slice %6 {offsets = [0, 0, 0], sizes = [96, 1, 240], strides = [1, 1, 1]} : vector<96x2x240xf32> to vector<96x1x240xf32>
    %8 = vector.shape_cast %7 : vector<96x1x240xf32> to vector<96x240xf32>
    %9 = vector.extract_strided_slice %6 {offsets = [0, 1, 0], sizes = [96, 1, 240], strides = [1, 1, 1]} : vector<96x2x240xf32> to vector<96x1x240xf32>
    %10 = vector.shape_cast %9 : vector<96x1x240xf32> to vector<96x240xf32>
    %11 = arith.maximumf %8, %10 : vector<96x240xf32>
    %c0_6 = arith.constant 0 : index
    %c0_7 = arith.constant 0 : index
    %12 = vector.load %arg4[%c0_6, %c0_7] : memref<1x240xf32, #tpu.memory_space<vmem>>, vector<1x240xf32>
    %13 = vector.broadcast %12 : vector<1x240xf32> to vector<96x240xf32>
    %14 = arith.addf %11, %13 : vector<96x240xf32>
    %cst_8 = arith.constant 0.000000e+00 : f32
    %15 = vector.broadcast %cst_8 : f32 to vector<96x240xf32>
    %16 = arith.maximumf %14, %15 : vector<96x240xf32>
    %17 = vector.shape_cast %16 : vector<96x240xf32> to vector<8x12x240xf32>
    %cst_9 = arith.constant 0.000000e+00 : f32
    %18 = vector.broadcast %cst_9 : f32 to vector<64x200xf32>
    %cst_10 = arith.constant 0.000000e+00 : f32
    %19 = vector.broadcast %cst_10 : f32 to vector<64x200xf32>
    %20 = vector.extract_strided_slice %17 {offsets = [0, 0, 0], sizes = [8, 8, 240], strides = [1, 1, 1]} : vector<8x12x240xf32> to vector<8x8x240xf32>
    %21 = vector.shape_cast %20 : vector<8x8x240xf32> to vector<64x240xf32>
    %22 = arith.truncf %21 : vector<64x240xf32> to vector<64x240xbf16>
    %c0_11 = arith.constant 0 : index
    %c0_12 = arith.constant 0 : index
    %c0_13 = arith.constant 0 : index
    %23 = vector.load %arg5[%c0_11, %c0_12, %c0_13] : memref<5x240x200xbf16, #tpu.memory_space<vmem>>, vector<1x240x200xbf16>
    %24 = vector.shape_cast %23 : vector<1x240x200xbf16> to vector<240x200xbf16>
    %cst_14 = arith.constant dense<0.000000e+00> : vector<64x200xf32>
    %25 = tpu.matmul %22, %24, %cst_14 {dimension_numbers = #tpu.dot_dimension_numbers<[1], [0], [0], [1], [0, 0, 1, 1], [], []>} : vector<64x240xbf16>, vector<240x200xbf16>, vector<64x200xf32> -> vector<64x200xf32>
    %26 = arith.addf %18, %25 : vector<64x200xf32>
    %c0_15 = arith.constant 0 : index
    %c0_16 = arith.constant 0 : index
    %c0_17 = arith.constant 0 : index
    %27 = vector.load %arg6[%c0_15, %c0_16, %c0_17] : memref<5x240x200xbf16, #tpu.memory_space<vmem>>, vector<1x240x200xbf16>
    %28 = vector.shape_cast %27 : vector<1x240x200xbf16> to vector<240x200xbf16>
    %cst_18 = arith.constant dense<0.000000e+00> : vector<64x200xf32>
    %29 = tpu.matmul %22, %28, %cst_18 {dimension_numbers = #tpu.dot_dimension_numbers<[1], [0], [0], [1], [0, 0, 1, 1], [], []>} : vector<64x240xbf16>, vector<240x200xbf16>, vector<64x200xf32> -> vector<64x200xf32>
    %30 = arith.addf %19, %29 : vector<64x200xf32>
    %31 = vector.extract_strided_slice %17 {offsets = [0, 1, 0], sizes = [8, 8, 240], strides = [1, 1, 1]} : vector<8x12x240xf32> to vector<8x8x240xf32>
    %32 = vector.shape_cast %31 : vector<8x8x240xf32> to vector<64x240xf32>
    %33 = arith.truncf %32 : vector<64x240xf32> to vector<64x240xbf16>
    %c1 = arith.constant 1 : index
    %c0_19 = arith.constant 0 : index
    %c0_20 = arith.constant 0 : index
    %34 = vector.load %arg5[%c1, %c0_19, %c0_20] : memref<5x240x200xbf16, #tpu.memory_space<vmem>>, vector<1x240x200xbf16>
    %35 = vector.shape_cast %34 : vector<1x240x200xbf16> to vector<240x200xbf16>
    %cst_21 = arith.constant dense<0.000000e+00> : vector<64x200xf32>
    %36 = tpu.matmul %33, %35, %cst_21 {dimension_numbers = #tpu.dot_dimension_numbers<[1], [0], [0], [1], [0, 0, 1, 1], [], []>} : vector<64x240xbf16>, vector<240x200xbf16>, vector<64x200xf32> -> vector<64x200xf32>
    %37 = arith.addf %26, %36 : vector<64x200xf32>
    %c1_22 = arith.constant 1 : index
    %c0_23 = arith.constant 0 : index
    %c0_24 = arith.constant 0 : index
    %38 = vector.load %arg6[%c1_22, %c0_23, %c0_24] : memref<5x240x200xbf16, #tpu.memory_space<vmem>>, vector<1x240x200xbf16>
    %39 = vector.shape_cast %38 : vector<1x240x200xbf16> to vector<240x200xbf16>
    %cst_25 = arith.constant dense<0.000000e+00> : vector<64x200xf32>
    %40 = tpu.matmul %33, %39, %cst_25 {dimension_numbers = #tpu.dot_dimension_numbers<[1], [0], [0], [1], [0, 0, 1, 1], [], []>} : vector<64x240xbf16>, vector<240x200xbf16>, vector<64x200xf32> -> vector<64x200xf32>
    %41 = arith.addf %30, %40 : vector<64x200xf32>
    %42 = vector.extract_strided_slice %17 {offsets = [0, 2, 0], sizes = [8, 8, 240], strides = [1, 1, 1]} : vector<8x12x240xf32> to vector<8x8x240xf32>
    %43 = vector.shape_cast %42 : vector<8x8x240xf32> to vector<64x240xf32>
    %44 = arith.truncf %43 : vector<64x240xf32> to vector<64x240xbf16>
    %c2 = arith.constant 2 : index
    %c0_26 = arith.constant 0 : index
    %c0_27 = arith.constant 0 : index
    %45 = vector.load %arg5[%c2, %c0_26, %c0_27] : memref<5x240x200xbf16, #tpu.memory_space<vmem>>, vector<1x240x200xbf16>
    %46 = vector.shape_cast %45 : vector<1x240x200xbf16> to vector<240x200xbf16>
    %cst_28 = arith.constant dense<0.000000e+00> : vector<64x200xf32>
    %47 = tpu.matmul %44, %46, %cst_28 {dimension_numbers = #tpu.dot_dimension_numbers<[1], [0], [0], [1], [0, 0, 1, 1], [], []>} : vector<64x240xbf16>, vector<240x200xbf16>, vector<64x200xf32> -> vector<64x200xf32>
    %48 = arith.addf %37, %47 : vector<64x200xf32>
    %c2_29 = arith.constant 2 : index
    %c0_30 = arith.constant 0 : index
    %c0_31 = arith.constant 0 : index
    %49 = vector.load %arg6[%c2_29, %c0_30, %c0_31] : memref<5x240x200xbf16, #tpu.memory_space<vmem>>, vector<1x240x200xbf16>
    %50 = vector.shape_cast %49 : vector<1x240x200xbf16> to vector<240x200xbf16>
    %cst_32 = arith.constant dense<0.000000e+00> : vector<64x200xf32>
    %51 = tpu.matmul %44, %50, %cst_32 {dimension_numbers = #tpu.dot_dimension_numbers<[1], [0], [0], [1], [0, 0, 1, 1], [], []>} : vector<64x240xbf16>, vector<240x200xbf16>, vector<64x200xf32> -> vector<64x200xf32>
    %52 = arith.addf %41, %51 : vector<64x200xf32>
    %53 = vector.extract_strided_slice %17 {offsets = [0, 3, 0], sizes = [8, 8, 240], strides = [1, 1, 1]} : vector<8x12x240xf32> to vector<8x8x240xf32>
    %54 = vector.shape_cast %53 : vector<8x8x240xf32> to vector<64x240xf32>
    %55 = arith.truncf %54 : vector<64x240xf32> to vector<64x240xbf16>
    %c3 = arith.constant 3 : index
    %c0_33 = arith.constant 0 : index
    %c0_34 = arith.constant 0 : index
    %56 = vector.load %arg5[%c3, %c0_33, %c0_34] : memref<5x240x200xbf16, #tpu.memory_space<vmem>>, vector<1x240x200xbf16>
    %57 = vector.shape_cast %56 : vector<1x240x200xbf16> to vector<240x200xbf16>
    %cst_35 = arith.constant dense<0.000000e+00> : vector<64x200xf32>
    %58 = tpu.matmul %55, %57, %cst_35 {dimension_numbers = #tpu.dot_dimension_numbers<[1], [0], [0], [1], [0, 0, 1, 1], [], []>} : vector<64x240xbf16>, vector<240x200xbf16>, vector<64x200xf32> -> vector<64x200xf32>
    %59 = arith.addf %48, %58 : vector<64x200xf32>
    %c3_36 = arith.constant 3 : index
    %c0_37 = arith.constant 0 : index
    %c0_38 = arith.constant 0 : index
    %60 = vector.load %arg6[%c3_36, %c0_37, %c0_38] : memref<5x240x200xbf16, #tpu.memory_space<vmem>>, vector<1x240x200xbf16>
    %61 = vector.shape_cast %60 : vector<1x240x200xbf16> to vector<240x200xbf16>
    %cst_39 = arith.constant dense<0.000000e+00> : vector<64x200xf32>
    %62 = tpu.matmul %55, %61, %cst_39 {dimension_numbers = #tpu.dot_dimension_numbers<[1], [0], [0], [1], [0, 0, 1, 1], [], []>} : vector<64x240xbf16>, vector<240x200xbf16>, vector<64x200xf32> -> vector<64x200xf32>
    %63 = arith.addf %52, %62 : vector<64x200xf32>
    %64 = vector.extract_strided_slice %17 {offsets = [0, 4, 0], sizes = [8, 8, 240], strides = [1, 1, 1]} : vector<8x12x240xf32> to vector<8x8x240xf32>
    %65 = vector.shape_cast %64 : vector<8x8x240xf32> to vector<64x240xf32>
    %66 = arith.truncf %65 : vector<64x240xf32> to vector<64x240xbf16>
    %c4 = arith.constant 4 : index
    %c0_40 = arith.constant 0 : index
    %c0_41 = arith.constant 0 : index
    %67 = vector.load %arg5[%c4, %c0_40, %c0_41] : memref<5x240x200xbf16, #tpu.memory_space<vmem>>, vector<1x240x200xbf16>
    %68 = vector.shape_cast %67 : vector<1x240x200xbf16> to vector<240x200xbf16>
    %cst_42 = arith.constant dense<0.000000e+00> : vector<64x200xf32>
    %69 = tpu.matmul %66, %68, %cst_42 {dimension_numbers = #tpu.dot_dimension_numbers<[1], [0], [0], [1], [0, 0, 1, 1], [], []>} : vector<64x240xbf16>, vector<240x200xbf16>, vector<64x200xf32> -> vector<64x200xf32>
    %70 = arith.addf %59, %69 : vector<64x200xf32>
    %c4_43 = arith.constant 4 : index
    %c0_44 = arith.constant 0 : index
    %c0_45 = arith.constant 0 : index
    %71 = vector.load %arg6[%c4_43, %c0_44, %c0_45] : memref<5x240x200xbf16, #tpu.memory_space<vmem>>, vector<1x240x200xbf16>
    %72 = vector.shape_cast %71 : vector<1x240x200xbf16> to vector<240x200xbf16>
    %cst_46 = arith.constant dense<0.000000e+00> : vector<64x200xf32>
    %73 = tpu.matmul %66, %72, %cst_46 {dimension_numbers = #tpu.dot_dimension_numbers<[1], [0], [0], [1], [0, 0, 1, 1], [], []>} : vector<64x240xbf16>, vector<240x200xbf16>, vector<64x200xf32> -> vector<64x200xf32>
    %74 = arith.addf %63, %73 : vector<64x200xf32>
    %75 = arith.maximumf %70, %74 : vector<64x200xf32>
    %76 = vector.shape_cast %75 : vector<64x200xf32> to vector<32x2x200xf32>
    %77 = vector.extract_strided_slice %76 {offsets = [0, 0, 0], sizes = [32, 1, 200], strides = [1, 1, 1]} : vector<32x2x200xf32> to vector<32x1x200xf32>
    %78 = vector.shape_cast %77 : vector<32x1x200xf32> to vector<32x200xf32>
    %79 = vector.extract_strided_slice %76 {offsets = [0, 1, 0], sizes = [32, 1, 200], strides = [1, 1, 1]} : vector<32x2x200xf32> to vector<32x1x200xf32>
    %80 = vector.shape_cast %79 : vector<32x1x200xf32> to vector<32x200xf32>
    %81 = arith.maximumf %78, %80 : vector<32x200xf32>
    %c0_47 = arith.constant 0 : index
    %c0_48 = arith.constant 0 : index
    %82 = vector.load %arg7[%c0_47, %c0_48] : memref<1x200xf32, #tpu.memory_space<vmem>>, vector<1x200xf32>
    %83 = vector.broadcast %82 : vector<1x200xf32> to vector<32x200xf32>
    %84 = arith.addf %81, %83 : vector<32x200xf32>
    %cst_49 = arith.constant 0.000000e+00 : f32
    %85 = vector.broadcast %cst_49 : f32 to vector<32x200xf32>
    %86 = arith.maximumf %84, %85 : vector<32x200xf32>
    %87 = vector.shape_cast %86 : vector<32x200xf32> to vector<8x4x200xf32>
    %cst_50 = arith.constant 0.000000e+00 : f32
    %88 = vector.broadcast %cst_50 : f32 to vector<8x500xf32>
    %89 = vector.extract_strided_slice %87 {offsets = [0, 0, 0], sizes = [8, 1, 200], strides = [1, 1, 1]} : vector<8x4x200xf32> to vector<8x1x200xf32>
    %90 = vector.shape_cast %89 : vector<8x1x200xf32> to vector<8x200xf32>
    %91 = arith.truncf %90 : vector<8x200xf32> to vector<8x200xbf16>
    %c0_51 = arith.constant 0 : index
    %c0_52 = arith.constant 0 : index
    %c0_53 = arith.constant 0 : index
    %92 = vector.load %arg8[%c0_51, %c0_52, %c0_53] : memref<4x200x500xbf16, #tpu.memory_space<vmem>>, vector<1x200x500xbf16>
    %93 = vector.shape_cast %92 : vector<1x200x500xbf16> to vector<200x500xbf16>
    %cst_54 = arith.constant dense<0.000000e+00> : vector<8x500xf32>
    %94 = tpu.matmul %91, %93, %cst_54 {dimension_numbers = #tpu.dot_dimension_numbers<[1], [0], [0], [1], [0, 0, 1, 1], [], []>} : vector<8x200xbf16>, vector<200x500xbf16>, vector<8x500xf32> -> vector<8x500xf32>
    %95 = arith.addf %88, %94 : vector<8x500xf32>
    %96 = vector.extract_strided_slice %87 {offsets = [0, 1, 0], sizes = [8, 1, 200], strides = [1, 1, 1]} : vector<8x4x200xf32> to vector<8x1x200xf32>
    %97 = vector.shape_cast %96 : vector<8x1x200xf32> to vector<8x200xf32>
    %98 = arith.truncf %97 : vector<8x200xf32> to vector<8x200xbf16>
    %c1_55 = arith.constant 1 : index
    %c0_56 = arith.constant 0 : index
    %c0_57 = arith.constant 0 : index
    %99 = vector.load %arg8[%c1_55, %c0_56, %c0_57] : memref<4x200x500xbf16, #tpu.memory_space<vmem>>, vector<1x200x500xbf16>
    %100 = vector.shape_cast %99 : vector<1x200x500xbf16> to vector<200x500xbf16>
    %cst_58 = arith.constant dense<0.000000e+00> : vector<8x500xf32>
    %101 = tpu.matmul %98, %100, %cst_58 {dimension_numbers = #tpu.dot_dimension_numbers<[1], [0], [0], [1], [0, 0, 1, 1], [], []>} : vector<8x200xbf16>, vector<200x500xbf16>, vector<8x500xf32> -> vector<8x500xf32>
    %102 = arith.addf %95, %101 : vector<8x500xf32>
    %103 = vector.extract_strided_slice %87 {offsets = [0, 2, 0], sizes = [8, 1, 200], strides = [1, 1, 1]} : vector<8x4x200xf32> to vector<8x1x200xf32>
    %104 = vector.shape_cast %103 : vector<8x1x200xf32> to vector<8x200xf32>
    %105 = arith.truncf %104 : vector<8x200xf32> to vector<8x200xbf16>
    %c2_59 = arith.constant 2 : index
    %c0_60 = arith.constant 0 : index
    %c0_61 = arith.constant 0 : index
    %106 = vector.load %arg8[%c2_59, %c0_60, %c0_61] : memref<4x200x500xbf16, #tpu.memory_space<vmem>>, vector<1x200x500xbf16>
    %107 = vector.shape_cast %106 : vector<1x200x500xbf16> to vector<200x500xbf16>
    %cst_62 = arith.constant dense<0.000000e+00> : vector<8x500xf32>
    %108 = tpu.matmul %105, %107, %cst_62 {dimension_numbers = #tpu.dot_dimension_numbers<[1], [0], [0], [1], [0, 0, 1, 1], [], []>} : vector<8x200xbf16>, vector<200x500xbf16>, vector<8x500xf32> -> vector<8x500xf32>
    %109 = arith.addf %102, %108 : vector<8x500xf32>
    %110 = vector.extract_strided_slice %87 {offsets = [0, 3, 0], sizes = [8, 1, 200], strides = [1, 1, 1]} : vector<8x4x200xf32> to vector<8x1x200xf32>
    %111 = vector.shape_cast %110 : vector<8x1x200xf32> to vector<8x200xf32>
    %112 = arith.truncf %111 : vector<8x200xf32> to vector<8x200xbf16>
    %c3_63 = arith.constant 3 : index
    %c0_64 = arith.constant 0 : index
    %c0_65 = arith.constant 0 : index
    %113 = vector.load %arg8[%c3_63, %c0_64, %c0_65] : memref<4x200x500xbf16, #tpu.memory_space<vmem>>, vector<1x200x500xbf16>
    %114 = vector.shape_cast %113 : vector<1x200x500xbf16> to vector<200x500xbf16>
    %cst_66 = arith.constant dense<0.000000e+00> : vector<8x500xf32>
    %115 = tpu.matmul %112, %114, %cst_66 {dimension_numbers = #tpu.dot_dimension_numbers<[1], [0], [0], [1], [0, 0, 1, 1], [], []>} : vector<8x200xbf16>, vector<200x500xbf16>, vector<8x500xf32> -> vector<8x500xf32>
    %116 = arith.addf %109, %115 : vector<8x500xf32>
    %c0_67 = arith.constant 0 : index
    %c0_68 = arith.constant 0 : index
    %117 = vector.load %arg9[%c0_67, %c0_68] : memref<1x500xf32, #tpu.memory_space<vmem>>, vector<1x500xf32>
    %118 = vector.broadcast %117 : vector<1x500xf32> to vector<8x500xf32>
    %119 = arith.addf %116, %118 : vector<8x500xf32>
    %cst_69 = arith.constant 0.000000e+00 : f32
    %120 = vector.broadcast %cst_69 : f32 to vector<8x500xf32>
    %121 = arith.maximumf %119, %120 : vector<8x500xf32>
    %122 = arith.truncf %121 : vector<8x500xf32> to vector<8x500xbf16>
    %c0_70 = arith.constant 0 : index
    %c0_71 = arith.constant 0 : index
    %123 = vector.load %arg10[%c0_70, %c0_71] : memref<500x100xbf16, #tpu.memory_space<vmem>>, vector<500x100xbf16>
    %cst_72 = arith.constant dense<0.000000e+00> : vector<8x100xf32>
    %124 = tpu.matmul %122, %123, %cst_72 {dimension_numbers = #tpu.dot_dimension_numbers<[1], [0], [0], [1], [0, 0, 1, 1], [], []>} : vector<8x500xbf16>, vector<500x100xbf16>, vector<8x100xf32> -> vector<8x100xf32>
    %c0_73 = arith.constant 0 : index
    %c0_74 = arith.constant 0 : index
    %125 = vector.load %arg11[%c0_73, %c0_74] : memref<1x100xf32, #tpu.memory_space<vmem>>, vector<1x100xf32>
    %126 = vector.broadcast %125 : vector<1x100xf32> to vector<8x100xf32>
    %127 = arith.addf %124, %126 : vector<8x100xf32>
    %cst_75 = arith.constant 0.000000e+00 : f32
    %128 = vector.broadcast %cst_75 : f32 to vector<8x100xf32>
    %129 = arith.maximumf %127, %128 : vector<8x100xf32>
    %130 = arith.truncf %129 : vector<8x100xf32> to vector<8x100xbf16>
    %c0_76 = arith.constant 0 : index
    %c0_77 = arith.constant 0 : index
    %131 = vector.load %arg12[%c0_76, %c0_77] : memref<100x128xbf16, #tpu.memory_space<vmem>>, vector<100x128xbf16>
    %cst_78 = arith.constant dense<0.000000e+00> : vector<8x128xf32>
    %132 = tpu.matmul %130, %131, %cst_78 {dimension_numbers = #tpu.dot_dimension_numbers<[1], [0], [0], [1], [0, 0, 1, 1], [], []>} : vector<8x100xbf16>, vector<100x128xbf16>, vector<8x128xf32> -> vector<8x128xf32>
    %c0_79 = arith.constant 0 : index
    %c0_80 = arith.constant 0 : index
    %133 = vector.load %arg13[%c0_79, %c0_80] : memref<1x128xf32, #tpu.memory_space<vmem>>, vector<1x128xf32>
    %134 = vector.broadcast %133 : vector<1x128xf32> to vector<8x128xf32>
    %135 = arith.addf %132, %134 : vector<8x128xf32>
    %c0_81 = arith.constant 0 : index
    %c0_82 = arith.constant 0 : index
    %136 = vector.load %arg14[%c0_81, %c0_82] : memref<8x128xf32, #tpu.memory_space<vmem>>, vector<8x128xf32>
    tpu.vector_store %arg14[%c0_81, %c0_82], %135 {strides = array<i32>} : memref<8x128xf32, #tpu.memory_space<vmem>>, vector<8x128xf32>,
    return
  }
  func.func @transform_0(%arg0: i32) -> (i32, i32) {
    %c0_i32 = arith.constant 0 : i32
    %c0_i32_0 = arith.constant 0 : i32
    return %arg0, %c0_i32 : i32, i32
  }
  func.func @transform_1(%arg0: i32) -> (i32, i32) {
    %c0_i32 = arith.constant 0 : i32
    %c0_i32_0 = arith.constant 0 : i32
    %c0_i32_1 = arith.constant 0 : i32
    return %c0_i32, %c0_i32_0 : i32, i32
  }
  func.func @transform_2(%arg0: i32) -> (i32, i32) {
    %c0_i32 = arith.constant 0 : i32
    %c0_i32_0 = arith.constant 0 : i32
    %c0_i32_1 = arith.constant 0 : i32
    return %c0_i32, %c0_i32_0 : i32, i32
  }
  func.func @transform_3(%arg0: i32) -> (i32, i32) {
    %c0_i32 = arith.constant 0 : i32
    %c0_i32_0 = arith.constant 0 : i32
    %c0_i32_1 = arith.constant 0 : i32
    return %c0_i32, %c0_i32_0 : i32, i32
  }
  func.func @transform_4(%arg0: i32) -> (i32, i32, i32) {
    %c0_i32 = arith.constant 0 : i32
    %c0_i32_0 = arith.constant 0 : i32
    %c0_i32_1 = arith.constant 0 : i32
    %c0_i32_2 = arith.constant 0 : i32
    return %c0_i32, %c0_i32_0, %c0_i32_1 : i32, i32, i32
  }
  func.func @transform_5(%arg0: i32) -> (i32, i32, i32) {
    %c0_i32 = arith.constant 0 : i32
    %c0_i32_0 = arith.constant 0 : i32
    %c0_i32_1 = arith.constant 0 : i32
    %c0_i32_2 = arith.constant 0 : i32
    return %c0_i32, %c0_i32_0, %c0_i32_1 : i32, i32, i32
  }
  func.func @transform_6(%arg0: i32) -> (i32, i32) {
    %c0_i32 = arith.constant 0 : i32
    %c0_i32_0 = arith.constant 0 : i32
    %c0_i32_1 = arith.constant 0 : i32
    return %c0_i32, %c0_i32_0 : i32, i32
  }
  func.func @transform_7(%arg0: i32) -> (i32, i32, i32) {
    %c0_i32 = arith.constant 0 : i32
    %c0_i32_0 = arith.constant 0 : i32
    %c0_i32_1 = arith.constant 0 : i32
    %c0_i32_2 = arith.constant 0 : i32
    return %c0_i32, %c0_i32_0, %c0_i32_1 : i32, i32, i32
  }
  func.func @transform_8(%arg0: i32) -> (i32, i32) {
    %c0_i32 = arith.constant 0 : i32
    %c0_i32_0 = arith.constant 0 : i32
    %c0_i32_1 = arith.constant 0 : i32
    return %c0_i32, %c0_i32_0 : i32, i32
  }
  func.func @transform_9(%arg0: i32) -> (i32, i32) {
    %c0_i32 = arith.constant 0 : i32
    %c0_i32_0 = arith.constant 0 : i32
    %c0_i32_1 = arith.constant 0 : i32
    return %c0_i32, %c0_i32_0 : i32, i32
  }
  func.func @transform_10(%arg0: i32) -> (i32, i32) {
    %c0_i32 = arith.constant 0 : i32
    %c0_i32_0 = arith.constant 0 : i32
    %c0_i32_1 = arith.constant 0 : i32
    return %c0_i32, %c0_i32_0 : i32, i32
  }
  func.func @transform_11(%arg0: i32) -> (i32, i32) {
    %c0_i32 = arith.constant 0 : i32
    %c0_i32_0 = arith.constant 0 : i32
    %c0_i32_1 = arith.constant 0 : i32
    return %c0_i32, %c0_i32_0 : i32, i32
  }
  func.func @transform_12(%arg0: i32) -> (i32, i32) {
    %c0_i32 = arith.constant 0 : i32
    %c0_i32_0 = arith.constant 0 : i32
    %c0_i32_1 = arith.constant 0 : i32
    return %c0_i32, %c0_i32_0 : i32, i32
  }
  func.func @transform_13(%arg0: i32) -> (i32, i32) {
    %c0_i32 = arith.constant 0 : i32
    %c0_i32_0 = arith.constant 0 : i32
    return %arg0, %c0_i32 : i32, i32
  }
}

</mosaic_0001>

<bundles_post_ra>
// kernel: lenet_forward.1
= control target key start
LH: loop header
LB: loop body
LE: loop exit
PB: predicated region body
PF: predicated region fallthrough
CT: control target
= control target key end

     0   :  { %vm320_vm0 = vcmask 1045504   ;;  %vm283_vm1 = vcmask 97280   ;;  %vm1111_vm2 = vcmask 1041408   ;;  %vm1113_vm3 = vcmask 1043458   ;;  %s22649_s1 = inlined_call_operand.vmem [shape: bf16[140,240], index: 1, kind: input, shape index: {}]   ;;  %s22650_s0 = inlined_call_operand.vmem [shape: bf16[192,140], index: 0, kind: input, shape index: {}]   ;;  %s22651_s2 = inlined_call_operand.vmem [shape: bf16[140,240], index: 2, kind: input, shape index: {}]   ;;  %s22652_s3 = inlined_call_operand.vmem [shape: f32[1,240], index: 3, kind: input, shape index: {}]   ;;  %s22653_s4 = inlined_call_operand.vmem [shape: bf16[5,240,200], index: 4, kind: input, shape index: {}]   ;;  %s22654_s5 = inlined_call_operand.vmem [shape: bf16[5,240,200], index: 5, kind: input, shape index: {}]   ;;  %s22655_s6 = inlined_call_operand.vmem [shape: f32[1,200], index: 6, kind: input, shape index: {}]   ;;  %s22656_s7 = inlined_call_operand.vmem [shape: bf16[4,200,500], index: 7, kind: input, shape index: {}]   ;;  %s22657_s10 = inlined_call_operand.vmem [shape: f32[1,100], index: 10, kind: input, shape index: {}]   ;;  %s22658_s9 = inlined_call_operand.vmem [shape: bf16[500,100], index: 9, kind: input, shape index: {}]   ;;  %s22659_s8 = inlined_call_operand.vmem [shape: f32[1,500], index: 8, kind: input, shape index: {}]   ;;  %s22660_s12 = inlined_call_operand.vmem [shape: f32[1,128], index: 12, kind: input, shape index: {}]   ;;  %s22661_s11 = inlined_call_operand.vmem [shape: bf16[100,128], index: 11, kind: input, shape index: {}]   ;;  %s22662_s13 = inlined_call_operand.vmem [shape: f32[8,128], index: 13, kind: output, shape index: {}]  }
   0x1   :  { %v10429_v0 = vld [vmem:[%s22649_s1 + $0x70] sm:$0xf]  ;;  %v13334_v1 = vld [vmem:[%s22649_s1 + $0x74] sm:$0xf0]  ;;  %v13333_v2 = vld [vmem:[%s22649_s1 + $0x74] sm:$0xf] }
   0x2   :  { %v10430_v3 = vor.u32 %v13334_v1, %v10429_v0  ;;  %v10431_v4 = vld [vmem:[%s22649_s1 + $0x78] sm:$0xf0]  ;;  %v13335_v5 = vld [vmem:[%s22649_s1 + $0x84] sm:$0xf]  ;;  %v10439_v6 = vld [vmem:[%s22649_s1 + $0x88] sm:$0x30] }
   0x3   :  { %v10434_v7 = vor.u32 %v13333_v2, %v10431_v4  ;;  %v10442_v8 = vor.u32 %v13335_v5, %v10439_v6  ;;  %v10421_v9 = vld [vmem:[%s22649_s1 + $0x60] sm:$0xf]  ;;  %v13332_v10 = vld [vmem:[%s22649_s1 + $0x64] sm:$0xf0]  ;;  %v13331_v11 = vld [vmem:[%s22649_s1 + $0x64] sm:$0xf] }
   0x4   :  { %327 = vmatpush.bf16.msra.mxu0 %v10430_v3  ;;  %v10422_v12 = vor.u32 %v13332_v10, %v10421_v9  ;;  %v10423_v13 = vld [vmem:[%s22649_s1 + $0x68] sm:$0xf0]  ;;  %v13295_v14 = vld [vmem:[%s22650_s0 + $0x4] sm:$0xf]  ;;  %v10437_v19 = vld [vmem:[%s22649_s1 + $0x80] sm:$0xf] }
   0x5   :  { %v10279_v15 = vld [vmem:[%s22650_s0 + $0x8] sm:$0xf0]  ;;  %465 = vmatpush.bf16.msra.mxu2 %v10434_v7  ;;  %v325_v16 = vsel %vm320_vm0, %v10442_v8, 0  ;;  %v10426_v17 = vor.u32 %v13331_v11, %v10423_v13  ;;  %v13336_v20 = vld [vmem:[%s22649_s1 + $0x84] sm:$0x30]  ;;  %vm1116_vm4 = vcmask 1045508  }
   0x6   :  { %v13993_v18 = vor.u32 %v13295_v14, %v10279_v15  ;;  %541 = vmatpush.bf16.msra.mxu3 %v325_v16  ;;  %v10438_v21 = vor.u32 %v13336_v20, %v10437_v19  ;;  %v10413_v22 = vld [vmem:[%s22649_s1 + $0x50] sm:$0xf]  ;;  %v13330_v23 = vld [vmem:[%s22649_s1 + $0x54] sm:$0xf0]  ;;  %v13329_v24 = vld [vmem:[%s22649_s1 + $0x54] sm:$0xf] }
   0x7   :  { %v10415_v25 = vld [vmem:[%s22649_s1 + $0x58] sm:$0xf0]  ;;  %v10414_v27 = vor.u32 %v13330_v23, %v10413_v22  ;;  %v10405_v29 = vld [vmem:[%s22649_s1 + $0x40] sm:$0xf]  ;;  %v13328_v30 = vld [vmem:[%s22649_s1 + $0x44] sm:$0xf0] }
   0x8   :  { %328 = vmatpush.bf16.msra.mxu0 %v10422_v12  ;;  %v322_v26 = vsel %vm320_vm0, %v10438_v21, 0  ;;  %v10418_v28 = vor.u32 %v13329_v24, %v10415_v25  ;;  %v13327_v31 = vld [vmem:[%s22649_s1 + $0x44] sm:$0xf]  ;;  %v10407_v32 = vld [vmem:[%s22649_s1 + $0x48] sm:$0xf0]  ;;  %v10406_v33 = vor.u32 %v13328_v30, %v10405_v29  ;;  %vm2830_vm5 = vcmask 1041409  }
   0x9   :  { %466 = vmatpush.bf16.msra.mxu2 %v10426_v17  ;;  %10455 = vmatmul.msk.bf16.vlgmr.msra.gmra.mxu3 %vm283_vm1, %v13993_v18  ;;  %v10410_v34 = vor.u32 %v13327_v31, %v10407_v32  ;;  %v10397_v35 = vld [vmem:[%s22649_s1 + $0x30] sm:$0xf]  ;;  %v13326_v36 = vld [vmem:[%s22649_s1 + $0x34] sm:$0xf0]  ;;  %v13325_v37 = vld [vmem:[%s22649_s1 + $0x34] sm:$0xf] }
   0xa   :  { %403 = vmatpush.bf16.msra.mxu1 %v322_v26  ;;  %v10399_v38 = vld [vmem:[%s22649_s1 + $0x38] sm:$0xf0]  ;;  %v10398_v39 = vor.u32 %v13326_v36, %v10397_v35  ;;  %v10389_v41 = vld [vmem:[%s22649_s1 + $0x20] sm:$0xf]  ;;  %v13324_v42 = vld [vmem:[%s22649_s1 + $0x24] sm:$0xf0] }
   0xb   :  { %v10402_v40 = vor.u32 %v13325_v37, %v10399_v38  ;;  %v13323_v43 = vld [vmem:[%s22649_s1 + $0x24] sm:$0xf]  ;;  %v10391_v44 = vld [vmem:[%s22649_s1 + $0x28] sm:$0xf0]  ;;  %v13297_v45 = vld [vmem:[%s22650_s0 + $0x14] sm:$0xf]  ;;  %v10390_v47 = vor.u32 %v13324_v42, %v10389_v41 }
   0xc   :  { %329 = vmatpush.bf16.msra.mxu0 %v10414_v27  ;;  %v10287_v46 = vld [vmem:[%s22650_s0 + $0x18] sm:$0xf0]  ;;  %v10394_v48 = vor.u32 %v13323_v43, %v10391_v44  ;;  %v10381_v50 = vld [vmem:[%s22649_s1 + $0x10] sm:$0xf]  ;;  %v13322_v51 = vld [vmem:[%s22649_s1 + $0x14] sm:$0xf0] }
   0xd   :  { %467 = vmatpush.bf16.msra.mxu2 %v10418_v28  ;;  %10443 = vmatmul.msk.bf16.vlgmr.msra.gmra.mxu1 %vm283_vm1, %v13993_v18  ;;  %v14060_v49 = vor.u32 %v13297_v45, %v10287_v46  ;;  %v13321_v52 = vld [vmem:[%s22649_s1 + $0x14] sm:$0xf]  ;;  %v10383_v53 = vld [vmem:[%s22649_s1 + $0x18] sm:$0xf0]  ;;  %v10382_v54 = vor.u32 %v13322_v51, %v10381_v50  ;;  %v10373_v56 = vld [vmem:[%s22649_s1] sm:$0xf] }
   0xe   :  { %v10386_v55 = vor.u32 %v13321_v52, %v10383_v53  ;;  %v13320_v57 = vld [vmem:[%s22649_s1 + $0x4] sm:$0xf0]  ;;  %v13319_v58 = vld [vmem:[%s22649_s1 + $0x4] sm:$0xf]  ;;  %v10375_v59 = vld [vmem:[%s22649_s1 + $0x8] sm:$0xf0] }
   0xf   :  { %v10374_v60 = vor.u32 %v13320_v57, %v10373_v56  ;;  %v10277_v61 = vld [vmem:[%s22650_s0] sm:$0xf]  ;;  %v13296_v62 = vld [vmem:[%s22650_s0 + $0x4] sm:$0xf0]  ;;  %v10378_v63 = vor.u32 %v13319_v58, %v10375_v59  ;;  %v13299_v1 = vld [vmem:[%s22650_s0 + $0x24] sm:$0xf] }
  0x10   :  { %330 = vmatpush.bf16.msra.mxu0 %v10406_v33  ;;  %v14096_v0 = vor.u32 %v13296_v62, %v10277_v61  ;;  %v10295_v2 = vld [vmem:[%s22650_s0 + $0x28] sm:$0xf0]  ;;  %v13353_v4 = vld [vmem:[%s22651_s2 + $0x84] sm:$0xf]  ;;  %v10533_v6 = vld [vmem:[%s22651_s2 + $0x80] sm:$0xf] }
  0x11   :  { %468 = vmatpush.bf16.msra.mxu2 %v10410_v34  ;;  %v14106_v3 = vor.u32 %v13299_v1, %v10295_v2  ;;  %v10535_v5 = vld [vmem:[%s22651_s2 + $0x88] sm:$0x30]  ;;  %v13354_v8 = vld [vmem:[%s22651_s2 + $0x84] sm:$0x30]  ;;  %v10285_v10 = vld [vmem:[%s22650_s0 + $0x10] sm:$0xf] }
  0x12   :  { %v10538_v7 = vor.u32 %v13353_v4, %v10535_v5  ;;  %v10534_v9 = vor.u32 %v13354_v8, %v10533_v6  ;;  %v13298_v11 = vld [vmem:[%s22650_s0 + $0x14] sm:$0xf0]  ;;  %v13351_v14 = vld [vmem:[%s22651_s2 + $0x74] sm:$0xf]  ;;  %v10527_v15 = vld [vmem:[%s22651_s2 + $0x78] sm:$0xf0] }
  0x13   :  { %v10530_v16 = vor.u32 %v13351_v14, %v10527_v15  ;;  %v10525_v17 = vld [vmem:[%s22651_s2 + $0x70] sm:$0xf]  ;;  %v13352_v19 = vld [vmem:[%s22651_s2 + $0x74] sm:$0xf0]  ;;  %v14144_v20 = vor.u32 %v13298_v11, %v10285_v10  ;;  %v13301_v22 = vld [vmem:[%s22650_s0 + $0x34] sm:$0xf] }
  0x14   :  { %331 = vmatpush.bf16.msra.mxu0 %v10398_v39  ;;  %v713_v12 = vsel %vm320_vm0, %v10538_v7, 0  ;;  %v710_v13 = vsel %vm320_vm0, %v10534_v9, 0  ;;  %v10526_v21 = vor.u32 %v13352_v19, %v10525_v17  ;;  %v10303_v23 = vld [vmem:[%s22650_s0 + $0x38] sm:$0xf0]  ;;  %v10293_v25 = vld [vmem:[%s22650_s0 + $0x20] sm:$0xf] }
  0x15   :  { %469 = vmatpush.bf16.msra.mxu2 %v10402_v40  ;;  %791 = vmatpush.bf16.msrb.mxu3 %v710_v13  ;;  %v14154_v24 = vor.u32 %v13301_v22, %v10303_v23  ;;  %v13300_v26 = vld [vmem:[%s22650_s0 + $0x24] sm:$0xf0]  ;;  %v13303_v28 = vld [vmem:[%s22650_s0 + $0x44] sm:$0xf]  ;;  %v10311_v29 = vld [vmem:[%s22650_s0 + $0x48] sm:$0xf0] }
  0x16   :  { %715 = vmatpush.bf16.msrb.mxu1 %v10526_v21  ;;  %v14166_v27 = vor.u32 %v13300_v26, %v10293_v25  ;;  %v13349_v30 = vld [vmem:[%s22651_s2 + $0x64] sm:$0xf]  ;;  %v10519_v31 = vld [vmem:[%s22651_s2 + $0x68] sm:$0xf0]  ;;  %v14182_v32 = vor.u32 %v13303_v28, %v10311_v29  ;;  %v10517_v34 = vld [vmem:[%s22651_s2 + $0x60] sm:$0xf] }
  0x17   :  { %v10522_v33 = vor.u32 %v13349_v30, %v10519_v31  ;;  %v13350_v35 = vld [vmem:[%s22651_s2 + $0x64] sm:$0xf0]  ;;  %v10301_v37 = vld [vmem:[%s22650_s0 + $0x30] sm:$0xf]  ;;  %v13302_v38 = vld [vmem:[%s22650_s0 + $0x34] sm:$0xf0] }
  0x18   :  { %332 = vmatpush.bf16.msra.mxu0 %v10390_v47  ;;  %v10518_v36 = vor.u32 %v13350_v35, %v10517_v34  ;;  %v14200_v39 = vor.u32 %v13302_v38, %v10301_v37  ;;  %v13305_v40 = vld [vmem:[%s22650_s0 + $0x54] sm:$0xf]  ;;  %v10319_v41 = vld [vmem:[%s22650_s0 + $0x58] sm:$0xf0]  ;;  %v10309_v43 = vld [vmem:[%s22650_s0 + $0x40] sm:$0xf] }
  0x19   :  { %470 = vmatpush.bf16.msra.mxu2 %v10394_v48  ;;  %10456 = vmatmul.msk.bf16.gmra.mxu3 %vm283_vm1, %v14060_v49  ;;  %v14210_v42 = vor.u32 %v13305_v40, %v10319_v41  ;;  %v13304_v44 = vld [vmem:[%s22650_s0 + $0x44] sm:$0xf0]  ;;  %v13347_v45 = vld [vmem:[%s22651_s2 + $0x54] sm:$0xf]  ;;  %v10511_v46 = vld [vmem:[%s22651_s2 + $0x58] sm:$0xf0] }
  0x1a   :  { %716 = vmatpush.bf16.msrb.mxu1 %v10518_v36  ;;  %v10509_v47 = vld [vmem:[%s22651_s2 + $0x50] sm:$0xf]  ;;  %v10514_v48 = vor.u32 %v13347_v45, %v10511_v46  ;;  %v13348_v50 = vld [vmem:[%s22651_s2 + $0x54] sm:$0xf0]  ;;  %v14234_v51 = vor.u32 %v13304_v44, %v10309_v43  ;;  %v13307_v53 = vld [vmem:[%s22650_s0 + $0x64] sm:$0xf] }
  0x1b   :  { %v10510_v52 = vor.u32 %v13348_v50, %v10509_v47  ;;  %v10317_v56 = vld [vmem:[%s22650_s0 + $0x50] sm:$0xf]  ;;  %v13306_v57 = vld [vmem:[%s22650_s0 + $0x54] sm:$0xf0]  ;;  %v13309_v59 = vld [vmem:[%s22650_s0 + $0x74] sm:$0xf] }
  0x1c   :  { %333 = vmatpush.bf16.msra.mxu0 %v10382_v54  ;;  %v10327_v54 = vld [vmem:[%s22650_s0 + $0x68] sm:$0xf0]  ;;  %v14256_v58 = vor.u32 %v13306_v57, %v10317_v56  ;;  %v13345_v61 = vld [vmem:[%s22651_s2 + $0x44] sm:$0xf]  ;;  %v10501_v2 = vld [vmem:[%s22651_s2 + $0x40] sm:$0xf] }
  0x1d   :  { %471 = vmatpush.bf16.msra.mxu2 %v10386_v55  ;;  %10444 = vmatmul.msk.bf16.gmra.mxu1 %vm283_vm1, %v14060_v49  ;;  %v14244_v55 = vor.u32 %v13307_v53, %v10327_v54  ;;  %v10503_v62 = vld [vmem:[%s22651_s2 + $0x48] sm:$0xf0]  ;;  %v13346_v4 = vld [vmem:[%s22651_s2 + $0x44] sm:$0xf0]  ;;  %v10325_v6 = vld [vmem:[%s22650_s0 + $0x60] sm:$0xf] }
  0x1e   :  { %717 = vmatpush.bf16.msrb.mxu1 %v10510_v52  ;;  %v10506_v1 = vor.u32 %v13345_v61, %v10503_v62  ;;  %v10502_v5 = vor.u32 %v13346_v4, %v10501_v2  ;;  %v13308_v7 = vld [vmem:[%s22650_s0 + $0x64] sm:$0xf0]  ;;  %v13311_v9 = vld [vmem:[%s22650_s0 + $0x84] sm:$0xf]  ;;  %v10343_v10 = vld [vmem:[%s22650_s0 + $0x88] sm:$0xf0] }
  0x1f   :  { %v14290_v8 = vor.u32 %v13308_v7, %v10325_v6  ;;  %v14300_v11 = vor.u32 %v13311_v9, %v10343_v10  ;;  %v10333_v14 = vld [vmem:[%s22650_s0 + $0x70] sm:$0xf]  ;;  %v13310_v15 = vld [vmem:[%s22650_s0 + $0x74] sm:$0xf0]  ;;  %v13343_v17 = vld [vmem:[%s22651_s2 + $0x34] sm:$0xf] }
  0x20   :  { %334 = vmatpush.bf16.msra.mxu0 %v10374_v60  ;;  %v10335_v60 = vld [vmem:[%s22650_s0 + $0x78] sm:$0xf0]  ;;  %v10493_v22 = vld [vmem:[%s22651_s2 + $0x30] sm:$0xf]  ;;  %v13344_v23 = vld [vmem:[%s22651_s2 + $0x34] sm:$0xf0] }
  0x21   :  { %472 = vmatpush.bf16.msra.mxu2 %v10378_v63  ;;  %v14272_v63 = vor.u32 %v13309_v59, %v10335_v60  ;;  %v10495_v19 = vld [vmem:[%s22651_s2 + $0x38] sm:$0xf0]  ;;  %v13313_v26 = vld [vmem:[%s22650_s0 + $0x94] sm:$0xf]  ;;  %v10494_v29 = vor.u32 %v13344_v23, %v10493_v22  ;;  %v10341_v35 = vld [vmem:[%s22650_s0 + $0x80] sm:$0xf] }
  0x22   :  { %718 = vmatpush.bf16.msrb.mxu1 %v10502_v5  ;;  %v10498_v21 = vor.u32 %v13343_v17, %v10495_v19  ;;  %v10351_v28 = vld [vmem:[%s22650_s0 + $0x98] sm:$0xf0]  ;;  %v13312_v36 = vld [vmem:[%s22650_s0 + $0x84] sm:$0xf0]  ;;  %v10485_v41 = vld [vmem:[%s22651_s2 + $0x20] sm:$0xf] }
  0x23   :  { %335 = vmatmul.bf16.vlgmr.msra.gmra.mxu0 %v14096_v0  ;;  %v14334_v31 = vor.u32 %v13313_v26, %v10351_v28  ;;  %v14346_v37 = vor.u32 %v13312_v36, %v10341_v35  ;;  %v13315_v44 = vld [vmem:[%s22650_s0 + $0xa4] sm:$0xf]  ;;  %v10359_v45 = vld [vmem:[%s22650_s0 + $0xa8] sm:$0xf0]  ;;  %v13342_v46 = vld [vmem:[%s22651_s2 + $0x24] sm:$0xf0] }
  0x24   :  { %473 = vmatmul.bf16.vlgmr.msra.gmra.mxu2 %v14096_v0  ;;  %853 = vmatpush.bf16.msrb.mxu0 %v10530_v16  ;;  %v14312_v16 = vor.u32 %v13310_v15, %v10333_v14  ;;  %v10486_v47 = vor.u32 %v13342_v46, %v10485_v41  ;;  %v14364_v50 = vor.u32 %v13315_v44, %v10359_v45  ;;  %v10477_v52 = vld [vmem:[%s22651_s2 + $0x10] sm:$0xf]  ;;  %v13340_v53 = vld [vmem:[%s22651_s2 + $0x14] sm:$0xf0]  ;;  %v13341_v60 = vld [vmem:[%s22651_s2 + $0x24] sm:$0xf] }
  0x25   :  { %929 = vmatpush.bf16.msrb.mxu2 %v713_v12  ;;  %v10478_v54 = vor.u32 %v13340_v53, %v10477_v52  ;;  %v10487_v61 = vld [vmem:[%s22651_s2 + $0x28] sm:$0xf0]  ;;  %v10469_v2 = vld [vmem:[%s22651_s2] sm:$0xf]  ;;  %v13338_v4 = vld [vmem:[%s22651_s2 + $0x4] sm:$0xf0] }
  0x26   :  { %719 = vmatpush.bf16.msrb.mxu1 %v10494_v29  ;;  %v10470_v6 = vor.u32 %v13338_v4, %v10469_v2  ;;  %v10349_v9 = vld [vmem:[%s22650_s0 + $0x90] sm:$0xf]  ;;  %v13314_v10 = vld [vmem:[%s22650_s0 + $0x94] sm:$0xf0]  ;;  %v10367_v22 = vld [vmem:[%s22650_s0 + $0xb8] sm:$0xf0] }
  0x27   :  { %v13339_v35 = vld [vmem:[%s22651_s2 + $0x14] sm:$0xf]  ;;  %v10479_v36 = vld [vmem:[%s22651_s2 + $0x18] sm:$0xf0]  ;;  %v13337_v44 = vld [vmem:[%s22651_s2 + $0x4] sm:$0xf] }
  0x28   :  { %854 = vmatpush.bf16.msrb.mxu0 %v10522_v33  ;;  %v10471_v45 = vld [vmem:[%s22651_s2 + $0x8] sm:$0xf0]  ;;  %vm2833_vm6 = vcmask 1042434   ;;  %vm2836_vm7 = vcmask 1043459   ;;  %vm2839_vm8 = vcmask 1044484   ;;  %vm2842_vm9 = vcmask 1045509  }
  0x29   :  { %10457 = vmatmul.msk.bf16.gmra.mxu3 %vm283_vm1, %v14106_v3  ;;  %v10474_v52 = vor.u32 %v13337_v44, %v10471_v45  ;;  %vm2845_vm10 = vcmask 1046534   ;;  %vm2848_vm11 = vcmask 1047559   ;;  %vm3222_vm12 = vcmask 916480  }
  0x2a   :  { %720 = vmatpush.bf16.msrb.mxu1 %v10486_v47  ;;  %vm8220_vm13 = vcmask 1043456   ;;  %vm8216_vm14 = vcmask 588800   ;;  %vm10133_vm15 = vcmask 949248  }
  0x2c   :  { %855 = vmatpush.bf16.msrb.mxu0 %v10514_v48 }
  0x2d   :  { %10445 = vmatmul.msk.bf16.gmra.mxu1 %vm283_vm1, %v14106_v3 }
  0x2e   :  { %721 = vmatpush.bf16.msrb.mxu1 %v10478_v54 }
  0x30   :  { %856 = vmatpush.bf16.msrb.mxu0 %v10506_v1  ;;  %v10490_v1 = vor.u32 %v13341_v60, %v10487_v61 }
  0x32   :  { %722 = vmatpush.bf16.msrb.mxu1 %v10470_v6 }
  0x33   :  { %340 = vmatmul.bf16.gmra.mxu0 %v14144_v20 }
  0x34   :  { %478 = vmatmul.bf16.gmra.mxu2 %v14144_v20  ;;  %857 = vmatpush.bf16.msrb.mxu0 %v10498_v21  ;;  %v13317_v21 = vld [vmem:[%s22650_s0 + $0xb4] sm:$0xf] }
  0x38   :  { %858 = vmatpush.bf16.msrb.mxu0 %v10490_v1 }
  0x39   :  { %10458 = vmatmul.msk.bf16.gmra.mxu3 %vm283_vm1, %v14154_v24 }
  0x3d   :  { %10446 = vmatmul.msk.bf16.gmra.mxu1 %vm283_vm1, %v14154_v24 }
  0x43   :  { %345 = vmatmul.bf16.gmra.mxu0 %v14166_v27 }
  0x44   :  { %483 = vmatmul.bf16.gmra.mxu2 %v14166_v27 }
  0x49   :  { %10459 = vmatmul.msk.bf16.gmra.mxu3 %vm283_vm1, %v14182_v32 }
  0x4d   :  { %10447 = vmatmul.msk.bf16.gmra.mxu1 %vm283_vm1, %v14182_v32 }
  0x53   :  { %350 = vmatmul.bf16.gmra.mxu0 %v14200_v39 }
  0x54   :  { %488 = vmatmul.bf16.gmra.mxu2 %v14200_v39 }
  0x59   :  { %10460 = vmatmul.msk.bf16.gmra.mxu3 %vm283_vm1, %v14210_v42 }
  0x5d   :  { %10448 = vmatmul.msk.bf16.gmra.mxu1 %vm283_vm1, %v14210_v42 }
  0x63   :  { %355 = vmatmul.bf16.gmra.mxu0 %v14234_v51 }
  0x64   :  { %493 = vmatmul.bf16.gmra.mxu2 %v14234_v51 }
  0x69   :  { %10461 = vmatmul.msk.bf16.gmra.mxu3 %vm283_vm1, %v14244_v55 }
  0x6d   :  { %10449 = vmatmul.msk.bf16.gmra.mxu1 %vm283_vm1, %v14244_v55 }
  0x73   :  { %360 = vmatmul.bf16.gmra.mxu0 %v14256_v58 }
  0x74   :  { %498 = vmatmul.bf16.gmra.mxu2 %v14256_v58 }
  0x79   :  { %10462 = vmatmul.msk.bf16.gmra.mxu3 %vm283_vm1, %v14272_v63 }
  0x7d   :  { %10450 = vmatmul.msk.bf16.gmra.mxu1 %vm283_vm1, %v14272_v63 }
  0x83   :  { %365 = vmatmul.bf16.gmra.mxu0 %v14290_v8 }
  0x84   :  { %503 = vmatmul.bf16.gmra.mxu2 %v14290_v8 }
  0x89   :  { %10463 = vmatmul.msk.bf16.gmra.mxu3 %vm283_vm1, %v14300_v11 }
  0x8a   :  { %v405_v12 = vpop.f32.mrf.mxu1 }
  0x8c   :  { %v543_v13 = vpop.f32.mrf.mxu3 }
  0x8d   :  { %10451 = vmatmul.msk.bf16.gmra.mxu1 %vm283_vm1, %v14300_v11 }
  0x92   :  { %v407_v25 = vpop.f32.mrf.mxu1 }
  0x93   :  { %370 = vmatmul.bf16.gmra.mxu0 %v14312_v16 }
  0x94   :  { %508 = vmatmul.bf16.gmra.mxu2 %v14312_v16  ;;  %v545_v30 = vpop.f32.mrf.mxu3 }
  0x99   :  { %10464 = vmatmul.msk.bf16.gmra.mxu3 %vm283_vm1, %v14334_v31 }
  0x9a   :  { %v410_v33 = vpop.f32.mrf.mxu1 }
  0x9c   :  { %v548_v34 = vpop.f32.mrf.mxu3 }
  0x9d   :  { %10452 = vmatmul.msk.bf16.gmra.mxu1 %vm283_vm1, %v14334_v31 }
  0xa0   :  { %v336_v38 = vpop.f32.mrf.mxu0 }
  0xa1   :  { %v14348_v40 = vadd.f32 %v405_v12, %v336_v38  ;;  %v10482_v38 = vor.u32 %v13339_v35, %v10479_v36 }
  0xa2   :  { %v412_v43 = vpop.f32.mrf.mxu1 }
  0xa3   :  { %375 = vmatmul.bf16.gmra.mxu0 %v14346_v37 }
  0xa4   :  { %513 = vmatmul.bf16.gmra.mxu2 %v14346_v37  ;;  %v550_v48 = vpop.f32.mrf.mxu3  ;;  %859 = vmatpush.bf16.msrb.mxu0 %v10482_v38 }
  0xa7   :  { %v474_v56 = vpop.f32.mrf.mxu2 }
  0xa8   :  { %v14372_v57 = vadd.f32 %v543_v13, %v474_v56  ;;  %v338_v59 = vpop.f32.mrf.mxu0  ;;  %v14398_v13 = vor.u32 %v13314_v10, %v10349_v9  ;;  %860 = vmatpush.bf16.msrb.mxu0 %v10474_v52  ;;  %v13318_v9 = vld [vmem:[%s22650_s0 + $0xb4] sm:$0xf0] }
  0xa9   :  { %v14380_v62 = vadd.f32 %v407_v25, %v338_v59  ;;  %10465 = vmatmul.msk.bf16.gmra.mxu3 %vm283_vm1, %v14364_v50  ;;  %v14412_v25 = vor.u32 %v13317_v21, %v10367_v22 }
  0xaa   :  { %v415_v5 = vpop.f32.mrf.mxu1 }
  0xac   :  { %v553_v7 = vpop.f32.mrf.mxu3 }
  0xad   :  { %10453 = vmatmul.msk.bf16.gmra.mxu1 %vm283_vm1, %v14364_v50 }
  0xaf   :  { %v476_v12 = vpop.f32.mrf.mxu2 }
  0xb0   :  { %v14400_v14 = vadd.f32 %v545_v30, %v476_v12  ;;  %v341_v15 = vpop.f32.mrf.mxu0 }
  0xb1   :  { %v14402_v17 = vadd.f32 %v410_v33, %v341_v15 }
  0xb2   :  { %v417_v19 = vpop.f32.mrf.mxu1 }
  0xb3   :  { %380 = vmatmul.bf16.gmra.mxu0 %v14398_v13 }
  0xb4   :  { %518 = vmatmul.bf16.gmra.mxu2 %v14398_v13  ;;  %v555_v23 = vpop.f32.mrf.mxu3 }
  0xb7   :  { %v479_v26 = vpop.f32.mrf.mxu2 }
  0xb8   :  { %v14414_v28 = vadd.f32 %v548_v34, %v479_v26  ;;  %v343_v29 = vpop.f32.mrf.mxu0  ;;  %v10357_v34 = vld [vmem:[%s22650_s0 + $0xa0] sm:$0xf] }
  0xb9   :  { %v14416_v30 = vadd.f32 %v412_v43, %v343_v29  ;;  %10466 = vmatmul.msk.bf16.gmra.mxu3 %vm283_vm1, %v14412_v25  ;;  %v13316_v43 = vld [vmem:[%s22650_s0 + $0xa4] sm:$0xf0] }
  0xba   :  { %v420_v33 = vpop.f32.mrf.mxu1  ;;  %v14440_v47 = vor.u32 %v13316_v43, %v10357_v34 }
  0xbc   :  { %v558_v41 = vpop.f32.mrf.mxu3 }
  0xbd   :  { %10454 = vmatmul.msk.bf16.gmra.mxu1 %vm283_vm1, %v14412_v25 }
  0xbf   :  { %v481_v46 = vpop.f32.mrf.mxu2 }
  0xc0   :  { %v14442_v53 = vadd.f32 %v550_v48, %v481_v46  ;;  %v346_v54 = vpop.f32.mrf.mxu0 }
  0xc1   :  { %v14444_v56 = vadd.f32 %v415_v5, %v346_v54  ;;  %v10365_v5 = vld [vmem:[%s22650_s0 + $0xb0] sm:$0xf] }
  0xc2   :  { %v422_v59 = vpop.f32.mrf.mxu1  ;;  %v14461_v10 = vor.u32 %v13318_v9, %v10365_v5 }
  0xc3   :  { %385 = vmatmul.bf16.gmra.mxu0 %v14440_v47 }
  0xc4   :  { %523 = vmatmul.bf16.gmra.mxu2 %v14440_v47  ;;  %v560_v60 = vpop.f32.mrf.mxu3 }
  0xc7   :  { %v484_v61 = vpop.f32.mrf.mxu2 }
  0xc8   :  { %v14448_v1 = vadd.f32 %v553_v7, %v484_v61  ;;  %v348_v2 = vpop.f32.mrf.mxu0 }
  0xc9   :  { %v14450_v4 = vadd.f32 %v417_v19, %v348_v2  ;;  %10539 = vmatmul.msk.bf16.vlgmr.msrb.gmra.mxu3 %vm283_vm1, %v13993_v18 }
  0xca   :  { %v425_v48 = vpop.f32.mrf.mxu1 }
  0xcc   :  { %v563_v6 = vpop.f32.mrf.mxu3 }
  0xcd   :  { %723 = vmatmul.bf16.vlgmr.msrb.gmra.mxu1 %v14096_v0 }
  0xcf   :  { %v486_v7 = vpop.f32.mrf.mxu2 }
  0xd0   :  { %v14463_v12 = vadd.f32 %v555_v23, %v486_v7  ;;  %v351_v15 = vpop.f32.mrf.mxu0 }
  0xd1   :  { %v14465_v19 = vadd.f32 %v420_v33, %v351_v15 }
  0xd2   :  { %v427_v21 = vpop.f32.mrf.mxu1 }
  0xd3   :  { %390 = vmatmul.bf16.gmra.mxu0 %v14461_v10 }
  0xd4   :  { %528 = vmatmul.bf16.gmra.mxu2 %v14461_v10  ;;  %v565_v22 = vpop.f32.mrf.mxu3 }
  0xd7   :  { %v489_v26 = vpop.f32.mrf.mxu2 }
  0xd8   :  { %v14469_v29 = vadd.f32 %v558_v41, %v489_v26  ;;  %v353_v35 = vpop.f32.mrf.mxu0 }
  0xd9   :  { %v14471_v36 = vadd.f32 %v422_v59, %v353_v35  ;;  %10540 = vmatmul.msk.bf16.gmra.mxu3 %vm283_vm1, %v14060_v49 }
  0xda   :  { %v430_v23 = vpop.f32.mrf.mxu1 }
  0xdc   :  { %v568_v38 = vpop.f32.mrf.mxu3 }
  0xdd   :  { %728 = vmatmul.bf16.gmra.mxu1 %v14144_v20 }
  0xdf   :  { %v491_v33 = vpop.f32.mrf.mxu2 }
  0xe0   :  { %v14476_v34 = vadd.f32 %v560_v60, %v491_v33  ;;  %v356_v43 = vpop.f32.mrf.mxu0 }
  0xe1   :  { %v14478_v44 = vadd.f32 %v425_v48, %v356_v43 }
  0xe2   :  { %v432_v45 = vpop.f32.mrf.mxu1 }
  0xe3   :  { %861 = vmatmul.bf16.vlgmr.msrb.gmra.mxu0 %v14096_v0 }
  0xe4   :  { %v570_v41 = vpop.f32.mrf.mxu3  ;;  %10551 = vmatmul.msk.bf16.vlgmr.msrb.gmra.mxu2 %vm283_vm1, %v13993_v18 }
  0xe7   :  { %v494_v46 = vpop.f32.mrf.mxu2 }
  0xe8   :  { %v14483_v52 = vadd.f32 %v563_v6, %v494_v46  ;;  %v358_v54 = vpop.f32.mrf.mxu0 }
  0xe9   :  { %v14485_v59 = vadd.f32 %v427_v21, %v358_v54  ;;  %10541 = vmatmul.msk.bf16.gmra.mxu3 %vm283_vm1, %v14106_v3 }
  0xea   :  { %v435_v60 = vpop.f32.mrf.mxu1 }
  0xec   :  { %v573_v61 = vpop.f32.mrf.mxu3 }
  0xed   :  { %733 = vmatmul.bf16.gmra.mxu1 %v14166_v27 }
  0xef   :  { %v496_v2 = vpop.f32.mrf.mxu2 }
  0xf0   :  { %v14490_v48 = vadd.f32 %v565_v22, %v496_v2  ;;  %v361_v0 = vpop.f32.mrf.mxu0 }
  0xf1   :  { %v14492_v5 = vadd.f32 %v430_v23, %v361_v0 }
  0xf2   :  { %23066 = vst [vmem:[#allocation2_spill] sm:$0xff] %v14490_v48  ;;  %v437_v18 = vpop.f32.mrf.mxu1 }
  0xf3   :  { %23067 = vst [vmem:[#allocation3_spill] sm:$0xff] %v14492_v5  ;;  %866 = vmatmul.bf16.gmra.mxu0 %v14144_v20  ;;  %v13423_v5 = vld [vmem:[%s22653_s4 + $0x134] sm:$0xf] }
  0xf4   :  { %10552 = vmatmul.msk.bf16.gmra.mxu2 %vm283_vm1, %v14060_v49  ;;  %v575_v6 = vpop.f32.mrf.mxu3 }
  0xf7   :  { %v499_v9 = vpop.f32.mrf.mxu2 }
  0xf8   :  { %v14497_v7 = vadd.f32 %v568_v38, %v499_v9  ;;  %v363_v15 = vpop.f32.mrf.mxu0 }
  0xf9   :  { %v14499_v21 = vadd.f32 %v432_v45, %v363_v15  ;;  %10542 = vmatmul.msk.bf16.gmra.mxu3 %vm283_vm1, %v14154_v24 }
  0xfa   :  { %23068 = vst [vmem:[#allocation4_spill] sm:$0xff] %v14497_v7  ;;  %v440_v22 = vpop.f32.mrf.mxu1 }
  0xfb   :  { %23069 = vst [vmem:[#allocation5_spill] sm:$0xff] %v14499_v21 }
  0xfc   :  { %v578_v26 = vpop.f32.mrf.mxu3 }
  0xfd   :  { %738 = vmatmul.bf16.gmra.mxu1 %v14200_v39 }
  0xff   :  { %v501_v35 = vpop.f32.mrf.mxu2 }
 0x100   :  { %v14504_v20 = vadd.f32 %v570_v41, %v501_v35  ;;  %v366_v23 = vpop.f32.mrf.mxu0 }
 0x101   :  { %v14506_v33 = vadd.f32 %v435_v60, %v366_v23 }
 0x102   :  { %23070 = vst [vmem:[#allocation6_spill] sm:$0xff] %v14504_v20  ;;  %v442_v38 = vpop.f32.mrf.mxu1  ;;  %v13440_v20 = vld [vmem:[%s22653_s4 + $0x1b4] sm:$0xf0] }
 0x103   :  { %23071 = vst [vmem:[#allocation7_spill] sm:$0xff] %v14506_v33  ;;  %871 = vmatmul.bf16.gmra.mxu0 %v14166_v27 }
 0x104   :  { %10553 = vmatmul.msk.bf16.gmra.mxu2 %vm283_vm1, %v14106_v3  ;;  %v580_v46 = vpop.f32.mrf.mxu3 }
 0x107   :  { %v504_v49 = vpop.f32.mrf.mxu2 }
 0x108   :  { %v14511_v43 = vadd.f32 %v573_v61, %v504_v49  ;;  %v368_v45 = vpop.f32.mrf.mxu0 }
 0x109   :  { %v14513_v54 = vadd.f32 %v437_v18, %v368_v45  ;;  %10543 = vmatmul.msk.bf16.gmra.mxu3 %vm283_vm1, %v14182_v32 }
 0x10a   :  { %23072 = vst [vmem:[#allocation8_spill] sm:$0xff] %v14511_v43  ;;  %v445_v3 = vpop.f32.mrf.mxu1 }
 0x10b   :  { %23073 = vst [vmem:[#allocation9_spill] sm:$0xff] %v14513_v54 }
 0x10c   :  { %v583_v0 = vpop.f32.mrf.mxu3 }
 0x10d   :  { %743 = vmatmul.bf16.gmra.mxu1 %v14234_v51 }
 0x10f   :  { %v506_v41 = vpop.f32.mrf.mxu2 }
 0x110   :  { %v14518_v60 = vadd.f32 %v575_v6, %v506_v41  ;;  %v371_v27 = vpop.f32.mrf.mxu0 }
 0x111   :  { %v14520_v2 = vadd.f32 %v440_v22, %v371_v27 }
 0x112   :  { %23074 = vst [vmem:[#allocation10_spill] sm:$0xff] %v14518_v60  ;;  %v447_v6 = vpop.f32.mrf.mxu1 }
 0x113   :  { %23075 = vst [vmem:[#allocation11_spill] sm:$0xff] %v14520_v2  ;;  %876 = vmatmul.bf16.gmra.mxu0 %v14200_v39 }
 0x114   :  { %10554 = vmatmul.msk.bf16.gmra.mxu2 %vm283_vm1, %v14154_v24  ;;  %v585_v35 = vpop.f32.mrf.mxu3 }
 0x117   :  { %v509_v61 = vpop.f32.mrf.mxu2 }
 0x118   :  { %v14525_v18 = vadd.f32 %v578_v26, %v509_v61  ;;  %v373_v9 = vpop.f32.mrf.mxu0 }
 0x119   :  { %v14527_v15 = vadd.f32 %v442_v38, %v373_v9  ;;  %10544 = vmatmul.msk.bf16.gmra.mxu3 %vm283_vm1, %v14210_v42 }
 0x11a   :  { %23076 = vst [vmem:[#allocation12_spill] sm:$0xff] %v14525_v18  ;;  %v450_v24 = vpop.f32.mrf.mxu1 }
 0x11b   :  { %23077 = vst [vmem:[#allocation13_spill] sm:$0xff] %v14527_v15 }
 0x11c   :  { %v588_v26 = vpop.f32.mrf.mxu3 }
 0x11d   :  { %748 = vmatmul.bf16.gmra.mxu1 %v14256_v58 }
 0x11f   :  { %v511_v22 = vpop.f32.mrf.mxu2 }
 0x120   :  { %v14532_v23 = vadd.f32 %v580_v46, %v511_v22  ;;  %v376_v39 = vpop.f32.mrf.mxu0 }
 0x121   :  { %v14534_v49 = vadd.f32 %v445_v3, %v376_v39 }
 0x122   :  { %23078 = vst [vmem:[#allocation14_spill] sm:$0xff] %v14532_v23  ;;  %v452_v3 = vpop.f32.mrf.mxu1 }
 0x123   :  { %23079 = vst [vmem:[#allocation15_spill] sm:$0xff] %v14534_v49  ;;  %881 = vmatmul.bf16.gmra.mxu0 %v14234_v51 }
 0x124   :  { %10555 = vmatmul.msk.bf16.gmra.mxu2 %vm283_vm1, %v14182_v32  ;;  %v590_v9 = vpop.f32.mrf.mxu3 }
 0x127   :  { %v514_v38 = vpop.f32.mrf.mxu2 }
 0x128   :  { %v14539_v45 = vadd.f32 %v583_v0, %v514_v38  ;;  %v378_v41 = vpop.f32.mrf.mxu0 }
 0x129   :  { %v14541_v27 = vadd.f32 %v447_v6, %v378_v41  ;;  %10545 = vmatmul.msk.bf16.gmra.mxu3 %vm283_vm1, %v14244_v55 }
 0x12a   :  { %23080 = vst [vmem:[#allocation16_spill] sm:$0xff] %v14539_v45 }
 0x12b   :  { %23081 = vst [vmem:[#allocation17_spill] sm:$0xff] %v14541_v27 }
 0x12c   :  { %v593_v38 = vpop.f32.mrf.mxu3 }
 0x12d   :  { %753 = vmatmul.bf16.gmra.mxu1 %v14290_v8 }
 0x12f   :  { %v516_v46 = vpop.f32.mrf.mxu2 }
 0x130   :  { %v14546_v61 = vadd.f32 %v585_v35, %v516_v46  ;;  %v381_v51 = vpop.f32.mrf.mxu0  ;;  %v455_v35 = vpop.f32.mrf.mxu1 }
 0x131   :  { %v14548_v32 = vadd.f32 %v450_v24, %v381_v51 }
 0x132   :  { %23082 = vst [vmem:[#allocation18_spill] sm:$0xff] %v14546_v61 }
 0x133   :  { %23083 = vst [vmem:[#allocation19_spill] sm:$0xff] %v14548_v32  ;;  %886 = vmatmul.bf16.gmra.mxu0 %v14256_v58 }
 0x134   :  { %10556 = vmatmul.msk.bf16.gmra.mxu2 %vm283_vm1, %v14210_v42 }
 0x137   :  { %v519_v0 = vpop.f32.mrf.mxu2 }
 0x138   :  { %v14553_v6 = vadd.f32 %v588_v26, %v519_v0  ;;  %v383_v22 = vpop.f32.mrf.mxu0  ;;  %v457_v42 = vpop.f32.mrf.mxu1 }
 0x139   :  { %v14555_v39 = vadd.f32 %v452_v3, %v383_v22  ;;  %10546 = vmatmul.msk.bf16.gmra.mxu3 %vm283_vm1, %v14272_v63  ;;  %v595_v26 = vpop.f32.mrf.mxu3 }
 0x13a   :  { %23084 = vst [vmem:[#allocation20_spill] sm:$0xff] %v14553_v6 }
 0x13b   :  { %23085 = vst [vmem:[#allocation21_spill] sm:$0xff] %v14555_v39 }
 0x13d   :  { %758 = vmatmul.bf16.gmra.mxu1 %v14312_v16 }
 0x13f   :  { %v521_v24 = vpop.f32.mrf.mxu2 }
 0x140   :  { %v14560_v41 = vadd.f32 %v590_v9, %v521_v24  ;;  %v386_v58 = vpop.f32.mrf.mxu0  ;;  %v460_v9 = vpop.f32.mrf.mxu1 }
 0x141   :  { %v14562_v46 = vadd.f32 %v455_v35, %v386_v58  ;;  %v598_v35 = vpop.f32.mrf.mxu3 }
 0x142   :  { %23086 = vst [vmem:[#allocation22_spill] sm:$0xff] %v14560_v41 }
 0x143   :  { %23087 = vst [vmem:[#allocation23_spill] sm:$0xff] %v14562_v46  ;;  %891 = vmatmul.bf16.gmra.mxu0 %v14290_v8 }
 0x144   :  { %10557 = vmatmul.msk.bf16.gmra.mxu2 %vm283_vm1, %v14244_v55 }
 0x147   :  { %v524_v3 = vpop.f32.mrf.mxu2 }
 0x148   :  { %v14567_v51 = vadd.f32 %v593_v38, %v524_v3  ;;  %v388_v0 = vpop.f32.mrf.mxu0  ;;  %v462_v38 = vpop.f32.mrf.mxu1 }
 0x149   :  { %v14569_v22 = vadd.f32 %v457_v42, %v388_v0  ;;  %10547 = vmatmul.msk.bf16.gmra.mxu3 %vm283_vm1, %v14300_v11  ;;  %v600_v0 = vpop.f32.mrf.mxu3 }
 0x14a   :  { %23088 = vst [vmem:[#allocation24_spill] sm:$0xff] %v14567_v51 }
 0x14b   :  { %23089 = vst [vmem:[#allocation25_spill] sm:$0xff] %v14569_v22 }
 0x14d   :  { %763 = vmatmul.bf16.gmra.mxu1 %v14346_v37 }
 0x14f   :  { %v526_v24 = vpop.f32.mrf.mxu2 }
 0x150   :  { %v14574_v8 = vadd.f32 %v595_v26, %v526_v24  ;;  %v391_v58 = vpop.f32.mrf.mxu0 }
 0x151   :  { %v14576_v41 = vadd.f32 %v460_v9, %v391_v58  ;;  %v793_v24 = vpop.f32.mrf.mxu3 }
 0x152   :  { %23090 = vst [vmem:[#allocation26_spill] sm:$0xff] %v14574_v8 }
 0x153   :  { %23091 = vst [vmem:[#allocation27_spill] sm:$0xff] %v14576_v41  ;;  %896 = vmatmul.bf16.gmra.mxu0 %v14312_v16  ;;  %v724_v16 = vpop.f32.mrf.mxu1 }
 0x154   :  { %10558 = vmatmul.msk.bf16.gmra.mxu2 %vm283_vm1, %v14272_v63  ;;  %v1762_v63 = vld [vmem:[%s22652_s3] sm:$0x3] }
 0x157   :  { %v529_v55 = vpop.f32.mrf.mxu2 }
 0x158   :  { %v14581_v42 = vadd.f32 %v598_v35, %v529_v55  ;;  %v393_v3 = vpop.f32.mrf.mxu0  ;;  %v1765_v55 = vperm.slane %v1762_v63, 1 }
 0x159   :  { %v14583_v51 = vadd.f32 %v462_v38, %v393_v3  ;;  %10548 = vmatmul.msk.bf16.gmra.mxu3 %vm283_vm1, %v14334_v31  ;;  %v794_v38 = vadd.f32 %v793_v24, %v724_v16  ;;  %v795_v8 = vpop.f32.mrf.mxu3 }
 0x15a   :  { %23092 = vst [vmem:[#allocation28_spill] sm:$0xff] %v14581_v42 }
 0x15b   :  { %23093 = vst [vmem:[#allocation29_spill] sm:$0xff] %v14583_v51  ;;  %v726_v42 = vpop.f32.mrf.mxu1 }
 0x15d   :  { %768 = vmatmul.bf16.gmra.mxu1 %v14398_v13 }
 0x15f   :  { %v531_v26 = vpop.f32.mrf.mxu2 }
 0x160   :  { %v14588_v9 = vadd.f32 %v600_v0, %v531_v26  ;;  %v862_v35 = vpop.f32.mrf.mxu0  ;;  %v991_v26 = vmax.f32 %v14348_v40, %v794_v38 }
 0x162   :  { %23094 = vst [vmem:[#allocation30_spill] sm:$0xff] %v14588_v9 }
 0x163   :  { %901 = vmatmul.bf16.gmra.mxu0 %v14346_v37  ;;  %v14599_v37 = vperm.slane %v1762_v63, 0 }
 0x164   :  { %10559 = vmatmul.msk.bf16.gmra.mxu2 %vm283_vm1, %v14300_v11  ;;  %v14601_v11 = vrot.slane %v1765_v55, 6 }
 0x166   :  { %v14607_v16 = vsel %vm1111_vm2, %v14599_v37, %v14601_v11  ;;  %v1768_v51 = vsel %vm1113_vm3, %v14599_v37, %v14601_v11 }
 0x167   :  { %v931_v58 = vpop.f32.mrf.mxu2  ;;  %v14620_v39 = vrot.slane %v14607_v16, 1 }
 0x168   :  { %v932_v3 = vadd.f32 %v931_v58, %v862_v35  ;;  %v864_v38 = vpop.f32.mrf.mxu0 }
 0x169   :  { %10549 = vmatmul.msk.bf16.gmra.mxu3 %vm283_vm1, %v14364_v50  ;;  %23095 = vst [vmem:[#allocation31_spill] sm:$0xff] %v14620_v39 }
 0x16a   :  { %v992_v0 = vmax.f32 %v14372_v57, %v932_v3 }
 0x16c   :  { %v1087_v9 = vrot.slane %v992_v0, 6  ;;  %v796_v0 = vadd.f32 %v795_v8, %v726_v42  ;;  %v13443_v8 = vld [vmem:[%s22653_s4 + $0x1d4] sm:$0xf]  ;;  %v10805_v42 = vld [vmem:[%s22653_s4 + $0x1d8] sm:$0xf0] }
 0x16d   :  { %773 = vmatmul.bf16.gmra.mxu1 %v14440_v47 }
 0x16e   :  { %v1112_v57 = vsel %vm1111_vm2, %v991_v26, %v1087_v9  ;;  %v1114_v24 = vsel %vm1113_vm3, %v991_v26, %v1087_v9  ;;  %v1117_v63 = vsel %vm1116_vm4, %v991_v26, %v1087_v9  ;;  %v14614_v35 = vsel %vm320_vm0, %v1087_v9, %v991_v26 }
 0x16f   :  { %v1115_v40 = vrot.slane %v1114_v24, 2  ;;  %v1118_v58 = vrot.slane %v1117_v63, 4  ;;  %v10563_v55 = vrot.slane %v1112_v57, 9  ;;  %v933_v3 = vpop.f32.mrf.mxu2  ;;  %v14623_v63 = vrot.slane %v1768_v51, 2 }
 0x170   :  { %v934_v41 = vadd.f32 %v933_v3, %v864_v38 }
 0x171   :  { %v10564_v22 = vrot.slane %v1115_v40, 9  ;;  %v10565_v6 = vrot.slane %v1118_v58, 9  ;;  %v1666_v46 = vmax.f32 %v1112_v57, %v10563_v55  ;;  %23096 = vst [vmem:[#allocation32_spill] sm:$0xff] %v14623_v63  ;;  %v993_v57 = vmax.f32 %v14380_v62, %v796_v0 }
 0x172   :  { %v994_v9 = vmax.f32 %v14400_v14, %v934_v41  ;;  %v10808_v14 = vor.u32 %v13443_v8, %v10805_v42 }
 0x173   :  { %v1667_v26 = vmax.f32 %v1115_v40, %v10564_v22  ;;  %v1668_v24 = vmax.f32 %v1118_v58, %v10565_v6  ;;  %v1786_v32 = vadd.f32 %v14607_v16, %v1666_v46  ;;  %906 = vmatmul.bf16.gmra.mxu0 %v14398_v13 }
 0x174   :  { %v1088_v55 = vrot.slane %v994_v9, 6  ;;  %10560 = vmatmul.msk.bf16.gmra.mxu2 %vm283_vm1, %v14334_v31 }
 0x175   :  { %v1787_v6 = vadd.f32 %v14620_v39, %v1667_v26  ;;  %v1788_v41 = vadd.f32 %v14623_v63, %v1668_v24  ;;  %v1882_v46 = vmax.f32 %v1786_v32, 0.0  ;;  %3323 = vmatpush.bf16.msra.mxu2 %v10808_v14 }
 0x176   :  { %v14639_v51 = vsel %vm1111_vm2, %v993_v57, %v1088_v55  ;;  %v14642_v22 = vsel %vm1113_vm3, %v993_v57, %v1088_v55  ;;  %v14645_v13 = vsel %vm1116_vm4, %v993_v57, %v1088_v55  ;;  %v14648_v62 = vsel %vm320_vm0, %v1088_v55, %v993_v57 }
 0x177   :  { %v1883_v40 = vmax.f32 %v1787_v6, 0.0  ;;  %v1884_v31 = vmax.f32 %v1788_v41, 0.0  ;;  %v2042_v58 = vperm.slane %v1882_v46, 0  ;;  %v2043_v38 = vperm.slane %v1882_v46, 2 }
 0x179   :  { %v2044_v3 = vperm.slane %v1883_v40, 0  ;;  %v2045_v0 = vperm.slane %v1883_v40, 2  ;;  %v2046_v32 = vperm.slane %v1884_v31, 0  ;;  %v2047_v9 = vperm.slane %v1884_v31, 2  ;;  %10550 = vmatmul.msk.bf16.gmra.mxu3 %vm283_vm1, %v14412_v25 }
 0x17a   :  { %v2298_v26 = vpack.c.bf16 %v2042_v58, %v2042_v58  ;;  %v2299_v27 = vpack.c.bf16 %v2043_v38, %v2043_v38 }
 0x17b   :  { %v2300_v24 = vpack.c.bf16 %v2044_v3, %v2044_v3  ;;  %v2301_v8 = vpack.c.bf16 %v2045_v0, %v2045_v0  ;;  %v2302_v42 = vpack.c.bf16 %v2046_v32, %v2046_v32  ;;  %v2303_v61 = vpack.c.bf16 %v2047_v9, %v2047_v9  ;;  %v936_v9 = vpop.f32.mrf.mxu2 }
 0x17c   :  { %v3367_v40 = vunpack.c.l.b16 %v2298_v26  ;;  %v3368_v58 = vunpack.c.l.b16 %v2299_v27  ;;  %v10803_v26 = vld [vmem:[%s22653_s4 + $0x1d0] sm:$0xf]  ;;  %v13444_v27 = vld [vmem:[%s22653_s4 + $0x1d4] sm:$0xf0] }
 0x17d   :  { %v2701_v57 = vunpack.c.l.b16 %v2300_v24  ;;  %v2702_v55 = vunpack.c.l.b16 %v2301_v8  ;;  %v14652_v14 = vunpack.c.l.b16 %v2302_v42  ;;  %v14654_v6 = vunpack.c.l.b16 %v2303_v61  ;;  %778 = vmatmul.bf16.gmra.mxu1 %v14461_v10  ;;  %v867_v42 = vpop.f32.mrf.mxu0 }
 0x17f   :  { %23097 = vst [vmem:[#allocation33_spill] sm:$0xff] %v14652_v14  ;;  %v2829_v41 = vrot.slane %v14652_v14, 7  ;;  %v2850_v46 = vrot.slane %v14654_v6, 7  ;;  %v3383_v31 = vrot.slane %v2701_v57, 7  ;;  %v3397_v3 = vrot.slane %v2702_v55, 7 }
 0x180   :  { %v3399_v38 = vrot.slane %v14654_v6, 6 }
 0x181   :  { %v14661_v0 = vsel %vm2830_vm5, %v2829_v41, %v2701_v57  ;;  %v14664_v61 = vsel %vm2830_vm5, %v2850_v46, %v2702_v55  ;;  %v14667_v32 = vsel %vm2830_vm5, %v3383_v31, %v3367_v40  ;;  %v3398_v24 = vsel %vm2830_vm5, %v3397_v3, %v3368_v58  ;;  %v13429_v57 = vld [vmem:[%s22653_s4 + $0x164] sm:$0xf]  ;;  %v10749_v55 = vld [vmem:[%s22653_s4 + $0x168] sm:$0xf0]  ;;  %v10747_v41 = vld [vmem:[%s22653_s4 + $0x160] sm:$0xf]  ;;  %v729_v31 = vpop.f32.mrf.mxu1  ;;  %v798_v58 = vpop.f32.mrf.mxu3 }
 0x182   :  { %23098 = vst [vmem:[#allocation34_spill] sm:$0xff] %v14667_v32  ;;  %v14677_v8 = vsel %vm2833_vm6, %v3399_v38, %v3398_v24  ;;  %v13430_v46 = vld [vmem:[%s22653_s4 + $0x164] sm:$0xf0]  ;;  %v10804_v40 = vor.u32 %v13444_v27, %v10803_v26  ;;  %v10752_v3 = vor.u32 %v13429_v57, %v10749_v55  ;;  %v937_v38 = vadd.f32 %v936_v9, %v867_v42 }
 0x183   :  { %911 = vmatmul.bf16.gmra.mxu0 %v14440_v47  ;;  %v10748_v24 = vor.u32 %v13430_v46, %v10747_v41  ;;  %v799_v32 = vadd.f32 %v798_v58, %v729_v31  ;;  %v938_v45 = vpop.f32.mrf.mxu2  ;;  %v1120_v46 = vrot.slane %v14614_v35, 6 }
 0x184   :  { %10561 = vmatmul.msk.bf16.gmra.mxu2 %vm283_vm1, %v14364_v50  ;;  %3265 = vmatpush.bf16.msra.mxu3 %v10804_v40  ;;  %v996_v47 = vmax.f32 %v14414_v28, %v937_v38  ;;  %v1770_v38 = vsel %vm1116_vm4, %v14599_v37, %v14601_v11 }
 0x185   :  { %3293 = vmatpush.bf16.msra.mxu0 %v10752_v3  ;;  %3235 = vmatpush.bf16.msra.mxu1 %v10748_v24  ;;  %v869_v49 = vpop.f32.mrf.mxu0  ;;  %v995_v18 = vmax.f32 %v14402_v17, %v799_v32  ;;  %v13441_v17 = vld [vmem:[%s22653_s4 + $0x1c4] sm:$0xf]  ;;  %v10797_v32 = vld [vmem:[%s22653_s4 + $0x1c8] sm:$0xf0]  ;;  %v10566_v24 = vrot.slane %v1120_v46, 9 }
 0x186   :  { %v1089_v23 = vrot.slane %v996_v47, 6  ;;  %v939_v42 = vadd.f32 %v938_v45, %v869_v49 }
 0x188   :  { %v14697_v50 = vsel %vm1111_vm2, %v995_v18, %v1089_v23  ;;  %v14700_v26 = vsel %vm1113_vm3, %v995_v18, %v1089_v23  ;;  %v14703_v9 = vsel %vm1116_vm4, %v995_v18, %v1089_v23  ;;  %v14706_v28 = vsel %vm320_vm0, %v1089_v23, %v995_v18 }
 0x189   :  { %v731_v15 = vpop.f32.mrf.mxu1  ;;  %v800_v2 = vpop.f32.mrf.mxu3  ;;  %23099 = vst [vmem:[#allocation35_spill] sm:$0xff] %v14706_v28  ;;  %v998_v57 = vmax.f32 %v14442_v53, %v939_v42  ;;  %v10800_v18 = vor.u32 %v13441_v17, %v10797_v32  ;;  %v14736_v42 = vrot.slane %v1770_v38, 4  ;;  %v1669_v32 = vmax.f32 %v1120_v46, %v10566_v24 }
 0x18a   :  { %v801_v27 = vadd.f32 %v800_v2, %v731_v15  ;;  %v13427_v2 = vld [vmem:[%s22653_s4 + $0x154] sm:$0xf]  ;;  %v10741_v15 = vld [vmem:[%s22653_s4 + $0x158] sm:$0xf0] }
 0x18b   :  { %v941_v55 = vpop.f32.mrf.mxu2  ;;  %v1090_v49 = vrot.slane %v998_v57, 6  ;;  %3324 = vmatpush.bf16.msra.mxu2 %v10800_v18  ;;  %v10744_v41 = vor.u32 %v13427_v2, %v10741_v15  ;;  %v14739_v57 = vrot.slane %v14623_v63, 1  ;;  %v14746_v15 = vrot.slane %v14736_v42, 1 }
 0x18c   :  { %v997_v23 = vmax.f32 %v14416_v30, %v801_v27 }
 0x18d   :  { %v872_v45 = vpop.f32.mrf.mxu0  ;;  %3294 = vmatpush.bf16.msra.mxu0 %v10744_v41  ;;  %23100 = vst [vmem:[#allocation36_spill] sm:$0xff] %v14739_v57 }
 0x18e   :  { %v1136_v53 = vsel %vm1113_vm3, %v997_v23, %v1090_v49  ;;  %v1138_v58 = vsel %vm1116_vm4, %v997_v23, %v1090_v49  ;;  %v14730_v3 = vsel %vm320_vm0, %v1090_v49, %v997_v23  ;;  %23101 = vst [vmem:[#allocation37_spill] sm:$0xff] %v14746_v15 }
 0x18f   :  { %v1137_v27 = vrot.slane %v1136_v53, 2  ;;  %v1139_v17 = vrot.slane %v1138_v58, 4 }
 0x191   :  { %v734_v40 = vpop.f32.mrf.mxu1  ;;  %v803_v31 = vpop.f32.mrf.mxu3  ;;  %v10576_v2 = vrot.slane %v1137_v27, 9 }
 0x192   :  { %v804_v47 = vadd.f32 %v803_v31, %v734_v40 }
 0x193   :  { %916 = vmatmul.bf16.gmra.mxu0 %v14461_v10  ;;  %v942_v10 = vadd.f32 %v941_v55, %v872_v45 }
 0x194   :  { %10562 = vmatmul.msk.bf16.gmra.mxu2 %vm283_vm1, %v14412_v25  ;;  %v1135_v25 = vsel %vm1111_vm2, %v997_v23, %v1090_v49  ;;  %v999_v55 = vmax.f32 %v14444_v56, %v804_v47  ;;  %v10577_v23 = vrot.slane %v1139_v17, 9 }
 0x195   :  { %v1000_v30 = vmax.f32 %v14448_v1, %v942_v10  ;;  %v10575_v18 = vrot.slane %v1135_v25, 9  ;;  %v1772_v1 = vsel %vm320_vm0, %v14601_v11, %v14599_v37  ;;  %v1679_v10 = vmax.f32 %v1137_v27, %v10576_v2 }
 0x196   :  { %v1789_v37 = vadd.f32 %v14739_v57, %v1669_v32  ;;  %v14761_v11 = vrot.slane %v1772_v1, 6  ;;  %v1680_v46 = vmax.f32 %v1139_v17, %v10577_v23 }
 0x197   :  { %v1091_v35 = vrot.slane %v1000_v30, 6  ;;  %v1678_v49 = vmax.f32 %v1135_v25, %v10575_v18  ;;  %v1799_v40 = vadd.f32 %v14746_v15, %v1679_v10 }
 0x198   :  { %23102 = vst [vmem:[#allocation38_spill] sm:$0xff] %v14761_v11  ;;  %v1800_v31 = vadd.f32 %v14761_v11, %v1680_v46  ;;  %v1885_v38 = vmax.f32 %v1789_v37, 0.0 }
 0x199   :  { %v14749_v45 = vsel %vm1111_vm2, %v999_v55, %v1091_v35  ;;  %v14752_v41 = vsel %vm1113_vm3, %v999_v55, %v1091_v35  ;;  %v14755_v56 = vsel %vm1116_vm4, %v999_v55, %v1091_v35  ;;  %v14758_v53 = vsel %vm320_vm0, %v1091_v35, %v999_v55 }
 0x19a   :  { %v1798_v25 = vadd.f32 %v14736_v42, %v1678_v49  ;;  %v1895_v30 = vmax.f32 %v1799_v40, 0.0  ;;  %v1896_v24 = vmax.f32 %v1800_v31, 0.0  ;;  %v2048_v23 = vperm.slane %v1885_v38, 0 }
 0x19b   :  { %v2049_v10 = vperm.slane %v1885_v38, 2 }
 0x19c   :  { %v1894_v58 = vmax.f32 %v1798_v25, 0.0  ;;  %v2060_v18 = vperm.slane %v1895_v30, 0  ;;  %v2061_v35 = vperm.slane %v1895_v30, 2  ;;  %v2062_v55 = vperm.slane %v1896_v24, 0 }
 0x19d   :  { %v2063_v2 = vperm.slane %v1896_v24, 2  ;;  %v2304_v54 = vpack.c.bf16 %v2048_v23, %v2048_v23 }
 0x19e   :  { %v2058_v47 = vperm.slane %v1894_v58, 0  ;;  %v2059_v27 = vperm.slane %v1894_v58, 2  ;;  %v2316_v28 = vpack.c.bf16 %v2060_v18, %v2060_v18  ;;  %v2317_v17 = vpack.c.bf16 %v2061_v35, %v2061_v35  ;;  %v736_v35 = vpop.f32.mrf.mxu1 }
 0x19f   :  { %v2318_v49 = vpack.c.bf16 %v2062_v55, %v2062_v55  ;;  %v2319_v60 = vpack.c.bf16 %v2063_v2, %v2063_v2  ;;  %v10795_v2 = vld [vmem:[%s22653_s4 + $0x1c0] sm:$0xf] }
 0x1a0   :  { %v2314_v32 = vpack.c.bf16 %v2058_v47, %v2058_v47  ;;  %v2315_v1 = vpack.c.bf16 %v2059_v27, %v2059_v27  ;;  %v2717_v43 = vunpack.c.l.b16 %v2316_v28  ;;  %v2718_v46 = vunpack.c.l.b16 %v2317_v17  ;;  %v805_v17 = vpop.f32.mrf.mxu3 }
 0x1a1   :  { %v14766_v25 = vunpack.c.l.b16 %v2318_v49  ;;  %v14768_v37 = vunpack.c.l.b16 %v2319_v60  ;;  %v2305_v27 = vpack.c.bf16 %v2049_v10, %v2049_v10  ;;  %v943_v49 = vpop.f32.mrf.mxu2  ;;  %v13428_v10 = vld [vmem:[%s22653_s4 + $0x154] sm:$0xf0]  ;;  %v806_v21 = vadd.f32 %v805_v17, %v736_v35  ;;  %v10723_v35 = vld [vmem:[%s22653_s4 + $0x130] sm:$0xf] }
 0x1a2   :  { %v3369_v40 = vunpack.c.l.b16 %v2314_v32  ;;  %v3370_v31 = vunpack.c.l.b16 %v2315_v1  ;;  %v3411_v58 = vrot.slane %v2717_v43, 7  ;;  %v3425_v30 = vrot.slane %v2718_v46, 7  ;;  %v13442_v32 = vld [vmem:[%s22653_s4 + $0x1c4] sm:$0xf0]  ;;  %v13424_v17 = vld [vmem:[%s22653_s4 + $0x134] sm:$0xf0] }
 0x1a3   :  { %23103 = vst [vmem:[#allocation39_spill] sm:$0xff] %v14766_v25  ;;  %v2864_v24 = vrot.slane %v14766_v25, 7  ;;  %v2878_v47 = vrot.slane %v14768_v37, 7  ;;  %v3427_v38 = vrot.slane %v14768_v37, 6  ;;  %v1123_v1 = vrot.slane %v14642_v22, 2 }
 0x1a4   :  { %v14773_v18 = vsel %vm2830_vm5, %v3411_v58, %v3369_v40  ;;  %v3426_v28 = vsel %vm2830_vm5, %v3425_v30, %v3370_v31  ;;  %v14801_v40 = vunpack.c.l.b16 %v2305_v27  ;;  %v874_v31 = vpop.f32.mrf.mxu0  ;;  %v10796_v58 = vor.u32 %v13442_v32, %v10795_v2  ;;  %v10731_v2 = vld [vmem:[%s22653_s4 + $0x140] sm:$0xf] }
 0x1a5   :  { %23104 = vst [vmem:[#allocation40_spill] sm:$0xff] %v14773_v18  ;;  %v14778_v60 = vsel %vm2830_vm5, %v2864_v24, %v2717_v43  ;;  %v14781_v55 = vsel %vm2830_vm5, %v2878_v47, %v2718_v46  ;;  %v14791_v23 = vsel %vm2833_vm6, %v3427_v38, %v3426_v28  ;;  %v10739_v43 = vld [vmem:[%s22653_s4 + $0x150] sm:$0xf]  ;;  %v14799_v46 = vunpack.c.l.b16 %v2304_v54 }
 0x1a6   :  { %23105 = vst [vmem:[#allocation41_spill] sm:$0xff] %v14778_v60  ;;  %v1125_v22 = vrot.slane %v14645_v13, 4  ;;  %v1127_v30 = vrot.slane %v14648_v62, 6  ;;  %v1141_v24 = vrot.slane %v14730_v3, 6  ;;  %v10567_v47 = vrot.slane %v14639_v51, 9  ;;  %3266 = vmatpush.bf16.msra.mxu3 %v10796_v58  ;;  %v739_v54 = vpop.f32.mrf.mxu1 }
 0x1a7   :  { %23106 = vst [vmem:[#allocation42_spill] sm:$0xff] %v14791_v23  ;;  %v10568_v28 = vrot.slane %v1123_v1, 9  ;;  %v10740_v38 = vor.u32 %v13428_v10, %v10739_v43  ;;  %v14808_v23 = vrot.slane %v14761_v11, 1  ;;  %v2852_v27 = vrot.slane %v14801_v40, 6  ;;  %v13425_v62 = vld [vmem:[%s22653_s4 + $0x144] sm:$0xf] }
 0x1a8   :  { %23107 = vst [vmem:[#allocation43_spill] sm:$0xff] %v14799_v46  ;;  %v10569_v3 = vrot.slane %v1125_v22, 9  ;;  %v10570_v32 = vrot.slane %v1127_v30, 9  ;;  %v10578_v18 = vrot.slane %v1141_v24, 9  ;;  %v1670_v43 = vmax.f32 %v14639_v51, %v10567_v47  ;;  %v808_v13 = vpop.f32.mrf.mxu3  ;;  %v10733_v51 = vld [vmem:[%s22653_s4 + $0x148] sm:$0xf0] }
 0x1a9   :  { %23108 = vst [vmem:[#allocation44_spill] sm:$0xff] %v14801_v40  ;;  %3236 = vmatpush.bf16.msra.mxu1 %v10740_v38  ;;  %v1671_v10 = vmax.f32 %v1123_v1, %v10568_v28  ;;  %v944_v33 = vadd.f32 %v943_v49, %v874_v31  ;;  %v13426_v38 = vld [vmem:[%s22653_s4 + $0x144] sm:$0xf0]  ;;  %v946_v1 = vpop.f32.mrf.mxu2  ;;  %v14837_v49 = vsel %vm2833_vm6, %v2852_v27, %v14664_v61  ;;  %v10787_v58 = vld [vmem:[%s22653_s4 + $0x1b0] sm:$0xf] }
 0x1aa   :  { %23109 = vst [vmem:[#allocation45_spill] sm:$0xff] %v14808_v23  ;;  %v1672_v31 = vmax.f32 %v1125_v22, %v10569_v3  ;;  %v1673_v47 = vmax.f32 %v1127_v30, %v10570_v32  ;;  %v1681_v28 = vmax.f32 %v1141_v24, %v10578_v18  ;;  %v14849_v7 = vadd.f32 %v14736_v42, %v1670_v43  ;;  %v10725_v24 = vld [vmem:[%s22653_s4 + $0x138] sm:$0xf0]  ;;  %v13439_v27 = vld [vmem:[%s22653_s4 + $0x1b4] sm:$0xf] }
 0x1ab   :  { %23110 = vst [vmem:[#allocation46_spill] sm:$0xff] %v14837_v49  ;;  %v14852_v61 = vadd.f32 %v14746_v15, %v1671_v10  ;;  %v1002_v18 = vmax.f32 %v14463_v12, %v944_v33  ;;  %v10732_v30 = vor.u32 %v13426_v38, %v10731_v2  ;;  %v10789_v3 = vld [vmem:[%s22653_s4 + $0x1b8] sm:$0xf0]  ;;  %v1001_v32 = vmax.f32 %v14450_v4, %v806_v21  ;;  %v10715_v12 = vld [vmem:[%s22653_s4 + $0x120] sm:$0xf] }
 0x1ac   :  { %v877_v22 = vpop.f32.mrf.mxu0  ;;  %v809_v43 = vadd.f32 %v808_v13, %v739_v54  ;;  %v10736_v10 = vor.u32 %v13425_v62, %v10733_v51  ;;  %v1130_v33 = vrot.slane %v14700_v26, 2  ;;  %v10724_v38 = vor.u32 %v13424_v17, %v10723_v35  ;;  %v13422_v60 = vld [vmem:[%s22653_s4 + $0x124] sm:$0xf0]  ;;  %v10779_v4 = vld [vmem:[%s22653_s4 + $0x1a0] sm:$0xf] }
 0x1ad   :  { %v947_v48 = vadd.f32 %v946_v1, %v877_v22  ;;  %v1092_v2 = vrot.slane %v1002_v18, 6  ;;  %3237 = vmatpush.bf16.msra.mxu1 %v10732_v30  ;;  %v10788_v49 = vor.u32 %v13440_v20, %v10787_v58  ;;  %v1801_v21 = vadd.f32 %v14808_v23, %v1681_v28  ;;  %v13438_v26 = vld [vmem:[%s22653_s4 + $0x1a4] sm:$0xf0]  ;;  %v13437_v20 = vld [vmem:[%s22653_s4 + $0x1a4] sm:$0xf] }
 0x1ae   :  { %3295 = vmatpush.bf16.msra.mxu0 %v10736_v10  ;;  %v10728_v13 = vor.u32 %v13423_v5, %v10725_v24  ;;  %v10792_v62 = vor.u32 %v13439_v27, %v10789_v3  ;;  %v10781_v58 = vld [vmem:[%s22653_s4 + $0x1a8] sm:$0xf0]  ;;  %v13421_v5 = vld [vmem:[%s22653_s4 + $0x124] sm:$0xf]  ;;  %v1792_v17 = vadd.f32 %v14761_v11, %v1672_v31  ;;  %v1886_v28 = vmax.f32 %v14849_v7, 0.0 }
 0x1af   :  { %v1004_v54 = vmax.f32 %v14469_v29, %v947_v48  ;;  %v14887_v51 = vsel %vm1111_vm2, %v1001_v32, %v1092_v2  ;;  %v14890_v1 = vsel %vm1113_vm3, %v1001_v32, %v1092_v2  ;;  %v14893_v29 = vsel %vm1116_vm4, %v1001_v32, %v1092_v2  ;;  %3267 = vmatpush.bf16.msra.mxu3 %v10788_v49  ;;  %v10717_v35 = vld [vmem:[%s22653_s4 + $0x128] sm:$0xf0] }
 0x1b0   :  { %23111 = vst [vmem:[#allocation47_spill] sm:$0xff] %v14893_v29  ;;  %v14896_v48 = vsel %vm320_vm0, %v1092_v2, %v1001_v32  ;;  %v10571_v18 = vrot.slane %v14697_v50, 9  ;;  %v1003_v22 = vmax.f32 %v14465_v19, %v809_v43  ;;  %3325 = vmatpush.bf16.msra.mxu2 %v10792_v62  ;;  %v10716_v49 = vor.u32 %v13422_v60, %v10715_v12 }
 0x1b1   :  { %23112 = vst [vmem:[#allocation48_spill] sm:$0xff] %v14896_v48  ;;  %v1093_v30 = vrot.slane %v1004_v54, 6  ;;  %3238 = vmatpush.bf16.msra.mxu1 %v10724_v38  ;;  %v10780_v24 = vor.u32 %v13438_v26, %v10779_v4  ;;  %v10784_v27 = vor.u32 %v13437_v20, %v10781_v58  ;;  %v1793_v3 = vadd.f32 %v14808_v23, %v1673_v47  ;;  %v13418_v23 = vld [vmem:[%s22653_s4 + $0x104] sm:$0xf0] }
 0x1b2   :  { %v10572_v32 = vrot.slane %v1130_v33, 9  ;;  %v1897_v10 = vmax.f32 %v1801_v21, 0.0  ;;  %3296 = vmatpush.bf16.msra.mxu0 %v10728_v13  ;;  %v10720_v2 = vor.u32 %v13421_v5, %v10717_v35  ;;  %v1887_v60 = vmax.f32 %v14852_v61, 0.0 }
 0x1b3   :  { %v14910_v31 = vsel %vm1111_vm2, %v1003_v22, %v1093_v30  ;;  %v14913_v7 = vsel %vm1113_vm3, %v1003_v22, %v1093_v30  ;;  %v14916_v19 = vsel %vm1116_vm4, %v1003_v22, %v1093_v30  ;;  %v14919_v43 = vsel %vm320_vm0, %v1093_v30, %v1003_v22  ;;  %3268 = vmatpush.bf16.msra.mxu3 %v10780_v24 }
 0x1b4   :  { %v2051_v47 = vperm.slane %v1886_v28, 2  ;;  %v1144_v12 = vrot.slane %v14752_v41, 2  ;;  %v1146_v38 = vrot.slane %v14755_v56, 4  ;;  %3326 = vmatpush.bf16.msra.mxu2 %v10784_v27  ;;  %v23113_v4 = vrot.slane %v14801_v40, 5 }
 0x1b5   :  { %v1674_v54 = vmax.f32 %v14697_v50, %v10571_v18  ;;  %v1148_v13 = vrot.slane %v14758_v53, 6  ;;  %v10579_v62 = vrot.slane %v14749_v45, 9  ;;  %3239 = vmatpush.bf16.msra.mxu1 %v10716_v49  ;;  %v23115_v61 = vrot.slane %v14799_v46, 7 }
 0x1b6   :  { %v14928_v21 = vsel %vm2836_vm7, %v23113_v4, %v14677_v8  ;;  %v1888_v56 = vmax.f32 %v1792_v17, 0.0  ;;  %v1889_v26 = vmax.f32 %v1793_v3, 0.0  ;;  %v1675_v20 = vmax.f32 %v1130_v33, %v10572_v32  ;;  %3297 = vmatpush.bf16.msra.mxu0 %v10720_v2 }
 0x1b7   :  { %23114 = vst [vmem:[#allocation49_spill] sm:$0xff] %v14928_v21  ;;  %v14937_v41 = vsel %vm2830_vm5, %v23115_v61, %v14652_v14  ;;  %v23117_v8 = vrot.slane %v14801_v40, 7  ;;  %v2050_v53 = vperm.slane %v1886_v28, 0  ;;  %v2064_v58 = vperm.slane %v1897_v10, 0  ;;  %v10773_v21 = vld [vmem:[%s22653_s4 + $0x198] sm:$0xf0] }
 0x1b8   :  { %23116 = vst [vmem:[#allocation50_spill] sm:$0xff] %v14937_v41  ;;  %v2065_v5 = vperm.slane %v1897_v10, 2  ;;  %v2052_v35 = vperm.slane %v1887_v60, 0  ;;  %v2307_v18 = vpack.c.bf16 %v2051_v47, %v2051_v47  ;;  %v10580_v22 = vrot.slane %v1144_v12, 9  ;;  %v13435_v41 = vld [vmem:[%s22653_s4 + $0x194] sm:$0xf] }
 0x1b9   :  { %v14943_v50 = vsel %vm2830_vm5, %v23117_v8, %v14654_v6  ;;  %v10581_v30 = vrot.slane %v1146_v38, 9  ;;  %v2053_v49 = vperm.slane %v1887_v60, 2  ;;  %v1794_v24 = vadd.f32 %v14607_v16, %v1674_v54  ;;  %v741_v60 = vpop.f32.mrf.mxu1  ;;  %v810_v54 = vpop.f32.mrf.mxu3  ;;  %v10699_v14 = vld [vmem:[%s22653_s4 + $0x100] sm:$0xf] }
 0x1ba   :  { %23118 = vst [vmem:[#allocation51_spill] sm:$0xff] %v14943_v50  ;;  %v10582_v17 = vrot.slane %v1148_v13, 9  ;;  %v1682_v33 = vmax.f32 %v14749_v45, %v10579_v62  ;;  %v14947_v27 = vperm.slane %v1888_v56, 0  ;;  %v14949_v3 = vperm.slane %v1888_v56, 2 }
 0x1bb   :  { %v14951_v32 = vperm.slane %v1889_v26, 0  ;;  %v1795_v6 = vadd.f32 %v14620_v39, %v1675_v20  ;;  %v2057_v28 = vperm.slane %v1889_v26, 2  ;;  %v2306_v10 = vpack.c.bf16 %v2050_v53, %v2050_v53 }
 0x1bc   :  { %v2320_v2 = vpack.c.bf16 %v2064_v58, %v2064_v58  ;;  %v2321_v47 = vpack.c.bf16 %v2065_v5, %v2065_v5  ;;  %v2308_v4 = vpack.c.bf16 %v2052_v35, %v2052_v35  ;;  %v14954_v61 = vunpack.c.l.b16 %v2307_v18 }
 0x1bd   :  { %v1683_v8 = vmax.f32 %v1144_v12, %v10580_v22  ;;  %v1684_v48 = vmax.f32 %v1146_v38, %v10581_v30  ;;  %v2309_v45 = vpack.c.bf16 %v2053_v49, %v2053_v49  ;;  %v1890_v62 = vmax.f32 %v1794_v24, 0.0 }
 0x1be   :  { %23119 = vst [vmem:[#allocation52_spill] sm:$0xff] %v14954_v61  ;;  %v1685_v40 = vmax.f32 %v1148_v13, %v10582_v17  ;;  %v1802_v56 = vadd.f32 %v14607_v16, %v1682_v33  ;;  %v2310_v50 = vpack.c.bf16 %v14947_v27, %v14947_v27  ;;  %v2311_v26 = vpack.c.bf16 %v14949_v3, %v14949_v3 }
 0x1bf   :  { %v1132_v20 = vrot.slane %v14703_v9, 4  ;;  %v1891_v53 = vmax.f32 %v1795_v6, 0.0  ;;  %v2312_v58 = vpack.c.bf16 %v14951_v32, %v14951_v32  ;;  %v2313_v5 = vpack.c.bf16 %v2057_v28, %v2057_v28  ;;  %v948_v9 = vpop.f32.mrf.mxu2  ;;  %v879_v6 = vpop.f32.mrf.mxu0 }
 0x1c0   :  { %v14964_v12 = vunpack.c.l.b16 %v2320_v2  ;;  %v14966_v38 = vunpack.c.l.b16 %v2321_v47  ;;  %v14971_v18 = vadd.f32 %v14620_v39, %v1683_v8  ;;  %v14974_v22 = vadd.f32 %v14623_v63, %v1684_v48  ;;  %v10707_v48 = vld [vmem:[%s22653_s4 + $0x110] sm:$0xf]  ;;  %v13420_v47 = vld [vmem:[%s22653_s4 + $0x114] sm:$0xf0]  ;;  %v10709_v2 = vld [vmem:[%s22653_s4 + $0x118] sm:$0xf0] }
 0x1c1   :  { %v2494_v30 = vperm.slane %v1890_v62, 0  ;;  %v811_v49 = vadd.f32 %v810_v54, %v741_v60  ;;  %v14977_v24 = vadd.f32 %v14739_v57, %v1685_v40  ;;  %v1898_v17 = vmax.f32 %v1802_v56, 0.0  ;;  %v744_v60 = vpop.f32.mrf.mxu1  ;;  %v13436_v8 = vld [vmem:[%s22653_s4 + $0x194] sm:$0xf0]  ;;  %v13419_v54 = vld [vmem:[%s22653_s4 + $0x114] sm:$0xf] }
 0x1c2   :  { %23120 = vst [vmem:[#allocation53_spill] sm:$0xff] %v14964_v12  ;;  %v10573_v33 = vrot.slane %v1132_v20, 9  ;;  %v2495_v27 = vperm.slane %v1890_v62, 2  ;;  %v4468_v3 = vperm.slane %v1891_v53, 0  ;;  %v14979_v32 = vperm.slane %v1891_v53, 2 }
 0x1c3   :  { %23121 = vst [vmem:[#allocation54_spill] sm:$0xff] %v14966_v38  ;;  %v14989_v62 = vunpack.c.l.b16 %v2306_v10  ;;  %v2526_v56 = vpack.c.bf16 %v2494_v30, %v2494_v30  ;;  %v14992_v35 = vperm.slane %v1898_v17, 0  ;;  %v15000_v13 = vunpack.c.l.b16 %v2308_v4  ;;  %v813_v30 = vpop.f32.mrf.mxu3  ;;  %v10771_v53 = vld [vmem:[%s22653_s4 + $0x190] sm:$0xf] }
 0x1c4   :  { %v15002_v28 = vunpack.c.l.b16 %v2309_v45  ;;  %v2527_v40 = vpack.c.bf16 %v2495_v27, %v2495_v27  ;;  %v4500_v10 = vpack.c.bf16 %v4468_v3, %v4468_v3  ;;  %v15013_v4 = vunpack.c.l.b16 %v2310_v50 }
 0x1c5   :  { %23122 = vst [vmem:[#allocation55_spill] sm:$0xff] %v14989_v62  ;;  %v15015_v45 = vunpack.c.l.b16 %v2311_v26  ;;  %v15017_v27 = vunpack.c.l.b16 %v2312_v58  ;;  %v15019_v3 = vunpack.c.l.b16 %v2313_v5  ;;  %v1005_v50 = vmax.f32 %v14471_v36, %v811_v49 }
 0x1c6   :  { %23123 = vst [vmem:[#allocation56_spill] sm:$0xff] %v15000_v13  ;;  %v15031_v26 = vperm.slane %v1898_v17, 2  ;;  %v10583_v58 = vrot.slane %v14887_v51, 9  ;;  %v949_v5 = vadd.f32 %v948_v9, %v879_v6  ;;  %v15040_v11 = vmax.f32 %v1132_v20, %v10573_v33  ;;  %v10763_v9 = vld [vmem:[%s22653_s4 + $0x180] sm:$0xf] }
 0x1c7   :  { %23124 = vst [vmem:[#allocation57_spill] sm:$0xff] %v15002_v28  ;;  %v15042_v29 = vunpack.c.l.b16 %v2526_v56  ;;  %v4501_v36 = vpack.c.bf16 %v14979_v32, %v14979_v32  ;;  %v814_v49 = vadd.f32 %v813_v30, %v744_v60  ;;  %v13434_v17 = vld [vmem:[%s22653_s4 + $0x184] sm:$0xf0]  ;;  %v13417_v6 = vld [vmem:[%s22653_s4 + $0x104] sm:$0xf]  ;;  %v15055_v20 = vunpack.c.l.b16 %v2527_v40 }
 0x1c8   :  { %23125 = vst [vmem:[#allocation58_spill] sm:$0xff] %v15013_v4  ;;  %v15057_v33 = vunpack.c.l.b16 %v4500_v10  ;;  %v1006_v56 = vmax.f32 %v14476_v34, %v949_v5  ;;  %v10708_v32 = vor.u32 %v13420_v47, %v10707_v48  ;;  %v10701_v60 = vld [vmem:[%s22653_s4 + $0x108] sm:$0xf0]  ;;  %v13433_v30 = vld [vmem:[%s22653_s4 + $0x184] sm:$0xf]  ;;  %v1151_v40 = vrot.slane %v14890_v1, 2  ;;  %v882_v47 = vpop.f32.mrf.mxu0 }
 0x1c9   :  { %23126 = vst [vmem:[#allocation59_spill] sm:$0xff] %v15015_v45  ;;  %v10772_v10 = vor.u32 %v13436_v8, %v10771_v53  ;;  %v1686_v34 = vmax.f32 %v14887_v51, %v10583_v58  ;;  %v10700_v5 = vor.u32 %v13418_v23, %v10699_v14  ;;  %v10764_v45 = vor.u32 %v13434_v17, %v10763_v9  ;;  %v10691_v8 = vld [vmem:[%s22653_s4 + $0xf0] sm:$0xf]  ;;  %v13416_v51 = vld [vmem:[%s22653_s4 + $0xf4] sm:$0xf0] }
 0x1ca   :  { %23127 = vst [vmem:[#allocation60_spill] sm:$0xff] %v15017_v27  ;;  %v1094_v48 = vrot.slane %v1006_v56, 6  ;;  %3240 = vmatpush.bf16.msra.mxu1 %v10708_v32  ;;  %v15071_v28 = vunpack.c.l.b16 %v4501_v36  ;;  %v10704_v61 = vor.u32 %v13417_v6, %v10701_v60  ;;  %v10755_v14 = vld [vmem:[%s22653_s4 + $0x170] sm:$0xf]  ;;  %v10693_v53 = vld [vmem:[%s22653_s4 + $0xf8] sm:$0xf0]  ;;  %v1007_v9 = vmax.f32 %v14478_v44, %v814_v49 }
 0x1cb   :  { %23128 = vst [vmem:[#allocation61_spill] sm:$0xff] %v15019_v3  ;;  %v951_v3 = vpop.f32.mrf.mxu2  ;;  %3269 = vmatpush.bf16.msra.mxu3 %v10772_v10  ;;  %v1158_v17 = vrot.slane %v14913_v7, 2  ;;  %v13431_v6 = vld [vmem:[%s22653_s4 + $0x174] sm:$0xf]  ;;  %v10692_v44 = vor.u32 %v13416_v51, %v10691_v8 }
 0x1cc   :  { %23129 = vst [vmem:[#allocation62_spill] sm:$0xff] %v15040_v11  ;;  %v10765_v11 = vld [vmem:[%s22653_s4 + $0x188] sm:$0xf0]  ;;  %v952_v27 = vadd.f32 %v951_v3, %v882_v47  ;;  %v15083_v23 = vsel %vm1111_vm2, %v1005_v50, %v1094_v48  ;;  %v23134_v3 = vrot.slane %v14966_v38, 6 }
 0x1cd   :  { %23130 = vst [vmem:[#allocation63_spill] sm:$0xff] %v15042_v29  ;;  %v10768_v29 = vor.u32 %v13433_v30, %v10765_v11  ;;  %v15089_v11 = vsel %vm1116_vm4, %v1005_v50, %v1094_v48  ;;  %v23139_v30 = vmax.f32 %v14977_v24, 0.0  ;;  %v10588_v8 = vrot.slane %v1158_v17, 9 }
 0x1ce   :  { %23131 = vst [vmem:[#allocation64_spill] sm:$0xff] %v15055_v20  ;;  %v10776_v20 = vor.u32 %v13435_v41, %v10773_v21  ;;  %v15086_v21 = vsel %vm1113_vm3, %v1005_v50, %v1094_v48  ;;  %v15092_v41 = vsel %vm320_vm0, %v1094_v48, %v1005_v50  ;;  %v15107_v58 = vsel %vm2833_vm6, %v23134_v3, %v14781_v55 }
 0x1cf   :  { %23132 = vst [vmem:[#allocation65_spill] sm:$0xff] %v15057_v33  ;;  %v10712_v33 = vor.u32 %v13419_v54, %v10709_v2  ;;  %v13432_v2 = vld [vmem:[%s22653_s4 + $0x174] sm:$0xf0]  ;;  %v13415_v54 = vld [vmem:[%s22653_s4 + $0xf4] sm:$0xf]  ;;  %v23135_v50 = vmax.f32 %v14971_v18, 0.0  ;;  %3241 = vmatpush.bf16.msra.mxu1 %v10700_v5  ;;  %v1008_v60 = vmax.f32 %v14483_v52, %v952_v27  ;;  %3270 = vmatpush.bf16.msra.mxu3 %v10764_v45 }
 0x1d0   :  { %23133 = vst [vmem:[#allocation66_spill] sm:$0xff] %v15071_v28  ;;  %3327 = vmatpush.bf16.msra.mxu2 %v10776_v20  ;;  %v10757_v20 = vld [vmem:[%s22653_s4 + $0x178] sm:$0xf0]  ;;  %v23137_v55 = vmax.f32 %v14974_v22, 0.0  ;;  %v2072_v10 = vperm.slane %v23139_v30, 0  ;;  %v10756_v48 = vor.u32 %v13432_v2, %v10755_v14  ;;  %v10696_v47 = vor.u32 %v13415_v54, %v10693_v53 }
 0x1d1   :  { %3298 = vmatpush.bf16.msra.mxu0 %v10712_v33  ;;  %v2068_v36 = vperm.slane %v23135_v50, 0  ;;  %v23136_v33 = vmov %v23135_v50  ;;  %v10584_v18 = vrot.slane %v1151_v40, 9  ;;  %v1806_v3 = vadd.f32 %v14736_v42, %v1686_v34  ;;  %v23166_v28 = vld [vmem:[#allocation57_spill] sm:$0xff] }
 0x1d2   :  { %v2069_v56 = vperm.slane %v23136_v33, 2  ;;  %v2070_v32 = vperm.slane %v23137_v55, 0  ;;  %v23138_v7 = vmov %v23137_v55  ;;  %v1095_v5 = vrot.slane %v1008_v60, 6 }
 0x1d3   :  { %v2071_v49 = vperm.slane %v23138_v7, 2  ;;  %v10760_v50 = vor.u32 %v13431_v6, %v10757_v20  ;;  %v1160_v52 = vrot.slane %v14916_v19, 4  ;;  %v1162_v22 = vrot.slane %v14919_v43, 6  ;;  %3242 = vmatpush.bf16.msra.mxu1 %v10692_v44  ;;  %3271 = vmatpush.bf16.msra.mxu3 %v10756_v48  ;;  %v746_v48 = vpop.f32.mrf.mxu1 }
 0x1d4   :  { %3328 = vmatpush.bf16.msra.mxu2 %v10768_v29  ;;  %v10587_v27 = vrot.slane %v14910_v31, 9  ;;  %v15135_v45 = vsel %vm1111_vm2, %v1007_v9, %v1095_v5  ;;  %v15141_v51 = vsel %vm1116_vm4, %v1007_v9, %v1095_v5  ;;  %v15144_v29 = vsel %vm320_vm0, %v1095_v5, %v1007_v9 }
 0x1d5   :  { %3299 = vmatpush.bf16.msra.mxu0 %v10704_v61  ;;  %v15138_v61 = vsel %vm1113_vm3, %v1007_v9, %v1095_v5  ;;  %23141 = vst [vmem:[#allocation68_spill] sm:$0xff] %v15141_v51  ;;  %v23143_v19 = vmov %v23139_v30  ;;  %v2322_v43 = vpack.c.bf16 %v14992_v35, %v14992_v35  ;;  %v2323_v14 = vpack.c.bf16 %v15031_v26, %v15031_v26  ;;  %v23163_v51 = vld [vmem:[#allocation46_spill] sm:$0xff] }
 0x1d6   :  { %23140 = vst [vmem:[#allocation67_spill] sm:$0xff] %v15138_v61  ;;  %v2073_v34 = vperm.slane %v23143_v19, 2  ;;  %v2324_v2 = vpack.c.bf16 %v2068_v36, %v2068_v36  ;;  %v23144_v54 = vrot.slane %v14964_v12, 7  ;;  %v2325_v9 = vpack.c.bf16 %v2069_v56, %v2069_v56  ;;  %v23164_v61 = vld [vmem:[#allocation52_spill] sm:$0xff] }
 0x1d7   :  { %23142 = vst [vmem:[#allocation69_spill] sm:$0xff] %v15144_v29  ;;  %v1687_v24 = vmax.f32 %v1151_v40, %v10584_v18  ;;  %v1902_v6 = vmax.f32 %v1806_v3, 0.0  ;;  %v23146_v35 = vrot.slane %v14966_v38, 7  ;;  %v10589_v36 = vrot.slane %v1160_v52, 9 }
 0x1d8   :  { %v15156_v53 = vsel %vm2830_vm5, %v23144_v54, %v14766_v25  ;;  %3329 = vmatpush.bf16.msra.mxu2 %v10760_v50  ;;  %v10590_v20 = vrot.slane %v1162_v22, 9  ;;  %v1690_v33 = vmax.f32 %v14910_v31, %v10587_v27  ;;  %v2326_v55 = vpack.c.bf16 %v2070_v32, %v2070_v32 }
 0x1d9   :  { %3300 = vmatpush.bf16.msra.mxu0 %v10696_v47  ;;  %23145 = vst [vmem:[#allocation70_spill] sm:$0xff] %v15156_v53  ;;  %v15164_v26 = vsel %vm2830_vm5, %v23146_v35, %v14768_v37  ;;  %v2327_v60 = vpack.c.bf16 %v2071_v49, %v2071_v49  ;;  %v2328_v44 = vpack.c.bf16 %v2072_v10, %v2072_v10  ;;  %v15167_v30 = vunpack.c.l.b16 %v2322_v43  ;;  %v815_v47 = vpop.f32.mrf.mxu3 }
 0x1da   :  { %23147 = vst [vmem:[#allocation71_spill] sm:$0xff] %v15164_v26  ;;  %v1691_v7 = vmax.f32 %v1158_v17, %v10588_v8  ;;  %v2329_v56 = vpack.c.bf16 %v2073_v34, %v2073_v34  ;;  %v15169_v1 = vunpack.c.l.b16 %v2323_v14  ;;  %v15171_v40 = vunpack.c.l.b16 %v2324_v2 }
 0x1db   :  { %23148 = vst [vmem:[#allocation72_spill] sm:$0xff] %v15167_v30  ;;  %v15173_v18 = vunpack.c.l.b16 %v2325_v9  ;;  %v1807_v37 = vadd.f32 %v14746_v15, %v1687_v24  ;;  %v2496_v3 = vperm.slane %v1902_v6, 0  ;;  %v2497_v5 = vperm.slane %v1902_v6, 2 }
 0x1dc   :  { %23149 = vst [vmem:[#allocation73_spill] sm:$0xff] %v15169_v1  ;;  %v1692_v31 = vmax.f32 %v1160_v52, %v10589_v36  ;;  %v1693_v32 = vmax.f32 %v1162_v22, %v10590_v20  ;;  %v1810_v49 = vadd.f32 %v14607_v16, %v1690_v33  ;;  %v2835_v17 = vrot.slane %v14989_v62, 5 }
 0x1dd   :  { %23150 = vst [vmem:[#allocation74_spill] sm:$0xff] %v15171_v40  ;;  %v15178_v10 = vunpack.c.l.b16 %v2326_v55  ;;  %v15180_v50 = vunpack.c.l.b16 %v2327_v60  ;;  %v15182_v27 = vunpack.c.l.b16 %v2328_v44  ;;  %v1811_v8 = vadd.f32 %v14620_v39, %v1691_v7  ;;  %v23161_v60 = vld [vmem:[#allocation41_spill] sm:$0xff] }
 0x1de   :  { %23151 = vst [vmem:[#allocation75_spill] sm:$0xff] %v15173_v18  ;;  %v15185_v19 = vunpack.c.l.b16 %v2329_v56  ;;  %v2882_v34 = vrot.slane %v15169_v1, 5  ;;  %v816_v43 = vadd.f32 %v815_v47, %v746_v48  ;;  %v2838_v52 = vrot.slane %v15000_v13, 4 }
 0x1df   :  { %23152 = vst [vmem:[#allocation76_spill] sm:$0xff] %v15178_v10  ;;  %v1903_v22 = vmax.f32 %v1807_v37, 0.0  ;;  %v2528_v14 = vpack.c.bf16 %v2496_v3, %v2496_v3  ;;  %v2529_v2 = vpack.c.bf16 %v2497_v5, %v2497_v5  ;;  %v23156_v54 = vrot.slane %v14799_v46, 6  ;;  %v953_v37 = vpop.f32.mrf.mxu2 }
 0x1e0   :  { %23153 = vst [vmem:[#allocation77_spill] sm:$0xff] %v15180_v50  ;;  %v15194_v24 = vadd.f32 %v14623_v63, %v1692_v31  ;;  %v15197_v6 = vadd.f32 %v14739_v57, %v1693_v32  ;;  %v1906_v35 = vmax.f32 %v1810_v49, 0.0  ;;  %v1907_v33 = vmax.f32 %v1811_v8, 0.0  ;;  %v749_v32 = vpop.f32.mrf.mxu1 }
 0x1e1   :  { %23154 = vst [vmem:[#allocation78_spill] sm:$0xff] %v15182_v27  ;;  %v2834_v9 = vsel %vm2833_vm6, %v23156_v54, %v14661_v0  ;;  %v2841_v55 = vrot.slane %v15013_v4, 3  ;;  %v15204_v44 = vmax.f32 %v14485_v59, %v816_v43  ;;  %v15207_v7 = vunpack.c.l.b16 %v2528_v14  ;;  %v818_v49 = vpop.f32.mrf.mxu3  ;;  %v884_v43 = vpop.f32.mrf.mxu0 }
 0x1e2   :  { %23155 = vst [vmem:[#allocation79_spill] sm:$0xff] %v15185_v19  ;;  %v2837_v36 = vsel %vm2836_vm7, %v2835_v17, %v2834_v9  ;;  %v15209_v56 = vunpack.c.l.b16 %v2529_v2  ;;  %v15211_v48 = vperm.slane %v1903_v22, 0  ;;  %v15213_v47 = vperm.slane %v1903_v22, 2  ;;  %v23159_v22 = vld [vmem:[#allocation60_spill] sm:$0xff]  ;;  %v23160_v2 = vld [vmem:[#allocation63_spill] sm:$0xff] }
 0x1e3   :  { %v2840_v0 = vsel %vm2839_vm8, %v2838_v52, %v2837_v36  ;;  %23157 = vst [vmem:[#allocation80_spill] sm:$0xff] %v15207_v7  ;;  %v1908_v3 = vmax.f32 %v15194_v24, 0.0  ;;  %v15217_v31 = vperm.slane %v1906_v35, 0  ;;  %v15219_v59 = vperm.slane %v1906_v35, 2 }
 0x1e4   :  { %23158 = vst [vmem:[#allocation81_spill] sm:$0xff] %v15209_v56  ;;  %v15221_v17 = vperm.slane %v1907_v33, 0  ;;  %v15223_v8 = vperm.slane %v1907_v33, 2  ;;  %v2843_v52 = vsel %vm2842_vm9, %v2841_v55, %v2840_v0  ;;  %v2844_v14 = vrot.slane %v23159_v22, 2 }
 0x1e5   :  { %v2847_v54 = vrot.slane %v23160_v2, 1  ;;  %v2868_v9 = vrot.slane %v15167_v30, 5  ;;  %v2870_v24 = vrot.slane %v15171_v40, 4  ;;  %v819_v35 = vadd.f32 %v818_v49, %v749_v32 }
 0x1e6   :  { %v1165_v36 = vrot.slane %v15086_v21, 2  ;;  %v23162_v20 = vrot.slane %v14964_v12, 6  ;;  %v2872_v5 = vrot.slane %v15178_v10, 3  ;;  %v2846_v55 = vsel %vm2845_vm10, %v2844_v14, %v2843_v52  ;;  %v23167_v14 = vld [vmem:[#allocation59_spill] sm:$0xff]  ;;  %v23193_v10 = vld [vmem:[#allocation5_spill] sm:$0xff] }
 0x1e7   :  { %v2876_v29 = vrot.slane %v15207_v7, 1  ;;  %v23165_v26 = vrot.slane %v23164_v61, 5  ;;  %v2874_v49 = vrot.slane %v15182_v27, 2 }
 0x1e8   :  { %v2867_v33 = vsel %vm2833_vm6, %v23162_v20, %v23161_v60  ;;  %v2856_v20 = vrot.slane %v23166_v28, 4  ;;  %v2849_v60 = vsel %vm2848_vm11, %v2847_v54, %v2846_v55  ;;  %v23169_v54 = vld [vmem:[#allocation64_spill] sm:$0xff] }
 0x1e9   :  { %v2869_v0 = vsel %vm2836_vm7, %v2868_v9, %v2867_v33  ;;  %v2855_v32 = vsel %vm2836_vm7, %v23165_v26, %v23163_v51  ;;  %v2858_v9 = vrot.slane %v23167_v14, 3  ;;  %v23168_v33 = vld [vmem:[#allocation61_spill] sm:$0xff]  ;;  %v2883_v51 = vsel %vm2836_vm7, %v2882_v34, %v15107_v58 }
 0x1ea   :  { %v2871_v21 = vsel %vm2839_vm8, %v2870_v24, %v2869_v0  ;;  %v2860_v53 = vrot.slane %v23168_v33, 2  ;;  %v2857_v2 = vsel %vm2839_vm8, %v2856_v20, %v2855_v32  ;;  %v2884_v26 = vrot.slane %v15173_v18, 4  ;;  %v956_v20 = vpop.f32.mrf.mxu2 }
 0x1eb   :  { %v2873_v52 = vsel %vm2842_vm9, %v2872_v5, %v2871_v21  ;;  %v2859_v0 = vsel %vm2842_vm9, %v2858_v9, %v2857_v2  ;;  %v2862_v55 = vrot.slane %v23169_v54, 1  ;;  %v2886_v5 = vrot.slane %v15180_v50, 3 }
 0x1ec   :  { %v2875_v7 = vsel %vm2845_vm10, %v2874_v49, %v2873_v52  ;;  %v2885_v1 = vsel %vm2839_vm8, %v2884_v26, %v2883_v51  ;;  %v2888_v49 = vrot.slane %v15185_v19, 2  ;;  %v2890_v32 = vrot.slane %v15209_v56, 1  ;;  %v887_v51 = vpop.f32.mrf.mxu0  ;;  %v15272_v26 = vpop.f32.mrf.mxu1 }
 0x1ed   :  { %v2877_v24 = vsel %vm2848_vm11, %v2876_v29, %v2875_v7  ;;  %v1167_v58 = vrot.slane %v15089_v11, 4  ;;  %v1169_v34 = vrot.slane %v15092_v41, 6  ;;  %v10591_v29 = vrot.slane %v15083_v23, 9  ;;  %v15274_v11 = vpop.f32.mrf.mxu3 }
 0x1ee   :  { %v15259_v21 = vpack.c.b16 %v2877_v24, %v2849_v60  ;;  %v2887_v7 = vsel %vm2842_vm9, %v2886_v5, %v2885_v1  ;;  %v10592_v2 = vrot.slane %v1165_v36, 9  ;;  %v2861_v60 = vsel %vm2845_vm10, %v2860_v53, %v2859_v0  ;;  %v23172_v53 = vld [vmem:[#allocation2_spill] sm:$0xff] }
 0x1ef   :  { %v2889_v52 = vsel %vm2845_vm10, %v2888_v49, %v2887_v7  ;;  %v954_v9 = vadd.f32 %v953_v37, %v884_v43  ;;  %v2863_v41 = vsel %vm2848_vm11, %v2862_v55, %v2861_v60  ;;  %v957_v1 = vadd.f32 %v956_v20, %v887_v51  ;;  %v23176_v20 = vld [vmem:[#allocation3_spill] sm:$0xff] }
 0x1f0   :  { %23170 = vst [vmem:[#allocation41_spill] sm:$0xff] %v15259_v21  ;;  %3243 = vmatmul.bf16.vlgmr.msra.gmra.mxu1 %v15259_v21  ;;  %3301 = vmatmul.bf16.vlgmr.msra.gmra.mxu0 %v15259_v21  ;;  %v2891_v24 = vsel %vm2848_vm11, %v2890_v32, %v2889_v52  ;;  %v2078_v5 = vperm.slane %v1908_v3, 0  ;;  %v2079_v56 = vperm.slane %v1908_v3, 2  ;;  %v23173_v49 = vmax.f32 %v15197_v6, 0.0  ;;  %v23174_v21 = vld [vmem:[#allocation4_spill] sm:$0xff] }
 0x1f1   :  { %v15278_v54 = vpack.c.b16 %v2891_v24, %v2863_v41  ;;  %v1010_v0 = vmax.f32 %v23172_v53, %v954_v9  ;;  %v10593_v43 = vrot.slane %v1167_v58, 9  ;;  %v10594_v7 = vrot.slane %v1169_v34, 9  ;;  %v23177_v53 = vld [vmem:[#allocation47_spill] sm:$0xff] }
 0x1f2   :  { %v2080_v37 = vperm.slane %v23173_v49, 0  ;;  %v1012_v19 = vmax.f32 %v23174_v21, %v957_v1  ;;  %v23175_v50 = vmov %v23173_v49  ;;  %v2332_v32 = vpack.c.bf16 %v15221_v17, %v15221_v17 }
 0x1f3   :  { %23171 = vst [vmem:[#allocation46_spill] sm:$0xff] %v15278_v54  ;;  %v2081_v55 = vperm.slane %v23175_v50, 2  ;;  %v1011_v60 = vmax.f32 %v23176_v20, %v819_v35  ;;  %10809 = vmatmul.msk.bf16.vlgmr.msra.gmra.mxu3 %vm3222_vm12, %v15278_v54  ;;  %10813 = vmatmul.msk.bf16.vlgmr.msra.gmra.mxu2 %vm3222_vm12, %v15278_v54  ;;  %v1096_v3 = vrot.slane %v1010_v0, 6  ;;  %v1694_v52 = vmax.f32 %v15083_v23, %v10591_v29 }
 0x1f4   :  { %v1695_v9 = vmax.f32 %v1165_v36, %v10592_v2  ;;  %v10595_v21 = vrot.slane %v15135_v45, 9  ;;  %v1097_v51 = vrot.slane %v1012_v19, 6  ;;  %v2334_v23 = vpack.c.bf16 %v2078_v5, %v2078_v5  ;;  %v889_v0 = vpop.f32.mrf.mxu0 }
 0x1f5   :  { %v15297_v50 = vsel %vm1111_vm2, %v15204_v44, %v1096_v3  ;;  %v15301_v6 = vsel %vm1113_vm3, %v15204_v44, %v1096_v3  ;;  %v15305_v17 = vsel %vm1116_vm4, %v15204_v44, %v1096_v3  ;;  %v15309_v35 = vsel %vm320_vm0, %v1096_v3, %v15204_v44  ;;  %v23178_v3 = vld [vmem:[#allocation38_spill] sm:$0xff] }
 0x1f6   :  { %v2335_v36 = vpack.c.bf16 %v2079_v56, %v2079_v56  ;;  %v1696_v29 = vmax.f32 %v1167_v58, %v10593_v43  ;;  %v1697_v19 = vmax.f32 %v1169_v34, %v10594_v7  ;;  %v15312_v2 = vsel %vm1111_vm2, %v1011_v60, %v1097_v51  ;;  %v958_v7 = vpop.f32.mrf.mxu2 }
 0x1f7   :  { %v15315_v41 = vsel %vm1113_vm3, %v1011_v60, %v1097_v51  ;;  %v15318_v24 = vsel %vm1116_vm4, %v1011_v60, %v1097_v51  ;;  %v15321_v1 = vsel %vm320_vm0, %v1097_v51, %v1011_v60  ;;  %v2333_v44 = vpack.c.bf16 %v15223_v8, %v15223_v8 }
 0x1f8   :  { %v1814_v56 = vadd.f32 %v14736_v42, %v1694_v52  ;;  %v1698_v58 = vmax.f32 %v15135_v45, %v10595_v21  ;;  %v4502_v34 = vpack.c.bf16 %v15211_v48, %v15211_v48  ;;  %v4503_v5 = vpack.c.bf16 %v15213_v47, %v15213_v47  ;;  %v15338_v45 = vpop.f32.mrf.mxu1  ;;  %v15340_v21 = vpop.f32.mrf.mxu3 }
 0x1f9   :  { %v2330_v49 = vpack.c.bf16 %v15217_v31, %v15217_v31  ;;  %v1815_v43 = vadd.f32 %v14746_v15, %v1695_v9  ;;  %v2331_v20 = vpack.c.bf16 %v15219_v59, %v15219_v59  ;;  %v2336_v8 = vpack.c.bf16 %v2080_v37, %v2080_v37  ;;  %v23182_v31 = vld [vmem:[#allocation45_spill] sm:$0xff] }
 0x1fa   :  { %v2337_v60 = vpack.c.bf16 %v2081_v55, %v2081_v55  ;;  %v1816_v52 = vadd.f32 %v23178_v3, %v1696_v29  ;;  %v15342_v48 = vunpack.c.l.b16 %v2332_v32  ;;  %v15344_v47 = vunpack.c.l.b16 %v2334_v23 }
 0x1fb   :  { %v15346_v51 = vunpack.c.l.b16 %v2335_v36  ;;  %v1817_v9 = vadd.f32 %v23182_v31, %v1697_v19  ;;  %v23183_v54 = vrot.slane %v23177_v53, 4  ;;  %v15353_v37 = vunpack.c.l.b16 %v2333_v44 }
 0x1fc   :  { %23179 = vst [vmem:[#allocation2_spill] sm:$0xff] %v15342_v48  ;;  %v1910_v55 = vmax.f32 %v1814_v56, 0.0  ;;  %v1818_v29 = vadd.f32 %v14607_v16, %v1698_v58  ;;  %v15356_v18 = vunpack.c.l.b16 %v4502_v34  ;;  %v15358_v32 = vunpack.c.l.b16 %v4503_v5 }
 0x1fd   :  { %23180 = vst [vmem:[#allocation4_spill] sm:$0xff] %v15344_v47  ;;  %v15351_v59 = vrot.slane %v23183_v54, 9  ;;  %v15360_v23 = vunpack.c.l.b16 %v2330_v49  ;;  %v1911_v36 = vmax.f32 %v1815_v43, 0.0  ;;  %v15362_v38 = vunpack.c.l.b16 %v2336_v8 }
 0x1fe   :  { %23181 = vst [vmem:[#allocation3_spill] sm:$0xff] %v15346_v51  ;;  %v15364_v19 = vunpack.c.l.b16 %v2337_v60  ;;  %v15366_v33 = vunpack.c.l.b16 %v2331_v20  ;;  %v1912_v54 = vmax.f32 %v1816_v52, 0.0  ;;  %v1913_v34 = vmax.f32 %v1817_v9, 0.0  ;;  %v961_v49 = vpop.f32.mrf.mxu2 }
 0x1ff   :  { %23184 = vst [vmem:[#allocation82_spill] sm:$0xff] %v15351_v59  ;;  %v2082_v53 = vperm.slane %v1910_v55, 0  ;;  %v1914_v43 = vmax.f32 %v1818_v29, 0.0  ;;  %v2083_v8 = vperm.slane %v1910_v55, 2  ;;  %v2084_v59 = vperm.slane %v1911_v36, 0 }
 0x200   :  { %23185 = vst [vmem:[#allocation83_spill] sm:$0xff] %v15353_v37  ;;  %v1179_v60 = vrot.slane %v15301_v6, 2  ;;  %v1181_v20 = vrot.slane %v15305_v17, 4  ;;  %v2085_v52 = vperm.slane %v1911_v36, 2  ;;  %v2087_v44 = vperm.slane %v1912_v54, 2  ;;  %v825_v17 = vpop.f32.mrf.mxu3 }
 0x201   :  { %23186 = vst [vmem:[#allocation84_spill] sm:$0xff] %v15356_v18  ;;  %v959_v18 = vadd.f32 %v958_v7, %v889_v0  ;;  %v2088_v56 = vperm.slane %v1913_v34, 0  ;;  %v821_v9 = vadd.f32 %v15274_v11, %v15272_v26  ;;  %v1183_v5 = vrot.slane %v15309_v35, 6  ;;  %v892_v7 = vpop.f32.mrf.mxu0  ;;  %v23192_v26 = vld [vmem:[#allocation6_spill] sm:$0xff] }
 0x202   :  { %23187 = vst [vmem:[#allocation85_spill] sm:$0xff] %v15358_v32  ;;  %v2086_v32 = vperm.slane %v1912_v54, 0  ;;  %v2338_v55 = vpack.c.bf16 %v2082_v53, %v2082_v53  ;;  %v2498_v58 = vperm.slane %v1914_v43, 0  ;;  %v10599_v6 = vrot.slane %v15297_v50, 9 }
 0x203   :  { %23188 = vst [vmem:[#allocation86_spill] sm:$0xff] %v15360_v23  ;;  %v756_v23 = vpop.f32.mrf.mxu1  ;;  %v2339_v36 = vpack.c.bf16 %v2083_v8, %v2083_v8  ;;  %v2340_v14 = vpack.c.bf16 %v2084_v59, %v2084_v59  ;;  %v10600_v54 = vrot.slane %v1179_v60, 9  ;;  %v10601_v0 = vrot.slane %v1181_v20, 9 }
 0x204   :  { %23189 = vst [vmem:[#allocation87_spill] sm:$0xff] %v15362_v38  ;;  %v2342_v28 = vpack.c.bf16 %v2086_v32, %v2086_v32  ;;  %v2343_v61 = vpack.c.bf16 %v2087_v44, %v2087_v44  ;;  %v1014_v11 = vmax.f32 %v23192_v26, %v959_v18  ;;  %v2344_v35 = vpack.c.bf16 %v2088_v56, %v2088_v56 }
 0x205   :  { %23190 = vst [vmem:[#allocation88_spill] sm:$0xff] %v15364_v19  ;;  %v1013_v29 = vmax.f32 %v23193_v10, %v821_v9  ;;  %v10602_v53 = vrot.slane %v1183_v5, 9  ;;  %v15382_v40 = vunpack.c.l.b16 %v2338_v55  ;;  %v2499_v30 = vperm.slane %v1914_v43, 2 }
 0x206   :  { %23191 = vst [vmem:[#allocation89_spill] sm:$0xff] %v15366_v33  ;;  %v2089_v33 = vperm.slane %v1913_v34, 2  ;;  %v2341_v34 = vpack.c.bf16 %v2085_v52, %v2085_v52  ;;  %v2530_v25 = vpack.c.bf16 %v2498_v58, %v2498_v58  ;;  %v1702_v8 = vmax.f32 %v15297_v50, %v10599_v6 }
 0x207   :  { %23194 = vst [vmem:[#allocation6_spill] sm:$0xff] %v15382_v40  ;;  %v15385_v59 = vunpack.c.l.b16 %v2339_v36  ;;  %v15387_v12 = vunpack.c.l.b16 %v2340_v14  ;;  %v1703_v52 = vmax.f32 %v1179_v60, %v10600_v54  ;;  %v1704_v32 = vmax.f32 %v1181_v20, %v10601_v0 }
 0x208   :  { %v2345_v27 = vpack.c.bf16 %v2089_v33, %v2089_v33  ;;  %v15389_v44 = vunpack.c.l.b16 %v2341_v34  ;;  %v15391_v18 = vunpack.c.l.b16 %v2342_v28  ;;  %v15393_v33 = vunpack.c.l.b16 %v2343_v61 }
 0x209   :  { %23195 = vst [vmem:[#allocation5_spill] sm:$0xff] %v15385_v59  ;;  %v1098_v10 = vrot.slane %v1014_v11, 6  ;;  %v15395_v56 = vunpack.c.l.b16 %v2344_v35  ;;  %v1705_v58 = vmax.f32 %v1183_v5, %v10602_v53  ;;  %v1186_v50 = vrot.slane %v15315_v41, 2  ;;  %v828_v5 = vpop.f32.mrf.mxu3  ;;  %v894_v54 = vpop.f32.mrf.mxu0  ;;  %v23207_v53 = vld [vmem:[#allocation7_spill] sm:$0xff] }
 0x20a   :  { %23196 = vst [vmem:[#allocation90_spill] sm:$0xff] %v15387_v12  ;;  %v15397_v9 = vunpack.c.l.b16 %v2345_v27  ;;  %v2531_v43 = vpack.c.bf16 %v2499_v30, %v2499_v30  ;;  %v15400_v55 = vunpack.c.l.b16 %v2530_v25  ;;  %v1822_v14 = vadd.f32 %v14736_v42, %v1702_v8  ;;  %v963_v27 = vpop.f32.mrf.mxu2 }
 0x20b   :  { %23197 = vst [vmem:[#allocation91_spill] sm:$0xff] %v15389_v44  ;;  %v1188_v60 = vrot.slane %v15318_v24, 4  ;;  %v824_v28 = vadd.f32 %v15340_v21, %v15338_v45  ;;  %v1823_v61 = vadd.f32 %v14746_v15, %v1703_v52  ;;  %v1824_v20 = vadd.f32 %v23178_v3, %v1704_v32  ;;  %v759_v36 = vpop.f32.mrf.mxu1 }
 0x20c   :  { %23198 = vst [vmem:[#allocation92_spill] sm:$0xff] %v15391_v18  ;;  %v826_v6 = vadd.f32 %v825_v17, %v756_v23  ;;  %v1191_v41 = vsel %vm1111_vm2, %v1013_v29, %v1098_v10  ;;  %v15410_v25 = vsel %vm1113_vm3, %v1013_v29, %v1098_v10  ;;  %v15413_v30 = vsel %vm1116_vm4, %v1013_v29, %v1098_v10 }
 0x20d   :  { %23199 = vst [vmem:[#allocation93_spill] sm:$0xff] %v15393_v33  ;;  %v15416_v24 = vsel %vm320_vm0, %v1098_v10, %v1013_v29  ;;  %v1825_v45 = vadd.f32 %v23182_v31, %v1705_v58  ;;  %v1190_v21 = vrot.slane %v15321_v1, 6  ;;  %v10603_v23 = vrot.slane %v15312_v2, 9  ;;  %v23208_v29 = vld [vmem:[#allocation9_spill] sm:$0xff]  ;;  %v23209_v58 = vld [vmem:[#allocation8_spill] sm:$0xff]  ;;  %v23210_v1 = vld [vmem:[#allocation10_spill] sm:$0xff] }
 0x20e   :  { %23200 = vst [vmem:[#allocation94_spill] sm:$0xff] %v15395_v56  ;;  %v10604_v17 = vrot.slane %v1186_v50, 9  ;;  %v1918_v0 = vmax.f32 %v1822_v14, 0.0  ;;  %v10605_v34 = vrot.slane %v1188_v60, 9  ;;  %v962_v26 = vadd.f32 %v961_v49, %v892_v7 }
 0x20f   :  { %23201 = vst [vmem:[#allocation95_spill] sm:$0xff] %v15397_v9  ;;  %v964_v11 = vadd.f32 %v963_v27, %v894_v54  ;;  %v15421_v35 = vunpack.c.l.b16 %v2531_v43  ;;  %v1015_v8 = vmax.f32 %v23207_v53, %v824_v28  ;;  %v1919_v52 = vmax.f32 %v1823_v61, 0.0 }
 0x210   :  { %23202 = vst [vmem:[#allocation96_spill] sm:$0xff] %v15400_v55  ;;  %v1920_v32 = vmax.f32 %v1824_v20, 0.0  ;;  %v1017_v10 = vmax.f32 %v23208_v29, %v826_v6  ;;  %v1921_v22 = vmax.f32 %v1825_v45, 0.0  ;;  %v10606_v4 = vrot.slane %v1190_v21, 9 }
 0x211   :  { %23203 = vst [vmem:[#allocation97_spill] sm:$0xff] %v15410_v25  ;;  %v1018_v25 = vmax.f32 %v23210_v1, %v964_v11  ;;  %v1706_v14 = vmax.f32 %v15312_v2, %v10603_v23  ;;  %v1707_v13 = vmax.f32 %v1186_v50, %v10604_v17  ;;  %v2090_v49 = vperm.slane %v1918_v0, 0  ;;  %v830_v11 = vpop.f32.mrf.mxu3 }
 0x212   :  { %23204 = vst [vmem:[#allocation98_spill] sm:$0xff] %v15413_v30  ;;  %v1016_v30 = vmax.f32 %v23209_v58, %v962_v26  ;;  %v2091_v7 = vperm.slane %v1918_v0, 2  ;;  %v1708_v43 = vmax.f32 %v1188_v60, %v10605_v34  ;;  %v2092_v54 = vperm.slane %v1919_v52, 0 }
 0x213   :  { %23205 = vst [vmem:[#allocation99_spill] sm:$0xff] %v15416_v24  ;;  %v829_v24 = vadd.f32 %v828_v5, %v759_v36  ;;  %v2094_v28 = vperm.slane %v1920_v32, 0  ;;  %v2095_v61 = vperm.slane %v1920_v32, 2  ;;  %v1100_v20 = vrot.slane %v1018_v25, 6  ;;  %v761_v26 = vpop.f32.mrf.mxu1 }
 0x214   :  { %23206 = vst [vmem:[#allocation100_spill] sm:$0xff] %v15421_v35  ;;  %v1099_v27 = vrot.slane %v1016_v30, 6  ;;  %v2093_v50 = vperm.slane %v1919_v52, 2  ;;  %v2096_v45 = vperm.slane %v1921_v22, 0  ;;  %v1709_v60 = vmax.f32 %v1190_v21, %v10606_v4  ;;  %v23211_v30 = vld [vmem:[#allocation11_spill] sm:$0xff] }
 0x215   :  { %v15441_v23 = vmax.f32 %v23211_v30, %v829_v24  ;;  %v2097_v17 = vperm.slane %v1921_v22, 2  ;;  %v1826_v25 = vadd.f32 %v14607_v16, %v1706_v14  ;;  %v1827_v0 = vadd.f32 %v14620_v39, %v1707_v13 }
 0x216   :  { %v15429_v6 = vsel %vm1111_vm2, %v1015_v8, %v1099_v27  ;;  %v15432_v36 = vsel %vm1113_vm3, %v1015_v8, %v1099_v27  ;;  %v15435_v5 = vsel %vm1116_vm4, %v1015_v8, %v1099_v27  ;;  %v15438_v2 = vsel %vm320_vm0, %v1099_v27, %v1015_v8 }
 0x217   :  { %v10607_v34 = vrot.slane %v1191_v41, 9  ;;  %v2350_v53 = vpack.c.bf16 %v2094_v28, %v2094_v28  ;;  %v1828_v32 = vadd.f32 %v14623_v63, %v1708_v43  ;;  %v15447_v8 = vsel %vm1111_vm2, %v1017_v10, %v1100_v20 }
 0x218   :  { %v15450_v52 = vsel %vm1113_vm3, %v1017_v10, %v1100_v20  ;;  %v2346_v4 = vpack.c.bf16 %v2090_v49, %v2090_v49  ;;  %v2347_v24 = vpack.c.bf16 %v2091_v7, %v2091_v7  ;;  %v2348_v21 = vpack.c.bf16 %v2092_v54, %v2092_v54 }
 0x219   :  { %v2351_v22 = vpack.c.bf16 %v2095_v61, %v2095_v61  ;;  %v2349_v29 = vpack.c.bf16 %v2093_v50, %v2093_v50  ;;  %v2352_v58 = vpack.c.bf16 %v2096_v45, %v2096_v45  ;;  %v1829_v13 = vadd.f32 %v14739_v57, %v1709_v60 }
 0x21a   :  { %v15454_v1 = vsel %vm1116_vm4, %v1017_v10, %v1100_v20  ;;  %v2353_v14 = vpack.c.bf16 %v2097_v17, %v2097_v17  ;;  %v1922_v27 = vmax.f32 %v1826_v25, 0.0  ;;  %v1710_v43 = vmax.f32 %v1191_v41, %v10607_v34 }
 0x21b   :  { %v15457_v30 = vunpack.c.l.b16 %v2350_v53  ;;  %v1923_v62 = vmax.f32 %v1827_v0, 0.0  ;;  %v15460_v49 = vsel %vm320_vm0, %v1100_v20, %v1017_v10  ;;  %v23213_v7 = vrot.slane %v15344_v47, 7 }
 0x21c   :  { %v15468_v61 = vunpack.c.l.b16 %v2348_v21  ;;  %v15470_v50 = vunpack.c.l.b16 %v2351_v22  ;;  %v15472_v45 = vunpack.c.l.b16 %v2346_v4  ;;  %v15474_v41 = vunpack.c.l.b16 %v2347_v24 }
 0x21d   :  { %23212 = vst [vmem:[#allocation7_spill] sm:$0xff] %v15457_v30  ;;  %v15466_v54 = vsel %vm2830_vm5, %v23213_v7, %v15342_v48  ;;  %v15476_v60 = vunpack.c.l.b16 %v2349_v29  ;;  %v15478_v17 = vunpack.c.l.b16 %v2352_v58  ;;  %v1924_v10 = vmax.f32 %v1828_v32, 0.0 }
 0x21e   :  { %23214 = vst [vmem:[#allocation9_spill] sm:$0xff] %v15468_v61  ;;  %v1925_v20 = vmax.f32 %v1829_v13, 0.0  ;;  %v15480_v25 = vunpack.c.l.b16 %v2353_v14  ;;  %v2098_v0 = vperm.slane %v1922_v27, 0  ;;  %v2099_v34 = vperm.slane %v1922_v27, 2  ;;  %v764_v13 = vpop.f32.mrf.mxu1  ;;  %v833_v14 = vpop.f32.mrf.mxu3 }
 0x21f   :  { %23215 = vst [vmem:[#allocation8_spill] sm:$0xff] %v15470_v50  ;;  %v1830_v53 = vadd.f32 %v14736_v42, %v1710_v43  ;;  %v2100_v22 = vperm.slane %v1923_v62, 0  ;;  %v1200_v4 = vrot.slane %v15432_v36, 2  ;;  %v1202_v24 = vrot.slane %v15435_v5, 4 }
 0x220   :  { %23216 = vst [vmem:[#allocation10_spill] sm:$0xff] %v15472_v45  ;;  %v2101_v7 = vperm.slane %v1923_v62, 2  ;;  %v1204_v58 = vrot.slane %v15438_v2, 6  ;;  %v10611_v32 = vrot.slane %v15429_v6, 9  ;;  %v2102_v28 = vperm.slane %v1924_v10, 0 }
 0x221   :  { %23217 = vst [vmem:[#allocation11_spill] sm:$0xff] %v15474_v41  ;;  %v2103_v27 = vperm.slane %v1924_v10, 2  ;;  %v2104_v41 = vperm.slane %v1925_v20, 0  ;;  %v2105_v43 = vperm.slane %v1925_v20, 2  ;;  %v2354_v45 = vpack.c.bf16 %v2098_v0, %v2098_v0  ;;  %v966_v20 = vpop.f32.mrf.mxu2 }
 0x222   :  { %23218 = vst [vmem:[#allocation101_spill] sm:$0xff] %v15476_v60  ;;  %v2355_v47 = vpack.c.bf16 %v2099_v34, %v2099_v34  ;;  %v1926_v36 = vmax.f32 %v1830_v53, 0.0  ;;  %v2356_v48 = vpack.c.bf16 %v2100_v22, %v2100_v22  ;;  %v10612_v29 = vrot.slane %v1200_v4, 9 }
 0x223   :  { %23219 = vst [vmem:[#allocation102_spill] sm:$0xff] %v15478_v17  ;;  %v10613_v62 = vrot.slane %v1202_v24, 9  ;;  %v2357_v46 = vpack.c.bf16 %v2101_v7, %v2101_v7  ;;  %v831_v2 = vadd.f32 %v830_v11, %v761_v26  ;;  %v10614_v31 = vrot.slane %v1204_v58, 9  ;;  %v897_v11 = vpop.f32.mrf.mxu0 }
 0x224   :  { %23220 = vst [vmem:[#allocation103_spill] sm:$0xff] %v15480_v25  ;;  %v1714_v9 = vmax.f32 %v15429_v6, %v10611_v32  ;;  %v2358_v3 = vpack.c.bf16 %v2102_v28, %v2102_v28  ;;  %v2359_v35 = vpack.c.bf16 %v2103_v27, %v2103_v27  ;;  %v2360_v10 = vpack.c.bf16 %v2104_v41, %v2104_v41 }
 0x225   :  { %v2361_v15 = vpack.c.bf16 %v2105_v43, %v2105_v43  ;;  %v15492_v25 = vunpack.c.l.b16 %v2354_v45  ;;  %v15494_v0 = vunpack.c.l.b16 %v2355_v47  ;;  %v2500_v34 = vperm.slane %v1926_v36, 0 }
 0x226   :  { %v2501_v53 = vperm.slane %v1926_v36, 2  ;;  %v15496_v5 = vunpack.c.l.b16 %v2356_v48  ;;  %v1715_v22 = vmax.f32 %v1200_v4, %v10612_v29  ;;  %v1716_v21 = vmax.f32 %v1202_v24, %v10613_v62  ;;  %v766_v24 = vpop.f32.mrf.mxu1  ;;  %v23230_v36 = vld [vmem:[#allocation12_spill] sm:$0xff] }
 0x227   :  { %23221 = vst [vmem:[#allocation104_spill] sm:$0xff] %v15492_v25  ;;  %v1207_v26 = vrot.slane %v15450_v52, 2  ;;  %v15499_v7 = vunpack.c.l.b16 %v2357_v46  ;;  %v1717_v6 = vmax.f32 %v1204_v58, %v10614_v31  ;;  %v1834_v28 = vadd.f32 %v14607_v16, %v1714_v9  ;;  %v835_v46 = vpop.f32.mrf.mxu3 }
 0x228   :  { %23222 = vst [vmem:[#allocation105_spill] sm:$0xff] %v15494_v0  ;;  %v967_v41 = vadd.f32 %v966_v20, %v897_v11  ;;  %v15502_v32 = vunpack.c.l.b16 %v2358_v3  ;;  %v15504_v45 = vunpack.c.l.b16 %v2359_v35  ;;  %v15506_v47 = vunpack.c.l.b16 %v2360_v10  ;;  %v23229_v35 = vld [vmem:[#allocation13_spill] sm:$0xff] }
 0x229   :  { %23223 = vst [vmem:[#allocation106_spill] sm:$0xff] %v15496_v5  ;;  %v834_v27 = vadd.f32 %v833_v14, %v764_v13  ;;  %v2532_v48 = vpack.c.bf16 %v2500_v34, %v2500_v34  ;;  %v2533_v43 = vpack.c.bf16 %v2501_v53, %v2501_v53  ;;  %v1209_v4 = vrot.slane %v15454_v1, 4  ;;  %v23231_v1 = vld [vmem:[#allocation15_spill] sm:$0xff] }
 0x22a   :  { %23224 = vst [vmem:[#allocation107_spill] sm:$0xff] %v15499_v7  ;;  %v10615_v52 = vrot.slane %v15447_v8, 9  ;;  %v15510_v29 = vunpack.c.l.b16 %v2361_v15  ;;  %v1835_v31 = vadd.f32 %v14620_v39, %v1715_v22  ;;  %v1836_v3 = vadd.f32 %v14623_v63, %v1716_v21 }
 0x22b   :  { %23225 = vst [vmem:[#allocation108_spill] sm:$0xff] %v15502_v32  ;;  %v10616_v9 = vrot.slane %v1207_v26, 9  ;;  %v15515_v58 = vmax.f32 %v23229_v35, %v831_v2  ;;  %v1837_v13 = vadd.f32 %v14739_v57, %v1717_v6  ;;  %v1930_v14 = vmax.f32 %v1834_v28, 0.0 }
 0x22c   :  { %23226 = vst [vmem:[#allocation109_spill] sm:$0xff] %v15504_v45  ;;  %v1020_v62 = vmax.f32 %v23230_v36, %v967_v41  ;;  %v15520_v10 = vmax.f32 %v23231_v1, %v834_v27  ;;  %v22732_v20 = vrot.slane %v15460_v49, 6  ;;  %v15523_v15 = vadd.f32 %v835_v46, %v766_v24 }
 0x22d   :  { %23227 = vst [vmem:[#allocation110_spill] sm:$0xff] %v15506_v47  ;;  %v23232_v34 = vrot.slane %v15362_v38, 6  ;;  %v15529_v53 = vunpack.c.l.b16 %v2532_v48  ;;  %v15531_v2 = vunpack.c.l.b16 %v2533_v43  ;;  %v10617_v22 = vrot.slane %v1209_v4, 9 }
 0x22e   :  { %23228 = vst [vmem:[#allocation111_spill] sm:$0xff] %v15510_v29  ;;  %v1718_v11 = vmax.f32 %v15447_v8, %v10615_v52  ;;  %v1931_v6 = vmax.f32 %v1835_v31, 0.0  ;;  %v1932_v28 = vmax.f32 %v1836_v3, 0.0  ;;  %v15534_v41 = vmax.f32 %v1207_v26, %v10616_v9 }
 0x22f   :  { %v2895_v21 = vsel %vm2833_vm6, %v23232_v34, %v15466_v54  ;;  %23233 = vst [vmem:[#allocation13_spill] sm:$0xff] %v15529_v53  ;;  %v2896_v27 = vrot.slane %v15382_v40, 5  ;;  %v1933_v24 = vmax.f32 %v1837_v13, 0.0  ;;  %v2106_v46 = vperm.slane %v1930_v14, 0 }
 0x230   :  { %23234 = vst [vmem:[#allocation12_spill] sm:$0xff] %v15531_v2  ;;  %v2107_v35 = vperm.slane %v1930_v14, 2  ;;  %v1101_v36 = vrot.slane %v1020_v62, 6  ;;  %v15539_v54 = vrot.slane %v22732_v20, 9  ;;  %v2898_v48 = vrot.slane %v15387_v12, 4 }
 0x231   :  { %v23235_v43 = vrot.slane %v15457_v30, 7  ;;  %v2922_v26 = vrot.slane %v15478_v17, 6  ;;  %v2108_v13 = vperm.slane %v1931_v6, 0  ;;  %v2109_v14 = vperm.slane %v1931_v6, 2  ;;  %v968_v6 = vpop.f32.mrf.mxu2 }
 0x232   :  { %v15549_v52 = vsel %vm1111_vm2, %v15441_v23, %v1101_v36  ;;  %v15553_v31 = vsel %vm1113_vm3, %v15441_v23, %v1101_v36  ;;  %v15557_v3 = vsel %vm1116_vm4, %v15441_v23, %v1101_v36  ;;  %v15561_v9 = vsel %vm320_vm0, %v1101_v36, %v15441_v23 }
 0x233   :  { %v2921_v8 = vsel %vm2830_vm5, %v23235_v43, %v15468_v61  ;;  %23236 = vst [vmem:[#allocation15_spill] sm:$0xff] %v15553_v31  ;;  %v15563_v62 = vmax.f32 %v1209_v4, %v10617_v22  ;;  %v2897_v1 = vsel %vm2836_vm7, %v2896_v27, %v2895_v21  ;;  %v2110_v34 = vperm.slane %v1932_v28, 0 }
 0x234   :  { %23237 = vst [vmem:[#allocation112_spill] sm:$0xff] %v15557_v3  ;;  %v2111_v43 = vperm.slane %v1932_v28, 2  ;;  %v2924_v20 = vrot.slane %v15492_v25, 5  ;;  %v2926_v31 = vrot.slane %v15496_v5, 4  ;;  %v2112_v17 = vperm.slane %v1933_v24, 0 }
 0x235   :  { %23238 = vst [vmem:[#allocation113_spill] sm:$0xff] %v15561_v9  ;;  %v15569_v30 = vadd.f32 %v14736_v42, %v1718_v11  ;;  %v2900_v3 = vrot.slane %v15391_v18, 3  ;;  %v2923_v23 = vsel %vm2833_vm6, %v2922_v26, %v2921_v8  ;;  %v2113_v36 = vperm.slane %v1933_v24, 2  ;;  %v899_v11 = vpop.f32.mrf.mxu0 }
 0x236   :  { %v2899_v4 = vsel %vm2839_vm8, %v2898_v48, %v2897_v1  ;;  %v2925_v22 = vsel %vm2836_vm7, %v2924_v20, %v2923_v23  ;;  %v2928_v21 = vrot.slane %v15502_v32, 3  ;;  %v2362_v28 = vpack.c.bf16 %v2106_v46, %v2106_v46 }
 0x237   :  { %v2363_v27 = vpack.c.bf16 %v2107_v35, %v2107_v35  ;;  %v2364_v9 = vpack.c.bf16 %v2108_v13, %v2108_v13  ;;  %v2365_v5 = vpack.c.bf16 %v2109_v14, %v2109_v14  ;;  %v2366_v25 = vpack.c.bf16 %v2110_v34, %v2110_v34 }
 0x238   :  { %v2367_v61 = vpack.c.bf16 %v2111_v43, %v2111_v43  ;;  %v2902_v12 = vrot.slane %v15395_v56, 2  ;;  %v2927_v18 = vsel %vm2839_vm8, %v2926_v31, %v2925_v22  ;;  %v2901_v24 = vsel %vm2842_vm9, %v2900_v3, %v2899_v4  ;;  %v23278_v56 = vld [vmem:[#allocation23_spill] sm:$0xff] }
 0x239   :  { %v2904_v48 = vrot.slane %v15400_v55, 1  ;;  %v2930_v20 = vrot.slane %v15506_v47, 2  ;;  %v2932_v8 = vrot.slane %v15529_v53, 1  ;;  %v2929_v46 = vsel %vm2842_vm9, %v2928_v21, %v2927_v18 }
 0x23a   :  { %v23239_v35 = vrot.slane %v15346_v51, 7  ;;  %v2908_v13 = vrot.slane %v15364_v19, 6  ;;  %v2910_v14 = vrot.slane %v15385_v59, 5  ;;  %v2368_v31 = vpack.c.bf16 %v2112_v17, %v2112_v17 }
 0x23b   :  { %v2369_v1 = vpack.c.bf16 %v2113_v36, %v2113_v36  ;;  %v15589_v3 = vunpack.c.l.b16 %v2362_v28  ;;  %v2912_v34 = vrot.slane %v15389_v44, 4  ;;  %v15592_v43 = vunpack.c.l.b16 %v2364_v9 }
 0x23c   :  { %v2907_v26 = vsel %vm2830_vm5, %v23239_v35, %v15353_v37  ;;  %v15594_v23 = vunpack.c.l.b16 %v2363_v27  ;;  %v2903_v18 = vsel %vm2845_vm10, %v2902_v12, %v2901_v24  ;;  %v2931_v4 = vsel %vm2845_vm10, %v2930_v20, %v2929_v46  ;;  %v23250_v46 = vld [vmem:[#allocation103_spill] sm:$0xff] }
 0x23d   :  { %23240 = vst [vmem:[#allocation114_spill] sm:$0xff] %v15589_v3  ;;  %v15598_v22 = vunpack.c.l.b16 %v2366_v25  ;;  %v2905_v21 = vsel %vm2848_vm11, %v2904_v48, %v2903_v18  ;;  %v2933_v35 = vsel %vm2848_vm11, %v2932_v8, %v2931_v4  ;;  %v2909_v17 = vsel %vm2833_vm6, %v2908_v13, %v2907_v26  ;;  %v971_v13 = vpop.f32.mrf.mxu2  ;;  %v23252_v4 = vld [vmem:[#allocation100_spill] sm:$0xff] }
 0x23e   :  { %23241 = vst [vmem:[#allocation115_spill] sm:$0xff] %v15594_v23  ;;  %v15603_v36 = vunpack.c.l.b16 %v2365_v5  ;;  %v15605_v28 = vpack.c.b16 %v2933_v35, %v2905_v21  ;;  %v2911_v9 = vsel %vm2836_vm7, %v2910_v14, %v2909_v17  ;;  %v2914_v27 = vrot.slane %v15393_v33, 3  ;;  %v902_v17 = vpop.f32.mrf.mxu0 }
 0x23f   :  { %23242 = vst [vmem:[#allocation116_spill] sm:$0xff] %v15598_v22  ;;  %v15609_v53 = vunpack.c.l.b16 %v2367_v61  ;;  %v15611_v12 = vunpack.c.l.b16 %v2368_v31  ;;  %v2913_v25 = vsel %vm2839_vm8, %v2912_v34, %v2911_v9  ;;  %v23247_v24 = vrot.slane %v15470_v50, 7  ;;  %v23251_v31 = vld [vmem:[#allocation37_spill] sm:$0xff] }
 0x240   :  { %23243 = vst [vmem:[#allocation117_spill] sm:$0xff] %v15603_v36  ;;  %v15618_v20 = vunpack.c.l.b16 %v2369_v1  ;;  %v23249_v5 = vrot.slane %v15460_v49, 6  ;;  %3248 = vmatmul.bf16.gmra.mxu1 %v15605_v28  ;;  %v2936_v61 = vrot.slane %v23250_v46, 6  ;;  %v2938_v26 = vrot.slane %v15494_v0, 5  ;;  %3306 = vmatmul.bf16.gmra.mxu0 %v15605_v28 }
 0x241   :  { %23244 = vst [vmem:[#allocation118_spill] sm:$0xff] %v15605_v28  ;;  %v2935_v48 = vsel %vm2830_vm5, %v23247_v24, %v15476_v60  ;;  %v1839_v34 = vadd.f32 %v23251_v31, %v15534_v41  ;;  %v2940_v1 = vrot.slane %v15499_v7, 4  ;;  %v2942_v18 = vrot.slane %v15504_v45, 3  ;;  %v23253_v41 = vld [vmem:[#allocation38_spill] sm:$0xff]  ;;  %v23254_v28 = vld [vmem:[#allocation95_spill] sm:$0xff] }
 0x242   :  { %23245 = vst [vmem:[#allocation119_spill] sm:$0xff] %v15609_v53  ;;  %v1721_v8 = vmax.f32 %v23249_v5, %v15539_v54  ;;  %v10619_v49 = vrot.slane %v15549_v52, 9  ;;  %v2915_v54 = vsel %vm2842_vm9, %v2914_v27, %v2913_v25  ;;  %v2918_v21 = vrot.slane %v23252_v4, 1  ;;  %v15643_v25 = vpop.f32.mrf.mxu1  ;;  %v15645_v4 = vpop.f32.mrf.mxu3 }
 0x243   :  { %23246 = vst [vmem:[#allocation120_spill] sm:$0xff] %v15611_v12  ;;  %v2937_v35 = vsel %vm2833_vm6, %v2936_v61, %v2935_v48  ;;  %v2946_v24 = vrot.slane %v15531_v2, 1  ;;  %v969_v5 = vadd.f32 %v968_v6, %v899_v11  ;;  %v972_v14 = vadd.f32 %v971_v13, %v902_v17  ;;  %v23255_v48 = vld [vmem:[#allocation45_spill] sm:$0xff]  ;;  %v23257_v11 = vld [vmem:[#allocation16_spill] sm:$0xff] }
 0x244   :  { %23248 = vst [vmem:[#allocation121_spill] sm:$0xff] %v15618_v20  ;;  %v2939_v9 = vsel %vm2836_vm7, %v2938_v26, %v2937_v35  ;;  %v1840_v55 = vadd.f32 %v23253_v41, %v15563_v62  ;;  %v2916_v23 = vrot.slane %v23254_v28, 2  ;;  %v2944_v27 = vrot.slane %v15510_v29, 2  ;;  %v23256_v35 = vld [vmem:[#allocation14_spill] sm:$0xff]  ;;  %v23259_v2 = vld [vmem:[#allocation33_spill] sm:$0xff] }
 0x245   :  { %v2941_v3 = vsel %vm2839_vm8, %v2940_v1, %v2939_v9  ;;  %v1841_v61 = vadd.f32 %v23255_v48, %v1721_v8  ;;  %v1022_v6 = vmax.f32 %v23256_v35, %v969_v5  ;;  %v1024_v13 = vmax.f32 %v23257_v11, %v972_v14  ;;  %v23258_v9 = vld [vmem:[#allocation34_spill] sm:$0xff] }
 0x246   :  { %v2943_v26 = vsel %vm2842_vm9, %v2942_v18, %v2941_v3  ;;  %v1722_v62 = vmax.f32 %v15549_v52, %v10619_v49  ;;  %v2917_v17 = vsel %vm2845_vm10, %v2916_v23, %v2915_v54  ;;  %v23260_v29 = vrot.slane %v23259_v2, 6  ;;  %v904_v11 = vpop.f32.mrf.mxu0 }
 0x247   :  { %v2945_v1 = vsel %vm2845_vm10, %v2944_v27, %v2943_v26  ;;  %v2919_v8 = vsel %vm2848_vm11, %v2918_v21, %v2917_v17  ;;  %v1102_v18 = vrot.slane %v1022_v6, 6  ;;  %v1103_v5 = vrot.slane %v1024_v13, 6 }
 0x248   :  { %v15658_v45 = vsel %vm2833_vm6, %v23260_v29, %v23258_v9  ;;  %v2947_v3 = vsel %vm2848_vm11, %v2946_v24, %v2945_v1  ;;  %v1934_v14 = vmax.f32 %v15569_v30, 0.0  ;;  %v1935_v35 = vmax.f32 %v1839_v34, 0.0 }
 0x249   :  { %23261 = vst [vmem:[#allocation14_spill] sm:$0xff] %v15658_v45  ;;  %v1936_v52 = vmax.f32 %v1840_v55, 0.0  ;;  %v15663_v49 = vpack.c.b16 %v2947_v3, %v2919_v8  ;;  %v1219_v23 = vsel %vm1111_vm2, %v15515_v58, %v1102_v18  ;;  %v1220_v2 = vsel %vm1113_vm3, %v15515_v58, %v1102_v18  ;;  %v973_v3 = vpop.f32.mrf.mxu2 }
 0x24a   :  { %v1222_v29 = vsel %vm1116_vm4, %v15515_v58, %v1102_v18  ;;  %v1224_v54 = vsel %vm320_vm0, %v1102_v18, %v15515_v58  ;;  %v1842_v21 = vadd.f32 %v14607_v16, %v1722_v62  ;;  %v1221_v55 = vrot.slane %v1220_v2, 2 }
 0x24b   :  { %23262 = vst [vmem:[#allocation16_spill] sm:$0xff] %v15663_v49  ;;  %10810 = vmatmul.msk.bf16.gmra.mxu3 %vm3222_vm12, %v15663_v49  ;;  %10814 = vmatmul.msk.bf16.gmra.mxu2 %vm3222_vm12, %v15663_v49  ;;  %v1223_v30 = vrot.slane %v1222_v29, 4  ;;  %v1225_v34 = vrot.slane %v1224_v54, 6  ;;  %v15680_v24 = vsel %vm1111_vm2, %v15520_v10, %v1103_v5  ;;  %v15684_v27 = vsel %vm1113_vm3, %v15520_v10, %v1103_v5  ;;  %v771_v49 = vpop.f32.mrf.mxu1 }
 0x24c   :  { %v15688_v58 = vsel %vm1116_vm4, %v15520_v10, %v1103_v5  ;;  %v15692_v26 = vsel %vm320_vm0, %v1103_v5, %v15520_v10  ;;  %v1937_v13 = vmax.f32 %v1841_v61, 0.0  ;;  %v2114_v1 = vperm.slane %v1934_v14, 0  ;;  %v840_v10 = vpop.f32.mrf.mxu3 }
 0x24d   :  { %v10625_v62 = vrot.slane %v1223_v30, 9  ;;  %v2115_v9 = vperm.slane %v1934_v14, 2  ;;  %v2116_v8 = vperm.slane %v1935_v35, 0  ;;  %v2117_v2 = vperm.slane %v1935_v35, 2  ;;  %v23263_v35 = vld [vmem:[#allocation17_spill] sm:$0xff] }
 0x24e   :  { %v1938_v29 = vmax.f32 %v1842_v21, 0.0  ;;  %v10623_v54 = vrot.slane %v1219_v23, 9  ;;  %v2118_v5 = vperm.slane %v1936_v52, 0  ;;  %v2119_v7 = vperm.slane %v1936_v52, 2 }
 0x24f   :  { %v10624_v6 = vrot.slane %v1221_v55, 9  ;;  %v10626_v0 = vrot.slane %v1225_v34, 9  ;;  %v2120_v61 = vperm.slane %v1937_v13, 0  ;;  %v2121_v46 = vperm.slane %v1937_v13, 2 }
 0x250   :  { %v1728_v50 = vmax.f32 %v1223_v30, %v10625_v62  ;;  %v974_v17 = vadd.f32 %v973_v3, %v904_v11  ;;  %v2370_v60 = vpack.c.bf16 %v2114_v1, %v2114_v1  ;;  %v2371_v28 = vpack.c.bf16 %v2115_v9, %v2115_v9  ;;  %v23264_v11 = vld [vmem:[#allocation18_spill] sm:$0xff] }
 0x251   :  { %v2372_v33 = vpack.c.bf16 %v2116_v8, %v2116_v8  ;;  %v2373_v18 = vpack.c.bf16 %v2117_v2, %v2117_v2  ;;  %v15701_v21 = vmax.f32 %v23263_v35, %v15523_v15  ;;  %v2502_v44 = vperm.slane %v1938_v29, 0 }
 0x252   :  { %v1726_v59 = vmax.f32 %v1219_v23, %v10623_v54  ;;  %v2374_v52 = vpack.c.bf16 %v2118_v5, %v2118_v5  ;;  %v2375_v19 = vpack.c.bf16 %v2119_v7, %v2119_v7  ;;  %v1727_v51 = vmax.f32 %v1221_v55, %v10624_v6 }
 0x253   :  { %v1729_v37 = vmax.f32 %v1225_v34, %v10626_v0  ;;  %v2376_v47 = vpack.c.bf16 %v2120_v61, %v2120_v61  ;;  %v2377_v13 = vpack.c.bf16 %v2121_v46, %v2121_v46  ;;  %v1848_v30 = vadd.f32 %v23253_v41, %v1728_v50  ;;  %v774_v6 = vpop.f32.mrf.mxu1 }
 0x254   :  { %v1026_v62 = vmax.f32 %v23264_v11, %v974_v17  ;;  %v15705_v1 = vunpack.c.l.b16 %v2370_v60  ;;  %v15707_v9 = vunpack.c.l.b16 %v2371_v28  ;;  %v15709_v8 = vunpack.c.l.b16 %v2372_v33  ;;  %v976_v28 = vpop.f32.mrf.mxu2  ;;  %v843_v17 = vpop.f32.mrf.mxu3 }
 0x255   :  { %v1228_v15 = vrot.slane %v15684_v27, 2  ;;  %v15712_v3 = vunpack.c.l.b16 %v2373_v18  ;;  %v2503_v23 = vperm.slane %v1938_v29, 2  ;;  %v2534_v7 = vpack.c.bf16 %v2502_v44, %v2502_v44  ;;  %v907_v29 = vpop.f32.mrf.mxu0 }
 0x256   :  { %23265 = vst [vmem:[#allocation34_spill] sm:$0xff] %v15705_v1  ;;  %v1846_v0 = vadd.f32 %v14736_v42, %v1726_v59  ;;  %v15715_v55 = vunpack.c.l.b16 %v2374_v52  ;;  %v15717_v46 = vunpack.c.l.b16 %v2375_v19  ;;  %v1847_v50 = vadd.f32 %v23251_v31, %v1727_v51 }
 0x257   :  { %23266 = vst [vmem:[#allocation33_spill] sm:$0xff] %v15707_v9  ;;  %v1849_v60 = vadd.f32 %v23255_v48, %v1729_v37  ;;  %v15721_v34 = vunpack.c.l.b16 %v2376_v47  ;;  %v15723_v33 = vunpack.c.l.b16 %v2377_v13  ;;  %v1944_v27 = vmax.f32 %v1848_v30, 0.0 }
 0x258   :  { %23267 = vst [vmem:[#allocation17_spill] sm:$0xff] %v15709_v8  ;;  %v1104_v18 = vrot.slane %v1026_v62, 6  ;;  %v1230_v44 = vrot.slane %v15688_v58, 4  ;;  %v1232_v59 = vrot.slane %v15692_v26, 6  ;;  %v10627_v19 = vrot.slane %v15680_v24, 9 }
 0x259   :  { %23268 = vst [vmem:[#allocation18_spill] sm:$0xff] %v15712_v3  ;;  %v10628_v2 = vrot.slane %v1228_v15, 9  ;;  %v2535_v51 = vpack.c.bf16 %v2503_v23, %v2503_v23  ;;  %v15728_v54 = vunpack.c.l.b16 %v2534_v7  ;;  %v839_v37 = vadd.f32 %v15645_v4, %v15643_v25  ;;  %v23276_v7 = vld [vmem:[#allocation19_spill] sm:$0xff] }
 0x25a   :  { %23269 = vst [vmem:[#allocation122_spill] sm:$0xff] %v15715_v55  ;;  %v1942_v47 = vmax.f32 %v1846_v0, 0.0  ;;  %v1943_v5 = vmax.f32 %v1847_v50, 0.0  ;;  %v1945_v61 = vmax.f32 %v1849_v60, 0.0  ;;  %v841_v35 = vadd.f32 %v840_v10, %v771_v49 }
 0x25b   :  { %23270 = vst [vmem:[#allocation123_spill] sm:$0xff] %v15717_v46  ;;  %v844_v52 = vadd.f32 %v843_v17, %v774_v6  ;;  %v2126_v13 = vperm.slane %v1944_v27, 0  ;;  %v2127_v30 = vperm.slane %v1944_v27, 2  ;;  %v15734_v58 = vsel %vm1111_vm2, %v15701_v21, %v1104_v18  ;;  %v23277_v6 = vld [vmem:[#allocation21_spill] sm:$0xff] }
 0x25c   :  { %23271 = vst [vmem:[#allocation124_spill] sm:$0xff] %v15721_v34  ;;  %v15738_v26 = vsel %vm1113_vm3, %v15701_v21, %v1104_v18  ;;  %v10629_v11 = vrot.slane %v1230_v44, 9  ;;  %v10630_v62 = vrot.slane %v1232_v59, 9  ;;  %v1730_v23 = vmax.f32 %v15680_v24, %v10627_v19 }
 0x25d   :  { %23272 = vst [vmem:[#allocation125_spill] sm:$0xff] %v15723_v33  ;;  %v1731_v4 = vmax.f32 %v1228_v15, %v10628_v2  ;;  %v15741_v25 = vunpack.c.l.b16 %v2535_v51  ;;  %v1027_v49 = vmax.f32 %v23276_v7, %v839_v37  ;;  %v2122_v10 = vperm.slane %v1942_v47, 0  ;;  %v978_v51 = vpop.f32.mrf.mxu2  ;;  %v23283_v7 = vld [vmem:[#allocation20_spill] sm:$0xff] }
 0x25e   :  { %23273 = vst [vmem:[#allocation126_spill] sm:$0xff] %v15728_v54  ;;  %v2123_v0 = vperm.slane %v1942_v47, 2  ;;  %v2124_v50 = vperm.slane %v1943_v5, 0  ;;  %v2125_v60 = vperm.slane %v1943_v5, 2  ;;  %v2128_v27 = vperm.slane %v1945_v61, 0 }
 0x25f   :  { %23274 = vst [vmem:[#allocation127_spill] sm:$0xff] %v15738_v26  ;;  %v15745_v17 = vmax.f32 %v23277_v6, %v841_v35  ;;  %v2129_v14 = vperm.slane %v1945_v61, 2  ;;  %v2382_v32 = vpack.c.bf16 %v2126_v13, %v2126_v13  ;;  %v2383_v26 = vpack.c.bf16 %v2127_v30, %v2127_v30 }
 0x260   :  { %23275 = vst [vmem:[#allocation128_spill] sm:$0xff] %v15741_v25  ;;  %v15748_v40 = vmax.f32 %v23278_v56, %v844_v52  ;;  %v1732_v24 = vmax.f32 %v1230_v44, %v10629_v11  ;;  %v1733_v15 = vmax.f32 %v1232_v59, %v10630_v62  ;;  %v1850_v19 = vadd.f32 %v14607_v16, %v1730_v23  ;;  %v909_v59 = vpop.f32.mrf.mxu0 }
 0x261   :  { %v1851_v2 = vadd.f32 %v14620_v39, %v1731_v4  ;;  %v2378_v37 = vpack.c.bf16 %v2122_v10, %v2122_v10  ;;  %v2379_v47 = vpack.c.bf16 %v2123_v0, %v2123_v0  ;;  %v15754_v5 = vsel %vm1116_vm4, %v15701_v21, %v1104_v18 }
 0x262   :  { %23279 = vst [vmem:[#allocation19_spill] sm:$0xff] %v15754_v5  ;;  %v15758_v61 = vsel %vm320_vm0, %v1104_v18, %v15701_v21  ;;  %v2380_v35 = vpack.c.bf16 %v2124_v50, %v2124_v50  ;;  %v2381_v56 = vpack.c.bf16 %v2125_v60, %v2125_v60  ;;  %v2384_v52 = vpack.c.bf16 %v2128_v27, %v2128_v27 }
 0x263   :  { %23280 = vst [vmem:[#allocation21_spill] sm:$0xff] %v15758_v61  ;;  %v977_v44 = vadd.f32 %v976_v28, %v907_v29  ;;  %v2385_v13 = vpack.c.bf16 %v2129_v14, %v2129_v14  ;;  %v15760_v30 = vunpack.c.l.b16 %v2382_v32  ;;  %v15762_v11 = vunpack.c.l.b16 %v2383_v26  ;;  %v23287_v29 = vld [vmem:[#allocation22_spill] sm:$0xff] }
 0x264   :  { %v979_v62 = vadd.f32 %v978_v51, %v909_v59  ;;  %v1852_v23 = vadd.f32 %v14623_v63, %v1732_v24  ;;  %v1853_v4 = vadd.f32 %v14739_v57, %v1733_v15  ;;  %v15768_v18 = vunpack.c.l.b16 %v2378_v37 }
 0x265   :  { %23281 = vst [vmem:[#allocation23_spill] sm:$0xff] %v15760_v30  ;;  %v1028_v10 = vmax.f32 %v23283_v7, %v977_v44  ;;  %v15770_v50 = vunpack.c.l.b16 %v2379_v47  ;;  %v1946_v28 = vmax.f32 %v1850_v19, 0.0  ;;  %v15773_v32 = vunpack.c.l.b16 %v2380_v35 }
 0x266   :  { %23282 = vst [vmem:[#allocation129_spill] sm:$0xff] %v15762_v11  ;;  %v1030_v14 = vmax.f32 %v23287_v29, %v979_v62  ;;  %v15775_v26 = vunpack.c.l.b16 %v2381_v56  ;;  %v15777_v60 = vunpack.c.l.b16 %v2384_v52  ;;  %v15779_v6 = vunpack.c.l.b16 %v2385_v13  ;;  %v776_v52 = vpop.f32.mrf.mxu1  ;;  %v845_v62 = vpop.f32.mrf.mxu3 }
 0x267   :  { %23285 = vst [vmem:[#allocation20_spill] sm:$0xff] %v15768_v18  ;;  %v1105_v27 = vrot.slane %v1028_v10, 6  ;;  %v1947_v51 = vmax.f32 %v1851_v2, 0.0  ;;  %v10631_v37 = vrot.slane %v15734_v58, 9  ;;  %v1948_v44 = vmax.f32 %v1852_v23, 0.0 }
 0x268   :  { %23286 = vst [vmem:[#allocation130_spill] sm:$0xff] %v15770_v50  ;;  %v1106_v35 = vrot.slane %v1030_v14, 6  ;;  %v1949_v56 = vmax.f32 %v1853_v4, 0.0  ;;  %v2130_v59 = vperm.slane %v1946_v28, 0  ;;  %v2131_v13 = vperm.slane %v1946_v28, 2 }
 0x269   :  { %23288 = vst [vmem:[#allocation22_spill] sm:$0xff] %v15773_v32  ;;  %v1240_v19 = vsel %vm1111_vm2, %v1027_v49, %v1105_v27  ;;  %v1241_v47 = vsel %vm1113_vm3, %v1027_v49, %v1105_v27  ;;  %v1243_v10 = vsel %vm1116_vm4, %v1027_v49, %v1105_v27  ;;  %v1245_v29 = vsel %vm320_vm0, %v1105_v27, %v1027_v49 }
 0x26a   :  { %23289 = vst [vmem:[#allocation131_spill] sm:$0xff] %v15775_v26  ;;  %v1242_v7 = vrot.slane %v1241_v47, 2  ;;  %v10635_v21 = vrot.slane %v1240_v19, 9  ;;  %v2132_v2 = vperm.slane %v1947_v51, 0  ;;  %v2133_v15 = vperm.slane %v1947_v51, 2 }
 0x26b   :  { %23290 = vst [vmem:[#allocation132_spill] sm:$0xff] %v15777_v60  ;;  %v1244_v24 = vrot.slane %v1243_v10, 4  ;;  %v1246_v61 = vrot.slane %v1245_v29, 6  ;;  %v1734_v5 = vmax.f32 %v15734_v58, %v10631_v37  ;;  %v15791_v23 = vsel %vm1111_vm2, %v15745_v17, %v1106_v35 }
 0x26c   :  { %23291 = vst [vmem:[#allocation133_spill] sm:$0xff] %v15779_v6  ;;  %v10636_v50 = vrot.slane %v1242_v7, 9  ;;  %v15795_v4 = vsel %vm1113_vm3, %v15745_v17, %v1106_v35  ;;  %v2134_v28 = vperm.slane %v1948_v44, 0  ;;  %v1738_v49 = vmax.f32 %v1240_v19, %v10635_v21 }
 0x26d   :  { %v10637_v14 = vrot.slane %v1244_v24, 9  ;;  %v10638_v47 = vrot.slane %v1246_v61, 9  ;;  %v2135_v27 = vperm.slane %v1948_v44, 2  ;;  %v2136_v18 = vperm.slane %v1949_v56, 0 }
 0x26e   :  { %v1739_v51 = vmax.f32 %v1242_v7, %v10636_v50  ;;  %v15799_v10 = vsel %vm1116_vm4, %v15745_v17, %v1106_v35  ;;  %v2137_v58 = vperm.slane %v1949_v56, 2  ;;  %v15803_v38 = vsel %vm320_vm0, %v1106_v35, %v15745_v17 }
 0x26f   :  { %v1740_v37 = vmax.f32 %v1244_v24, %v10637_v14  ;;  %v1741_v29 = vmax.f32 %v1246_v61, %v10638_v47  ;;  %v2386_v0 = vpack.c.bf16 %v2130_v59, %v2130_v59  ;;  %v2387_v45 = vpack.c.bf16 %v2131_v13, %v2131_v13  ;;  %v848_v14 = vpop.f32.mrf.mxu3 }
 0x270   :  { %v1854_v33 = vadd.f32 %v14736_v42, %v1734_v5  ;;  %v1859_v21 = vadd.f32 %v14620_v39, %v1739_v51  ;;  %v2388_v19 = vpack.c.bf16 %v2132_v2, %v2132_v2  ;;  %v2389_v44 = vpack.c.bf16 %v2133_v15, %v2133_v15  ;;  %v779_v5 = vpop.f32.mrf.mxu1 }
 0x271   :  { %v2390_v50 = vpack.c.bf16 %v2134_v28, %v2134_v28  ;;  %v1858_v7 = vadd.f32 %v14607_v16, %v1738_v49  ;;  %v2391_v56 = vpack.c.bf16 %v2135_v27, %v2135_v27  ;;  %v2392_v24 = vpack.c.bf16 %v2136_v18, %v2136_v18 }
 0x272   :  { %v1860_v61 = vadd.f32 %v14623_v63, %v1740_v37  ;;  %v2393_v35 = vpack.c.bf16 %v2137_v58, %v2137_v58  ;;  %v1861_v59 = vadd.f32 %v14739_v57, %v1741_v29  ;;  %v1955_v13 = vmax.f32 %v1859_v21, 0.0 }
 0x273   :  { %v15812_v47 = vunpack.c.l.b16 %v2386_v0  ;;  %v15814_v15 = vunpack.c.l.b16 %v2387_v45  ;;  %v1950_v2 = vmax.f32 %v1854_v33, 0.0  ;;  %v846_v28 = vadd.f32 %v845_v62, %v776_v52  ;;  %v981_v0 = vpop.f32.mrf.mxu2 }
 0x274   :  { %v15816_v49 = vunpack.c.l.b16 %v2388_v19  ;;  %v15818_v27 = vunpack.c.l.b16 %v2389_v44  ;;  %v15820_v18 = vunpack.c.l.b16 %v2390_v50  ;;  %v1954_v51 = vmax.f32 %v1858_v7, 0.0  ;;  %v23300_v19 = vld [vmem:[#allocation25_spill] sm:$0xff] }
 0x275   :  { %23292 = vst [vmem:[#allocation134_spill] sm:$0xff] %v15812_v47  ;;  %v15822_v37 = vunpack.c.l.b16 %v2391_v56  ;;  %v15824_v58 = vunpack.c.l.b16 %v2392_v24  ;;  %v1956_v29 = vmax.f32 %v1860_v61, 0.0  ;;  %v1249_v21 = vrot.slane %v15795_v4, 2  ;;  %v912_v56 = vpop.f32.mrf.mxu0 }
 0x276   :  { %23293 = vst [vmem:[#allocation135_spill] sm:$0xff] %v15814_v15  ;;  %v15827_v17 = vunpack.c.l.b16 %v2393_v35  ;;  %v1957_v45 = vmax.f32 %v1861_v59, 0.0  ;;  %v2140_v33 = vperm.slane %v1955_v13, 0  ;;  %v849_v52 = vadd.f32 %v848_v14, %v779_v5 }
 0x277   :  { %23294 = vst [vmem:[#allocation136_spill] sm:$0xff] %v15816_v49  ;;  %v2504_v62 = vperm.slane %v1950_v2, 0  ;;  %v15830_v44 = vmax.f32 %v23300_v19, %v846_v28  ;;  %v1251_v50 = vrot.slane %v15799_v10, 4  ;;  %v1253_v7 = vrot.slane %v15803_v38, 6  ;;  %v23302_v19 = vld [vmem:[#allocation27_spill] sm:$0xff] }
 0x278   :  { %23295 = vst [vmem:[#allocation137_spill] sm:$0xff] %v15818_v27  ;;  %v2505_v24 = vperm.slane %v1950_v2, 2  ;;  %v2138_v25 = vperm.slane %v1954_v51, 0  ;;  %v2139_v61 = vperm.slane %v1954_v51, 2  ;;  %v982_v57 = vadd.f32 %v981_v0, %v912_v56  ;;  %v781_v51 = vpop.f32.mrf.mxu1  ;;  %v850_v0 = vpop.f32.mrf.mxu3 }
 0x279   :  { %23296 = vst [vmem:[#allocation138_spill] sm:$0xff] %v15820_v18  ;;  %v2141_v4 = vperm.slane %v1955_v13, 2  ;;  %v2142_v63 = vperm.slane %v1956_v29, 0  ;;  %v10639_v35 = vrot.slane %v15791_v23, 9  ;;  %v10640_v59 = vrot.slane %v1249_v21, 9  ;;  %v23304_v13 = vld [vmem:[#allocation24_spill] sm:$0xff] }
 0x27a   :  { %23297 = vst [vmem:[#allocation139_spill] sm:$0xff] %v15822_v37  ;;  %v2143_v39 = vperm.slane %v1956_v29, 2  ;;  %v2144_v5 = vperm.slane %v1957_v45, 0  ;;  %v2145_v14 = vperm.slane %v1957_v45, 2  ;;  %v2536_v28 = vpack.c.bf16 %v2504_v62, %v2504_v62 }
 0x27b   :  { %23298 = vst [vmem:[#allocation140_spill] sm:$0xff] %v15824_v58  ;;  %v10641_v10 = vrot.slane %v1251_v50, 9  ;;  %v10642_v38 = vrot.slane %v1253_v7, 9  ;;  %v2537_v37 = vpack.c.bf16 %v2505_v24, %v2505_v24  ;;  %v2394_v2 = vpack.c.bf16 %v2138_v25, %v2138_v25 }
 0x27c   :  { %23299 = vst [vmem:[#allocation141_spill] sm:$0xff] %v15827_v17  ;;  %v2396_v17 = vpack.c.bf16 %v2140_v33, %v2140_v33  ;;  %v2395_v27 = vpack.c.bf16 %v2139_v61, %v2139_v61  ;;  %v1032_v56 = vmax.f32 %v23304_v13, %v982_v57  ;;  %v2397_v15 = vpack.c.bf16 %v2141_v4, %v2141_v4 }
 0x27d   :  { %23301 = vst [vmem:[#allocation25_spill] sm:$0xff] %v15830_v44  ;;  %v15836_v44 = vmax.f32 %v23302_v19, %v849_v52  ;;  %v2398_v6 = vpack.c.bf16 %v2142_v63, %v2142_v63  ;;  %v1742_v29 = vmax.f32 %v15791_v23, %v10639_v35  ;;  %v1743_v11 = vmax.f32 %v1249_v21, %v10640_v59 }
 0x27e   :  { %v2399_v45 = vpack.c.bf16 %v2143_v39, %v2143_v39  ;;  %v2400_v33 = vpack.c.bf16 %v2144_v5, %v2144_v5  ;;  %v2401_v62 = vpack.c.bf16 %v2145_v14, %v2145_v14  ;;  %v15840_v26 = vunpack.c.l.b16 %v2396_v17 }
 0x27f   :  { %23303 = vst [vmem:[#allocation27_spill] sm:$0xff] %v15836_v44  ;;  %v15842_v52 = vunpack.c.l.b16 %v2536_v28  ;;  %v1744_v19 = vmax.f32 %v1251_v50, %v10641_v10  ;;  %v1745_v24 = vmax.f32 %v1253_v7, %v10642_v38  ;;  %v851_v25 = vadd.f32 %v850_v0, %v781_v51 }
 0x280   :  { %v15844_v61 = vunpack.c.l.b16 %v2537_v37  ;;  %v15846_v44 = vunpack.c.l.b16 %v2394_v2  ;;  %v15848_v57 = vunpack.c.l.b16 %v2395_v27  ;;  %v1107_v63 = vrot.slane %v1032_v56, 6 }
 0x281   :  { %23305 = vst [vmem:[#allocation24_spill] sm:$0xff] %v15842_v52  ;;  %v15850_v4 = vunpack.c.l.b16 %v2397_v15  ;;  %v15852_v23 = vunpack.c.l.b16 %v2398_v6  ;;  %v1862_v39 = vadd.f32 %v14736_v42, %v1742_v29  ;;  %v1863_v17 = vadd.f32 %v23251_v31, %v1743_v11 }
 0x282   :  { %23306 = vst [vmem:[#allocation142_spill] sm:$0xff] %v15844_v61  ;;  %v15856_v21 = vunpack.c.l.b16 %v2399_v45  ;;  %v15858_v50 = vunpack.c.l.b16 %v2400_v33  ;;  %v15860_v7 = vunpack.c.l.b16 %v2401_v62  ;;  %v1864_v27 = vadd.f32 %v23253_v41, %v1744_v19  ;;  %v23317_v33 = vld [vmem:[#allocation29_spill] sm:$0xff] }
 0x283   :  { %23307 = vst [vmem:[#allocation143_spill] sm:$0xff] %v15846_v44  ;;  %v1865_v35 = vadd.f32 %v23255_v48, %v1745_v24  ;;  %v23313_v6 = vrot.slane %v15598_v22, 7  ;;  %v2950_v59 = vrot.slane %v15611_v12, 6  ;;  %v1254_v11 = vsel %vm1111_vm2, %v15748_v40, %v1107_v63 }
 0x284   :  { %23308 = vst [vmem:[#allocation144_spill] sm:$0xff] %v15848_v57  ;;  %v15874_v5 = vsel %vm1113_vm3, %v15748_v40, %v1107_v63  ;;  %v15878_v14 = vsel %vm1116_vm4, %v15748_v40, %v1107_v63  ;;  %v15882_v28 = vsel %vm320_vm0, %v1107_v63, %v15748_v40  ;;  %v1958_v2 = vmax.f32 %v1862_v39, 0.0 }
 0x285   :  { %23309 = vst [vmem:[#allocation145_spill] sm:$0xff] %v15852_v23  ;;  %v2949_v15 = vsel %vm2830_vm5, %v23313_v6, %v15592_v43  ;;  %v1959_v51 = vmax.f32 %v1863_v17, 0.0  ;;  %v2952_v29 = vrot.slane %v15705_v1, 5  ;;  %v1960_v45 = vmax.f32 %v1864_v27, 0.0 }
 0x286   :  { %23310 = vst [vmem:[#allocation146_spill] sm:$0xff] %v15856_v21  ;;  %v15891_v62 = vmax.f32 %v23317_v33, %v851_v25  ;;  %v2951_v40 = vsel %vm2833_vm6, %v2950_v59, %v2949_v15  ;;  %v2954_v19 = vrot.slane %v15709_v8, 4  ;;  %v1961_v24 = vmax.f32 %v1865_v35, 0.0 }
 0x287   :  { %23311 = vst [vmem:[#allocation147_spill] sm:$0xff] %v15858_v50  ;;  %v2953_v63 = vsel %vm2836_vm7, %v2952_v29, %v2951_v40  ;;  %v23318_v39 = vrot.slane %v15760_v30, 7  ;;  %v2978_v6 = vrot.slane %v15777_v60, 6  ;;  %v2146_v56 = vperm.slane %v1958_v2, 0  ;;  %v983_v29 = vpop.f32.mrf.mxu2  ;;  %v10933_v60 = vld [vmem:[%s22653_s4 + $0xe8] sm:$0xf0] }
 0x288   :  { %23312 = vst [vmem:[#allocation148_spill] sm:$0xff] %v15860_v7  ;;  %v15901_v38 = vperm.slane %v1958_v2, 2  ;;  %v15903_v27 = vperm.slane %v1959_v51, 0  ;;  %v10643_v25 = vrot.slane %v1254_v11, 9  ;;  %v15905_v33 = vperm.slane %v1959_v51, 2  ;;  %v914_v51 = vpop.f32.mrf.mxu0 }
 0x289   :  { %23314 = vst [vmem:[#allocation149_spill] sm:$0xff] %v15874_v5  ;;  %v2977_v17 = vsel %vm2830_vm5, %v23318_v39, %v15773_v32  ;;  %v2956_v15 = vrot.slane %v15715_v55, 3  ;;  %v2980_v35 = vrot.slane %v15812_v47, 5  ;;  %v2982_v59 = vrot.slane %v15816_v49, 4 }
 0x28a   :  { %23315 = vst [vmem:[#allocation150_spill] sm:$0xff] %v15878_v14  ;;  %v15910_v40 = vperm.slane %v1960_v45, 0  ;;  %v15912_v39 = vperm.slane %v1960_v45, 2  ;;  %v2955_v13 = vsel %vm2839_vm8, %v2954_v19, %v2953_v63  ;;  %v2979_v2 = vsel %vm2833_vm6, %v2978_v6, %v2977_v17 }
 0x28b   :  { %23316 = vst [vmem:[#allocation151_spill] sm:$0xff] %v15882_v28  ;;  %v15916_v37 = vperm.slane %v1961_v24, 0  ;;  %v15918_v0 = vperm.slane %v1961_v24, 2  ;;  %v2981_v10 = vsel %vm2836_vm7, %v2980_v35, %v2979_v2  ;;  %v2984_v28 = vrot.slane %v15820_v18, 3 }
 0x28c   :  { %v2402_v14 = vpack.c.bf16 %v2146_v56, %v2146_v56  ;;  %v2403_v5 = vpack.c.bf16 %v15901_v38, %v15901_v38  ;;  %v2404_v45 = vpack.c.bf16 %v15903_v27, %v15903_v27  ;;  %v1746_v57 = vmax.f32 %v1254_v11, %v10643_v25 }
 0x28d   :  { %v2957_v19 = vsel %vm2842_vm9, %v2956_v15, %v2955_v13  ;;  %v2960_v63 = vrot.slane %v15728_v54, 1  ;;  %v2983_v24 = vsel %vm2839_vm8, %v2982_v59, %v2981_v10  ;;  %v2988_v17 = vrot.slane %v15842_v52, 1  ;;  %v23322_v54 = vld [vmem:[#allocation129_spill] sm:$0xff] }
 0x28e   :  { %v2958_v38 = vrot.slane %v15721_v34, 2  ;;  %v2986_v35 = vrot.slane %v15824_v58, 2  ;;  %v2985_v13 = vsel %vm2842_vm9, %v2984_v28, %v2983_v24  ;;  %v23319_v10 = vrot.slane %v15609_v53, 7 }
 0x28f   :  { %v2964_v25 = vrot.slane %v15618_v20, 6  ;;  %v2966_v2 = vrot.slane %v15707_v9, 5  ;;  %v2968_v56 = vrot.slane %v15712_v3, 4  ;;  %v1866_v6 = vadd.f32 %v14607_v16, %v1746_v57  ;;  %v23330_v3 = vld [vmem:[#allocation125_spill] sm:$0xff] }
 0x290   :  { %v2963_v27 = vsel %vm2830_vm5, %v23319_v10, %v15603_v36  ;;  %v2959_v15 = vsel %vm2845_vm10, %v2958_v38, %v2957_v19  ;;  %v2987_v59 = vsel %vm2845_vm10, %v2986_v35, %v2985_v13  ;;  %v2970_v38 = vrot.slane %v15717_v46, 3  ;;  %v23321_v13 = vld [vmem:[#allocation131_spill] sm:$0xff]  ;;  %v23331_v9 = vld [vmem:[#allocation141_spill] sm:$0xff] }
 0x291   :  { %v2961_v11 = vsel %vm2848_vm11, %v2960_v63, %v2959_v15  ;;  %v2989_v28 = vsel %vm2848_vm11, %v2988_v17, %v2987_v59  ;;  %v2965_v24 = vsel %vm2833_vm6, %v2964_v25, %v2963_v27  ;;  %v23323_v57 = vrot.slane %v23322_v54, 7  ;;  %v23324_v15 = vld [vmem:[#allocation133_spill] sm:$0xff]  ;;  %v23325_v59 = vld [vmem:[#allocation135_spill] sm:$0xff]  ;;  %v986_v25 = vpop.f32.mrf.mxu2  ;;  %v917_v54 = vpop.f32.mrf.mxu0 }
 0x292   :  { %v15954_v52 = vpack.c.b16 %v2989_v28, %v2961_v11  ;;  %v2967_v19 = vsel %vm2836_vm7, %v2966_v2, %v2965_v24  ;;  %v2992_v17 = vrot.slane %v23324_v15, 6  ;;  %v2994_v27 = vrot.slane %v23325_v59, 5  ;;  %v23327_v2 = vld [vmem:[#allocation137_spill] sm:$0xff] }
 0x293   :  { %v2969_v35 = vsel %vm2839_vm8, %v2968_v56, %v2967_v19  ;;  %v2991_v63 = vsel %vm2830_vm5, %v23323_v57, %v23321_v13  ;;  %v15967_v28 = vunpack.c.l.b16 %v2402_v14  ;;  %v2996_v24 = vrot.slane %v23327_v2, 4  ;;  %v23328_v56 = vld [vmem:[#allocation139_spill] sm:$0xff]  ;;  %v23329_v57 = vld [vmem:[#allocation128_spill] sm:$0xff] }
 0x294   :  { %23320 = vst [vmem:[#allocation29_spill] sm:$0xff] %v15954_v52  ;;  %3253 = vmatmul.bf16.gmra.mxu1 %v15954_v52  ;;  %v2998_v19 = vrot.slane %v23328_v56, 3  ;;  %3311 = vmatmul.bf16.gmra.mxu0 %v15954_v52  ;;  %v1962_v10 = vmax.f32 %v1866_v6, 0.0  ;;  %v2974_v44 = vrot.slane %v23329_v57, 1  ;;  %v2993_v15 = vsel %vm2833_vm6, %v2992_v17, %v2991_v63  ;;  %v23332_v6 = vld [vmem:[#allocation26_spill] sm:$0xff] }
 0x295   :  { %23326 = vst [vmem:[#allocation152_spill] sm:$0xff] %v15967_v28  ;;  %v984_v59 = vadd.f32 %v983_v29, %v914_v51  ;;  %v2971_v13 = vsel %vm2842_vm9, %v2970_v38, %v2969_v35  ;;  %v2995_v14 = vsel %vm2836_vm7, %v2994_v27, %v2993_v15  ;;  %v3002_v11 = vrot.slane %v15844_v61, 1  ;;  %v23335_v51 = vld [vmem:[#allocation28_spill] sm:$0xff] }
 0x296   :  { %v987_v46 = vadd.f32 %v986_v25, %v917_v54  ;;  %v2972_v2 = vrot.slane %v23330_v3, 2  ;;  %v2997_v56 = vsel %vm2839_vm8, %v2996_v24, %v2995_v14  ;;  %v3000_v52 = vrot.slane %v23331_v9, 2 }
 0x297   :  { %v1034_v20 = vmax.f32 %v23332_v6, %v984_v59  ;;  %v15982_v57 = vunpack.c.l.b16 %v2403_v5  ;;  %v15984_v63 = vunpack.c.l.b16 %v2404_v45  ;;  %v2999_v29 = vsel %vm2842_vm9, %v2998_v19, %v2997_v56  ;;  %v23337_v45 = vld [vmem:[#allocation25_spill] sm:$0xff] }
 0x298   :  { %v1036_v38 = vmax.f32 %v23335_v51, %v987_v46  ;;  %v2506_v35 = vperm.slane %v1962_v10, 0  ;;  %v2973_v15 = vsel %vm2845_vm10, %v2972_v2, %v2971_v13  ;;  %v3001_v54 = vsel %vm2845_vm10, %v3000_v52, %v2999_v29 }
 0x299   :  { %23333 = vst [vmem:[#allocation26_spill] sm:$0xff] %v15982_v57  ;;  %v1108_v17 = vrot.slane %v1034_v20, 6  ;;  %v2507_v27 = vperm.slane %v1962_v10, 2  ;;  %v2975_v25 = vsel %vm2848_vm11, %v2974_v44, %v2973_v15  ;;  %v3003_v24 = vsel %vm2848_vm11, %v3002_v11, %v3001_v54  ;;  %v23338_v11 = vld [vmem:[#allocation27_spill] sm:$0xff] }
 0x29a   :  { %23334 = vst [vmem:[#allocation153_spill] sm:$0xff] %v15984_v63  ;;  %v1109_v59 = vrot.slane %v1036_v38, 6  ;;  %v15992_v5 = vpack.c.b16 %v3003_v24, %v2975_v25  ;;  %v2538_v3 = vpack.c.bf16 %v2506_v35, %v2506_v35  ;;  %v23343_v35 = vpack.c.bf16 %v15912_v39, %v15912_v39 }
 0x29b   :  { %v1261_v14 = vsel %vm1111_vm2, %v23337_v45, %v1108_v17  ;;  %v1262_v46 = vsel %vm1113_vm3, %v23337_v45, %v1108_v17  ;;  %v1264_v13 = vsel %vm1116_vm4, %v23337_v45, %v1108_v17  ;;  %v1266_v20 = vsel %vm320_vm0, %v1108_v17, %v23337_v45  ;;  %v988_v45 = vpop.f32.mrf.mxu2 }
 0x29c   :  { %23336 = vst [vmem:[#allocation28_spill] sm:$0xff] %v15992_v5  ;;  %v1263_v2 = vrot.slane %v1262_v46, 2  ;;  %v1265_v52 = vrot.slane %v1264_v13, 4  ;;  %v10647_v44 = vrot.slane %v1261_v14, 9  ;;  %10811 = vmatmul.msk.bf16.gmra.mxu3 %vm3222_vm12, %v15992_v5  ;;  %10815 = vmatmul.msk.bf16.gmra.mxu2 %vm3222_vm12, %v15992_v5  ;;  %v1267_v10 = vrot.slane %v1266_v20, 6 }
 0x29d   :  { %v1268_v56 = vsel %vm1111_vm2, %v23338_v11, %v1109_v59  ;;  %v1269_v19 = vsel %vm1113_vm3, %v23338_v11, %v1109_v59  ;;  %v1271_v6 = vsel %vm1116_vm4, %v23338_v11, %v1109_v59  ;;  %v1273_v25 = vsel %vm320_vm0, %v1109_v59, %v23338_v11 }
 0x29e   :  { %v10648_v29 = vrot.slane %v1263_v2, 9  ;;  %v10649_v51 = vrot.slane %v1265_v52, 9  ;;  %v1750_v38 = vmax.f32 %v1261_v14, %v10647_v44  ;;  %v1270_v15 = vrot.slane %v1269_v19, 2  ;;  %v919_v19 = vpop.f32.mrf.mxu0 }
 0x29f   :  { %v10650_v54 = vrot.slane %v1267_v10, 9  ;;  %v1272_v17 = vrot.slane %v1271_v6, 4  ;;  %v10651_v24 = vrot.slane %v1268_v56, 9  ;;  %v1274_v61 = vrot.slane %v1273_v25, 6 }
 0x2a0   :  { %v1751_v46 = vmax.f32 %v1263_v2, %v10648_v29  ;;  %v1752_v13 = vmax.f32 %v1265_v52, %v10649_v51  ;;  %v1870_v20 = vadd.f32 %v14736_v42, %v1750_v38  ;;  %v23339_v5 = vpack.c.bf16 %v15905_v33, %v15905_v33 }
 0x2a1   :  { %v1753_v14 = vmax.f32 %v1267_v10, %v10650_v54  ;;  %v10652_v44 = vrot.slane %v1270_v15, 9  ;;  %v10653_v11 = vrot.slane %v1272_v17, 9  ;;  %v989_v53 = vadd.f32 %v988_v45, %v919_v19  ;;  %v23350_v19 = vld [vmem:[#allocation30_spill] sm:$0xff] }
 0x2a2   :  { %v16018_v9 = vunpack.c.l.b16 %v23339_v5  ;;  %v1871_v6 = vadd.f32 %v23251_v31, %v1751_v46  ;;  %v1872_v59 = vadd.f32 %v23253_v41, %v1752_v13  ;;  %v23341_v2 = vpack.c.bf16 %v15910_v40, %v15910_v40 }
 0x2a3   :  { %v2539_v29 = vpack.c.bf16 %v2507_v27, %v2507_v27  ;;  %v1873_v33 = vadd.f32 %v23255_v48, %v1753_v14  ;;  %v10654_v5 = vrot.slane %v1274_v61, 9  ;;  %v16031_v10 = vunpack.c.l.b16 %v23343_v35  ;;  %v23354_v48 = vld [vmem:[#allocation43_spill] sm:$0xff] }
 0x2a4   :  { %23340 = vst [vmem:[#allocation25_spill] sm:$0xff] %v16018_v9  ;;  %v16025_v52 = vunpack.c.l.b16 %v23341_v2  ;;  %v1966_v51 = vmax.f32 %v1870_v20, 0.0  ;;  %v1968_v38 = vmax.f32 %v1872_v59, 0.0  ;;  %v1754_v54 = vmax.f32 %v1268_v56, %v10651_v24  ;;  %v23351_v20 = vld [vmem:[#allocation55_spill] sm:$0xff] }
 0x2a5   :  { %23344 = vst [vmem:[#allocation154_spill] sm:$0xff] %v16031_v10  ;;  %v23345_v25 = vpack.c.bf16 %v15916_v37, %v15916_v37  ;;  %v23347_v40 = vpack.c.bf16 %v15918_v0, %v15918_v0  ;;  %v1967_v46 = vmax.f32 %v1871_v6, 0.0  ;;  %v1755_v13 = vmax.f32 %v1270_v15, %v10652_v44 }
 0x2a6   :  { %23342 = vst [vmem:[#allocation27_spill] sm:$0xff] %v16025_v52  ;;  %v16043_v14 = vunpack.c.l.b16 %v2538_v3  ;;  %v1756_v39 = vmax.f32 %v1272_v17, %v10653_v11  ;;  %v1038_v2 = vmax.f32 %v23350_v19, %v989_v53  ;;  %v3389_v59 = vrot.slane %v23351_v20, 4  ;;  %v23356_v53 = vld [vmem:[#allocation31_spill] sm:$0xff]  ;;  %v23357_v19 = vld [vmem:[#allocation32_spill] sm:$0xff]  ;;  %v3302_v55 = vpop.f32.mrf.mxu0 }
 0x2a7   :  { %v16036_v45 = vunpack.c.l.b16 %v23345_v25  ;;  %v16041_v27 = vunpack.c.l.b16 %v23347_v40  ;;  %v16047_v56 = vunpack.c.l.b16 %v2539_v29  ;;  %v1969_v24 = vmax.f32 %v1873_v33, 0.0  ;;  %v23353_v40 = vld [vmem:[#allocation14_spill] sm:$0xff] }
 0x2a8   :  { %23349 = vst [vmem:[#allocation157_spill] sm:$0xff] %v16043_v14  ;;  %v2158_v37 = vperm.slane %v1968_v38, 0  ;;  %v1757_v35 = vmax.f32 %v1274_v61, %v10654_v5  ;;  %v2154_v25 = vperm.slane %v1966_v51, 0  ;;  %v2155_v31 = vperm.slane %v1966_v51, 2  ;;  %v23358_v61 = vld [vmem:[#allocation56_spill] sm:$0xff] }
 0x2a9   :  { %23346 = vst [vmem:[#allocation155_spill] sm:$0xff] %v16036_v45  ;;  %v1874_v0 = vadd.f32 %v14607_v16, %v1754_v54  ;;  %v23355_v6 = vrot.slane %v23354_v48, 5  ;;  %v2156_v15 = vperm.slane %v1967_v46, 0  ;;  %v2157_v17 = vperm.slane %v1967_v46, 2  ;;  %v23359_v54 = vld [vmem:[#allocation36_spill] sm:$0xff] }
 0x2aa   :  { %23348 = vst [vmem:[#allocation156_spill] sm:$0xff] %v16041_v27  ;;  %v2159_v44 = vperm.slane %v1968_v38, 2  ;;  %v1875_v11 = vadd.f32 %v23356_v53, %v1755_v13  ;;  %v1876_v29 = vadd.f32 %v23357_v19, %v1756_v39  ;;  %v1110_v41 = vrot.slane %v1038_v2, 6 }
 0x2ab   :  { %23352 = vst [vmem:[#allocation30_spill] sm:$0xff] %v16047_v56  ;;  %v3388_v3 = vsel %vm2836_vm7, %v23355_v6, %v23353_v40  ;;  %v3391_v5 = vrot.slane %v23358_v61, 3  ;;  %v2160_v51 = vperm.slane %v1969_v24, 0  ;;  %v2161_v20 = vperm.slane %v1969_v24, 2  ;;  %v23360_v6 = vld [vmem:[#allocation58_spill] sm:$0xff] }
 0x2ac   :  { %v3390_v33 = vsel %vm2839_vm8, %v3389_v59, %v3388_v3  ;;  %v2414_v16 = vpack.c.bf16 %v2158_v37, %v2158_v37  ;;  %v1877_v36 = vadd.f32 %v23359_v54, %v1757_v35  ;;  %v2410_v48 = vpack.c.bf16 %v2154_v25, %v2154_v25  ;;  %v13384_v54 = vld [vmem:[%s22653_s4 + $0xe4] sm:$0xf0] }
 0x2ad   :  { %v2411_v58 = vpack.c.bf16 %v2155_v31, %v2155_v31  ;;  %v1970_v40 = vmax.f32 %v1874_v0, 0.0  ;;  %v2412_v38 = vpack.c.bf16 %v2156_v15, %v2156_v15  ;;  %v2413_v18 = vpack.c.bf16 %v2157_v17, %v2157_v17  ;;  %v10875_v17 = vld [vmem:[%s22653_s4 + $0x70] sm:$0xf] }
 0x2ae   :  { %v2415_v13 = vpack.c.bf16 %v2159_v44, %v2159_v44  ;;  %v1971_v53 = vmax.f32 %v1875_v11, 0.0  ;;  %v1972_v39 = vmax.f32 %v1876_v29, 0.0  ;;  %v1275_v2 = vsel %vm1111_vm2, %v15891_v62, %v1110_v41 }
 0x2af   :  { %v16064_v59 = vsel %vm1113_vm3, %v15891_v62, %v1110_v41  ;;  %v16068_v24 = vsel %vm1116_vm4, %v15891_v62, %v1110_v41  ;;  %v2416_v31 = vpack.c.bf16 %v2160_v51, %v2160_v51  ;;  %v2417_v37 = vpack.c.bf16 %v2161_v20, %v2161_v20 }
 0x2b0   :  { %23361 = vst [vmem:[#allocation14_spill] sm:$0xff] %v16064_v59  ;;  %v16070_v35 = vunpack.c.l.b16 %v2414_v16  ;;  %v1973_v25 = vmax.f32 %v1877_v36, 0.0  ;;  %v2162_v0 = vperm.slane %v1970_v40, 0  ;;  %v2163_v3 = vperm.slane %v1970_v40, 2  ;;  %v13370_v36 = vld [vmem:[%s22653_s4 + $0x74] sm:$0xf0] }
 0x2b1   :  { %23362 = vst [vmem:[#allocation58_spill] sm:$0xff] %v16068_v24  ;;  %v16072_v15 = vperm.slane %v1971_v53, 0  ;;  %v16078_v44 = vsel %vm2842_vm9, %v3391_v5, %v3390_v33  ;;  %v16080_v11 = vunpack.c.l.b16 %v2412_v38  ;;  %v16082_v29 = vunpack.c.l.b16 %v2413_v18  ;;  %v13369_v16 = vld [vmem:[%s22653_s4 + $0x74] sm:$0xf]  ;;  %v10877_v33 = vld [vmem:[%s22653_s4 + $0x78] sm:$0xf0] }
 0x2b2   :  { %23363 = vst [vmem:[#allocation158_spill] sm:$0xff] %v16070_v35  ;;  %v16084_v51 = vunpack.c.l.b16 %v2410_v48  ;;  %v16086_v20 = vunpack.c.l.b16 %v2411_v58  ;;  %v16097_v5 = vunpack.c.l.b16 %v2415_v13  ;;  %v2165_v18 = vperm.slane %v1971_v53, 2  ;;  %v10867_v58 = vld [vmem:[%s22653_s4 + $0x60] sm:$0xf]  ;;  %v13368_v38 = vld [vmem:[%s22653_s4 + $0x64] sm:$0xf0]  ;;  %v3273_v53 = vpop.f32.mrf.mxu3 }
 0x2b3   :  { %v2166_v40 = vperm.slane %v1972_v39, 0  ;;  %v16099_v48 = vperm.slane %v1972_v39, 2  ;;  %v16107_v46 = vunpack.c.l.b16 %v2416_v31  ;;  %v16109_v24 = vunpack.c.l.b16 %v2417_v37  ;;  %v10931_v39 = vld [vmem:[%s22653_s4 + $0xe0] sm:$0xf]  ;;  %v3331_v37 = vpop.f32.mrf.mxu2  ;;  %v13367_v59 = vld [vmem:[%s22653_s4 + $0x64] sm:$0xf] }
 0x2b4   :  { %23364 = vst [vmem:[#allocation159_spill] sm:$0xff] %v16084_v51  ;;  %v16112_v13 = vperm.slane %v1973_v25, 0  ;;  %v2169_v19 = vperm.slane %v1973_v25, 2  ;;  %v2418_v61 = vpack.c.bf16 %v2162_v0, %v2162_v0  ;;  %v2420_v31 = vpack.c.bf16 %v16072_v15, %v16072_v15  ;;  %v10869_v51 = vld [vmem:[%s22653_s4 + $0x68] sm:$0xf0]  ;;  %v3244_v25 = vpop.f32.mrf.mxu1 }
 0x2b5   :  { %23365 = vst [vmem:[#allocation160_spill] sm:$0xff] %v16086_v20  ;;  %v2419_v20 = vpack.c.bf16 %v2163_v3, %v2163_v3  ;;  %v16130_v49 = vsel %vm320_vm0, %v1110_v41, %v15891_v62  ;;  %v10655_v47 = vrot.slane %v1275_v2, 9  ;;  %v10876_v0 = vor.u32 %v13370_v36, %v10875_v17  ;;  %v13383_v15 = vld [vmem:[%s22653_s4 + $0xe4] sm:$0xf]  ;;  %v10859_v62 = vld [vmem:[%s22653_s4 + $0x50] sm:$0xf] }
 0x2b6   :  { %23366 = vst [vmem:[#allocation161_spill] sm:$0xff] %v16097_v5  ;;  %v10880_v3 = vor.u32 %v13369_v16, %v10877_v33  ;;  %v2421_v30 = vpack.c.bf16 %v2165_v18, %v2165_v18  ;;  %v2422_v32 = vpack.c.bf16 %v2166_v40, %v2166_v40  ;;  %v2423_v34 = vpack.c.bf16 %v16099_v48, %v16099_v48  ;;  %v13366_v17 = vld [vmem:[%s22653_s4 + $0x54] sm:$0xf0]  ;;  %v10923_v36 = vld [vmem:[%s22653_s4 + $0xd0] sm:$0xf] }
 0x2b7   :  { %23367 = vst [vmem:[#allocation162_spill] sm:$0xff] %v16107_v46  ;;  %v16140_v41 = vadd.f32 %v3273_v53, %v3244_v25  ;;  %v1758_v33 = vmax.f32 %v1275_v2, %v10655_v47  ;;  %3781 = vmatpush.bf16.msrb.mxu1 %v10876_v0  ;;  %v16152_v18 = vadd.f32 %v3331_v37, %v3302_v55  ;;  %v13382_v48 = vld [vmem:[%s22653_s4 + $0xd4] sm:$0xf0]  ;;  %v13365_v53 = vld [vmem:[%s22653_s4 + $0x54] sm:$0xf]  ;;  %v16185_v0 = vunpack.c.l.b16 %v2420_v31 }
 0x2b8   :  { %23368 = vst [vmem:[#allocation163_spill] sm:$0xff] %v16109_v24  ;;  %3839 = vmatpush.bf16.msrb.mxu0 %v10880_v3  ;;  %v10868_v40 = vor.u32 %v13368_v38, %v10867_v58  ;;  %v2424_v25 = vpack.c.bf16 %v16112_v13, %v16112_v13  ;;  %v10932_v47 = vor.u32 %v13384_v54, %v10931_v39  ;;  %v10861_v55 = vld [vmem:[%s22653_s4 + $0x58] sm:$0xf0]  ;;  %v13381_v2 = vld [vmem:[%s22653_s4 + $0xd4] sm:$0xf]  ;;  %v16173_v38 = vunpack.c.l.b16 %v2419_v20 }
 0x2b9   :  { %23369 = vst [vmem:[#allocation164_spill] sm:$0xff] %v16130_v49  ;;  %v16162_v49 = vunpack.c.l.b16 %v2418_v61  ;;  %v10925_v58 = vld [vmem:[%s22653_s4 + $0xd8] sm:$0xf0]  ;;  %v1878_v13 = vadd.f32 %v14736_v42, %v1758_v33  ;;  %v10936_v61 = vor.u32 %v13383_v15, %v10933_v60  ;;  %v10851_v54 = vld [vmem:[%s22653_s4 + $0x40] sm:$0xf]  ;;  %v16187_v20 = vunpack.c.l.b16 %v2421_v30 }
 0x2ba   :  { %23370 = vst [vmem:[#allocation165_spill] sm:$0xff] %v16140_v41  ;;  %v2425_v41 = vpack.c.bf16 %v2169_v19, %v2169_v19  ;;  %v10872_v19 = vor.u32 %v13367_v59, %v10869_v51  ;;  %v13364_v39 = vld [vmem:[%s22653_s4 + $0x44] sm:$0xf0]  ;;  %v10915_v37 = vld [vmem:[%s22653_s4 + $0xc0] sm:$0xf]  ;;  %v16189_v3 = vunpack.c.l.b16 %v2422_v32  ;;  %3811 = vmatpush.bf16.msrb.mxu3 %v10932_v47  ;;  %v10924_v42 = vor.u32 %v13382_v48, %v10923_v36 }
 0x2bb   :  { %23371 = vst [vmem:[#allocation166_spill] sm:$0xff] %v16152_v18  ;;  %v13380_v60 = vld [vmem:[%s22653_s4 + $0xc4] sm:$0xf0]  ;;  %v13363_v59 = vld [vmem:[%s22653_s4 + $0x44] sm:$0xf]  ;;  %v1974_v31 = vmax.f32 %v1878_v13, 0.0  ;;  %3782 = vmatpush.bf16.msrb.mxu1 %v10868_v40  ;;  %v10860_v30 = vor.u32 %v13366_v17, %v10859_v62  ;;  %v10864_v32 = vor.u32 %v13365_v53, %v10861_v55  ;;  %v16207_v48 = vunpack.c.l.b16 %v2423_v34  ;;  %3869 = vmatpush.bf16.msrb.mxu2 %v10936_v61 }
 0x2bc   :  { %23372 = vst [vmem:[#allocation167_spill] sm:$0xff] %v16162_v49  ;;  %v10853_v51 = vld [vmem:[%s22653_s4 + $0x48] sm:$0xf0]  ;;  %3840 = vmatpush.bf16.msrb.mxu0 %v10872_v19  ;;  %v13379_v15 = vld [vmem:[%s22653_s4 + $0xc4] sm:$0xf]  ;;  %v3006_v33 = vrot.slane %v15858_v50, 6  ;;  %v16209_v47 = vunpack.c.l.b16 %v2424_v25  ;;  %v16211_v16 = vunpack.c.l.b16 %v2425_v41  ;;  %v10928_v40 = vor.u32 %v13381_v2, %v10925_v58 }
 0x2bd   :  { %23373 = vst [vmem:[#allocation168_spill] sm:$0xff] %v16173_v38  ;;  %v10917_v36 = vld [vmem:[%s22653_s4 + $0xc8] sm:$0xf0]  ;;  %v2508_v62 = vperm.slane %v1974_v31, 0  ;;  %v2509_v17 = vperm.slane %v1974_v31, 2  ;;  %v10852_v53 = vor.u32 %v13364_v39, %v10851_v54  ;;  %v10916_v55 = vor.u32 %v13380_v60, %v10915_v37 }
 0x2be   :  { %23374 = vst [vmem:[#allocation169_spill] sm:$0xff] %v16185_v0  ;;  %3812 = vmatpush.bf16.msrb.mxu3 %v10924_v42  ;;  %v10856_v13 = vor.u32 %v13363_v59, %v10853_v51  ;;  %v10920_v19 = vor.u32 %v13379_v15, %v10917_v36  ;;  %v23380_v18 = vrot.slane %v15852_v23, 7  ;;  %v3008_v34 = vrot.slane %v15967_v28, 5 }
 0x2bf   :  { %23375 = vst [vmem:[#allocation170_spill] sm:$0xff] %v16187_v20  ;;  %v2540_v25 = vpack.c.bf16 %v2508_v62, %v2508_v62  ;;  %v2541_v8 = vpack.c.bf16 %v2509_v17, %v2509_v17  ;;  %3783 = vmatpush.bf16.msrb.mxu1 %v10860_v30  ;;  %v3010_v2 = vrot.slane %v15984_v63, 4  ;;  %3870 = vmatpush.bf16.msrb.mxu2 %v10928_v40  ;;  %v3012_v61 = vrot.slane %v16025_v52, 3 }
 0x2c0   :  { %23376 = vst [vmem:[#allocation171_spill] sm:$0xff] %v16189_v3  ;;  %v3005_v50 = vsel %vm2830_vm5, %v23380_v18, %v15840_v26  ;;  %3841 = vmatpush.bf16.msrb.mxu0 %v10864_v32  ;;  %v3014_v54 = vrot.slane %v16036_v45, 2  ;;  %v3016_v39 = vrot.slane %v16043_v14, 1  ;;  %v3034_v51 = vrot.slane %v16107_v46, 6  ;;  %v16323_v14 = vld [vmem:[%s22653_s4 + $0x28] sm:$0xf0] }
 0x2c1   :  { %23377 = vst [vmem:[#allocation172_spill] sm:$0xff] %v16207_v48  ;;  %v3007_v41 = vsel %vm2833_vm6, %v3006_v33, %v3005_v50  ;;  %v16224_v18 = vunpack.c.l.b16 %v2540_v25  ;;  %v16226_v37 = vunpack.c.l.b16 %v2541_v8  ;;  %v23383_v50 = vrot.slane %v16070_v35, 7 }
 0x2c2   :  { %23378 = vst [vmem:[#allocation173_spill] sm:$0xff] %v16209_v47  ;;  %v3009_v58 = vsel %vm2836_vm7, %v3008_v34, %v3007_v41  ;;  %3813 = vmatpush.bf16.msrb.mxu3 %v10916_v55  ;;  %v3036_v31 = vrot.slane %v16162_v49, 5  ;;  %v3038_v30 = vrot.slane %v16185_v0, 4  ;;  %v3040_v32 = vrot.slane %v16189_v3, 3 }
 0x2c3   :  { %23379 = vst [vmem:[#allocation174_spill] sm:$0xff] %v16211_v16  ;;  %v3011_v42 = vsel %vm2839_vm8, %v3010_v2, %v3009_v58  ;;  %v3033_v60 = vsel %vm2830_vm5, %v23383_v50, %v16080_v11  ;;  %3784 = vmatpush.bf16.msrb.mxu1 %v10852_v53  ;;  %v3042_v15 = vrot.slane %v16209_v47, 2  ;;  %v3044_v36 = vrot.slane %v16224_v18, 1  ;;  %3871 = vmatpush.bf16.msrb.mxu2 %v10920_v19 }
 0x2c4   :  { %23381 = vst [vmem:[#allocation175_spill] sm:$0xff] %v16224_v18  ;;  %v3013_v59 = vsel %vm2842_vm9, %v3012_v61, %v3011_v42  ;;  %3842 = vmatpush.bf16.msrb.mxu0 %v10856_v13  ;;  %v3035_v40 = vsel %vm2833_vm6, %v3034_v51, %v3033_v60  ;;  %v23384_v62 = vrot.slane %v15856_v21, 7  ;;  %v3020_v53 = vrot.slane %v15860_v7, 6  ;;  %v10843_v61 = vld [vmem:[%s22653_s4 + $0x30] sm:$0xf] }
 0x2c5   :  { %23382 = vst [vmem:[#allocation176_spill] sm:$0xff] %v16226_v37  ;;  %v3015_v8 = vsel %vm2845_vm10, %v3014_v54, %v3013_v59  ;;  %v3037_v55 = vsel %vm2836_vm7, %v3036_v31, %v3035_v40  ;;  %v3022_v13 = vrot.slane %v15982_v57, 5  ;;  %v3024_v34 = vrot.slane %v16018_v9, 4  ;;  %v13362_v54 = vld [vmem:[%s22653_s4 + $0x34] sm:$0xf0] }
 0x2c6   :  { %v3017_v33 = vsel %vm2848_vm11, %v3016_v39, %v3015_v8  ;;  %v3019_v17 = vsel %vm2830_vm5, %v23384_v62, %v15850_v4  ;;  %v3026_v25 = vrot.slane %v16031_v10, 3  ;;  %v3039_v19 = vsel %vm2839_vm8, %v3038_v30, %v3037_v55  ;;  %v10907_v51 = vld [vmem:[%s22653_s4 + $0xb0] sm:$0xf]  ;;  %v13378_v31 = vld [vmem:[%s22653_s4 + $0xb4] sm:$0xf0] }
 0x2c7   :  { %v3021_v41 = vsel %vm2833_vm6, %v3020_v53, %v3019_v17  ;;  %v3028_v2 = vrot.slane %v16041_v27, 2  ;;  %v3030_v58 = vrot.slane %v16047_v56, 1  ;;  %v3041_v39 = vsel %vm2842_vm9, %v3040_v32, %v3039_v19  ;;  %v13361_v30 = vld [vmem:[%s22653_s4 + $0x34] sm:$0xf]  ;;  %v10845_v8 = vld [vmem:[%s22653_s4 + $0x38] sm:$0xf0] }
 0x2c8   :  { %v3023_v42 = vsel %vm2836_vm7, %v3022_v13, %v3021_v41  ;;  %v23385_v50 = vrot.slane %v16097_v5, 7  ;;  %v3048_v59 = vrot.slane %v16109_v24, 6  ;;  %v3043_v32 = vsel %vm2845_vm10, %v3042_v15, %v3041_v39  ;;  %v13377_v53 = vld [vmem:[%s22653_s4 + $0xb4] sm:$0xf]  ;;  %v10909_v55 = vld [vmem:[%s22653_s4 + $0xb8] sm:$0xf0] }
 0x2c9   :  { %v3025_v40 = vsel %vm2839_vm8, %v3024_v34, %v3023_v42  ;;  %v3050_v62 = vrot.slane %v16173_v38, 5  ;;  %v3052_v17 = vrot.slane %v16187_v20, 4  ;;  %v16294_v13 = vld [vmem:[%s22653_s4 + $0x20] sm:$0xf]  ;;  %v16299_v15 = vld [vmem:[%s22653_s4 + $0x24] sm:$0xf0]  ;;  %v3045_v41 = vsel %vm2848_vm11, %v3044_v36, %v3043_v32 }
 0x2ca   :  { %v3047_v60 = vsel %vm2830_vm5, %v23385_v50, %v16082_v29  ;;  %v16304_v34 = vld [vmem:[%s22653_s4 + $0xa0] sm:$0xf]  ;;  %v16309_v19 = vld [vmem:[%s22653_s4 + $0xa4] sm:$0xf0]  ;;  %v3027_v39 = vsel %vm2842_vm9, %v3026_v25, %v3025_v40  ;;  %v3054_v50 = vrot.slane %v16207_v48, 3  ;;  %v3056_v40 = vrot.slane %v16211_v16, 2 }
 0x2cb   :  { %v3049_v42 = vsel %vm2833_vm6, %v3048_v59, %v3047_v60  ;;  %v16318_v56 = vld [vmem:[%s22653_s4 + $0x24] sm:$0xf]  ;;  %v16333_v25 = vld [vmem:[%s22653_s4 + $0xa8] sm:$0xf0]  ;;  %v16335_v60 = vpack.c.b16 %v3045_v41, %v3017_v33  ;;  %v3029_v59 = vsel %vm2845_vm10, %v3028_v2, %v3027_v39  ;;  %v16343_v18 = vld [vmem:[%s22653_s4 + $0x10] sm:$0xf]  ;;  %v10844_v20 = vor.u32 %v13362_v54, %v10843_v61 }
 0x2cc   :  { %v16328_v36 = vld [vmem:[%s22653_s4 + $0xa4] sm:$0xf]  ;;  %v3051_v32 = vsel %vm2836_vm7, %v3050_v62, %v3049_v42  ;;  %v16348_v48 = vld [vmem:[%s22653_s4 + $0x14] sm:$0xf0]  ;;  %v16353_v33 = vld [vmem:[%s22653_s4 + $0x90] sm:$0xf]  ;;  %v3031_v39 = vsel %vm2848_vm11, %v3030_v58, %v3029_v59  ;;  %v10908_v61 = vor.u32 %v13378_v31, %v10907_v51  ;;  %v10848_v54 = vor.u32 %v13361_v30, %v10845_v8 }
 0x2cd   :  { %23386 = vst [vmem:[#allocation177_spill] sm:$0xff] %v16335_v60  ;;  %v16358_v2 = vld [vmem:[%s22653_s4 + $0x94] sm:$0xf0]  ;;  %v16363_v62 = vld [vmem:[%s22653_s4 + $0x14] sm:$0xf]  ;;  %v3053_v42 = vsel %vm2839_vm8, %v3052_v17, %v3051_v32  ;;  %v3058_v16 = vrot.slane %v16226_v37, 1  ;;  %3258 = vmatmul.bf16.gmra.mxu1 %v16335_v60  ;;  %3316 = vmatmul.bf16.gmra.mxu0 %v16335_v60  ;;  %v10836_v51 = vor.u32 %v16299_v15, %v16294_v13 }
 0x2ce   :  { %v16368_v41 = vld [vmem:[%s22653_s4 + $0x18] sm:$0xf0]  ;;  %v16376_v38 = vld [vmem:[%s22653_s4 + $0x94] sm:$0xf]  ;;  %v16386_v5 = vld [vmem:[%s22653_s4] sm:$0xf]  ;;  %v3055_v58 = vsel %vm2842_vm9, %v3054_v50, %v3053_v42  ;;  %3785 = vmatpush.bf16.msrb.mxu1 %v10844_v20  ;;  %v10912_v50 = vor.u32 %v13377_v53, %v10909_v55  ;;  %v10900_v31 = vor.u32 %v16309_v19, %v16304_v34  ;;  %3814 = vmatpush.bf16.msrb.mxu3 %v10908_v61 }
 0x2cf   :  { %v16381_v24 = vld [vmem:[%s22653_s4 + $0x98] sm:$0xf0]  ;;  %v16394_v17 = vld [vmem:[%s22653_s4 + $0x4] sm:$0xf0]  ;;  %v16399_v59 = vld [vmem:[%s22653_s4 + $0x80] sm:$0xf]  ;;  %v3057_v27 = vsel %vm2845_vm10, %v3056_v40, %v3055_v58  ;;  %3843 = vmatpush.bf16.msrb.mxu0 %v10848_v54  ;;  %v10840_v55 = vor.u32 %v16318_v56, %v16323_v14  ;;  %v10904_v13 = vor.u32 %v16328_v36, %v16333_v25  ;;  %v10828_v14 = vor.u32 %v16348_v48, %v16343_v18 }
 0x2d0   :  { %v23387_v32 = vld [vmem:[#allocation60_spill] sm:$0xff]  ;;  %v16410_v30 = vld [vmem:[%s22653_s4 + $0x84] sm:$0xf0]  ;;  %v16415_v8 = vld [vmem:[%s22653_s4 + $0x4] sm:$0xf]  ;;  %v3059_v53 = vsel %vm2848_vm11, %v3058_v16, %v3057_v27  ;;  %3872 = vmatpush.bf16.msrb.mxu2 %v10912_v50  ;;  %v10892_v56 = vor.u32 %v16358_v2, %v16353_v33  ;;  %v10832_v36 = vor.u32 %v16363_v62, %v16368_v41  ;;  %v10896_v25 = vor.u32 %v16376_v38, %v16381_v24 }
 0x2d1   :  { %v3395_v37 = vrot.slane %v23387_v32, 1  ;;  %v16420_v20 = vld [vmem:[%s22653_s4 + $0x8] sm:$0xf0]  ;;  %v16430_v15 = vld [vmem:[%s22653_s4 + $0x84] sm:$0xf]  ;;  %v23388_v19 = vld [vmem:[#allocation53_spill] sm:$0xff]  ;;  %v16438_v16 = vpack.c.b16 %v3059_v53, %v3031_v39  ;;  %v10820_v40 = vor.u32 %v16394_v17, %v16386_v5  ;;  %v10884_v39 = vor.u32 %v16410_v30, %v16399_v59 }
 0x2d2   :  { %v16435_v34 = vld [vmem:[%s22653_s4 + $0x88] sm:$0xf0]  ;;  %v3415_v27 = vrot.slane %v23388_v19, 5  ;;  %v10824_v42 = vor.u32 %v16415_v8, %v16420_v20  ;;  %v23390_v24 = vrot.slane %v23360_v6, 2  ;;  %v23391_v38 = vld [vmem:[#allocation40_spill] sm:$0xff]  ;;  %3786 = vmatpush.bf16.msrb.mxu1 %v10836_v51  ;;  %3815 = vmatpush.bf16.msrb.mxu3 %v10900_v31  ;;  %v23395_v54 = vld [vmem:[#allocation74_spill] sm:$0xff] }
 0x2d3   :  { %23389 = vst [vmem:[#allocation60_spill] sm:$0xff] %v16438_v16  ;;  %10812 = vmatmul.msk.bf16.gmra.mxu3 %vm3222_vm12, %v16438_v16  ;;  %10816 = vmatmul.msk.bf16.gmra.mxu2 %vm3222_vm12, %v16438_v16  ;;  %v10888_v48 = vor.u32 %v16430_v15, %v16435_v34  ;;  %v23392_v18 = vld [vmem:[#allocation39_spill] sm:$0xff]  ;;  %v23394_v62 = vld [vmem:[#allocation72_spill] sm:$0xff]  ;;  %v3419_v17 = vrot.slane %v23395_v54, 3  ;;  %v23397_v30 = vld [vmem:[#allocation78_spill] sm:$0xff] }
 0x2d4   :  { %v3394_v5 = vsel %vm2845_vm10, %v23390_v24, %v16078_v44  ;;  %v23393_v33 = vrot.slane %v23392_v18, 6  ;;  %v3417_v41 = vrot.slane %v23394_v62, 4  ;;  %v23396_v59 = vld [vmem:[#allocation76_spill] sm:$0xff]  ;;  %3844 = vmatpush.bf16.msrb.mxu0 %v10840_v55  ;;  %3873 = vmatpush.bf16.msrb.mxu2 %v10904_v13  ;;  %v3423_v8 = vrot.slane %v23397_v30, 1  ;;  %v23399_v15 = vld [vmem:[#allocation57_spill] sm:$0xff]  ;;  %v23400_v31 = vld [vmem:[#allocation59_spill] sm:$0xff] }
 0x2d5   :  { %v3396_v58 = vsel %vm2848_vm11, %v3395_v37, %v3394_v5  ;;  %v3421_v50 = vrot.slane %v23396_v59, 2  ;;  %v23398_v20 = vld [vmem:[#allocation52_spill] sm:$0xff]  ;;  %v3405_v34 = vrot.slane %v23399_v15, 3  ;;  %v3407_v37 = vrot.slane %v23400_v31, 2  ;;  %v23401_v24 = vld [vmem:[#allocation61_spill] sm:$0xff]  ;;  %v23402_v5 = vld [vmem:[#allocation42_spill] sm:$0xff] }
 0x2d6   :  { %v3414_v2 = vsel %vm2833_vm6, %v23393_v33, %v23391_v38  ;;  %v3403_v53 = vrot.slane %v23398_v20, 4  ;;  %v23403_v38 = vld [vmem:[#allocation54_spill] sm:$0xff]  ;;  %v23405_v33 = vld [vmem:[#allocation49_spill] sm:$0xff]  ;;  %v23407_v19 = vld [vmem:[#allocation75_spill] sm:$0xff]  ;;  %3787 = vmatpush.bf16.msrb.mxu1 %v10828_v14  ;;  %3816 = vmatpush.bf16.msrb.mxu3 %v10892_v56 }
 0x2d7   :  { %v3416_v61 = vsel %vm2836_vm7, %v3415_v27, %v3414_v2  ;;  %v3409_v27 = vrot.slane %v23401_v24, 1  ;;  %v23404_v18 = vrot.slane %v23403_v38, 5  ;;  %v3433_v16 = vrot.slane %v23407_v19, 3  ;;  %v23408_v60 = vld [vmem:[#allocation77_spill] sm:$0xff]  ;;  %v23409_v38 = vld [vmem:[#allocation79_spill] sm:$0xff] }
 0x2d8   :  { %v3418_v44 = vsel %vm2839_vm8, %v3417_v41, %v3416_v61  ;;  %v3404_v2 = vsel %vm2839_vm8, %v3403_v53, %v23405_v33  ;;  %v23406_v41 = vld [vmem:[#allocation73_spill] sm:$0xff]  ;;  %v3435_v24 = vrot.slane %v23408_v60, 2  ;;  %v3437_v31 = vrot.slane %v23409_v38, 1  ;;  %3845 = vmatpush.bf16.msrb.mxu0 %v10832_v36  ;;  %3874 = vmatpush.bf16.msrb.mxu2 %v10896_v25  ;;  %v16505_v25 = vpop.f32.mrf.mxu3  ;;  %v13472_v38 = vld [vmem:[%s22654_s5 + $0x1c4] sm:$0xf0] }
 0x2d9   :  { %v3420_v51 = vsel %vm2842_vm9, %v3419_v17, %v3418_v44  ;;  %v3430_v55 = vsel %vm2836_vm7, %v23404_v18, %v23402_v5  ;;  %v3431_v61 = vrot.slane %v23406_v41, 4  ;;  %v3406_v44 = vsel %vm2842_vm9, %v3405_v34, %v3404_v2  ;;  %v23411_v5 = vld [vmem:[#allocation87_spill] sm:$0xff]  ;;  %v23413_v34 = vld [vmem:[#allocation2_spill] sm:$0xff]  ;;  %23416 = vst [vmem:[#allocation39_spill] sm:$0xff] %v16505_v25 }
 0x2da   :  { %v3422_v13 = vsel %vm2845_vm10, %v3421_v50, %v3420_v51  ;;  %v3408_v53 = vsel %vm2845_vm10, %v3407_v37, %v3406_v44  ;;  %v3443_v18 = vrot.slane %v23411_v5, 5  ;;  %v23415_v2 = vld [vmem:[#allocation6_spill] sm:$0xff]  ;;  %v23417_v37 = vld [vmem:[#allocation4_spill] sm:$0xff]  ;;  %3788 = vmatpush.bf16.msrb.mxu1 %v10820_v40  ;;  %3817 = vmatpush.bf16.msrb.mxu3 %v10884_v39  ;;  %v23428_v39 = vld [vmem:[#allocation7_spill] sm:$0xff] }
 0x2db   :  { %v3424_v17 = vsel %vm2848_vm11, %v3423_v8, %v3422_v13  ;;  %v3432_v51 = vsel %vm2839_vm8, %v3431_v61, %v3430_v55  ;;  %v3410_v14 = vsel %vm2848_vm11, %v3409_v27, %v3408_v53  ;;  %v23412_v8 = vld [vmem:[#allocation86_spill] sm:$0xff]  ;;  %v23414_v13 = vrot.slane %v23413_v34, 7  ;;  %v23420_v27 = vld [vmem:[#allocation92_spill] sm:$0xff]  ;;  %v11083_v41 = vld [vmem:[%s22654_s5 + $0x1c8] sm:$0xf0] }
 0x2dc   :  { %v16493_v50 = vpack.c.b16 %v3424_v17, %v3396_v58  ;;  %v3434_v56 = vsel %vm2842_vm9, %v3433_v16, %v3432_v51  ;;  %v3445_v36 = vrot.slane %v23415_v2, 4  ;;  %v23418_v17 = vrot.slane %v23417_v37, 6  ;;  %v23419_v61 = vld [vmem:[#allocation90_spill] sm:$0xff]  ;;  %v16513_v16 = vpop.f32.mrf.mxu2  ;;  %3846 = vmatpush.bf16.msrb.mxu0 %v10824_v42  ;;  %3875 = vmatpush.bf16.msrb.mxu2 %v10888_v48 }
 0x2dd   :  { %v3440_v33 = vsel %vm2830_vm5, %v23414_v13, %v23412_v8  ;;  %v3436_v58 = vsel %vm2845_vm10, %v3435_v24, %v3434_v56  ;;  %v3447_v44 = vrot.slane %v23419_v61, 3  ;;  %v3449_v53 = vrot.slane %v23420_v27, 2  ;;  %23421 = vst [vmem:[#allocation42_spill] sm:$0xff] %v16513_v16  ;;  %v23422_v34 = vld [vmem:[#allocation94_spill] sm:$0xff]  ;;  %v23424_v24 = vld [vmem:[#allocation9_spill] sm:$0xff] }
 0x2de   :  { %23410 = vst [vmem:[#allocation40_spill] sm:$0xff] %v16493_v50  ;;  %v3442_v55 = vsel %vm2833_vm6, %v23418_v17, %v3440_v33  ;;  %v3438_v51 = vsel %vm2848_vm11, %v3437_v31, %v3436_v58  ;;  %v3451_v13 = vrot.slane %v23422_v34, 1  ;;  %v23423_v25 = vld [vmem:[#allocation10_spill] sm:$0xff]  ;;  %v23425_v56 = vrot.slane %v23424_v24, 7  ;;  %v16522_v33 = vpop.f32.mrf.mxu1  ;;  %v23431_v34 = vld [vmem:[#allocation104_spill] sm:$0xff]  ;;  %3789 = vmatmul.bf16.vlgmr.msrb.gmra.mxu1 %v16493_v50 }
 0x2df   :  { %v3444_v8 = vsel %vm2836_vm7, %v3443_v18, %v3442_v55  ;;  %23426 = vst [vmem:[#allocation49_spill] sm:$0xff] %v16522_v33  ;;  %v16524_v17 = vpack.c.b16 %v3438_v51, %v3410_v14  ;;  %v3469_v27 = vrot.slane %v23428_v39, 6  ;;  %v23429_v31 = vld [vmem:[#allocation102_spill] sm:$0xff]  ;;  %v16529_v18 = vpop.f32.mrf.mxu0  ;;  %v3473_v24 = vrot.slane %v23431_v34, 4  ;;  %v23435_v51 = vld [vmem:[#allocation89_spill] sm:$0xff]  ;;  %3847 = vmatmul.bf16.vlgmr.msrb.gmra.mxu0 %v16493_v50 }
 0x2e0   :  { %v3468_v37 = vsel %vm2830_vm5, %v23425_v56, %v23423_v25  ;;  %v3446_v40 = vsel %vm2839_vm8, %v3445_v36, %v3444_v8  ;;  %v3471_v58 = vrot.slane %v23429_v31, 5  ;;  %23430 = vst [vmem:[#allocation2_spill] sm:$0xff] %v16529_v18  ;;  %v23432_v61 = vld [vmem:[#allocation106_spill] sm:$0xff]  ;;  %v23433_v56 = vld [vmem:[#allocation108_spill] sm:$0xff]  ;;  %v23436_v8 = vld [vmem:[#allocation83_spill] sm:$0xff] }
 0x2e1   :  { %23427 = vst [vmem:[#allocation86_spill] sm:$0xff] %v16524_v17  ;;  %v3448_v55 = vsel %vm2842_vm9, %v3447_v44, %v3446_v40  ;;  %v3475_v25 = vrot.slane %v23432_v61, 3  ;;  %v3477_v16 = vrot.slane %v23433_v56, 2  ;;  %v3470_v48 = vsel %vm2833_vm6, %v3469_v27, %v3468_v37  ;;  %v23434_v14 = vld [vmem:[#allocation110_spill] sm:$0xff]  ;;  %v23438_v56 = vld [vmem:[#allocation3_spill] sm:$0xff]  ;;  %v23441_v27 = vld [vmem:[#allocation5_spill] sm:$0xff] }
 0x2e2   :  { %v3450_v42 = vsel %vm2845_vm10, %v3449_v53, %v3448_v55  ;;  %v3479_v36 = vrot.slane %v23434_v14, 1  ;;  %v23437_v39 = vrot.slane %v23436_v8, 7  ;;  %v3472_v40 = vsel %vm2836_vm7, %v3471_v58, %v3470_v48  ;;  %v23440_v53 = vld [vmem:[#allocation88_spill] sm:$0xff]  ;;  %v23442_v18 = vld [vmem:[#allocation91_spill] sm:$0xff]  ;;  %v23443_v33 = vld [vmem:[#allocation93_spill] sm:$0xff] }
 0x2e3   :  { %v3452_v44 = vsel %vm2848_vm11, %v3451_v13, %v3450_v42  ;;  %v23439_v61 = vrot.slane %v23438_v56, 6  ;;  %v3457_v55 = vrot.slane %v23440_v53, 5  ;;  %v3474_v37 = vsel %vm2839_vm8, %v3473_v24, %v3472_v40  ;;  %v23444_v42 = vld [vmem:[#allocation95_spill] sm:$0xff]  ;;  %v23446_v56 = vld [vmem:[#allocation101_spill] sm:$0xff]  ;;  %10937 = vmatmul.msk.bf16.vlgmr.msrb.gmra.mxu3 %vm3222_vm12, %v16524_v17  ;;  %10941 = vmatmul.msk.bf16.vlgmr.msrb.gmra.mxu2 %vm3222_vm12, %v16524_v17  ;;  %v11081_v50 = vld [vmem:[%s22654_s5 + $0x1c0] sm:$0xf] }
 0x2e4   :  { %v3454_v31 = vsel %vm2830_vm5, %v23437_v39, %v23435_v51  ;;  %v3459_v14 = vrot.slane %v23441_v27, 4  ;;  %v3461_v8 = vrot.slane %v23442_v18, 3  ;;  %v3463_v39 = vrot.slane %v23443_v33, 2  ;;  %v23445_v48 = vld [vmem:[#allocation11_spill] sm:$0xff]  ;;  %v3336_v27 = vpop.f32.mrf.mxu2  ;;  %v16712_v60 = vld [vmem:[%s22654_s5 + $0x144] sm:$0xf] }
 0x2e5   :  { %v3456_v34 = vsel %vm2833_vm6, %v23439_v61, %v3454_v31  ;;  %v3476_v51 = vsel %vm2842_vm9, %v3475_v25, %v3474_v37  ;;  %v3465_v58 = vrot.slane %v23444_v42, 1  ;;  %v23447_v2 = vrot.slane %v23446_v56, 7  ;;  %v23448_v25 = vld [vmem:[#allocation8_spill] sm:$0xff]  ;;  %v3278_v37 = vpop.f32.mrf.mxu3  ;;  %v23451_v33 = vld [vmem:[#allocation107_spill] sm:$0xff]  ;;  %v13471_v19 = vld [vmem:[%s22654_s5 + $0x1c4] sm:$0xf] }
 0x2e6   :  { %v3458_v13 = vsel %vm2836_vm7, %v3457_v55, %v3456_v34  ;;  %v3478_v31 = vsel %vm2845_vm10, %v3477_v16, %v3476_v51  ;;  %v3483_v40 = vrot.slane %v23448_v25, 6  ;;  %v23449_v34 = vld [vmem:[#allocation103_spill] sm:$0xff]  ;;  %v3489_v18 = vrot.slane %v23451_v33, 3  ;;  %v3249_v53 = vpop.f32.mrf.mxu1  ;;  %v23453_v51 = vld [vmem:[#allocation109_spill] sm:$0xff] }
 0x2e7   :  { %v3482_v61 = vsel %vm2830_vm5, %v23447_v2, %v23445_v48  ;;  %v3460_v24 = vsel %vm2839_vm8, %v3459_v14, %v3458_v13  ;;  %v3485_v55 = vrot.slane %v23449_v34, 5  ;;  %v3480_v42 = vsel %vm2848_vm11, %v3479_v36, %v3478_v31  ;;  %v23450_v2 = vld [vmem:[#allocation105_spill] sm:$0xff]  ;;  %v3307_v31 = vpop.f32.mrf.mxu0 }
 0x2e8   :  { %v3462_v56 = vsel %vm2842_vm9, %v3461_v8, %v3460_v24  ;;  %v3487_v48 = vrot.slane %v23450_v2, 4  ;;  %v16573_v5 = vpack.c.b16 %v3480_v42, %v3452_v44  ;;  %v3484_v14 = vsel %vm2833_vm6, %v3483_v40, %v3482_v61  ;;  %v23455_v42 = vld [vmem:[#allocation111_spill] sm:$0xff]  ;;  %v23457_v40 = vld [vmem:[#allocation114_spill] sm:$0xff]  ;;  %v11027_v34 = vld [vmem:[%s22654_s5 + $0x158] sm:$0xf0] }
 0x2e9   :  { %v3464_v16 = vsel %vm2845_vm10, %v3463_v39, %v3462_v56  ;;  %v3491_v13 = vrot.slane %v23453_v51, 2  ;;  %v3486_v8 = vsel %vm2836_vm7, %v3485_v55, %v3484_v14  ;;  %v16581_v24 = vadd.f32 %v3278_v37, %v3249_v53  ;;  %v16678_v51 = vld [vmem:[%s22654_s5 + $0x154] sm:$0xf] }
 0x2ea   :  { %23452 = vst [vmem:[#allocation10_spill] sm:$0xff] %v16573_v5  ;;  %v3466_v33 = vsel %vm2848_vm11, %v3465_v58, %v3464_v16  ;;  %v3488_v44 = vsel %vm2839_vm8, %v3487_v48, %v3486_v8  ;;  %v3493_v2 = vrot.slane %v23455_v42, 1  ;;  %v16586_v39 = vadd.f32 %v3336_v27, %v3307_v31  ;;  %v23460_v48 = vld [vmem:[#allocation17_spill] sm:$0xff]  ;;  %v23461_v16 = vld [vmem:[#allocation122_spill] sm:$0xff]  ;;  %v23462_v31 = vld [vmem:[#allocation124_spill] sm:$0xff] }
 0x2eb   :  { %23454 = vst [vmem:[#allocation9_spill] sm:$0xff] %v16581_v24  ;;  %v3490_v61 = vsel %vm2842_vm9, %v3489_v18, %v3488_v44  ;;  %v23458_v56 = vrot.slane %v15592_v43, 7  ;;  %v3499_v25 = vrot.slane %v15611_v12, 5  ;;  %v3501_v53 = vrot.slane %v15705_v1, 4  ;;  %v23463_v44 = vld [vmem:[#allocation20_spill] sm:$0xff]  ;;  %v23489_v24 = vld [vmem:[#allocation137_spill] sm:$0xff] }
 0x2ec   :  { %23456 = vst [vmem:[#allocation89_spill] sm:$0xff] %v16586_v39  ;;  %v3492_v55 = vsel %vm2845_vm10, %v3491_v13, %v3490_v61  ;;  %v23459_v58 = vrot.slane %v15598_v22, 6  ;;  %v3503_v27 = vrot.slane %v23460_v48, 3  ;;  %v3505_v14 = vrot.slane %v23461_v16, 2  ;;  %v23468_v48 = vld [vmem:[#allocation132_spill] sm:$0xff] }
 0x2ed   :  { %v3496_v36 = vsel %vm2830_vm5, %v23458_v56, %v23457_v40  ;;  %v3494_v18 = vsel %vm2848_vm11, %v3493_v2, %v3492_v55  ;;  %v3507_v8 = vrot.slane %v23462_v31, 1  ;;  %v23464_v40 = vld [vmem:[#allocation22_spill] sm:$0xff]  ;;  %v3527_v22 = vrot.slane %v23468_v48, 5 }
 0x2ee   :  { %v3498_v37 = vsel %vm2833_vm6, %v23459_v58, %v3496_v36  ;;  %v23465_v56 = vrot.slane %v23464_v40, 7  ;;  %v16608_v13 = vpack.c.b16 %v3494_v18, %v3466_v33  ;;  %v23467_v36 = vld [vmem:[#allocation23_spill] sm:$0xff]  ;;  %v23469_v2 = vld [vmem:[#allocation134_spill] sm:$0xff]  ;;  %v23472_v33 = vld [vmem:[#allocation140_spill] sm:$0xff]  ;;  %3794 = vmatmul.bf16.gmra.mxu1 %v16573_v5  ;;  %v3545_v17 = vrot.slane %v23489_v24, 3 }
 0x2ef   :  { %v3500_v43 = vsel %vm2836_vm7, %v3499_v25, %v3498_v37  ;;  %v3525_v58 = vrot.slane %v23467_v36, 6  ;;  %v3529_v55 = vrot.slane %v23469_v2, 4  ;;  %v23470_v25 = vld [vmem:[#allocation136_spill] sm:$0xff]  ;;  %v23471_v31 = vld [vmem:[#allocation138_spill] sm:$0xff]  ;;  %v3535_v18 = vrot.slane %v23472_v33, 1  ;;  %v23481_v33 = vld [vmem:[#allocation123_spill] sm:$0xff]  ;;  %3852 = vmatmul.bf16.gmra.mxu0 %v16573_v5 }
 0x2f0   :  { %v3524_v1 = vsel %vm2830_vm5, %v23465_v56, %v23463_v44  ;;  %23466 = vst [vmem:[#allocation83_spill] sm:$0xff] %v16608_v13  ;;  %v3502_v61 = vsel %vm2839_vm8, %v3501_v53, %v3500_v43  ;;  %v3531_v37 = vrot.slane %v23470_v25, 3  ;;  %v3533_v12 = vrot.slane %v23471_v31, 2  ;;  %v23473_v56 = vld [vmem:[#allocation115_spill] sm:$0xff]  ;;  %v23474_v53 = vld [vmem:[#allocation117_spill] sm:$0xff] }
 0x2f1   :  { %v3504_v16 = vsel %vm2842_vm9, %v3503_v27, %v3502_v61  ;;  %v3526_v44 = vsel %vm2833_vm6, %v3525_v58, %v3524_v1  ;;  %v23475_v43 = vrot.slane %v23474_v53, 7  ;;  %v23476_v61 = vld [vmem:[#allocation119_spill] sm:$0xff]  ;;  %v23478_v31 = vld [vmem:[#allocation121_spill] sm:$0xff]  ;;  %v23480_v58 = vld [vmem:[#allocation18_spill] sm:$0xff] }
 0x2f2   :  { %v3506_v40 = vsel %vm2845_vm10, %v3505_v14, %v3504_v16  ;;  %v3528_v27 = vsel %vm2836_vm7, %v3527_v22, %v3526_v44  ;;  %v23477_v2 = vrot.slane %v23476_v61, 6  ;;  %v3513_v42 = vrot.slane %v23478_v31, 5  ;;  %v23479_v16 = vld [vmem:[#allocation33_spill] sm:$0xff]  ;;  %v11033_v22 = vld [vmem:[%s22654_s5 + $0x160] sm:$0xf]  ;;  %v23491_v24 = vld [vmem:[#allocation139_spill] sm:$0xff] }
 0x2f3   :  { %v3510_v36 = vsel %vm2830_vm5, %v23475_v43, %v23473_v56  ;;  %v3508_v48 = vsel %vm2848_vm11, %v3507_v8, %v3506_v40  ;;  %v3530_v1 = vsel %vm2839_vm8, %v3529_v55, %v3528_v27  ;;  %v3515_v14 = vrot.slane %v23479_v16, 4  ;;  %v13460_v8 = vld [vmem:[%s22654_s5 + $0x164] sm:$0xf0]  ;;  %v23482_v55 = vld [vmem:[#allocation125_spill] sm:$0xff]  ;;  %v23483_v44 = vld [vmem:[#allocation130_spill] sm:$0xff]  ;;  %10938 = vmatmul.msk.bf16.gmra.mxu3 %vm3222_vm12, %v16608_v13  ;;  %10942 = vmatmul.msk.bf16.gmra.mxu2 %vm3222_vm12, %v16608_v13 }
 0x2f4   :  { %v3512_v25 = vsel %vm2833_vm6, %v23477_v2, %v3510_v36  ;;  %v3517_v53 = vrot.slane %v23480_v58, 3  ;;  %v3519_v56 = vrot.slane %v23481_v33, 2  ;;  %v3532_v36 = vsel %vm2842_vm9, %v3531_v37, %v3530_v1  ;;  %v23484_v43 = vld [vmem:[#allocation131_spill] sm:$0xff]  ;;  %v13459_v58 = vld [vmem:[%s22654_s5 + $0x164] sm:$0xf]  ;;  %v23487_v16 = vld [vmem:[#allocation133_spill] sm:$0xff] }
 0x2f5   :  { %v3514_v2 = vsel %vm2836_vm7, %v3513_v42, %v3512_v25  ;;  %v3521_v40 = vrot.slane %v23482_v55, 1  ;;  %v23485_v27 = vrot.slane %v23484_v43, 7  ;;  %v11035_v61 = vld [vmem:[%s22654_s5 + $0x168] sm:$0xf0]  ;;  %v16658_v37 = vld [vmem:[%s22654_s5 + $0x150] sm:$0xf]  ;;  %v11034_v20 = vor.u32 %v13460_v8, %v11033_v22 }
 0x2f6   :  { %v16663_v42 = vld [vmem:[%s22654_s5 + $0x154] sm:$0xf0]  ;;  %v11089_v25 = vld [vmem:[%s22654_s5 + $0x1d0] sm:$0xf]  ;;  %v3516_v43 = vsel %vm2839_vm8, %v3515_v14, %v3514_v2  ;;  %v3541_v31 = vrot.slane %v23487_v16, 5  ;;  %v23488_v16 = vld [vmem:[#allocation135_spill] sm:$0xff] }
 0x2f7   :  { %v3538_v33 = vsel %vm2830_vm5, %v23485_v27, %v23483_v44  ;;  %v13474_v1 = vld [vmem:[%s22654_s5 + $0x1d4] sm:$0xf0]  ;;  %v3534_v44 = vsel %vm2845_vm10, %v3533_v12, %v3532_v36  ;;  %v13473_v5 = vld [vmem:[%s22654_s5 + $0x1d4] sm:$0xf]  ;;  %v11091_v12 = vld [vmem:[%s22654_s5 + $0x1d8] sm:$0xf0]  ;;  %4078 = vmatpush.bf16.msra.mxu1 %v11034_v20 }
 0x2f8   :  { %v23486_v27 = vld [vmem:[#allocation129_spill] sm:$0xff]  ;;  %v16692_v14 = vld [vmem:[%s22654_s5 + $0x140] sm:$0xf]  ;;  %v16697_v36 = vld [vmem:[%s22654_s5 + $0x144] sm:$0xf0]  ;;  %v3536_v2 = vsel %vm2848_vm11, %v3535_v18, %v3534_v44  ;;  %v3543_v39 = vrot.slane %v23488_v16, 4 }
 0x2f9   :  { %v3539_v55 = vrot.slane %v23486_v27, 6  ;;  %v3518_v27 = vsel %vm2842_vm9, %v3517_v53, %v3516_v43  ;;  %v16717_v18 = vld [vmem:[%s22654_s5 + $0x148] sm:$0xf0]  ;;  %v16723_v53 = vpack.c.b16 %v3536_v2, %v3508_v48  ;;  %v3547_v16 = vrot.slane %v23491_v24, 2  ;;  %v23492_v48 = vld [vmem:[#allocation141_spill] sm:$0xff]  ;;  %v23557_v24 = vld [vmem:[#allocation54_spill] sm:$0xff] }
 0x2fa   :  { %v3520_v44 = vsel %vm2845_vm10, %v3519_v56, %v3518_v27  ;;  %v3549_v2 = vrot.slane %v23492_v48, 1  ;;  %v16745_v56 = vld [vmem:[%s22654_s5 + $0x134] sm:$0xf0]  ;;  %v11038_v27 = vor.u32 %v13459_v58, %v11035_v61  ;;  %v11073_v22 = vld [vmem:[%s22654_s5 + $0x1b0] sm:$0xf]  ;;  %v11094_v61 = vor.u32 %v13473_v5, %v11091_v12 }
 0x2fb   :  { %23490 = vst [vmem:[#allocation11_spill] sm:$0xff] %v16723_v53  ;;  %v3540_v43 = vsel %vm2833_vm6, %v3539_v55, %v3538_v33  ;;  %v3522_v15 = vsel %vm2848_vm11, %v3521_v40, %v3520_v44  ;;  %v16740_v33 = vld [vmem:[%s22654_s5 + $0x130] sm:$0xf]  ;;  %v11026_v40 = vor.u32 %v16663_v42, %v16658_v37  ;;  %v13470_v8 = vld [vmem:[%s22654_s5 + $0x1b4] sm:$0xf0]  ;;  %v11018_v58 = vor.u32 %v16697_v36, %v16692_v14 }
 0x2fc   :  { %v3542_v13 = vsel %vm2836_vm7, %v3541_v31, %v3540_v43  ;;  %v11090_v31 = vor.u32 %v13474_v1, %v11089_v25  ;;  %v16759_v44 = vld [vmem:[%s22654_s5 + $0x134] sm:$0xf]  ;;  %v16768_v37 = vld [vmem:[%s22654_s5 + $0x138] sm:$0xf0]  ;;  %4136 = vmatpush.bf16.msra.mxu0 %v11038_v27  ;;  %v11082_v5 = vor.u32 %v13472_v38, %v11081_v50  ;;  %4166 = vmatpush.bf16.msra.mxu2 %v11094_v61  ;;  %v23495_v38 = vld [vmem:[#allocation143_spill] sm:$0xff]  ;;  %v23496_v50 = vrot.slane %v15840_v26, 7 }
 0x2fd   :  { %v3544_v55 = vsel %vm2839_vm8, %v3543_v39, %v3542_v13  ;;  %v11030_v13 = vor.u32 %v16678_v51, %v11027_v34  ;;  %v13469_v42 = vld [vmem:[%s22654_s5 + $0x1b4] sm:$0xf]  ;;  %v11022_v34 = vor.u32 %v16712_v60, %v16717_v18  ;;  %v23493_v51 = vld [vmem:[#allocation147_spill] sm:$0xff]  ;;  %v11086_v12 = vor.u32 %v13471_v19, %v11083_v41  ;;  %4079 = vmatpush.bf16.msra.mxu1 %v11026_v40 }
 0x2fe   :  { %v3546_v39 = vsel %vm2842_vm9, %v3545_v17, %v3544_v55  ;;  %v11075_v17 = vld [vmem:[%s22654_s5 + $0x1b8] sm:$0xf0]  ;;  %4108 = vmatpush.bf16.msra.mxu3 %v11090_v31  ;;  %v3555_v25 = vrot.slane %v23493_v51, 5  ;;  %v11010_v14 = vor.u32 %v16745_v56, %v16740_v33  ;;  %v11074_v36 = vor.u32 %v13470_v8, %v11073_v22  ;;  %v23498_v26 = vld [vmem:[#allocation159_spill] sm:$0xff]  ;;  %3799 = vmatmul.bf16.gmra.mxu1 %v16723_v53 }
 0x2ff   :  { %v3548_v20 = vsel %vm2845_vm10, %v3547_v16, %v3546_v39  ;;  %v11078_v55 = vor.u32 %v13469_v42, %v11075_v17  ;;  %v3552_v60 = vsel %vm2830_vm5, %v23496_v50, %v23495_v38  ;;  %v23497_v18 = vrot.slane %v15852_v23, 6  ;;  %3857 = vmatmul.bf16.gmra.mxu0 %v16723_v53  ;;  %v16927_v16 = vld [vmem:[%s22654_s5 + $0x104] sm:$0xf0]  ;;  %v11219_v48 = vld [vmem:[%s22654_s5 + $0xe8] sm:$0xf0] }
 0x300   :  { %v3550_v1 = vsel %vm2848_vm11, %v3549_v2, %v3548_v20  ;;  %v3557_v41 = vrot.slane %v15967_v28, 4  ;;  %v3559_v2 = vrot.slane %v15984_v63, 3  ;;  %4137 = vmatpush.bf16.msra.mxu0 %v11030_v13  ;;  %v3563_v56 = vrot.slane %v16036_v45, 1  ;;  %4167 = vmatpush.bf16.msra.mxu2 %v11086_v12  ;;  %v23554_v45 = vld [vmem:[#allocation46_spill] sm:$0xff] }
 0x301   :  { %v16783_v43 = vpack.c.b16 %v3550_v1, %v3522_v15  ;;  %v3554_v19 = vsel %vm2833_vm6, %v23497_v18, %v3552_v60  ;;  %v3561_v15 = vrot.slane %v16025_v52, 2  ;;  %v23499_v27 = vrot.slane %v16080_v11, 7  ;;  %4080 = vmatpush.bf16.msra.mxu1 %v11018_v58 }
 0x302   :  { %4109 = vmatpush.bf16.msra.mxu3 %v11082_v5  ;;  %v3556_v33 = vsel %vm2836_vm7, %v3555_v25, %v3554_v19  ;;  %v3581_v31 = vrot.slane %v16070_v35, 6  ;;  %v3583_v8 = vrot.slane %v16107_v46, 5  ;;  %v3585_v39 = vrot.slane %v16162_v49, 4  ;;  %v23500_v25 = vld [vmem:[#allocation144_spill] sm:$0xff]  ;;  %v16954_v35 = vld [vmem:[%s22654_s5 + $0x108] sm:$0xf0] }
 0x303   :  { %23494 = vst [vmem:[#allocation101_spill] sm:$0xff] %v16783_v43  ;;  %v3580_v40 = vsel %vm2830_vm5, %v23499_v27, %v23498_v26  ;;  %v3558_v22 = vsel %vm2839_vm8, %v3557_v41, %v3556_v33  ;;  %v3587_v13 = vrot.slane %v16185_v0, 3  ;;  %v3589_v17 = vrot.slane %v16189_v3, 2  ;;  %v13452_v33 = vld [vmem:[%s22654_s5 + $0x124] sm:$0xf0]  ;;  %10939 = vmatmul.msk.bf16.gmra.mxu3 %vm3222_vm12, %v16783_v43  ;;  %10943 = vmatmul.msk.bf16.gmra.mxu2 %vm3222_vm12, %v16783_v43 }
 0x304   :  { %v3560_v61 = vsel %vm2842_vm9, %v3559_v2, %v3558_v22  ;;  %v3582_v42 = vsel %vm2833_vm6, %v3581_v31, %v3580_v40  ;;  %v3591_v11 = vrot.slane %v16209_v47, 1  ;;  %v23501_v1 = vrot.slane %v15850_v4, 7  ;;  %4138 = vmatpush.bf16.msra.mxu0 %v11022_v34  ;;  %v16846_v26 = vld [vmem:[%s22654_s5 + $0x124] sm:$0xf]  ;;  %v16851_v27 = vld [vmem:[%s22654_s5 + $0x128] sm:$0xf0]  ;;  %4168 = vmatpush.bf16.msra.mxu2 %v11078_v55 }
 0x305   :  { %v3562_v20 = vsel %vm2845_vm10, %v3561_v15, %v3560_v61  ;;  %v3584_v5 = vsel %vm2836_vm7, %v3583_v8, %v3582_v42  ;;  %v3569_v38 = vrot.slane %v15860_v7, 5  ;;  %v23502_v58 = vrot.slane %v15856_v21, 6  ;;  %v11001_v15 = vld [vmem:[%s22654_s5 + $0x120] sm:$0xf]  ;;  %v23503_v22 = vld [vmem:[#allocation156_spill] sm:$0xff]  ;;  %4081 = vmatpush.bf16.msra.mxu1 %v11010_v14 }
 0x306   :  { %v3566_v12 = vsel %vm2830_vm5, %v23501_v1, %v23500_v25  ;;  %v3564_v50 = vsel %vm2848_vm11, %v3563_v56, %v3562_v20  ;;  %v3586_v60 = vsel %vm2839_vm8, %v3585_v39, %v3584_v5  ;;  %v3571_v19 = vrot.slane %v15982_v57, 4  ;;  %4110 = vmatpush.bf16.msra.mxu3 %v11074_v36  ;;  %v11065_v36 = vld [vmem:[%s22654_s5 + $0x1a0] sm:$0xf]  ;;  %v13468_v56 = vld [vmem:[%s22654_s5 + $0x1a4] sm:$0xf0]  ;;  %v23504_v39 = vld [vmem:[#allocation160_spill] sm:$0xff] }
 0x307   :  { %v3568_v18 = vsel %vm2833_vm6, %v23502_v58, %v3566_v12  ;;  %v3588_v4 = vsel %vm2842_vm9, %v3587_v13, %v3586_v60  ;;  %v3573_v2 = vrot.slane %v16018_v9, 3  ;;  %v3575_v34 = vrot.slane %v16031_v10, 2  ;;  %v13467_v42 = vld [vmem:[%s22654_s5 + $0x1a4] sm:$0xf]  ;;  %v11067_v20 = vld [vmem:[%s22654_s5 + $0x1a8] sm:$0xf0] }
 0x308   :  { %v3570_v41 = vsel %vm2836_vm7, %v3569_v38, %v3568_v18  ;;  %v3590_v40 = vsel %vm2845_vm10, %v3589_v17, %v3588_v4  ;;  %v3577_v8 = vrot.slane %v23503_v22, 1  ;;  %v23505_v13 = vrot.slane %v16082_v29, 7  ;;  %v16869_v55 = vld [vmem:[%s22654_s5 + $0x110] sm:$0xf]  ;;  %v16874_v17 = vld [vmem:[%s22654_s5 + $0x114] sm:$0xf0] }
 0x309   :  { %v3572_v31 = vsel %vm2839_vm8, %v3571_v19, %v3570_v41  ;;  %v16879_v29 = vld [vmem:[%s22654_s5 + $0x190] sm:$0xf]  ;;  %v16884_v5 = vld [vmem:[%s22654_s5 + $0x194] sm:$0xf0]  ;;  %v3592_v25 = vsel %vm2848_vm11, %v3591_v11, %v3590_v40  ;;  %v23507_v60 = vld [vmem:[#allocation163_spill] sm:$0xff] }
 0x30a   :  { %v3594_v61 = vsel %vm2830_vm5, %v23505_v13, %v23504_v39  ;;  %v3574_v1 = vsel %vm2842_vm9, %v3573_v2, %v3572_v31  ;;  %v23506_v12 = vld [vmem:[#allocation161_spill] sm:$0xff]  ;;  %v3597_v58 = vrot.slane %v23507_v60, 5  ;;  %v16893_v18 = vld [vmem:[%s22654_s5 + $0x114] sm:$0xf]  ;;  %v16914_v4 = vpack.c.b16 %v3592_v25, %v3564_v50  ;;  %v23510_v31 = vld [vmem:[#allocation170_spill] sm:$0xff] }
 0x30b   :  { %v3595_v38 = vrot.slane %v23506_v12, 6  ;;  %v16898_v19 = vld [vmem:[%s22654_s5 + $0x118] sm:$0xf0]  ;;  %v16903_v14 = vld [vmem:[%s22654_s5 + $0x194] sm:$0xf]  ;;  %v3576_v41 = vsel %vm2845_vm10, %v3575_v34, %v3574_v1  ;;  %v3601_v39 = vrot.slane %v23510_v31, 3  ;;  %v23511_v25 = vor.u32 %v16759_v44, %v16768_v37 }
 0x30c   :  { %v16908_v11 = vld [vmem:[%s22654_s5 + $0x198] sm:$0xf0]  ;;  %23508 = vst [vmem:[#allocation114_spill] sm:$0xff] %v16914_v4  ;;  %v23509_v2 = vld [vmem:[#allocation168_spill] sm:$0xff]  ;;  %v16922_v13 = vld [vmem:[%s22654_s5 + $0x100] sm:$0xf]  ;;  %v3578_v1 = vsel %vm2848_vm11, %v3577_v8, %v3576_v41  ;;  %v11006_v41 = vor.u32 %v16846_v26, %v16851_v27 }
 0x30d   :  { %v3599_v40 = vrot.slane %v23509_v2, 4  ;;  %v16932_v50 = vld [vmem:[%s22654_s5 + $0x180] sm:$0xf]  ;;  %v16937_v34 = vld [vmem:[%s22654_s5 + $0x184] sm:$0xf0]  ;;  %4139 = vmatpush.bf16.msra.mxu0 %v23511_v25  ;;  %v3596_v22 = vsel %vm2833_vm6, %v3595_v38, %v3594_v61  ;;  %v23512_v31 = vld [vmem:[#allocation172_spill] sm:$0xff]  ;;  %v11002_v61 = vor.u32 %v13452_v33, %v11001_v15  ;;  %v11066_v38 = vor.u32 %v13468_v56, %v11065_v36 }
 0x30e   :  { %v3603_v47 = vrot.slane %v23512_v31, 2  ;;  %v23513_v12 = vld [vmem:[#allocation174_spill] sm:$0xff]  ;;  %v16964_v37 = vld [vmem:[%s22654_s5 + $0x188] sm:$0xf0]  ;;  %v3598_v8 = vsel %vm2836_vm7, %v3597_v58, %v3596_v22  ;;  %v16972_v25 = vld [vmem:[%s22654_s5 + $0xf0] sm:$0xf]  ;;  %v11070_v33 = vor.u32 %v13467_v42, %v11067_v20  ;;  %v10994_v36 = vor.u32 %v16874_v17, %v16869_v55  ;;  %3804 = vmatmul.bf16.gmra.mxu1 %v16914_v4 }
 0x30f   :  { %v3605_v3 = vrot.slane %v23513_v12, 1  ;;  %v16949_v21 = vld [vmem:[%s22654_s5 + $0x104] sm:$0xf]  ;;  %v16977_v12 = vld [vmem:[%s22654_s5 + $0xf4] sm:$0xf0]  ;;  %v3600_v15 = vsel %vm2839_vm8, %v3599_v40, %v3598_v8  ;;  %v11058_v56 = vor.u32 %v16884_v5, %v16879_v29  ;;  %4082 = vmatpush.bf16.msra.mxu1 %v11002_v61  ;;  %4111 = vmatpush.bf16.msra.mxu3 %v11066_v38  ;;  %v10998_v20 = vor.u32 %v16893_v18, %v16898_v19  ;;  %v23514_v5 = vld [vmem:[#allocation55_spill] sm:$0xff] }
 0x310   :  { %v16959_v44 = vld [vmem:[%s22654_s5 + $0x184] sm:$0xf]  ;;  %v16982_v31 = vld [vmem:[%s22654_s5 + $0x170] sm:$0xf]  ;;  %v16992_v26 = vld [vmem:[%s22654_s5 + $0x174] sm:$0xf0]  ;;  %v3602_v42 = vsel %vm2842_vm9, %v3601_v39, %v3600_v15  ;;  %v11062_v55 = vor.u32 %v16903_v14, %v16908_v11  ;;  %4169 = vmatpush.bf16.msra.mxu2 %v11070_v33  ;;  %v10986_v18 = vor.u32 %v16927_v16, %v16922_v13  ;;  %v11050_v19 = vor.u32 %v16937_v34, %v16932_v50 }
 0x311   :  { %v16997_v27 = vld [vmem:[%s22654_s5 + $0xf4] sm:$0xf]  ;;  %v17002_v22 = vld [vmem:[%s22654_s5 + $0xf8] sm:$0xf0]  ;;  %v4581_v58 = vrot.slane %v23514_v5, 6  ;;  %v3604_v40 = vsel %vm2845_vm10, %v3603_v47, %v3602_v42  ;;  %4140 = vmatpush.bf16.msra.mxu0 %v11006_v41  ;;  %v10990_v8 = vor.u32 %v16949_v21, %v16954_v35  ;;  %v11054_v61 = vor.u32 %v16959_v44, %v16964_v37  ;;  %v23517_v21 = vld [vmem:[#allocation50_spill] sm:$0xff] }
 0x312   :  { %v17012_v17 = vld [vmem:[%s22654_s5 + $0x174] sm:$0xf]  ;;  %v17017_v29 = vld [vmem:[%s22654_s5 + $0x178] sm:$0xf0]  ;;  %v3606_v39 = vsel %vm2848_vm11, %v3605_v3, %v3604_v40  ;;  %v10978_v47 = vor.u32 %v16977_v12, %v16972_v25  ;;  %v11042_v16 = vor.u32 %v16992_v26, %v16982_v31  ;;  %v10982_v13 = vor.u32 %v16997_v27, %v17002_v22  ;;  %v23518_v34 = vld [vmem:[#allocation63_spill] sm:$0xff]  ;;  %3862 = vmatmul.bf16.gmra.mxu0 %v16914_v4 }
 0x313   :  { %v23515_v14 = vld [vmem:[#allocation56_spill] sm:$0xff]  ;;  %v17033_v38 = vpack.c.b16 %v3606_v39, %v3578_v1  ;;  %v11046_v3 = vor.u32 %v17012_v17, %v17017_v29  ;;  %4083 = vmatpush.bf16.msra.mxu1 %v10994_v36  ;;  %4112 = vmatpush.bf16.msra.mxu3 %v11058_v56  ;;  %v4582_v35 = vsel %vm2833_vm6, %v4581_v58, %v23517_v21  ;;  %v4585_v50 = vrot.slane %v23360_v6, 4  ;;  %v23519_v44 = vld [vmem:[#allocation65_spill] sm:$0xff]  ;;  %v23521_v22 = vld [vmem:[#allocation70_spill] sm:$0xff] }
 0x314   :  { %v4583_v11 = vrot.slane %v23515_v14, 5  ;;  %v4587_v12 = vrot.slane %v23387_v32, 3  ;;  %v4589_v1 = vrot.slane %v23518_v34, 2  ;;  %4170 = vmatpush.bf16.msra.mxu2 %v11062_v55  ;;  %v4591_v37 = vrot.slane %v23519_v44, 1  ;;  %v23520_v56 = vld [vmem:[#allocation80_spill] sm:$0xff]  ;;  %v23523_v17 = vld [vmem:[#allocation51_spill] sm:$0xff] }
 0x315   :  { %23516 = vst [vmem:[#allocation20_spill] sm:$0xff] %v17033_v38  ;;  %4141 = vmatpush.bf16.msra.mxu0 %v10998_v20  ;;  %v4609_v41 = vrot.slane %v23394_v62, 6  ;;  %v4611_v25 = vrot.slane %v23395_v54, 5  ;;  %v4613_v33 = vrot.slane %v23396_v59, 4  ;;  %v4615_v36 = vrot.slane %v23397_v30, 3  ;;  %v23522_v20 = vld [vmem:[#allocation84_spill] sm:$0xff]  ;;  %10940 = vmatmul.msk.bf16.gmra.mxu3 %vm3222_vm12, %v17033_v38 }
 0x316   :  { %v4584_v31 = vsel %vm2836_vm7, %v4583_v11, %v4582_v35  ;;  %v4617_v26 = vrot.slane %v23520_v56, 2  ;;  %v4619_v55 = vrot.slane %v23522_v20, 1  ;;  %v23524_v29 = vld [vmem:[#allocation52_spill] sm:$0xff]  ;;  %v23526_v21 = vld [vmem:[#allocation57_spill] sm:$0xff]  ;;  %10944 = vmatmul.msk.bf16.gmra.mxu2 %vm3222_vm12, %v17033_v38  ;;  %v23645_v44 = vld [vmem:[#allocation91_spill] sm:$0xff] }
 0x317   :  { %v4586_v15 = vsel %vm2839_vm8, %v4585_v50, %v4584_v31  ;;  %v4610_v42 = vsel %vm2833_vm6, %v4609_v41, %v23521_v22  ;;  %v23525_v58 = vrot.slane %v23524_v29, 6  ;;  %4113 = vmatpush.bf16.msra.mxu3 %v11050_v19  ;;  %v4597_v35 = vrot.slane %v23526_v21, 5  ;;  %v23527_v50 = vld [vmem:[#allocation59_spill] sm:$0xff]  ;;  %4084 = vmatpush.bf16.msra.mxu1 %v10986_v18  ;;  %v23532_v2 = vld [vmem:[#allocation73_spill] sm:$0xff]  ;;  %v23564_v38 = vld [vmem:[#allocation48_spill] sm:$0xff] }
 0x318   :  { %v4588_v27 = vsel %vm2842_vm9, %v4587_v12, %v4586_v15  ;;  %v4612_v39 = vsel %vm2836_vm7, %v4611_v25, %v4610_v42  ;;  %v4599_v12 = vrot.slane %v23527_v50, 4  ;;  %v23528_v15 = vld [vmem:[#allocation61_spill] sm:$0xff]  ;;  %4171 = vmatpush.bf16.msra.mxu2 %v11054_v61  ;;  %v23530_v25 = vld [vmem:[#allocation66_spill] sm:$0xff]  ;;  %v23531_v42 = vld [vmem:[#allocation71_spill] sm:$0xff]  ;;  %v23533_v0 = vrot.slane %v23532_v2, 6 }
 0x319   :  { %v4596_v40 = vsel %vm2833_vm6, %v23525_v58, %v23523_v17  ;;  %v4590_v11 = vsel %vm2845_vm10, %v4589_v1, %v4588_v27  ;;  %v4614_v41 = vsel %vm2839_vm8, %v4613_v33, %v4612_v39  ;;  %v4601_v22 = vrot.slane %v23528_v15, 3  ;;  %v23529_v17 = vld [vmem:[#allocation64_spill] sm:$0xff]  ;;  %4142 = vmatpush.bf16.msra.mxu0 %v10990_v8  ;;  %v23536_v61 = vld [vmem:[#allocation77_spill] sm:$0xff] }
 0x31a   :  { %v4592_v31 = vsel %vm2848_vm11, %v4591_v37, %v4590_v11  ;;  %v4603_v58 = vrot.slane %v23529_v17, 2  ;;  %v4616_v19 = vsel %vm2842_vm9, %v4615_v36, %v4614_v41  ;;  %v4598_v1 = vsel %vm2836_vm7, %v4597_v35, %v4596_v40  ;;  %v23534_v11 = vld [vmem:[#allocation75_spill] sm:$0xff]  ;;  %v23538_v35 = vld [vmem:[#allocation81_spill] sm:$0xff] }
 0x31b   :  { %v4605_v27 = vrot.slane %v23530_v25, 1  ;;  %v4624_v18 = vsel %vm2833_vm6, %v23533_v0, %v23531_v42  ;;  %v4618_v37 = vsel %vm2845_vm10, %v4617_v26, %v4616_v19  ;;  %v4600_v33 = vsel %vm2839_vm8, %v4599_v12, %v4598_v1  ;;  %v23537_v40 = vld [vmem:[#allocation79_spill] sm:$0xff]  ;;  %4085 = vmatpush.bf16.msra.mxu1 %v10978_v47  ;;  %4114 = vmatpush.bf16.msra.mxu3 %v11042_v16  ;;  %v23540_v42 = vld [vmem:[#allocation85_spill] sm:$0xff] }
 0x31c   :  { %v23535_v39 = vrot.slane %v23534_v11, 5  ;;  %v4627_v60 = vrot.slane %v23536_v61, 4  ;;  %v4620_v36 = vsel %vm2848_vm11, %v4619_v55, %v4618_v37  ;;  %v4602_v0 = vsel %vm2842_vm9, %v4601_v22, %v4600_v33  ;;  %4172 = vmatpush.bf16.msra.mxu2 %v11046_v3  ;;  %v23541_v37 = vld [vmem:[#allocation82_spill] sm:$0xff]  ;;  %v23542_v22 = vld [vmem:[#allocation47_spill] sm:$0xff]  ;;  %v17113_v3 = vpop.f32.mrf.mxu0 }
 0x31d   :  { %v4629_v26 = vrot.slane %v23537_v40, 3  ;;  %v4631_v12 = vrot.slane %v23538_v35, 2  ;;  %v17093_v41 = vpack.c.b16 %v4620_v36, %v4592_v31  ;;  %v4604_v19 = vsel %vm2845_vm10, %v4603_v58, %v4602_v0  ;;  %4143 = vmatpush.bf16.msra.mxu0 %v10982_v13  ;;  %v23544_v31 = vld [vmem:[#allocation62_spill] sm:$0xff]  ;;  %v23545_v58 = vld [vmem:[#allocation32_spill] sm:$0xff]  ;;  %v17111_v13 = vpop.f32.mrf.mxu1  ;;  %23547 = vst [vmem:[#allocation117_spill] sm:$0xff] %v17113_v3 }
 0x31e   :  { %v4626_v8 = vsel %vm2836_vm7, %v23535_v39, %v4624_v18  ;;  %v4633_v18 = vrot.slane %v23540_v42, 1  ;;  %v23543_v33 = vrot.slane %v23542_v22, 4  ;;  %v4606_v47 = vsel %vm2848_vm11, %v4605_v27, %v4604_v19  ;;  %v23597_v3 = vld [vmem:[#allocation60_spill] sm:$0xff] }
 0x31f   :  { %23539 = vst [vmem:[#allocation22_spill] sm:$0xff] %v17093_v41  ;;  %v4628_v1 = vsel %vm2839_vm8, %v4627_v60, %v4626_v8  ;;  %v17107_v36 = vadd.f32 %v23545_v58, %v23544_v31  ;;  %v23548_v8 = vld [vmem:[#allocation38_spill] sm:$0xff]  ;;  %v13394_v41 = vld [vmem:[%s22654_s5 + $0x44] sm:$0xf0]  ;;  %v1155_v4 = vrot.slane %v23564_v38, 6 }
 0x320   :  { %v4630_v55 = vsel %vm2842_vm9, %v4629_v26, %v4628_v1  ;;  %v1688_v39 = vmax.f32 %v23543_v33, %v23541_v37  ;;  %v17118_v26 = vpop.f32.mrf.mxu3  ;;  %v5555_v1 = vrot.slane %v23524_v29, 7  ;;  %v5557_v37 = vrot.slane %v23526_v21, 6  ;;  %v11129_v38 = vld [vmem:[%s22654_s5 + $0x30] sm:$0xf] }
 0x321   :  { %v4632_v49 = vsel %vm2845_vm10, %v4631_v12, %v4630_v55  ;;  %v17120_v12 = vpop.f32.mrf.mxu2  ;;  %v22908_v27 = vmax.f32 %v17107_v36, 0.0  ;;  %v23551_v55 = vld [vmem:[#allocation41_spill] sm:$0xff] }
 0x322   :  { %v4634_v16 = vsel %vm2848_vm11, %v4633_v18, %v4632_v49  ;;  %v17116_v0 = vadd.f32 %v23548_v8, %v1688_v39  ;;  %23549 = vst [vmem:[#allocation130_spill] sm:$0xff] %v17120_v12  ;;  %v23550_v49 = vld [vmem:[#allocation35_spill] sm:$0xff]  ;;  %4086 = vmatmul.bf16.vlgmr.msra.gmra.mxu1 %v23551_v55  ;;  %4144 = vmatmul.bf16.vlgmr.msra.gmra.mxu0 %v23551_v55  ;;  %v23553_v55 = vld [vmem:[#allocation44_spill] sm:$0xff] }
 0x323   :  { %v17109_v60 = vpack.c.b16 %v4634_v16, %v4606_v47  ;;  %v22913_v19 = vrot.slane %v23550_v49, 6  ;;  %v5431_v22 = vperm.slane %v22908_v27, 2  ;;  %v5583_v47 = vrot.slane %v23532_v2, 7 }
 0x324   :  { %v5585_v16 = vrot.slane %v23534_v11, 6  ;;  %v3312_v18 = vpop.f32.mrf.mxu0  ;;  %v23552_v10 = vmax.f32 %v17116_v0, 0.0  ;;  %v5556_v57 = vsel %vm2830_vm5, %v5555_v1, %v23553_v55  ;;  %v13400_v1 = vld [vmem:[%s22654_s5 + $0x74] sm:$0xf0]  ;;  %v13399_v55 = vld [vmem:[%s22654_s5 + $0x74] sm:$0xf] }
 0x325   :  { %23546 = vst [vmem:[#allocation115_spill] sm:$0xff] %v17109_v60  ;;  %v17133_v33 = vrot.slane %v22913_v19, 9  ;;  %v3254_v31 = vpop.f32.mrf.mxu1  ;;  %v5559_v19 = vrot.slane %v23527_v50, 5  ;;  %11095 = vmatmul.msk.bf16.vlgmr.msra.gmra.mxu3 %vm3222_vm12, %v23554_v45  ;;  %v5463_v23 = vpack.c.bf16 %v5431_v22, %v5431_v22  ;;  %v13414_v22 = vld [vmem:[%s22654_s5 + $0xe4] sm:$0xf0]  ;;  %v5584_v60 = vsel %vm2830_vm5, %v5583_v47, %v23557_v24 }
 0x326   :  { %v5433_v46 = vperm.slane %v23552_v10, 2  ;;  %11099 = vmatmul.msk.bf16.vlgmr.msra.gmra.mxu2 %vm3222_vm12, %v23554_v45  ;;  %v11161_v10 = vld [vmem:[%s22654_s5 + $0x70] sm:$0xf]  ;;  %v11163_v45 = vld [vmem:[%s22654_s5 + $0x78] sm:$0xf0] }
 0x327   :  { %v11162_v63 = vor.u32 %v13400_v1, %v11161_v10  ;;  %v13397_v10 = vld [vmem:[%s22654_s5 + $0x64] sm:$0xf]  ;;  %v5558_v1 = vsel %vm2833_vm6, %v5557_v37, %v5556_v57  ;;  %v13396_v37 = vld [vmem:[%s22654_s5 + $0x54] sm:$0xf0]  ;;  %v11147_v47 = vld [vmem:[%s22654_s5 + $0x58] sm:$0xf0] }
 0x328   :  { %v3283_v27 = vpop.f32.mrf.mxu3  ;;  %v5465_v28 = vpack.c.bf16 %v5433_v46, %v5433_v46  ;;  %v11145_v46 = vld [vmem:[%s22654_s5 + $0x50] sm:$0xf]  ;;  %v13412_v24 = vld [vmem:[%s22654_s5 + $0xd4] sm:$0xf0] }
 0x329   :  { %v3341_v9 = vpop.f32.mrf.mxu2  ;;  %v17148_v39 = vadd.f32 %v3283_v27, %v3254_v31  ;;  %v13398_v27 = vld [vmem:[%s22654_s5 + $0x64] sm:$0xf0]  ;;  %v11217_v31 = vld [vmem:[%s22654_s5 + $0xe0] sm:$0xf]  ;;  %4344 = vmatpush.bf16.msrb.mxu1 %v11162_v63 }
 0x32a   :  { %v17150_v52 = vadd.f32 %v3341_v9, %v3312_v18  ;;  %v11153_v9 = vld [vmem:[%s22654_s5 + $0x60] sm:$0xf]  ;;  %v11166_v18 = vor.u32 %v13399_v55, %v11163_v45  ;;  %v11218_v51 = vor.u32 %v13414_v22, %v11217_v31  ;;  %v11155_v55 = vld [vmem:[%s22654_s5 + $0x68] sm:$0xf0]  ;;  %v13413_v45 = vld [vmem:[%s22654_s5 + $0xe4] sm:$0xf] }
 0x32b   :  { %23555 = vst [vmem:[#allocation131_spill] sm:$0xff] %v17148_v39  ;;  %v11154_v7 = vor.u32 %v13398_v27, %v11153_v9  ;;  %v11158_v57 = vor.u32 %v13397_v10, %v11155_v55  ;;  %v11222_v63 = vor.u32 %v13413_v45, %v11219_v48  ;;  %v11209_v9 = vld [vmem:[%s22654_s5 + $0xd0] sm:$0xf]  ;;  %v17200_v27 = vunpack.c.l.b16 %v5463_v23  ;;  %v13395_v48 = vld [vmem:[%s22654_s5 + $0x54] sm:$0xf] }
 0x32c   :  { %23556 = vst [vmem:[#allocation143_spill] sm:$0xff] %v17150_v52  ;;  %4402 = vmatpush.bf16.msrb.mxu0 %v11166_v18  ;;  %4374 = vmatpush.bf16.msrb.mxu3 %v11218_v51  ;;  %v5560_v18 = vsel %vm2836_vm7, %v5559_v19, %v5558_v1  ;;  %v5565_v31 = vrot.slane %v23530_v25, 2  ;;  %v11210_v23 = vor.u32 %v13412_v24, %v11209_v9  ;;  %v13411_v51 = vld [vmem:[%s22654_s5 + $0xd4] sm:$0xf]  ;;  %v11211_v22 = vld [vmem:[%s22654_s5 + $0xd8] sm:$0xf0]  ;;  %v17221_v45 = vunpack.c.l.b16 %v5465_v28 }
 0x32d   :  { %23558 = vst [vmem:[#allocation159_spill] sm:$0xff] %v17200_v27  ;;  %4432 = vmatpush.bf16.msrb.mxu2 %v11222_v63  ;;  %v5561_v10 = vrot.slane %v23528_v15, 4  ;;  %v5586_v55 = vsel %vm2833_vm6, %v5585_v16, %v5584_v60  ;;  %v5591_v19 = vrot.slane %v23538_v35, 3  ;;  %4345 = vmatpush.bf16.msrb.mxu1 %v11154_v7  ;;  %v11146_v1 = vor.u32 %v13396_v37, %v11145_v46  ;;  %v11137_v24 = vld [vmem:[%s22654_s5 + $0x40] sm:$0xf]  ;;  %v23584_v25 = vld [vmem:[#allocation113_spill] sm:$0xff] }
 0x32e   :  { %23559 = vst [vmem:[#allocation144_spill] sm:$0xff] %v17221_v45  ;;  %v11214_v63 = vor.u32 %v13411_v51, %v11211_v22  ;;  %v11150_v9 = vor.u32 %v13395_v48, %v11147_v47  ;;  %v11201_v28 = vld [vmem:[%s22654_s5 + $0xc0] sm:$0xf]  ;;  %v13410_v7 = vld [vmem:[%s22654_s5 + $0xc4] sm:$0xf0]  ;;  %v23560_v46 = vrot.slane %v23529_v17, 3 }
 0x32f   :  { %v5562_v60 = vsel %vm2839_vm8, %v5561_v10, %v5560_v18  ;;  %v13393_v16 = vld [vmem:[%s22654_s5 + $0x44] sm:$0xf]  ;;  %v23561_v48 = vrot.slane %v23536_v61, 5  ;;  %v23562_v18 = vrot.slane %v23550_v49, 6  ;;  %v5593_v51 = vrot.slane %v23540_v42, 2  ;;  %v23585_v17 = vld [vmem:[#allocation149_spill] sm:$0xff] }
 0x330   :  { %4403 = vmatpush.bf16.msrb.mxu0 %v11158_v57  ;;  %4375 = vmatpush.bf16.msrb.mxu3 %v11210_v23  ;;  %v11139_v57 = vld [vmem:[%s22654_s5 + $0x48] sm:$0xf0]  ;;  %v5564_v37 = vsel %vm2842_vm9, %v23560_v46, %v5562_v60  ;;  %v11202_v22 = vor.u32 %v13410_v7, %v11201_v28  ;;  %v13409_v10 = vld [vmem:[%s22654_s5 + $0xc4] sm:$0xf]  ;;  %v5589_v46 = vrot.slane %v23537_v40, 4  ;;  %v11138_v49 = vor.u32 %v13394_v41, %v11137_v24  ;;  %v23565_v41 = vld [vmem:[#allocation36_spill] sm:$0xff]  ;;  %v17435_v43 = vpop.f32.mrf.mxu3 }
 0x331   :  { %v5588_v47 = vsel %vm2836_vm7, %v23561_v48, %v5586_v55  ;;  %v1677_v23 = vmax.f32 %v23562_v18, %v17133_v33  ;;  %4433 = vmatpush.bf16.msrb.mxu2 %v11214_v63  ;;  %v11203_v60 = vld [vmem:[%s22654_s5 + $0xc8] sm:$0xf0]  ;;  %v5567_v55 = vrot.slane %v17200_v27, 1  ;;  %v5595_v48 = vrot.slane %v17221_v45, 1  ;;  %4346 = vmatpush.bf16.msrb.mxu1 %v11146_v1  ;;  %v23563_v18 = vld [vmem:[#allocation118_spill] sm:$0xff]  ;;  %23589 = vst [vmem:[#allocation51_spill] sm:$0xff] %v17435_v43 }
 0x332   :  { %v11206_v33 = vor.u32 %v13409_v10, %v11203_v60  ;;  %4091 = vmatmul.bf16.gmra.mxu1 %v23563_v18  ;;  %v5566_v63 = vsel %vm2845_vm10, %v5565_v31, %v5564_v37  ;;  %v5590_v28 = vsel %vm2839_vm8, %v5589_v46, %v5588_v47  ;;  %4149 = vmatmul.bf16.gmra.mxu0 %v23563_v18  ;;  %v23566_v37 = vld [vmem:[#allocation16_spill] sm:$0xff]  ;;  %v13408_v47 = vld [vmem:[%s22654_s5 + $0xb4] sm:$0xf0]  ;;  %v13390_v18 = vld [vmem:[%s22654_s5 + $0x24] sm:$0xf0] }
 0x333   :  { %v11142_v7 = vor.u32 %v13393_v16, %v11139_v57  ;;  %v5592_v15 = vsel %vm2842_vm9, %v5591_v19, %v5590_v28  ;;  %v17270_v24 = vadd.f32 %v23565_v41, %v1677_v23  ;;  %v11193_v19 = vld [vmem:[%s22654_s5 + $0xb0] sm:$0xf]  ;;  %v13391_v23 = vld [vmem:[%s22654_s5 + $0x34] sm:$0xf]  ;;  %v23587_v40 = vld [vmem:[#allocation127_spill] sm:$0xff] }
 0x334   :  { %4404 = vmatpush.bf16.msrb.mxu0 %v11150_v9  ;;  %4376 = vmatpush.bf16.msrb.mxu3 %v11202_v22  ;;  %v5594_v1 = vsel %vm2845_vm10, %v5593_v51, %v5592_v15  ;;  %v5568_v9 = vsel %vm2848_vm11, %v5567_v55, %v5566_v63  ;;  %v13392_v15 = vld [vmem:[%s22654_s5 + $0x34] sm:$0xf0]  ;;  %v11131_v51 = vld [vmem:[%s22654_s5 + $0x38] sm:$0xf0]  ;;  %v10586_v22 = vrot.slane %v1155_v4, 9  ;;  %v11194_v10 = vor.u32 %v13408_v47, %v11193_v19  ;;  %v23594_v35 = vld [vmem:[#allocation31_spill] sm:$0xff] }
 0x335   :  { %4434 = vmatpush.bf16.msrb.mxu2 %v11206_v33  ;;  %4347 = vmatpush.bf16.msrb.mxu1 %v11138_v49  ;;  %v5596_v31 = vsel %vm2848_vm11, %v5595_v48, %v5594_v1  ;;  %v11130_v57 = vor.u32 %v13392_v15, %v11129_v38  ;;  %v11134_v60 = vor.u32 %v13391_v23, %v11131_v51  ;;  %v13407_v46 = vld [vmem:[%s22654_s5 + $0xb4] sm:$0xf]  ;;  %v11195_v55 = vld [vmem:[%s22654_s5 + $0xb8] sm:$0xf0]  ;;  %v1893_v48 = vmax.f32 %v17270_v24, 0.0 }
 0x336   :  { %11096 = vmatmul.msk.bf16.gmra.mxu3 %vm3222_vm12, %v23566_v37  ;;  %11100 = vmatmul.msk.bf16.gmra.mxu2 %vm3222_vm12, %v23566_v37  ;;  %v17287_v16 = vpack.c.b16 %v5596_v31, %v5568_v9  ;;  %v11198_v49 = vor.u32 %v13407_v46, %v11195_v55  ;;  %v11121_v33 = vld [vmem:[%s22654_s5 + $0x20] sm:$0xf]  ;;  %v13389_v1 = vld [vmem:[%s22654_s5 + $0x24] sm:$0xf]  ;;  %v11123_v9 = vld [vmem:[%s22654_s5 + $0x28] sm:$0xf0]  ;;  %v1689_v31 = vmax.f32 %v1155_v4, %v10586_v22 }
 0x337   :  { %v11185_v63 = vld [vmem:[%s22654_s5 + $0xa0] sm:$0xf]  ;;  %v11122_v28 = vor.u32 %v13390_v18, %v11121_v33  ;;  %v11126_v38 = vor.u32 %v13389_v1, %v11123_v9  ;;  %v13405_v15 = vld [vmem:[%s22654_s5 + $0xa4] sm:$0xf]  ;;  %v11187_v19 = vld [vmem:[%s22654_s5 + $0xa8] sm:$0xf0] }
 0x338   :  { %23567 = vst [vmem:[#allocation160_spill] sm:$0xff] %v17287_v16  ;;  %4405 = vmatpush.bf16.msrb.mxu0 %v11142_v7  ;;  %4377 = vmatpush.bf16.msrb.mxu3 %v11194_v10  ;;  %v13406_v7 = vld [vmem:[%s22654_s5 + $0xa4] sm:$0xf0]  ;;  %v11190_v47 = vor.u32 %v13405_v15, %v11187_v19  ;;  %v13388_v4 = vld [vmem:[%s22654_s5 + $0x14] sm:$0xf0]  ;;  %v6393_v33 = vperm.slane %v1893_v48, 2 }
 0x339   :  { %4348 = vmatpush.bf16.msrb.mxu1 %v11130_v57  ;;  %4435 = vmatpush.bf16.msrb.mxu2 %v11198_v49  ;;  %v11186_v37 = vor.u32 %v13406_v7, %v11185_v63  ;;  %v11113_v57 = vld [vmem:[%s22654_s5 + $0x10] sm:$0xf]  ;;  %v13404_v51 = vld [vmem:[%s22654_s5 + $0x94] sm:$0xf0]  ;;  %v11115_v46 = vld [vmem:[%s22654_s5 + $0x18] sm:$0xf0] }
 0x33a   :  { %v11177_v23 = vld [vmem:[%s22654_s5 + $0x90] sm:$0xf]  ;;  %v11114_v22 = vor.u32 %v13388_v4, %v11113_v57  ;;  %v13403_v55 = vld [vmem:[%s22654_s5 + $0x94] sm:$0xf]  ;;  %v11179_v49 = vld [vmem:[%s22654_s5 + $0x98] sm:$0xf0] }
 0x33b   :  { %v11178_v10 = vor.u32 %v13404_v51, %v11177_v23  ;;  %v23568_v18 = vld [vmem:[#allocation45_spill] sm:$0xff]  ;;  %v11182_v7 = vor.u32 %v13403_v55, %v11179_v49  ;;  %v11105_v9 = vld [vmem:[%s22654_s5] sm:$0xf]  ;;  %v13402_v15 = vld [vmem:[%s22654_s5 + $0x84] sm:$0xf0]  ;;  %v17387_v55 = vpop.f32.mrf.mxu0 }
 0x33c   :  { %4406 = vmatpush.bf16.msrb.mxu0 %v11134_v60  ;;  %4378 = vmatpush.bf16.msrb.mxu3 %v11186_v37  ;;  %v13387_v60 = vld [vmem:[%s22654_s5 + $0x14] sm:$0xf]  ;;  %v17356_v63 = vadd.f32 %v23568_v18, %v1689_v31  ;;  %v23570_v1 = vld [vmem:[#allocation29_spill] sm:$0xff]  ;;  %v13386_v37 = vld [vmem:[%s22654_s5 + $0x4] sm:$0xf0]  ;;  %23572 = vst [vmem:[#allocation50_spill] sm:$0xff] %v17387_v55 }
 0x33d   :  { %4349 = vmatpush.bf16.msrb.mxu1 %v11122_v28  ;;  %4436 = vmatpush.bf16.msrb.mxu2 %v11190_v47  ;;  %v11118_v28 = vor.u32 %v13387_v60, %v11115_v46  ;;  %v11106_v31 = vor.u32 %v13386_v37, %v11105_v9  ;;  %v13385_v19 = vld [vmem:[%s22654_s5 + $0x4] sm:$0xf]  ;;  %v11107_v57 = vld [vmem:[%s22654_s5 + $0x8] sm:$0xf0]  ;;  %v6425_v47 = vpack.c.bf16 %v6393_v33, %v6393_v33  ;;  %v17385_v46 = vpop.f32.mrf.mxu1  ;;  %v23573_v49 = vld [vmem:[#allocation28_spill] sm:$0xff] }
 0x33e   :  { %23569 = vst [vmem:[#allocation55_spill] sm:$0xff] %v17356_v63  ;;  %v22931_v4 = vmax.f32 %v17356_v63, 0.0  ;;  %v11110_v51 = vor.u32 %v13385_v19, %v11107_v57  ;;  %v23574_v33 = vld [vmem:[#allocation67_spill] sm:$0xff]  ;;  %v17407_v57 = vperm.slane %v1893_v48, 0  ;;  %v23580_v24 = vld [vmem:[#allocation97_spill] sm:$0xff]  ;;  %v1235_v63 = vrot.slane %v23587_v40, 2 }
 0x33f   :  { %23571 = vst [vmem:[#allocation56_spill] sm:$0xff] %v17385_v46  ;;  %v17395_v9 = vunpack.c.l.b16 %v6425_v47  ;;  %v23578_v47 = vmax.f32 %v17116_v0, 0.0  ;;  %v1193_v48 = vrot.slane %v23580_v24, 2  ;;  %v1256_v0 = vrot.slane %v23585_v17, 2  ;;  %v23591_v17 = vld [vmem:[#allocation150_spill] sm:$0xff] }
 0x340   :  { %4407 = vmatpush.bf16.msrb.mxu0 %v11126_v38  ;;  %4379 = vmatpush.bf16.msrb.mxu3 %v11178_v10  ;;  %v11169_v38 = vld [vmem:[%s22654_s5 + $0x80] sm:$0xf]  ;;  %v11171_v10 = vld [vmem:[%s22654_s5 + $0x88] sm:$0xf0]  ;;  %v6395_v37 = vperm.slane %v22931_v4, 2 }
 0x341   :  { %4350 = vmatpush.bf16.msrb.mxu1 %v11114_v22  ;;  %4437 = vmatpush.bf16.msrb.mxu2 %v11182_v7  ;;  %v11170_v23 = vor.u32 %v13402_v15, %v11169_v38  ;;  %v13401_v22 = vld [vmem:[%s22654_s5 + $0x84] sm:$0xf]  ;;  %v23575_v7 = vld [vmem:[#allocation68_spill] sm:$0xff]  ;;  %23576 = vst [vmem:[#allocation63_spill] sm:$0xff] %v17395_v9  ;;  %v23577_v15 = vmax.f32 %v17107_v36, 0.0 }
 0x342   :  { %4096 = vmatmul.bf16.gmra.mxu1 %v23570_v1  ;;  %4154 = vmatmul.bf16.gmra.mxu0 %v23570_v1  ;;  %v11174_v60 = vor.u32 %v13401_v22, %v11171_v10  ;;  %v1174_v1 = vrot.slane %v23575_v7, 4  ;;  %v17412_v22 = vperm.slane %v23578_v47, 0  ;;  %v23579_v10 = vld [vmem:[#allocation69_spill] sm:$0xff]  ;;  %v23582_v47 = vld [vmem:[#allocation98_spill] sm:$0xff]  ;;  %v23588_v7 = vld [vmem:[#allocation19_spill] sm:$0xff] }
 0x343   :  { %v17403_v19 = vperm.slane %v23577_v15, 0  ;;  %v6427_v15 = vpack.c.bf16 %v6395_v37, %v6395_v37  ;;  %v1195_v38 = vrot.slane %v23582_v47, 4  ;;  %v1237_v55 = vrot.slane %v23588_v7, 4  ;;  %v23593_v47 = vld [vmem:[#allocation177_spill] sm:$0xff] }
 0x344   :  { %4408 = vmatpush.bf16.msrb.mxu0 %v11118_v28  ;;  %v1172_v28 = vrot.slane %v23574_v33, 2  ;;  %4380 = vmatpush.bf16.msrb.mxu3 %v11170_v23  ;;  %v10597_v36 = vrot.slane %v1174_v1, 9  ;;  %v1218_v23 = vrot.slane %v23584_v25, 6  ;;  %v10644_v7 = vrot.slane %v1256_v0, 9 }
 0x345   :  { %4351 = vmatpush.bf16.msrb.mxu1 %v11106_v31  ;;  %4438 = vmatpush.bf16.msrb.mxu2 %v11174_v60  ;;  %v23581_v31 = vld [vmem:[#allocation15_spill] sm:$0xff]  ;;  %v17430_v50 = vunpack.c.l.b16 %v6427_v15  ;;  %v10609_v61 = vrot.slane %v1195_v38, 9  ;;  %v10633_v52 = vrot.slane %v1237_v55, 9 }
 0x346   :  { %11097 = vmatmul.msk.bf16.gmra.mxu3 %vm3222_vm12, %v23573_v49  ;;  %11101 = vmatmul.msk.bf16.gmra.mxu2 %vm3222_vm12, %v23573_v49  ;;  %v10596_v33 = vrot.slane %v1172_v28, 9  ;;  %v1214_v4 = vrot.slane %v23581_v31, 2  ;;  %v1700_v31 = vmax.f32 %v1174_v1, %v10597_v36  ;;  %v23592_v36 = vld [vmem:[#allocation151_spill] sm:$0xff]  ;;  %v10622_v40 = vrot.slane %v1218_v23, 9 }
 0x347   :  { %23586 = vst [vmem:[#allocation70_spill] sm:$0xff] %v17430_v50  ;;  %v1260_v15 = vrot.slane %v23592_v36, 6  ;;  %v10632_v36 = vrot.slane %v1235_v63, 9 }
 0x348   :  { %4409 = vmatpush.bf16.msrb.mxu0 %v11110_v51  ;;  %v1176_v51 = vrot.slane %v23579_v10, 6  ;;  %v23583_v10 = vld [vmem:[#allocation112_spill] sm:$0xff]  ;;  %v1699_v27 = vmax.f32 %v1172_v28, %v10596_v33  ;;  %v10620_v60 = vrot.slane %v1214_v4, 9  ;;  %v17437_v28 = vpop.f32.mrf.mxu2  ;;  %v1258_v33 = vrot.slane %v23591_v17, 4 }
 0x349   :  { %v1216_v16 = vrot.slane %v23583_v10, 4  ;;  %v10608_v10 = vrot.slane %v1193_v48, 9  ;;  %23590 = vst [vmem:[#allocation52_spill] sm:$0xff] %v17437_v28  ;;  %v17445_v53 = vadd.f32 %v23545_v58, %v1700_v31  ;;  %v1712_v17 = vmax.f32 %v1195_v38, %v10609_v61 }
 0x34a   :  { %v10598_v37 = vrot.slane %v1176_v51, 9  ;;  %v3259_v9 = vpop.f32.mrf.mxu1  ;;  %v3317_v24 = vpop.f32.mrf.mxu0  ;;  %v1819_v46 = vadd.f32 %v23594_v35, %v1699_v27  ;;  %v1723_v25 = vmax.f32 %v1214_v4, %v10620_v60  ;;  %v10645_v31 = vrot.slane %v1258_v33, 9 }
 0x34b   :  { %v10621_v49 = vrot.slane %v1216_v16, 9  ;;  %v1711_v43 = vmax.f32 %v1193_v48, %v10608_v10  ;;  %v10646_v12 = vrot.slane %v1260_v15, 9  ;;  %v1747_v38 = vmax.f32 %v1256_v0, %v10644_v7  ;;  %v23599_v10 = vld [vmem:[#allocation37_spill] sm:$0xff] }
 0x34c   :  { %v1701_v1 = vmax.f32 %v1176_v51, %v10598_v37  ;;  %v23595_v51 = vld [vmem:[#allocation14_spill] sm:$0xff]  ;;  %v1915_v48 = vmax.f32 %v1819_v46, 0.0  ;;  %v17465_v28 = vadd.f32 %v23548_v8, %v1712_v17  ;;  %v1735_v50 = vmax.f32 %v1235_v63, %v10632_v36 }
 0x34d   :  { %v1277_v37 = vrot.slane %v23595_v51, 2  ;;  %v1724_v42 = vmax.f32 %v1216_v16, %v10621_v49  ;;  %v1725_v16 = vmax.f32 %v1218_v23, %v10622_v40  ;;  %v23598_v49 = vld [vmem:[#allocation99_spill] sm:$0xff]  ;;  %v1843_v51 = vadd.f32 %v23594_v35, %v1723_v25  ;;  %v23611_v36 = vld [vmem:[#allocation166_spill] sm:$0xff] }
 0x34e   :  { %v17452_v27 = vadd.f32 %v23565_v41, %v1701_v1  ;;  %v17461_v1 = vadd.f32 %v23599_v10, %v1711_v43  ;;  %v1736_v46 = vmax.f32 %v1237_v55, %v10633_v52  ;;  %v1748_v23 = vmax.f32 %v1258_v33, %v10645_v31 }
 0x34f   :  { %v10656_v39 = vrot.slane %v1277_v37, 9  ;;  %v1749_v0 = vmax.f32 %v1260_v15, %v10646_v12  ;;  %v17475_v25 = vperm.slane %v1915_v48, 0  ;;  %v17478_v17 = vadd.f32 %v23565_v41, %v1725_v16 }
 0x350   :  { %23596 = vst [vmem:[#allocation57_spill] sm:$0xff] %v17452_v27  ;;  %v23602_v52 = vrot.slane %v23598_v49, 6  ;;  %v1939_v55 = vmax.f32 %v1843_v51, 0.0  ;;  %v17488_v33 = vadd.f32 %v23599_v10, %v1735_v50  ;;  %v17491_v15 = vadd.f32 %v23548_v8, %v1736_v46  ;;  %v23608_v50 = vld [vmem:[#allocation164_spill] sm:$0xff]  ;;  %v11377_v8 = vld [vmem:[%s22653_s4 + $0x2c8] sm:$0xf0] }
 0x351   :  { %23601 = vst [vmem:[#allocation73_spill] sm:$0xff] %v17478_v17  ;;  %v1759_v12 = vmax.f32 %v1277_v37, %v10656_v39  ;;  %v17496_v31 = vadd.f32 %v23545_v58, %v1748_v23  ;;  %v23622_v17 = vld [vmem:[#allocation86_spill] sm:$0xff] }
 0x352   :  { %4101 = vmatmul.bf16.gmra.mxu1 %v23593_v47  ;;  %4159 = vmatmul.bf16.gmra.mxu0 %v23593_v47  ;;  %v3261_v4 = vpop.f32.mrf.mxu1  ;;  %v3319_v60 = vpop.f32.mrf.mxu0  ;;  %v17481_v47 = vperm.slane %v1915_v48, 2  ;;  %v10610_v63 = vrot.slane %v23602_v52, 9  ;;  %23604 = vst [vmem:[#allocation75_spill] sm:$0xff] %v17491_v15  ;;  %v17499_v48 = vadd.f32 %v23565_v41, %v1749_v0  ;;  %v17504_v46 = vperm.slane %v1939_v55, 0  ;;  %v13503_v15 = vld [vmem:[%s22653_s4 + $0x2c4] sm:$0xf] }
 0x353   :  { %23605 = vst [vmem:[#allocation82_spill] sm:$0xff] %v17496_v31  ;;  %v17506_v52 = vperm.slane %v1939_v55, 2 }
 0x354   :  { %23606 = vst [vmem:[#allocation47_spill] sm:$0xff] %v17499_v48 }
 0x356   :  { %11098 = vmatmul.msk.bf16.gmra.mxu3 %vm3222_vm12, %v23597_v3  ;;  %11102 = vmatmul.msk.bf16.gmra.mxu2 %vm3222_vm12, %v23597_v3  ;;  %v17468_v3 = vadd.f32 %v23545_v58, %v1724_v42  ;;  %v3288_v45 = vpop.f32.mrf.mxu3  ;;  %v3346_v61 = vpop.f32.mrf.mxu2  ;;  %v1867_v42 = vadd.f32 %v23594_v35, %v1747_v38  ;;  %v23610_v58 = vld [vmem:[#allocation165_spill] sm:$0xff]  ;;  %v11319_v38 = vld [vmem:[%s22653_s4 + $0x250] sm:$0xf] }
 0x357   :  { %v17470_v40 = vadd.f32 %v3288_v45, %v3259_v9  ;;  %v17472_v7 = vadd.f32 %v3346_v61, %v3317_v24  ;;  %v23603_v9 = vld [vmem:[#allocation21_spill] sm:$0xff]  ;;  %v23607_v61 = vld [vmem:[#allocation58_spill] sm:$0xff] }
 0x358   :  { %23600 = vst [vmem:[#allocation71_spill] sm:$0xff] %v17468_v3  ;;  %v1239_v24 = vrot.slane %v23603_v9, 6  ;;  %v1963_v37 = vmax.f32 %v1867_v42, 0.0  ;;  %v17509_v9 = vadd.f32 %v23599_v10, %v1759_v12  ;;  %v23612_v12 = vld [vmem:[#allocation40_spill] sm:$0xff]  ;;  %v23615_v42 = vrot.slane %v23607_v61, 4 }
 0x359   :  { %v13488_v3 = vld [vmem:[%s22653_s4 + $0x244] sm:$0xf0] }
 0x35a   :  { %23609 = vst [vmem:[#allocation62_spill] sm:$0xff] %v17509_v9  ;;  %v10634_v41 = vrot.slane %v1239_v24, 9  ;;  %v17528_v0 = vrot.slane %v23615_v42, 9 }
 0x35b   :  { %v3790_v51 = vpop.f32.mrf.mxu1 }
 0x35c   :  { %v3791_v23 = vadd.f32 %v3790_v51, %v23610_v58  ;;  %v3848_v35 = vpop.f32.mrf.mxu0  ;;  %v17522_v51 = vperm.slane %v1963_v37, 0  ;;  %v17524_v58 = vperm.slane %v1963_v37, 2  ;;  %v5543_v37 = vrot.slane %v23515_v14, 6 }
 0x35d   :  { %v3849_v45 = vadd.f32 %v3848_v35, %v23611_v36  ;;  %v23616_v36 = vrot.slane %v23608_v50, 6  ;;  %v1737_v48 = vmax.f32 %v1239_v24, %v10634_v41  ;;  %v11321_v24 = vld [vmem:[%s22653_s4 + $0x258] sm:$0xf0]  ;;  %v23623_v41 = vld [vmem:[#allocation87_spill] sm:$0xff] }
 0x35e   :  { %v3290_v39 = vpop.f32.mrf.mxu3  ;;  %v3348_v43 = vpop.f32.mrf.mxu2  ;;  %23613 = vst [vmem:[#allocation32_spill] sm:$0xff] %v17522_v51  ;;  %v13487_v51 = vld [vmem:[%s22653_s4 + $0x244] sm:$0xf] }
 0x35f   :  { %v17517_v16 = vadd.f32 %v3290_v39, %v3261_v4  ;;  %v17519_v10 = vadd.f32 %v3348_v43, %v3319_v60  ;;  %23614 = vst [vmem:[#allocation35_spill] sm:$0xff] %v17524_v58  ;;  %v17532_v35 = vrot.slane %v23616_v36, 9  ;;  %v23617_v60 = vpack.c.bf16 %v17412_v22, %v17412_v22  ;;  %v23626_v58 = vld [vmem:[#allocation5_spill] sm:$0xff] }
 0x360   :  { %v5541_v39 = vrot.slane %v23514_v5, 7  ;;  %v23621_v22 = vrot.slane %v23598_v49, 6  ;;  %v5571_v36 = vrot.slane %v23395_v54, 6 }
 0x361   :  { %v17539_v43 = vunpack.c.l.b16 %v23617_v60 }
 0x362   :  { %4352 = vmatmul.bf16.vlgmr.msrb.gmra.mxu1 %v23612_v12  ;;  %4410 = vmatmul.bf16.vlgmr.msrb.gmra.mxu0 %v23612_v12  ;;  %v23619_v12 = vrot.slane %v23526_v21, 7  ;;  %v1713_v60 = vmax.f32 %v23621_v22, %v10610_v63  ;;  %v13490_v21 = vld [vmem:[%s22653_s4 + $0x254] sm:$0xf0]  ;;  %v11375_v22 = vld [vmem:[%s22653_s4 + $0x2c0] sm:$0xf] }
 0x363   :  { %23618 = vst [vmem:[#allocation41_spill] sm:$0xff] %v17539_v43  ;;  %v3792_v49 = vpop.f32.mrf.mxu1  ;;  %v11320_v63 = vor.u32 %v13490_v21, %v11319_v38  ;;  %v23625_v21 = vld [vmem:[#allocation6_spill] sm:$0xff] }
 0x364   :  { %v17551_v4 = vsel %vm2830_vm5, %v23619_v12, %v23524_v29  ;;  %v13489_v29 = vld [vmem:[%s22653_s4 + $0x254] sm:$0xf]  ;;  %v3850_v55 = vpop.f32.mrf.mxu0  ;;  %v23644_v43 = vld [vmem:[#allocation94_spill] sm:$0xff] }
 0x365   :  { %23620 = vst [vmem:[#allocation44_spill] sm:$0xff] %v17551_v4  ;;  %v23624_v12 = vld [vmem:[#allocation88_spill] sm:$0xff]  ;;  %v11324_v42 = vor.u32 %v13489_v29, %v11321_v24  ;;  %4977 = vmatpush.bf16.msra.mxu1 %v11320_v63  ;;  %v11311_v63 = vld [vmem:[%s22653_s4 + $0x240] sm:$0xf] }
 0x366   :  { %11223 = vmatmul.msk.bf16.vlgmr.msrb.gmra.mxu3 %vm3222_vm12, %v23622_v17  ;;  %11227 = vmatmul.msk.bf16.vlgmr.msrb.gmra.mxu2 %vm3222_vm12, %v23622_v17  ;;  %v3819_v27 = vpop.f32.mrf.mxu3  ;;  %v3877_v38 = vpop.f32.mrf.mxu2  ;;  %v23629_v17 = vld [vmem:[#allocation43_spill] sm:$0xff] }
 0x367   :  { %v17583_v24 = vadd.f32 %v3819_v27, %v3791_v23  ;;  %v17585_v31 = vadd.f32 %v3877_v38, %v3849_v45  ;;  %5035 = vmatpush.bf16.msra.mxu0 %v11324_v42  ;;  %v5542_v29 = vsel %vm2830_vm5, %v5541_v39, %v23629_v17  ;;  %v23630_v45 = vrot.slane %v23534_v11, 7  ;;  %v13504_v38 = vld [vmem:[%s22653_s4 + $0x2c4] sm:$0xf0]  ;;  %v11313_v39 = vld [vmem:[%s22653_s4 + $0x248] sm:$0xf0]  ;;  %v23632_v17 = vld [vmem:[#allocation53_spill] sm:$0xff] }
 0x368   :  { %v11312_v42 = vor.u32 %v13488_v3, %v11311_v63  ;;  %v23633_v27 = vrot.slane %v23394_v62, 7  ;;  %v17623_v3 = vadd.f32 %v23568_v18, %v1737_v48  ;;  %v11376_v63 = vor.u32 %v13504_v38, %v11375_v22  ;;  %v23639_v48 = vld [vmem:[#allocation42_spill] sm:$0xff]  ;;  %v13486_v22 = vld [vmem:[%s22653_s4 + $0x234] sm:$0xf0]  ;;  %v11367_v38 = vld [vmem:[%s22653_s4 + $0x2b0] sm:$0xf] }
 0x369   :  { %23627 = vst [vmem:[#allocation46_spill] sm:$0xff] %v17583_v24  ;;  %v17604_v23 = vsel %vm2830_vm5, %v23630_v45, %v23532_v2  ;;  %v17620_v2 = vadd.f32 %v23568_v18, %v1713_v60  ;;  %v11316_v45 = vor.u32 %v13487_v51, %v11313_v39  ;;  %v23637_v60 = vld [vmem:[#allocation39_spill] sm:$0xff]  ;;  %v23638_v24 = vld [vmem:[#allocation2_spill] sm:$0xff]  ;;  %v11380_v51 = vor.u32 %v13503_v15, %v11377_v8  ;;  %v13502_v39 = vld [vmem:[%s22653_s4 + $0x2b4] sm:$0xf0] }
 0x36a   :  { %23628 = vst [vmem:[#allocation54_spill] sm:$0xff] %v17585_v31  ;;  %v5570_v11 = vsel %vm2830_vm5, %v23633_v27, %v23632_v17  ;;  %v11303_v27 = vld [vmem:[%s22653_s4 + $0x230] sm:$0xf]  ;;  %v23636_v17 = vld [vmem:[#allocation49_spill] sm:$0xff]  ;;  %4978 = vmatpush.bf16.msra.mxu1 %v11312_v42  ;;  %5007 = vmatpush.bf16.msra.mxu3 %v11376_v63  ;;  %v11368_v42 = vor.u32 %v13502_v39, %v11367_v38  ;;  %v13485_v8 = vld [vmem:[%s22653_s4 + $0x234] sm:$0xf] }
 0x36b   :  { %23631 = vst [vmem:[#allocation118_spill] sm:$0xff] %v17604_v23  ;;  %v3276_v31 = vadd.f32 %v23637_v60, %v23636_v17  ;;  %5036 = vmatpush.bf16.msra.mxu0 %v11316_v45  ;;  %v11305_v15 = vld [vmem:[%s22653_s4 + $0x238] sm:$0xf0]  ;;  %v13501_v17 = vld [vmem:[%s22653_s4 + $0x2b4] sm:$0xf]  ;;  %v5572_v60 = vsel %vm2833_vm6, %v5571_v36, %v5570_v11  ;;  %5065 = vmatpush.bf16.msra.mxu2 %v11380_v51 }
 0x36c   :  { %23634 = vst [vmem:[#allocation48_spill] sm:$0xff] %v17620_v2  ;;  %v17648_v2 = vsel %vm2833_vm6, %v5543_v37, %v5542_v29  ;;  %v3795_v29 = vpop.f32.mrf.mxu1  ;;  %v11369_v63 = vld [vmem:[%s22653_s4 + $0x2b8] sm:$0xf0]  ;;  %v4504_v45 = vpack.c.bf16 %v17475_v25, %v17475_v25  ;;  %v3853_v4 = vpop.f32.mrf.mxu0  ;;  %v11308_v36 = vor.u32 %v13485_v8, %v11305_v15  ;;  %v4505_v25 = vpack.c.bf16 %v17481_v47, %v17481_v47  ;;  %v11359_v47 = vld [vmem:[%s22653_s4 + $0x2a0] sm:$0xf]  ;;  %v23649_v8 = vld [vmem:[#allocation4_spill] sm:$0xff] }
 0x36d   :  { %23635 = vst [vmem:[#allocation36_spill] sm:$0xff] %v17623_v3  ;;  %v3334_v3 = vadd.f32 %v23639_v48, %v23638_v24  ;;  %v11304_v24 = vor.u32 %v13486_v22, %v11303_v27  ;;  %v3793_v37 = vadd.f32 %v3792_v49, %v3276_v31  ;;  %v23640_v27 = vld [vmem:[#allocation90_spill] sm:$0xff]  ;;  %v23641_v22 = vld [vmem:[#allocation92_spill] sm:$0xff]  ;;  %v23642_v18 = vld [vmem:[#allocation9_spill] sm:$0xff]  ;;  %v11372_v31 = vor.u32 %v13501_v17, %v11369_v63 }
 0x36e   :  { %v4639_v48 = vrot.slane %v23640_v27, 5  ;;  %v17668_v23 = vadd.f32 %v3795_v29, %v23642_v18  ;;  %v3821_v49 = vpop.f32.mrf.mxu3  ;;  %v3879_v11 = vpop.f32.mrf.mxu2  ;;  %v23643_v51 = vld [vmem:[#allocation89_spill] sm:$0xff]  ;;  %5008 = vmatpush.bf16.msra.mxu3 %v11368_v42  ;;  %v23650_v15 = vrot.slane %v23623_v41, 7  ;;  %v13483_v29 = vld [vmem:[%s22653_s4 + $0x224] sm:$0xf] }
 0x36f   :  { %v3851_v39 = vadd.f32 %v3850_v55, %v3334_v3  ;;  %v17671_v9 = vadd.f32 %v3853_v4, %v23643_v51  ;;  %4979 = vmatpush.bf16.msra.mxu1 %v11304_v24  ;;  %v17677_v55 = vadd.f32 %v3821_v49, %v3793_v37  ;;  %v23648_v3 = vld [vmem:[#allocation10_spill] sm:$0xff]  ;;  %v13484_v24 = vld [vmem:[%s22653_s4 + $0x224] sm:$0xf0]  ;;  %5066 = vmatpush.bf16.msra.mxu2 %v11372_v31  ;;  %v11297_v63 = vld [vmem:[%s22653_s4 + $0x228] sm:$0xf0] }
 0x370   :  { %v11295_v4 = vld [vmem:[%s22653_s4 + $0x220] sm:$0xf]  ;;  %v4636_v17 = vsel %vm2830_vm5, %v23650_v15, %v23649_v8  ;;  %v13500_v37 = vld [vmem:[%s22653_s4 + $0x2a4] sm:$0xf0]  ;;  %5037 = vmatpush.bf16.msra.mxu0 %v11308_v36  ;;  %v17717_v8 = vunpack.c.l.b16 %v4504_v45  ;;  %v23654_v15 = vld [vmem:[#allocation93_spill] sm:$0xff] }
 0x371   :  { %23646 = vst [vmem:[#allocation16_spill] sm:$0xff] %v17677_v55  ;;  %v17679_v18 = vadd.f32 %v3879_v11, %v3851_v39  ;;  %v11296_v42 = vor.u32 %v13484_v24, %v11295_v4  ;;  %v23651_v39 = vrot.slane %v23625_v21, 6  ;;  %v23652_v11 = vrot.slane %v23396_v59, 5  ;;  %v13499_v4 = vld [vmem:[%s22653_s4 + $0x2a4] sm:$0xf]  ;;  %v23657_v36 = vld [vmem:[#allocation95_spill] sm:$0xff] }
 0x372   :  { %4357 = vmatmul.bf16.gmra.mxu1 %v23648_v3  ;;  %4415 = vmatmul.bf16.gmra.mxu0 %v23648_v3  ;;  %v11360_v51 = vor.u32 %v13500_v37, %v11359_v47  ;;  %v11300_v3 = vor.u32 %v13483_v29, %v11297_v63  ;;  %v11361_v24 = vld [vmem:[%s22653_s4 + $0x2a8] sm:$0xf0]  ;;  %23653 = vst [vmem:[#allocation28_spill] sm:$0xff] %v17717_v8  ;;  %v11287_v45 = vld [vmem:[%s22653_s4 + $0x210] sm:$0xf]  ;;  %v23660_v63 = vrot.slane %v23624_v12, 7 }
 0x373   :  { %23647 = vst [vmem:[#allocation29_spill] sm:$0xff] %v17679_v18  ;;  %v4638_v49 = vsel %vm2833_vm6, %v23651_v39, %v4636_v17  ;;  %v5574_v31 = vsel %vm2836_vm7, %v23652_v11, %v5572_v60  ;;  %4980 = vmatpush.bf16.msra.mxu1 %v11296_v42  ;;  %v11364_v17 = vor.u32 %v13499_v4, %v11361_v24  ;;  %v23655_v39 = vld [vmem:[#allocation96_spill] sm:$0xff]  ;;  %v17721_v60 = vunpack.c.l.b16 %v4505_v25  ;;  %v23658_v37 = vld [vmem:[#allocation83_spill] sm:$0xff]  ;;  %v13482_v42 = vld [vmem:[%s22653_s4 + $0x214] sm:$0xf0] }
 0x374   :  { %v11351_v25 = vld [vmem:[%s22653_s4 + $0x290] sm:$0xf]  ;;  %v23659_v29 = vld [vmem:[#allocation3_spill] sm:$0xff]  ;;  %v23661_v4 = vrot.slane %v23360_v6, 5  ;;  %v17748_v38 = vpop.f32.mrf.mxu1  ;;  %5009 = vmatpush.bf16.msra.mxu3 %v11360_v51  ;;  %v11288_v62 = vor.u32 %v13482_v42, %v11287_v45  ;;  %v13498_v18 = vld [vmem:[%s22653_s4 + $0x294] sm:$0xf0]  ;;  %5038 = vmatpush.bf16.msra.mxu0 %v11300_v3 }
 0x375   :  { %23656 = vst [vmem:[#allocation67_spill] sm:$0xff] %v17721_v60  ;;  %v4650_v11 = vsel %vm2830_vm5, %v23660_v63, %v23659_v29  ;;  %5067 = vmatpush.bf16.msra.mxu2 %v11364_v17  ;;  %v13481_v29 = vld [vmem:[%s22653_s4 + $0x214] sm:$0xf]  ;;  %v4640_v63 = vsel %vm2836_vm7, %v4639_v48, %v4638_v49  ;;  %v3855_v17 = vpop.f32.mrf.mxu0  ;;  %v11352_v45 = vor.u32 %v13498_v18, %v11351_v25  ;;  %v13495_v48 = vld [vmem:[%s22653_s4 + $0x284] sm:$0xf] }
 0x376   :  { %11224 = vmatmul.msk.bf16.gmra.mxu3 %vm3222_vm12, %v23658_v37  ;;  %11228 = vmatmul.msk.bf16.gmra.mxu2 %vm3222_vm12, %v23658_v37  ;;  %v5546_v24 = vsel %vm2836_vm7, %v23661_v4, %v17648_v2  ;;  %v23662_v37 = vrot.slane %v23397_v30, 4  ;;  %v11289_v2 = vld [vmem:[%s22653_s4 + $0x218] sm:$0xf0]  ;;  %v13497_v4 = vld [vmem:[%s22653_s4 + $0x294] sm:$0xf]  ;;  %v3824_v49 = vpop.f32.mrf.mxu3  ;;  %v3882_v59 = vpop.f32.mrf.mxu2 }
 0x377   :  { %v11292_v42 = vor.u32 %v13481_v29, %v11289_v2  ;;  %v23664_v30 = vld [vmem:[#allocation100_spill] sm:$0xff]  ;;  %4981 = vmatpush.bf16.msra.mxu1 %v11288_v62  ;;  %v23666_v29 = vrot.slane %v23607_v61, 4  ;;  %v17780_v54 = vadd.f32 %v3824_v49, %v17668_v23  ;;  %v17783_v55 = vadd.f32 %v3882_v59, %v17671_v9  ;;  %v11279_v62 = vld [vmem:[%s22653_s4 + $0x200] sm:$0xf]  ;;  %v13496_v49 = vld [vmem:[%s22653_s4 + $0x284] sm:$0xf0] }
 0x378   :  { %v5576_v47 = vsel %vm2839_vm8, %v23662_v37, %v5574_v31  ;;  %v23663_v31 = vrot.slane %v23626_v58, 6  ;;  %v11353_v37 = vld [vmem:[%s22653_s4 + $0x298] sm:$0xf0]  ;;  %v11343_v61 = vld [vmem:[%s22653_s4 + $0x280] sm:$0xf]  ;;  %v23671_v59 = vpack.c.bf16 %v17403_v19, %v17403_v19  ;;  %5010 = vmatpush.bf16.msra.mxu3 %v11352_v45  ;;  %v23673_v45 = vrot.slane %v23645_v44, 5 }
 0x379   :  { %v17777_v2 = vmax.f32 %v23666_v29, %v17528_v0  ;;  %23668 = vst [vmem:[#allocation69_spill] sm:$0xff] %v17780_v54  ;;  %v23670_v0 = vrot.slane %v23520_v56, 3  ;;  %v13479_v29 = vld [vmem:[%s22653_s4 + $0x204] sm:$0xf]  ;;  %5039 = vmatpush.bf16.msra.mxu0 %v11292_v42  ;;  %v23677_v42 = vld [vmem:[#allocation117_spill] sm:$0xff]  ;;  %v23686_v54 = vld [vmem:[#allocation103_spill] sm:$0xff] }
 0x37a   :  { %v4652_v51 = vsel %vm2833_vm6, %v23663_v31, %v4650_v11  ;;  %v11356_v11 = vor.u32 %v13497_v4, %v11353_v37  ;;  %v23665_v31 = vld [vmem:[#allocation102_spill] sm:$0xff]  ;;  %23669 = vst [vmem:[#allocation97_spill] sm:$0xff] %v17783_v55  ;;  %v13480_v4 = vld [vmem:[%s22653_s4 + $0x204] sm:$0xf0]  ;;  %v17800_v9 = vunpack.c.l.b16 %v23671_v59  ;;  %v11344_v59 = vor.u32 %v13496_v49, %v11343_v61  ;;  %v11337_v55 = vld [vmem:[%s22653_s4 + $0x278] sm:$0xf0] }
 0x37b   :  { %23667 = vst [vmem:[#allocation68_spill] sm:$0xff] %v17777_v2  ;;  %v5578_v23 = vsel %vm2842_vm9, %v23670_v0, %v5576_v47  ;;  %v11280_v37 = vor.u32 %v13480_v4, %v11279_v62  ;;  %v11281_v47 = vld [vmem:[%s22653_s4 + $0x208] sm:$0xf0]  ;;  %v23672_v0 = vrot.slane %v23641_v22, 4  ;;  %v23674_v62 = vrot.slane %v23608_v50, 6  ;;  %v23678_v61 = vld [vmem:[#allocation130_spill] sm:$0xff] }
 0x37c   :  { %5068 = vmatpush.bf16.msra.mxu2 %v11356_v11  ;;  %v4654_v11 = vsel %vm2836_vm7, %v23673_v45, %v4652_v51  ;;  %v11284_v18 = vor.u32 %v13479_v29, %v11281_v47  ;;  %v11271_v51 = vld [vmem:[%s22653_s4 + $0x1f0] sm:$0xf]  ;;  %v3339_v49 = vadd.f32 %v23678_v61, %v23677_v42  ;;  %v13478_v47 = vld [vmem:[%s22653_s4 + $0x1f4] sm:$0xf0]  ;;  %v23683_v61 = vrot.slane %v23522_v20, 2  ;;  %v3800_v25 = vpop.f32.mrf.mxu1  ;;  %5011 = vmatpush.bf16.msra.mxu3 %v11344_v59 }
 0x37d   :  { %v4642_v19 = vsel %vm2839_vm8, %v23672_v0, %v4640_v63  ;;  %v17820_v4 = vmax.f32 %v23674_v62, %v17532_v35  ;;  %v11345_v63 = vld [vmem:[%s22653_s4 + $0x288] sm:$0xf0]  ;;  %v23676_v0 = vrot.slane %v23387_v32, 4  ;;  %v3281_v35 = vadd.f32 %v17118_v26, %v17111_v13  ;;  %4982 = vmatpush.bf16.msra.mxu1 %v11280_v37  ;;  %v11335_v45 = vld [vmem:[%s22653_s4 + $0x270] sm:$0xf]  ;;  %v23691_v56 = vld [vmem:[#allocation105_spill] sm:$0xff] }
 0x37e   :  { %v11348_v29 = vor.u32 %v13495_v48, %v11345_v63  ;;  %v23679_v62 = vrot.slane %v23518_v34, 3  ;;  %v11272_v26 = vor.u32 %v13478_v47, %v11271_v51  ;;  %v13477_v48 = vld [vmem:[%s22653_s4 + $0x1f4] sm:$0xf]  ;;  %v11273_v37 = vld [vmem:[%s22653_s4 + $0x1f8] sm:$0xf0]  ;;  %v17870_v47 = vsel %vm2845_vm10, %v23683_v61, %v5578_v23  ;;  %v3858_v23 = vpop.f32.mrf.mxu0  ;;  %5040 = vmatpush.bf16.msra.mxu0 %v11284_v18  ;;  %v3884_v59 = vpop.f32.mrf.mxu2 }
 0x37f   :  { %23675 = vst [vmem:[#allocation15_spill] sm:$0xff] %v17820_v4  ;;  %v5548_v50 = vsel %vm2839_vm8, %v23676_v0, %v5546_v24  ;;  %v13494_v24 = vld [vmem:[%s22653_s4 + $0x274] sm:$0xf0]  ;;  %v13493_v63 = vld [vmem:[%s22653_s4 + $0x274] sm:$0xf]  ;;  %v23681_v0 = vrot.slane %v23644_v43, 3  ;;  %v11276_v61 = vor.u32 %v13477_v48, %v11273_v37 }
 0x380   :  { %v17850_v13 = vsel %vm2842_vm9, %v23679_v62, %v5548_v50  ;;  %v23682_v50 = vrot.slane %v23654_v15, 4  ;;  %23684 = vst [vmem:[#allocation112_spill] sm:$0xff] %v17870_v47  ;;  %v3798_v62 = vadd.f32 %v17748_v38, %v3281_v35  ;;  %5069 = vmatpush.bf16.msra.mxu2 %v11348_v29  ;;  %v11336_v3 = vor.u32 %v13494_v24, %v11335_v45  ;;  %v3826_v35 = vpop.f32.mrf.mxu3  ;;  %v23688_v29 = vld [vmem:[#allocation143_spill] sm:$0xff] }
 0x381   :  { %23680 = vst [vmem:[#allocation98_spill] sm:$0xff] %v17850_v13  ;;  %v4644_v42 = vsel %vm2842_vm9, %v23681_v0, %v4642_v19  ;;  %v23685_v19 = vld [vmem:[#allocation104_spill] sm:$0xff]  ;;  %v4677_v4 = vrot.slane %v23686_v54, 7  ;;  %v11340_v38 = vor.u32 %v13493_v63, %v11337_v55  ;;  %v3859_v45 = vadd.f32 %v3858_v23, %v23688_v29  ;;  %4983 = vmatpush.bf16.msra.mxu1 %v11272_v26  ;;  %v23690_v13 = vld [vmem:[#allocation106_spill] sm:$0xff]  ;;  %v13476_v18 = vld [vmem:[%s22653_s4 + $0x1e4] sm:$0xf0] }
 0x382   :  { %v4656_v51 = vsel %vm2839_vm8, %v23682_v50, %v4654_v11  ;;  %v4665_v0 = vrot.slane %v23685_v19, 6  ;;  %v3856_v11 = vadd.f32 %v3855_v17, %v3339_v49  ;;  %v23687_v50 = vld [vmem:[#allocation131_spill] sm:$0xff]  ;;  %v23689_v24 = vmax.f32 %v17461_v1, 0.0  ;;  %v11263_v55 = vld [vmem:[%s22653_s4 + $0x1e0] sm:$0xf]  ;;  %5012 = vmatpush.bf16.msra.mxu3 %v11336_v3  ;;  %5041 = vmatpush.bf16.msra.mxu0 %v11276_v61 }
 0x383   :  { %v17879_v2 = vadd.f32 %v3800_v25, %v23687_v50  ;;  %v4667_v20 = vrot.slane %v23690_v13, 5  ;;  %v4679_v54 = vrot.slane %v23691_v56, 6  ;;  %v17886_v17 = vadd.f32 %v3826_v35, %v3798_v62  ;;  %v23694_v49 = vld [vmem:[#allocation11_spill] sm:$0xff]  ;;  %v11327_v26 = vld [vmem:[%s22653_s4 + $0x260] sm:$0xf] }
 0x384   :  { %v4474_v47 = vperm.slane %v23689_v24, 0  ;;  %v17888_v25 = vadd.f32 %v3884_v59, %v3856_v11  ;;  %4362 = vmatmul.bf16.gmra.mxu1 %v23694_v49  ;;  %v23695_v48 = vrot.slane %v23655_v39, 2  ;;  %v23696_v63 = vrot.slane %v23657_v36, 3  ;;  %4420 = vmatmul.bf16.gmra.mxu0 %v23694_v49  ;;  %v13492_v50 = vld [vmem:[%s22653_s4 + $0x264] sm:$0xf0] }
 0x385   :  { %23692 = vst [vmem:[#allocation113_spill] sm:$0xff] %v17886_v17  ;;  %v11264_v11 = vor.u32 %v13476_v18, %v11263_v55  ;;  %v13475_v23 = vld [vmem:[%s22653_s4 + $0x1e4] sm:$0xf]  ;;  %v23697_v35 = vld [vmem:[#allocation7_spill] sm:$0xff]  ;;  %v23698_v59 = vrot.slane %v23665_v31, 7  ;;  %v23699_v3 = vrot.slane %v23625_v21, 7  ;;  %v23700_v24 = vpack.c.bf16 %v17407_v57, %v17407_v57  ;;  %5070 = vmatpush.bf16.msra.mxu2 %v11340_v38 }
 0x386   :  { %23693 = vst [vmem:[#allocation149_spill] sm:$0xff] %v17888_v25  ;;  %v4646_v37 = vsel %vm2845_vm10, %v23695_v48, %v4644_v42  ;;  %v4658_v62 = vsel %vm2842_vm9, %v23696_v63, %v4656_v51  ;;  %v11265_v42 = vld [vmem:[%s22653_s4 + $0x1e8] sm:$0xf0]  ;;  %v11328_v55 = vor.u32 %v13492_v50, %v11327_v26  ;;  %v13491_v48 = vld [vmem:[%s22653_s4 + $0x264] sm:$0xf]  ;;  %v23702_v38 = vld [vmem:[#allocation8_spill] sm:$0xff]  ;;  %v3860_v21 = vpop.f32.mrf.mxu0 }
 0x387   :  { %v4664_v51 = vsel %vm2830_vm5, %v23698_v59, %v23697_v35  ;;  %v5598_v29 = vsel %vm2830_vm5, %v23699_v3, %v23623_v41  ;;  %v17927_v49 = vunpack.c.l.b16 %v23700_v24  ;;  %v11268_v18 = vor.u32 %v13475_v23, %v11265_v42  ;;  %v11329_v63 = vld [vmem:[%s22653_s4 + $0x268] sm:$0xf0]  ;;  %4984 = vmatpush.bf16.msra.mxu1 %v11264_v11  ;;  %v23704_v42 = vld [vmem:[#allocation56_spill] sm:$0xff]  ;;  %v23706_v25 = vld [vmem:[#allocation101_spill] sm:$0xff] }
 0x388   :  { %v4666_v35 = vsel %vm2833_vm6, %v4665_v0, %v4664_v51  ;;  %v5599_v41 = vrot.slane %v23640_v27, 6  ;;  %v11332_v57 = vor.u32 %v13491_v48, %v11329_v63  ;;  %v23701_v59 = vmax.f32 %v17461_v1, 0.0  ;;  %v23703_v50 = vld [vmem:[#allocation107_spill] sm:$0xff]  ;;  %11225 = vmatmul.msk.bf16.gmra.mxu3 %vm3222_vm12, %v23706_v25  ;;  %11229 = vmatmul.msk.bf16.gmra.mxu2 %vm3222_vm12, %v23706_v25  ;;  %v23707_v0 = vld [vmem:[#allocation108_spill] sm:$0xff] }
 0x389   :  { %v4678_v26 = vsel %vm2830_vm5, %v4677_v4, %v23702_v38  ;;  %v4681_v23 = vrot.slane %v23703_v50, 5  ;;  %v23705_v3 = vld [vmem:[#allocation51_spill] sm:$0xff]  ;;  %v4669_v11 = vrot.slane %v23707_v0, 4  ;;  %v23708_v51 = vrot.slane %v23664_v30, 2  ;;  %v23709_v4 = vld [vmem:[#allocation50_spill] sm:$0xff]  ;;  %v23710_v63 = vld [vmem:[#allocation52_spill] sm:$0xff]  ;;  %v3802_v38 = vpop.f32.mrf.mxu1  ;;  %5013 = vmatpush.bf16.msra.mxu3 %v11328_v55  ;;  %5042 = vmatpush.bf16.msra.mxu0 %v11268_v18  ;;  %v3829_v55 = vpop.f32.mrf.mxu3 }
 0x38a   :  { %v4475_v61 = vperm.slane %v23701_v59, 2  ;;  %v3286_v24 = vadd.f32 %v23705_v3, %v23704_v42  ;;  %v4680_v48 = vsel %vm2833_vm6, %v4679_v54, %v4678_v26  ;;  %v3344_v59 = vadd.f32 %v23710_v63, %v23709_v4  ;;  %5071 = vmatpush.bf16.msra.mxu2 %v11332_v57 }
 0x38b   :  { %v4660_v1 = vsel %vm2845_vm10, %v23708_v51, %v4658_v62  ;;  %v4506_v42 = vpack.c.bf16 %v4474_v47, %v4474_v47  ;;  %v4668_v3 = vsel %vm2836_vm7, %v4667_v20, %v4666_v35  ;;  %v5601_v17 = vrot.slane %v23641_v22, 5  ;;  %v23712_v62 = vld [vmem:[#allocation109_spill] sm:$0xff]  ;;  %v3887_v20 = vpop.f32.mrf.mxu2 }
 0x38c   :  { %v23711_v25 = vrot.slane %v17717_v8, 1  ;;  %v4683_v54 = vrot.slane %v23712_v62, 4  ;;  %v23713_v26 = vmax.f32 %v17445_v53, 0.0  ;;  %v5600_v47 = vsel %vm2833_vm6, %v5599_v41, %v5598_v29  ;;  %v23717_v29 = vld [vmem:[#allocation13_spill] sm:$0xff] }
 0x38d   :  { %v4507_v35 = vpack.c.bf16 %v4475_v61, %v4475_v61  ;;  %v23714_v4 = vrot.slane %v17721_v60, 1  ;;  %v4682_v57 = vsel %vm2836_vm7, %v4681_v23, %v4680_v48  ;;  %v17976_v63 = vadd.f32 %v3829_v55, %v17879_v2  ;;  %v23718_v61 = vld [vmem:[#allocation110_spill] sm:$0xff] }
 0x38e   :  { %v17960_v27 = vsel %vm2848_vm11, %v23711_v25, %v4646_v37  ;;  %v17965_v51 = vperm.slane %v23713_v26, 0  ;;  %v5611_v37 = vrot.slane %v23626_v58, 7  ;;  %v17978_v25 = vadd.f32 %v3887_v20, %v3859_v45  ;;  %v23723_v20 = vld [vmem:[#allocation12_spill] sm:$0xff] }
 0x38f   :  { %v17971_v18 = vsel %vm2848_vm11, %v23714_v4, %v4660_v1  ;;  %23715 = vst [vmem:[#allocation127_spill] sm:$0xff] %v17976_v63  ;;  %v4670_v26 = vsel %vm2839_vm8, %v4669_v11, %v4668_v3  ;;  %v4673_v41 = vrot.slane %v23717_v29, 2  ;;  %v17982_v22 = vunpack.c.l.b16 %v4506_v42  ;;  %v23719_v4 = vld [vmem:[#allocation55_spill] sm:$0xff]  ;;  %v23727_v63 = vld [vmem:[#allocation121_spill] sm:$0xff] }
 0x390   :  { %23716 = vst [vmem:[#allocation19_spill] sm:$0xff] %v17978_v25  ;;  %v4671_v60 = vrot.slane %v23718_v61, 3  ;;  %v5602_v1 = vsel %vm2836_vm7, %v5601_v17, %v5600_v47  ;;  %v23720_v8 = vmax.f32 %v23719_v4, 0.0  ;;  %v4684_v48 = vsel %vm2839_vm8, %v4683_v54, %v4682_v57  ;;  %v23722_v17 = vld [vmem:[#allocation111_spill] sm:$0xff]  ;;  %v23724_v54 = vld [vmem:[#allocation120_spill] sm:$0xff] }
 0x391   :  { %v5603_v45 = vrot.slane %v23644_v43, 4  ;;  %v23721_v11 = vmax.f32 %v17445_v53, 0.0  ;;  %v17999_v55 = vunpack.c.l.b16 %v4507_v35  ;;  %v4685_v47 = vrot.slane %v23722_v17, 3  ;;  %v23726_v35 = vld [vmem:[#allocation34_spill] sm:$0xff] }
 0x392   :  { %v17988_v23 = vperm.slane %v23720_v8, 0  ;;  %v4672_v42 = vsel %vm2842_vm9, %v4671_v60, %v4670_v26  ;;  %v4687_v8 = vrot.slane %v23723_v20, 2  ;;  %v4691_v57 = vrot.slane %v23724_v54, 7  ;;  %v23728_v54 = vld [vmem:[#allocation33_spill] sm:$0xff] }
 0x393   :  { %v17996_v3 = vperm.slane %v23721_v11, 2  ;;  %v4674_v4 = vsel %vm2845_vm10, %v4673_v41, %v4672_v42  ;;  %v18006_v2 = vsel %vm2839_vm8, %v5603_v45, %v5602_v1  ;;  %v5612_v53 = vsel %vm2830_vm5, %v5611_v37, %v23624_v12  ;;  %v3805_v11 = vpop.f32.mrf.mxu1  ;;  %v3863_v42 = vpop.f32.mrf.mxu0 }
 0x394   :  { %23725 = vst [vmem:[#allocation150_spill] sm:$0xff] %v18006_v2  ;;  %v4675_v25 = vrot.slane %v17982_v22, 1  ;;  %v4686_v60 = vsel %vm2842_vm9, %v4685_v47, %v4684_v48  ;;  %v4693_v26 = vrot.slane %v23726_v35, 6  ;;  %v4705_v58 = vrot.slane %v23727_v63, 7  ;;  %v3831_v45 = vpop.f32.mrf.mxu3  ;;  %v3889_v2 = vpop.f32.mrf.mxu2 }
 0x395   :  { %v3803_v43 = vadd.f32 %v3802_v38, %v3286_v24  ;;  %v3861_v17 = vadd.f32 %v3860_v21, %v3344_v59  ;;  %v3806_v41 = vadd.f32 %v3805_v11, %v17470_v40  ;;  %v4707_v1 = vrot.slane %v23728_v54, 6  ;;  %v23731_v21 = vld [vmem:[#allocation114_spill] sm:$0xff]  ;;  %v23732_v40 = vld [vmem:[#allocation116_spill] sm:$0xff]  ;;  %v23733_v59 = vld [vmem:[#allocation17_spill] sm:$0xff] }
 0x396   :  { %v3864_v12 = vadd.f32 %v3863_v42, %v17472_v7  ;;  %v4688_v37 = vsel %vm2845_vm10, %v4687_v8, %v4686_v60  ;;  %v4689_v20 = vrot.slane %v17999_v55, 1  ;;  %v5613_v48 = vrot.slane %v23645_v44, 6  ;;  %4367 = vmatmul.bf16.gmra.mxu1 %v23731_v21  ;;  %4425 = vmatmul.bf16.gmra.mxu0 %v23731_v21  ;;  %v23734_v11 = vld [vmem:[#allocation119_spill] sm:$0xff]  ;;  %v23764_v54 = vld [vmem:[#allocation76_spill] sm:$0xff] }
 0x397   :  { %v18020_v47 = vadd.f32 %v3831_v45, %v3803_v43  ;;  %v18022_v63 = vadd.f32 %v3889_v2, %v3861_v17  ;;  %v4692_v24 = vsel %vm2830_vm5, %v4691_v57, %v23732_v40  ;;  %v4695_v38 = vrot.slane %v23733_v59, 5  ;;  %v23735_v43 = vld [vmem:[#allocation18_spill] sm:$0xff]  ;;  %v23737_v40 = vld [vmem:[#allocation20_spill] sm:$0xff] }
 0x398   :  { %v4676_v7 = vsel %vm2848_vm11, %v4675_v25, %v4674_v4  ;;  %v4694_v8 = vsel %vm2833_vm6, %v4693_v26, %v4692_v24  ;;  %v4706_v60 = vsel %vm2830_vm5, %v4705_v58, %v23734_v11  ;;  %v4709_v42 = vrot.slane %v23735_v43, 5  ;;  %v23736_v25 = vld [vmem:[#allocation122_spill] sm:$0xff]  ;;  %11226 = vmatmul.msk.bf16.gmra.mxu3 %vm3222_vm12, %v23737_v40  ;;  %11230 = vmatmul.msk.bf16.gmra.mxu2 %vm3222_vm12, %v23737_v40  ;;  %v23739_v11 = vld [vmem:[#allocation123_spill] sm:$0xff]  ;;  %v23776_v59 = vld [vmem:[#allocation80_spill] sm:$0xff] }
 0x399   :  { %23729 = vst [vmem:[#allocation151_spill] sm:$0xff] %v18020_v47  ;;  %v4708_v2 = vsel %vm2833_vm6, %v4707_v1, %v4706_v60  ;;  %v5625_v17 = vrot.slane %v23685_v19, 7  ;;  %v4690_v21 = vsel %vm2848_vm11, %v4689_v20, %v4688_v37  ;;  %v4697_v4 = vrot.slane %v23736_v25, 4  ;;  %v23754_v19 = vld [vmem:[#allocation128_spill] sm:$0xff]  ;;  %v23771_v43 = vld [vmem:[#allocation115_spill] sm:$0xff] }
 0x39a   :  { %23730 = vst [vmem:[#allocation177_spill] sm:$0xff] %v18022_v63  ;;  %v18049_v1 = vpack.c.b16 %v4676_v7, %v17960_v27  ;;  %v4696_v24 = vsel %vm2836_vm7, %v4695_v38, %v4694_v8  ;;  %v4711_v60 = vrot.slane %v23739_v11, 4  ;;  %v18054_v20 = vsel %vm2833_vm6, %v5613_v48, %v5612_v53  ;;  %v23746_v48 = vld [vmem:[#allocation134_spill] sm:$0xff]  ;;  %v23758_v11 = vld [vmem:[#allocation65_spill] sm:$0xff] }
 0x39b   :  { %v3807_v37 = vpop.f32.mrf.mxu1  ;;  %v4508_v26 = vpack.c.bf16 %v17504_v46, %v17504_v46  ;;  %v4509_v58 = vpack.c.bf16 %v17506_v52, %v17506_v52  ;;  %v4710_v57 = vsel %vm2836_vm7, %v4709_v42, %v4708_v2  ;;  %v3865_v7 = vpop.f32.mrf.mxu0  ;;  %v18064_v38 = vpack.c.b16 %v4690_v21, %v17971_v18  ;;  %v23741_v2 = vld [vmem:[#allocation124_spill] sm:$0xff] }
 0x39c   :  { %23738 = vst [vmem:[#allocation31_spill] sm:$0xff] %v18049_v1  ;;  %v3808_v27 = vadd.f32 %v3807_v37, %v17517_v16  ;;  %v18068_v53 = vsel %vm2830_vm5, %v5625_v17, %v23665_v31  ;;  %v3834_v46 = vpop.f32.mrf.mxu3  ;;  %v3892_v8 = vpop.f32.mrf.mxu2  ;;  %v3866_v52 = vadd.f32 %v3865_v7, %v17519_v10  ;;  %v4698_v42 = vsel %vm2839_vm8, %v4697_v4, %v4696_v24  ;;  %v23744_v21 = vld [vmem:[#allocation132_spill] sm:$0xff]  ;;  %v23748_v10 = vld [vmem:[#allocation125_spill] sm:$0xff] }
 0x39d   :  { %23740 = vst [vmem:[#allocation14_spill] sm:$0xff] %v18064_v38  ;;  %v4699_v40 = vrot.slane %v23741_v2, 3  ;;  %v6503_v16 = vrot.slane %v23515_v14, 7  ;;  %v18075_v37 = vadd.f32 %v3834_v46, %v3806_v41  ;;  %v18077_v18 = vadd.f32 %v3892_v8, %v3864_v12  ;;  %v23751_v8 = vld [vmem:[#allocation126_spill] sm:$0xff] }
 0x39e   :  { %v4719_v45 = vrot.slane %v23744_v21, 7  ;;  %v4712_v31 = vsel %vm2839_vm8, %v4711_v60, %v4710_v57  ;;  %v18081_v17 = vunpack.c.l.b16 %v4508_v26  ;;  %v4721_v63 = vrot.slane %v23746_v48, 6  ;;  %v23775_v2 = vld [vmem:[#allocation142_spill] sm:$0xff] }
 0x39f   :  { %23742 = vst [vmem:[#allocation60_spill] sm:$0xff] %v18075_v37  ;;  %v18084_v47 = vunpack.c.l.b16 %v4509_v58  ;;  %v4713_v4 = vrot.slane %v23748_v10, 3  ;;  %v23749_v24 = vmax.f32 %v17488_v33, 0.0  ;;  %v23750_v14 = vmax.f32 %v17465_v28, 0.0 }
 0x3a0   :  { %23743 = vst [vmem:[#allocation99_spill] sm:$0xff] %v18077_v18  ;;  %v6505_v46 = vrot.slane %v23360_v6, 6  ;;  %v4700_v57 = vsel %vm2842_vm9, %v4699_v40, %v4698_v42  ;;  %v6504_v60 = vsel %vm2830_vm5, %v6503_v16, %v23514_v5  ;;  %v4701_v18 = vrot.slane %v23751_v8, 2  ;;  %v23757_v8 = vld [vmem:[#allocation133_spill] sm:$0xff] }
 0x3a1   :  { %23745 = vst [vmem:[#allocation37_spill] sm:$0xff] %v18081_v17  ;;  %v4478_v7 = vperm.slane %v23749_v24, 0  ;;  %v18091_v41 = vperm.slane %v23750_v14, 0  ;;  %v4714_v26 = vsel %vm2842_vm9, %v4713_v4, %v4712_v31  ;;  %v23752_v24 = vld [vmem:[#allocation23_spill] sm:$0xff]  ;;  %v23753_v14 = vld [vmem:[#allocation136_spill] sm:$0xff]  ;;  %v4715_v12 = vrot.slane %v23754_v19, 2 }
 0x3a2   :  { %23747 = vst [vmem:[#allocation21_spill] sm:$0xff] %v18084_v47  ;;  %v4720_v37 = vsel %vm2830_vm5, %v4719_v45, %v23752_v24  ;;  %v4723_v21 = vrot.slane %v23753_v14, 5  ;;  %v6507_v31 = vrot.slane %v23387_v32, 5  ;;  %v6506_v16 = vsel %vm2833_vm6, %v6505_v46, %v6504_v60  ;;  %v23755_v45 = vld [vmem:[#allocation74_spill] sm:$0xff]  ;;  %v23762_v46 = vld [vmem:[#allocation135_spill] sm:$0xff] }
 0x3a3   :  { %v4087_v48 = vpop.f32.mrf.mxu1  ;;  %v4722_v40 = vsel %vm2833_vm6, %v4721_v63, %v4720_v37  ;;  %v4145_v4 = vpop.f32.mrf.mxu0  ;;  %v4510_v5 = vpack.c.bf16 %v4478_v7, %v4478_v7  ;;  %v6509_v58 = vrot.slane %v23518_v34, 4  ;;  %v6531_v24 = vrot.slane %v23755_v45, 7  ;;  %v23756_v19 = vld [vmem:[#allocation138_spill] sm:$0xff] }
 0x3a4   :  { %v3836_v14 = vpop.f32.mrf.mxu3  ;;  %v3894_v44 = vpop.f32.mrf.mxu2  ;;  %v4725_v10 = vrot.slane %v23756_v19, 4  ;;  %v4733_v6 = vrot.slane %v23757_v8, 7  ;;  %v6511_v63 = vrot.slane %v23758_v11, 3  ;;  %v6513_v37 = vrot.slane %v17800_v9, 2  ;;  %v23761_v7 = vld [vmem:[#allocation22_spill] sm:$0xff] }
 0x3a5   :  { %v18116_v42 = vadd.f32 %v3836_v14, %v3808_v27  ;;  %v18118_v32 = vadd.f32 %v3894_v44, %v3866_v52  ;;  %v4724_v34 = vsel %vm2836_vm7, %v4723_v21, %v4722_v40  ;;  %v4735_v60 = vrot.slane %v23762_v46, 6  ;;  %v23766_v52 = vld [vmem:[#allocation72_spill] sm:$0xff]  ;;  %v23767_v40 = vld [vmem:[#allocation78_spill] sm:$0xff] }
 0x3a6   :  { %4985 = vmatmul.bf16.vlgmr.msra.gmra.mxu1 %v23761_v7  ;;  %5043 = vmatmul.bf16.vlgmr.msra.gmra.mxu0 %v23761_v7  ;;  %v23763_v45 = vmax.f32 %v17488_v33, 0.0  ;;  %v6508_v8 = vsel %vm2836_vm7, %v6507_v31, %v6506_v16  ;;  %v6533_v27 = vrot.slane %v23764_v54, 6  ;;  %v18129_v14 = vunpack.c.l.b16 %v4510_v5  ;;  %v23768_v46 = vld [vmem:[#allocation140_spill] sm:$0xff]  ;;  %v23770_v31 = vld [vmem:[#allocation129_spill] sm:$0xff] }
 0x3a7   :  { %23759 = vst [vmem:[#allocation58_spill] sm:$0xff] %v18116_v42  ;;  %v6510_v44 = vsel %vm2839_vm8, %v6509_v58, %v6508_v8  ;;  %v6532_v21 = vsel %vm2830_vm5, %v6531_v24, %v23766_v52  ;;  %v4726_v42 = vsel %vm2839_vm8, %v4725_v10, %v4724_v34  ;;  %v4727_v33 = vrot.slane %v23768_v46, 3  ;;  %v11477_v10 = vld [vmem:[%s22654_s5 + $0x250] sm:$0xf]  ;;  %v13519_v5 = vld [vmem:[%s22654_s5 + $0x254] sm:$0xf] }
 0x3a8   :  { %23760 = vst [vmem:[#allocation164_spill] sm:$0xff] %v18118_v32  ;;  %v4479_v19 = vperm.slane %v23763_v45, 2  ;;  %v6535_v32 = vrot.slane %v23767_v40, 5  ;;  %v23769_v45 = vld [vmem:[#allocation24_spill] sm:$0xff]  ;;  %v4734_v16 = vsel %vm2830_vm5, %v4733_v6, %v23770_v31  ;;  %11381 = vmatmul.msk.bf16.vlgmr.msra.gmra.mxu3 %vm3222_vm12, %v23771_v43  ;;  %11385 = vmatmul.msk.bf16.vlgmr.msra.gmra.mxu2 %vm3222_vm12, %v23771_v43  ;;  %v4702_v54 = vsel %vm2845_vm10, %v4701_v18, %v4700_v57  ;;  %v13520_v6 = vld [vmem:[%s22654_s5 + $0x254] sm:$0xf0] }
 0x3a9   :  { %23765 = vst [vmem:[#allocation165_spill] sm:$0xff] %v18129_v14  ;;  %v4729_v7 = vrot.slane %v23769_v45, 2  ;;  %v4716_v58 = vsel %vm2845_vm10, %v4715_v12, %v4714_v26  ;;  %v4736_v8 = vsel %vm2833_vm6, %v4735_v60, %v4734_v16  ;;  %v23772_v18 = vld [vmem:[#allocation137_spill] sm:$0xff]  ;;  %v11478_v12 = vor.u32 %v13520_v6, %v11477_v10  ;;  %v23773_v43 = vld [vmem:[#allocation139_spill] sm:$0xff] }
 0x3aa   :  { %v4511_v34 = vpack.c.bf16 %v4479_v19, %v4479_v19  ;;  %v4737_v57 = vrot.slane %v23772_v18, 5  ;;  %v11479_v26 = vld [vmem:[%s22654_s5 + $0x258] sm:$0xf0]  ;;  %v6512_v60 = vsel %vm2842_vm9, %v6511_v63, %v6510_v44  ;;  %v4728_v40 = vsel %vm2842_vm9, %v4727_v33, %v4726_v42  ;;  %v11533_v33 = vld [vmem:[%s22654_s5 + $0x2c0] sm:$0xf] }
 0x3ab   :  { %v18156_v24 = vpop.f32.mrf.mxu1  ;;  %v18163_v52 = vpop.f32.mrf.mxu0  ;;  %v4731_v31 = vrot.slane %v18129_v14, 1  ;;  %v11482_v16 = vor.u32 %v13519_v5, %v11479_v26  ;;  %v6534_v46 = vsel %vm2833_vm6, %v6533_v27, %v6532_v21  ;;  %v4739_v18 = vrot.slane %v23773_v43, 4  ;;  %v23774_v10 = vld [vmem:[#allocation141_spill] sm:$0xff]  ;;  %5290 = vmatpush.bf16.msrb.mxu1 %v11478_v12  ;;  %v11469_v27 = vld [vmem:[%s22654_s5 + $0x240] sm:$0xf]  ;;  %v23790_v43 = vld [vmem:[#allocation27_spill] sm:$0xff] }
 0x3ac   :  { %v4116_v45 = vpop.f32.mrf.mxu3  ;;  %v4174_v19 = vpop.f32.mrf.mxu2  ;;  %v6537_v63 = vrot.slane %v23776_v59, 4  ;;  %v4730_v42 = vsel %vm2845_vm10, %v4729_v7, %v4728_v40  ;;  %v13518_v21 = vld [vmem:[%s22654_s5 + $0x244] sm:$0xf0]  ;;  %v6514_v59 = vsel %vm2845_vm10, %v6513_v37, %v6512_v60  ;;  %v13517_v5 = vld [vmem:[%s22654_s5 + $0x244] sm:$0xf]  ;;  %v23780_v37 = vrot.slane %v23690_v13, 6 }
 0x3ad   :  { %v18172_v44 = vadd.f32 %v4116_v45, %v4087_v48  ;;  %v18174_v35 = vadd.f32 %v4174_v19, %v4145_v4  ;;  %5348 = vmatpush.bf16.msrb.mxu0 %v11482_v16  ;;  %v18187_v48 = vunpack.c.l.b16 %v4511_v34  ;;  %v4738_v4 = vsel %vm2836_vm7, %v4737_v57, %v4736_v8  ;;  %v13534_v45 = vld [vmem:[%s22654_s5 + $0x2c4] sm:$0xf0]  ;;  %v11471_v12 = vld [vmem:[%s22654_s5 + $0x248] sm:$0xf0]  ;;  %v13533_v19 = vld [vmem:[%s22654_s5 + $0x2c4] sm:$0xf] }
 0x3ae   :  { %v11470_v7 = vor.u32 %v13518_v21, %v11469_v27  ;;  %v18203_v34 = vsel %vm2833_vm6, %v23780_v37, %v18068_v53  ;;  %v23781_v8 = vrot.slane %v18081_v17, 1  ;;  %v23782_v26 = vrot.slane %v18084_v47, 1  ;;  %v11535_v53 = vld [vmem:[%s22654_s5 + $0x2c8] sm:$0xf0]  ;;  %v13516_v21 = vld [vmem:[%s22654_s5 + $0x234] sm:$0xf0] }
 0x3af   :  { %23777 = vst [vmem:[#allocation166_spill] sm:$0xff] %v18172_v44  ;;  %v11534_v40 = vor.u32 %v13534_v45, %v11533_v33  ;;  %v11474_v16 = vor.u32 %v13517_v5, %v11471_v12  ;;  %v18225_v27 = vsel %vm2848_vm11, %v4731_v31, %v4730_v42  ;;  %v11525_v33 = vld [vmem:[%s22654_s5 + $0x2b0] sm:$0xf]  ;;  %v13532_v45 = vld [vmem:[%s22654_s5 + $0x2b4] sm:$0xf0]  ;;  %v23783_v5 = vrot.slane %v17927_v49, 1 }
 0x3b0   :  { %23778 = vst [vmem:[#allocation40_spill] sm:$0xff] %v18174_v35  ;;  %v18208_v57 = vsel %vm2848_vm11, %v23781_v8, %v4702_v54  ;;  %v18213_v60 = vsel %vm2848_vm11, %v23782_v26, %v4716_v58  ;;  %v11461_v54 = vld [vmem:[%s22654_s5 + $0x230] sm:$0xf]  ;;  %5291 = vmatpush.bf16.msrb.mxu1 %v11470_v7  ;;  %v11538_v58 = vor.u32 %v13533_v19, %v11535_v53  ;;  %v13515_v8 = vld [vmem:[%s22654_s5 + $0x234] sm:$0xf]  ;;  %v23792_v53 = vld [vmem:[#allocation41_spill] sm:$0xff] }
 0x3b1   :  { %23779 = vst [vmem:[#allocation86_spill] sm:$0xff] %v18187_v48  ;;  %v18239_v12 = vsel %vm2848_vm11, %v23783_v5, %v6514_v59  ;;  %v6536_v31 = vsel %vm2836_vm7, %v6535_v32, %v6534_v46  ;;  %v4740_v42 = vsel %vm2839_vm8, %v4739_v18, %v4738_v4  ;;  %5320 = vmatpush.bf16.msrb.mxu3 %v11534_v40  ;;  %v11463_v26 = vld [vmem:[%s22654_s5 + $0x238] sm:$0xf0]  ;;  %v13531_v49 = vld [vmem:[%s22654_s5 + $0x2b4] sm:$0xf]  ;;  %v4745_v59 = vrot.slane %v18187_v48, 1 }
 0x3b2   :  { %5349 = vmatpush.bf16.msrb.mxu0 %v11474_v16  ;;  %v11462_v7 = vor.u32 %v13516_v21, %v11461_v54  ;;  %v11526_v37 = vor.u32 %v13532_v45, %v11525_v33  ;;  %v23784_v32 = vpack.c.bf16 %v17988_v23, %v17988_v23  ;;  %5378 = vmatpush.bf16.msrb.mxu2 %v11538_v58  ;;  %v11527_v4 = vld [vmem:[%s22654_s5 + $0x2b8] sm:$0xf0]  ;;  %v23785_v40 = vld [vmem:[#allocation147_spill] sm:$0xff]  ;;  %v23786_v19 = vld [vmem:[#allocation148_spill] sm:$0xff]  ;;  %v6541_v17 = vrot.slane %v23792_v53, 2 }
 0x3b3   :  { %v18257_v18 = vpop.f32.mrf.mxu1  ;;  %v4747_v16 = vrot.slane %v23785_v40, 7  ;;  %v23787_v54 = vld [vmem:[#allocation84_spill] sm:$0xff]  ;;  %v18266_v33 = vpop.f32.mrf.mxu0  ;;  %v11466_v23 = vor.u32 %v13515_v8, %v11463_v26  ;;  %v11530_v45 = vor.u32 %v13531_v49, %v11527_v4  ;;  %v6538_v25 = vsel %vm2839_vm8, %v6537_v63, %v6536_v31  ;;  %v23789_v48 = vld [vmem:[#allocation153_spill] sm:$0xff]  ;;  %v23791_v40 = vld [vmem:[#allocation155_spill] sm:$0xff] }
 0x3b4   :  { %v18255_v46 = vunpack.c.l.b16 %v23784_v32  ;;  %v6539_v21 = vrot.slane %v23787_v54, 3  ;;  %v23788_v5 = vld [vmem:[#allocation152_spill] sm:$0xff]  ;;  %v4118_v6 = vpop.f32.mrf.mxu3  ;;  %v4176_v58 = vpop.f32.mrf.mxu2  ;;  %5292 = vmatpush.bf16.msrb.mxu1 %v11462_v7  ;;  %v23795_v63 = vrot.slane %v23774_v10, 3  ;;  %v11453_v7 = vld [vmem:[%s22654_s5 + $0x220] sm:$0xf] }
 0x3b5   :  { %v4749_v32 = vrot.slane %v23788_v5, 6  ;;  %v18275_v54 = vadd.f32 %v4118_v6, %v18156_v24  ;;  %v18278_v8 = vadd.f32 %v4176_v58, %v18163_v52  ;;  %5321 = vmatpush.bf16.msrb.mxu3 %v11526_v37  ;;  %v13514_v26 = vld [vmem:[%s22654_s5 + $0x224] sm:$0xf0]  ;;  %v11517_v24 = vld [vmem:[%s22654_s5 + $0x2a0] sm:$0xf]  ;;  %v23796_v52 = vrot.slane %v23775_v2, 2 }
 0x3b6   :  { %4990 = vmatmul.bf16.gmra.mxu1 %v18049_v1  ;;  %v4742_v31 = vsel %vm2842_vm9, %v23795_v63, %v4740_v42  ;;  %5048 = vmatmul.bf16.gmra.mxu0 %v18049_v1  ;;  %v11454_v42 = vor.u32 %v13514_v26, %v11453_v7  ;;  %v13530_v37 = vld [vmem:[%s22654_s5 + $0x2a4] sm:$0xf0]  ;;  %v13513_v49 = vld [vmem:[%s22654_s5 + $0x224] sm:$0xf]  ;;  %v11455_v4 = vld [vmem:[%s22654_s5 + $0x228] sm:$0xf0]  ;;  %v6540_v58 = vsel %vm2842_vm9, %v6539_v21, %v6538_v25 }
 0x3b7   :  { %23793 = vst [vmem:[#allocation87_spill] sm:$0xff] %v18275_v54  ;;  %v4744_v6 = vsel %vm2845_vm10, %v23796_v52, %v4742_v31  ;;  %5379 = vmatpush.bf16.msrb.mxu2 %v11530_v45  ;;  %5350 = vmatpush.bf16.msrb.mxu0 %v11466_v23  ;;  %v11518_v63 = vor.u32 %v13530_v37, %v11517_v24  ;;  %v13529_v45 = vld [vmem:[%s22654_s5 + $0x2a4] sm:$0xf]  ;;  %v11519_v31 = vld [vmem:[%s22654_s5 + $0x2a8] sm:$0xf0]  ;;  %v23798_v52 = vld [vmem:[#allocation25_spill] sm:$0xff] }
 0x3b8   :  { %23794 = vst [vmem:[#allocation88_spill] sm:$0xff] %v18278_v8  ;;  %v11458_v13 = vor.u32 %v13513_v49, %v11455_v4  ;;  %v23797_v7 = vld [vmem:[#allocation26_spill] sm:$0xff]  ;;  %5293 = vmatpush.bf16.msrb.mxu1 %v11454_v42  ;;  %v11522_v47 = vor.u32 %v13529_v45, %v11519_v31  ;;  %v6543_v23 = vrot.slane %v18255_v46, 1  ;;  %11382 = vmatmul.msk.bf16.gmra.mxu3 %vm3222_vm12, %v18064_v38  ;;  %v23801_v37 = vld [vmem:[#allocation145_spill] sm:$0xff]  ;;  %v11445_v42 = vld [vmem:[%s22654_s5 + $0x210] sm:$0xf] }
 0x3b9   :  { %v23799_v10 = vld [vmem:[#allocation162_spill] sm:$0xff]  ;;  %11386 = vmatmul.msk.bf16.gmra.mxu2 %vm3222_vm12, %v18064_v38  ;;  %v4746_v24 = vsel %vm2848_vm11, %v4745_v59, %v4744_v6  ;;  %v4748_v49 = vsel %vm2830_vm5, %v4747_v16, %v23801_v37  ;;  %v13512_v4 = vld [vmem:[%s22654_s5 + $0x214] sm:$0xf0]  ;;  %v11509_v46 = vld [vmem:[%s22654_s5 + $0x290] sm:$0xf]  ;;  %v6542_v45 = vsel %vm2845_vm10, %v6541_v17, %v6540_v58  ;;  %5322 = vmatpush.bf16.msrb.mxu3 %v11518_v63 }
 0x3ba   :  { %v4775_v2 = vrot.slane %v23799_v10, 7  ;;  %v23800_v25 = vld [vmem:[#allocation154_spill] sm:$0xff]  ;;  %v4750_v59 = vsel %vm2833_vm6, %v4749_v32, %v4748_v49  ;;  %v11446_v16 = vor.u32 %v13512_v4, %v11445_v42  ;;  %v13528_v6 = vld [vmem:[%s22654_s5 + $0x294] sm:$0xf0]  ;;  %v13511_v37 = vld [vmem:[%s22654_s5 + $0x214] sm:$0xf]  ;;  %v6544_v17 = vsel %vm2848_vm11, %v6543_v23, %v6542_v45 }
 0x3bb   :  { %v18335_v31 = vpop.f32.mrf.mxu1  ;;  %5380 = vmatpush.bf16.msrb.mxu2 %v11522_v47  ;;  %v11447_v21 = vld [vmem:[%s22654_s5 + $0x218] sm:$0xf0]  ;;  %v18348_v58 = vpop.f32.mrf.mxu0  ;;  %5351 = vmatpush.bf16.msrb.mxu0 %v11458_v13  ;;  %v23802_v47 = vld [vmem:[#allocation167_spill] sm:$0xff]  ;;  %v11510_v42 = vor.u32 %v13528_v6, %v11509_v46  ;;  %v13527_v14 = vld [vmem:[%s22654_s5 + $0x294] sm:$0xf] }
 0x3bc   :  { %v4777_v32 = vrot.slane %v23802_v47, 6  ;;  %v23803_v63 = vld [vmem:[#allocation163_spill] sm:$0xff]  ;;  %v11450_v4 = vor.u32 %v13511_v37, %v11447_v21  ;;  %v11511_v26 = vld [vmem:[%s22654_s5 + $0x298] sm:$0xf0]  ;;  %v4121_v10 = vpop.f32.mrf.mxu3  ;;  %v4179_v5 = vpop.f32.mrf.mxu2  ;;  %v23804_v23 = vld [vmem:[#allocation62_spill] sm:$0xff]  ;;  %5294 = vmatpush.bf16.msrb.mxu1 %v11446_v16  ;;  %v18372_v37 = vpack.c.b16 %v18225_v27, %v18208_v57 }
 0x3bd   :  { %v4789_v49 = vrot.slane %v23803_v63, 7  ;;  %v23805_v45 = vmax.f32 %v23804_v23, 0.0  ;;  %v23806_v13 = vld [vmem:[#allocation169_spill] sm:$0xff]  ;;  %v23807_v1 = vld [vmem:[#allocation168_spill] sm:$0xff]  ;;  %v11514_v21 = vor.u32 %v13527_v14, %v11511_v26  ;;  %v18365_v46 = vadd.f32 %v4121_v10, %v18257_v18  ;;  %v13510_v63 = vld [vmem:[%s22654_s5 + $0x204] sm:$0xf0]  ;;  %5323 = vmatpush.bf16.msrb.mxu3 %v11510_v42 }
 0x3be   :  { %v4779_v47 = vrot.slane %v23806_v13, 5  ;;  %v18368_v6 = vadd.f32 %v4179_v5, %v18266_v33  ;;  %v11501_v14 = vld [vmem:[%s22654_s5 + $0x280] sm:$0xf]  ;;  %v18384_v10 = vpack.c.b16 %v6544_v17, %v18239_v12  ;;  %v23811_v18 = vrot.slane %v23789_v48, 5  ;;  %v13526_v33 = vld [vmem:[%s22654_s5 + $0x284] sm:$0xf0] }
 0x3bf   :  { %v18360_v38 = vperm.slane %v23805_v45, 0  ;;  %23808 = vst [vmem:[#allocation43_spill] sm:$0xff] %v18365_v46  ;;  %v11437_v45 = vld [vmem:[%s22654_s5 + $0x200] sm:$0xf]  ;;  %5381 = vmatpush.bf16.msrb.mxu2 %v11514_v21  ;;  %v13509_v5 = vld [vmem:[%s22654_s5 + $0x204] sm:$0xf]  ;;  %v23812_v26 = vpack.c.bf16 %v17965_v51, %v17965_v51  ;;  %v18410_v21 = vpack.c.b16 %v4746_v24, %v18213_v60  ;;  %5352 = vmatpush.bf16.msrb.mxu0 %v11450_v4 }
 0x3c0   :  { %23809 = vst [vmem:[#allocation53_spill] sm:$0xff] %v18368_v6  ;;  %v4752_v57 = vsel %vm2836_vm7, %v23811_v18, %v4750_v59  ;;  %v11438_v27 = vor.u32 %v13510_v63, %v11437_v45  ;;  %v11439_v12 = vld [vmem:[%s22654_s5 + $0x208] sm:$0xf0]  ;;  %v23813_v59 = vld [vmem:[#allocation44_spill] sm:$0xff]  ;;  %v23817_v45 = vld [vmem:[#allocation158_spill] sm:$0xff] }
 0x3c1   :  { %23810 = vst [vmem:[#allocation49_spill] sm:$0xff] %v18384_v10  ;;  %v18401_v16 = vunpack.c.l.b16 %v23812_v26  ;;  %v23814_v17 = vld [vmem:[#allocation59_spill] sm:$0xff]  ;;  %v4776_v18 = vsel %vm2830_vm5, %v4775_v2, %v23817_v45  ;;  %v11502_v10 = vor.u32 %v13526_v33, %v11501_v14  ;;  %v11442_v13 = vor.u32 %v13509_v5, %v11439_v12  ;;  %v13525_v51 = vld [vmem:[%s22654_s5 + $0x284] sm:$0xf]  ;;  %v23818_v60 = vld [vmem:[#allocation32_spill] sm:$0xff] }
 0x3c2   :  { %v23815_v63 = vrot.slane %v23814_v17, 6  ;;  %23816 = vst [vmem:[#allocation39_spill] sm:$0xff] %v18410_v21  ;;  %v11503_v26 = vld [vmem:[%s22654_s5 + $0x288] sm:$0xf0]  ;;  %v4778_v2 = vsel %vm2833_vm6, %v4777_v32, %v4776_v18  ;;  %v23819_v4 = vld [vmem:[#allocation146_spill] sm:$0xff]  ;;  %v23820_v14 = vrot.slane %v23786_v19, 7  ;;  %5295 = vmatpush.bf16.msrb.mxu1 %v11438_v27 }
 0x3c3   :  { %v11506_v5 = vor.u32 %v13525_v51, %v11503_v26  ;;  %v13508_v12 = vld [vmem:[%s22654_s5 + $0x1f4] sm:$0xf0]  ;;  %v11493_v17 = vld [vmem:[%s22654_s5 + $0x270] sm:$0xf]  ;;  %v23821_v32 = vrot.slane %v23790_v43, 4  ;;  %v23822_v27 = vrot.slane %v23797_v7, 6  ;;  %5324 = vmatpush.bf16.msrb.mxu3 %v11502_v10  ;;  %v18474_v46 = vpop.f32.mrf.mxu0  ;;  %5353 = vmatpush.bf16.msrb.mxu0 %v11442_v13 }
 0x3c4   :  { %v18407_v42 = vsel %vm2833_vm6, %v23815_v63, %v23813_v59  ;;  %v11429_v59 = vld [vmem:[%s22654_s5 + $0x1f0] sm:$0xf]  ;;  %v4762_v33 = vsel %vm2830_vm5, %v23820_v14, %v23819_v4  ;;  %v13524_v63 = vld [vmem:[%s22654_s5 + $0x274] sm:$0xf0]  ;;  %v13507_v26 = vld [vmem:[%s22654_s5 + $0x1f4] sm:$0xf]  ;;  %v4123_v8 = vpop.f32.mrf.mxu3  ;;  %v4181_v54 = vpop.f32.mrf.mxu2 }
 0x3c5   :  { %v18442_v45 = vsel %vm2839_vm8, %v23821_v32, %v4752_v57  ;;  %v18447_v18 = vsel %vm2833_vm6, %v23822_v27, %v4762_v33  ;;  %v11430_v51 = vor.u32 %v13508_v12, %v11429_v59  ;;  %v11431_v4 = vld [vmem:[%s22654_s5 + $0x1f8] sm:$0xf0]  ;;  %v13523_v14 = vld [vmem:[%s22654_s5 + $0x274] sm:$0xf]  ;;  %v23823_v57 = vld [vmem:[#allocation118_spill] sm:$0xff]  ;;  %v18462_v33 = vpop.f32.mrf.mxu1  ;;  %v23827_v27 = vmax.f32 %v23804_v23, 0.0  ;;  %5382 = vmatpush.bf16.msrb.mxu2 %v11506_v5 }
 0x3c6   :  { %v23824_v32 = vld [vmem:[#allocation77_spill] sm:$0xff]  ;;  %v23826_v59 = vld [vmem:[#allocation171_spill] sm:$0xff]  ;;  %v11494_v6 = vor.u32 %v13524_v63, %v11493_v17  ;;  %v11434_v23 = vor.u32 %v13507_v26, %v11431_v4  ;;  %v18489_v13 = vadd.f32 %v4181_v54, %v18348_v58  ;;  %4995 = vmatmul.bf16.gmra.mxu1 %v18372_v37  ;;  %5053 = vmatmul.bf16.gmra.mxu0 %v18372_v37 }
 0x3c7   :  { %v23825_v24 = vrot.slane %v23824_v32, 6  ;;  %v4781_v12 = vrot.slane %v23826_v59, 4  ;;  %v18467_v43 = vperm.slane %v23827_v27, 2  ;;  %v23828_v7 = vld [vmem:[#allocation161_spill] sm:$0xff]  ;;  %5296 = vmatpush.bf16.msrb.mxu1 %v11430_v51  ;;  %v23832_v63 = vld [vmem:[#allocation79_spill] sm:$0xff] }
 0x3c8   :  { %v4790_v48 = vsel %vm2830_vm5, %v4789_v49, %v23828_v7  ;;  %v11495_v32 = vld [vmem:[%s22654_s5 + $0x278] sm:$0xf0]  ;;  %v4514_v7 = vpack.c.bf16 %v18360_v38, %v18360_v38  ;;  %v23830_v49 = vld [vmem:[#allocation170_spill] sm:$0xff]  ;;  %v23833_v35 = vrot.slane %v23832_v63, 5  ;;  %5325 = vmatpush.bf16.msrb.mxu3 %v11494_v6  ;;  %v13522_v4 = vld [vmem:[%s22654_s5 + $0x264] sm:$0xf0]  ;;  %5354 = vmatpush.bf16.msrb.mxu0 %v11434_v23 }
 0x3c9   :  { %v6548_v19 = vsel %vm2833_vm6, %v23825_v24, %v23823_v57  ;;  %v4780_v24 = vsel %vm2836_vm7, %v4779_v47, %v4778_v2  ;;  %v23829_v57 = vld [vmem:[#allocation173_spill] sm:$0xff]  ;;  %v11498_v27 = vor.u32 %v13523_v14, %v11495_v32  ;;  %v4793_v10 = vrot.slane %v23830_v49, 5  ;;  %v11421_v51 = vld [vmem:[%s22654_s5 + $0x1e0] sm:$0xf]  ;;  %v13505_v14 = vld [vmem:[%s22654_s5 + $0x1e4] sm:$0xf]  ;;  %11383 = vmatmul.msk.bf16.gmra.mxu3 %vm3222_vm12, %v18410_v21  ;;  %11387 = vmatmul.msk.bf16.gmra.mxu2 %vm3222_vm12, %v18410_v21 }
 0x3ca   :  { %v4783_v59 = vrot.slane %v23829_v57, 3  ;;  %v23831_v5 = vld [vmem:[#allocation61_spill] sm:$0xff]  ;;  %v6550_v44 = vsel %vm2836_vm7, %v23833_v35, %v6548_v19  ;;  %v18486_v47 = vadd.f32 %v4123_v8, %v18335_v31  ;;  %v23834_v2 = vrot.slane %v23807_v1, 6  ;;  %v13506_v35 = vld [vmem:[%s22654_s5 + $0x1e4] sm:$0xf0] }
 0x3cb   :  { %v6521_v17 = vrot.slane %v23831_v5, 5  ;;  %v11485_v19 = vld [vmem:[%s22654_s5 + $0x260] sm:$0xf]  ;;  %v23835_v54 = vld [vmem:[#allocation81_spill] sm:$0xff]  ;;  %v4515_v58 = vpack.c.bf16 %v18467_v43, %v18467_v43  ;;  %v11422_v26 = vor.u32 %v13506_v35, %v11421_v51  ;;  %v23838_v43 = vld [vmem:[#allocation172_spill] sm:$0xff]  ;;  %5383 = vmatpush.bf16.msrb.mxu2 %v11498_v27  ;;  %v5649_v57 = vrot.slane %v17999_v55, 2 }
 0x3cc   :  { %v4792_v38 = vsel %vm2833_vm6, %v23834_v2, %v4790_v48  ;;  %v23836_v8 = vrot.slane %v23835_v54, 4  ;;  %v4782_v48 = vsel %vm2839_vm8, %v4781_v12, %v4780_v24  ;;  %v23837_v12 = vpack.c.bf16 %v17996_v3, %v17996_v3  ;;  %v13521_v63 = vld [vmem:[%s22654_s5 + $0x264] sm:$0xf]  ;;  %v11487_v2 = vld [vmem:[%s22654_s5 + $0x268] sm:$0xf0]  ;;  %v23840_v54 = vld [vmem:[#allocation64_spill] sm:$0xff] }
 0x3cd   :  { %v4795_v6 = vrot.slane %v23838_v43, 4  ;;  %v11486_v24 = vor.u32 %v13522_v4, %v11485_v19  ;;  %v6522_v51 = vsel %vm2836_vm7, %v6521_v17, %v18407_v42  ;;  %v18534_v3 = vunpack.c.l.b16 %v4514_v7  ;;  %5297 = vmatpush.bf16.msrb.mxu1 %v11422_v26  ;;  %v23842_v19 = vld [vmem:[#allocation85_spill] sm:$0xff]  ;;  %v23845_v17 = vld [vmem:[#allocation66_spill] sm:$0xff] }
 0x3ce   :  { %v6552_v31 = vsel %vm2839_vm8, %v23836_v8, %v6550_v44  ;;  %v11423_v44 = vld [vmem:[%s22654_s5 + $0x1e8] sm:$0xf0]  ;;  %v18523_v32 = vunpack.c.l.b16 %v23837_v12  ;;  %v11490_v35 = vor.u32 %v13521_v63, %v11487_v2  ;;  %v23841_v23 = vrot.slane %v23840_v54, 4  ;;  %v23847_v12 = vld [vmem:[#allocation144_spill] sm:$0xff] }
 0x3cf   :  { %v11426_v5 = vor.u32 %v13505_v14, %v11423_v44  ;;  %23839 = vst [vmem:[#allocation2_spill] sm:$0xff] %v18534_v3  ;;  %v23843_v8 = vrot.slane %v23842_v19, 3  ;;  %v23844_v14 = vld [vmem:[#allocation175_spill] sm:$0xff]  ;;  %v4794_v7 = vsel %vm2836_vm7, %v4793_v10, %v4792_v38  ;;  %v23846_v26 = vrot.slane %v23845_v17, 3  ;;  %5326 = vmatpush.bf16.msrb.mxu3 %v11486_v24  ;;  %v23854_v17 = vld [vmem:[#allocation70_spill] sm:$0xff] }
 0x3d0   :  { %v6524_v27 = vsel %vm2839_vm8, %v23841_v23, %v6522_v51  ;;  %v4785_v42 = vrot.slane %v23844_v14, 2  ;;  %v23848_v63 = vrot.slane %v23847_v12, 2  ;;  %v4099_v51 = vpop.f32.mrf.mxu1  ;;  %v23851_v23 = vld [vmem:[#allocation35_spill] sm:$0xff]  ;;  %v4157_v12 = vpop.f32.mrf.mxu0  ;;  %v4784_v43 = vsel %vm2842_vm9, %v4783_v59, %v4782_v48  ;;  %5384 = vmatpush.bf16.msrb.mxu2 %v11490_v35  ;;  %v23862_v35 = vld [vmem:[#allocation176_spill] sm:$0xff] }
 0x3d1   :  { %v6554_v4 = vsel %vm2842_vm9, %v23843_v8, %v6552_v31  ;;  %v6526_v44 = vsel %vm2842_vm9, %v23846_v26, %v6524_v27  ;;  %v23849_v31 = vpack.c.bf16 %v23818_v60, %v23818_v60  ;;  %v4513_v19 = vpack.c.bf16 %v23851_v23, %v23851_v23  ;;  %v23852_v8 = vld [vmem:[#allocation159_spill] sm:$0xff]  ;;  %5355 = vmatpush.bf16.msrb.mxu0 %v11426_v5 }
 0x3d2   :  { %v6556_v2 = vsel %vm2845_vm10, %v23848_v63, %v6554_v4  ;;  %v23853_v10 = vrot.slane %v23852_v8, 2  ;;  %v23855_v27 = vrot.slane %v23854_v17, 1  ;;  %v23856_v4 = vld [vmem:[#allocation157_spill] sm:$0xff]  ;;  %v23857_v60 = vrot.slane %v23798_v52, 5  ;;  %v23858_v24 = vld [vmem:[#allocation63_spill] sm:$0xff]  ;;  %v4126_v8 = vpop.f32.mrf.mxu3  ;;  %v23892_v52 = vld [vmem:[#allocation68_spill] sm:$0xff] }
 0x3d3   :  { %v18557_v54 = vunpack.c.l.b16 %v23849_v31  ;;  %v4757_v63 = vrot.slane %v23856_v4, 2  ;;  %v23859_v23 = vrot.slane %v23858_v24, 1  ;;  %v18577_v17 = vunpack.c.l.b16 %v4515_v58 }
 0x3d4   :  { %v6528_v38 = vsel %vm2845_vm10, %v23853_v10, %v6526_v44  ;;  %v6558_v26 = vsel %vm2848_vm11, %v23855_v27, %v6556_v2  ;;  %v4766_v31 = vsel %vm2836_vm7, %v23857_v60, %v18447_v18  ;;  %v4184_v10 = vpop.f32.mrf.mxu2  ;;  %v4787_v2 = vrot.slane %v18534_v3, 1 }
 0x3d5   :  { %23850 = vst [vmem:[#allocation42_spill] sm:$0xff] %v18557_v54  ;;  %v6530_v44 = vsel %vm2848_vm11, %v23859_v23, %v6528_v38  ;;  %v4796_v27 = vsel %vm2839_vm8, %v4795_v6, %v4794_v7  ;;  %v18583_v48 = vadd.f32 %v4126_v8, %v18462_v33  ;;  %v18586_v18 = vadd.f32 %v4184_v10, %v18474_v46  ;;  %v23865_v7 = vld [vmem:[#allocation174_spill] sm:$0xff]  ;;  %v23868_v10 = vld [vmem:[#allocation156_spill] sm:$0xff] }
 0x3d6   :  { %23860 = vst [vmem:[#allocation9_spill] sm:$0xff] %v18577_v17  ;;  %v18580_v59 = vpack.c.b16 %v6558_v26, %v6530_v44  ;;  %v4786_v5 = vsel %vm2845_vm10, %v4785_v42, %v4784_v43  ;;  %v4799_v38 = vrot.slane %v23862_v35, 2  ;;  %v23863_v60 = vrot.slane %v23791_v40, 3  ;;  %v23867_v43 = vld [vmem:[#allocation30_spill] sm:$0xff] }
 0x3d7   :  { %v4759_v24 = vrot.slane %v18557_v54, 1  ;;  %v18595_v6 = vunpack.c.l.b16 %v4513_v19  ;;  %v4797_v26 = vrot.slane %v23865_v7, 3  ;;  %v23866_v46 = vrot.slane %v23800_v25, 4  ;;  %v23888_v25 = vld [vmem:[#allocation112_spill] sm:$0xff] }
 0x3d8   :  { %23861 = vst [vmem:[#allocation89_spill] sm:$0xff] %v18580_v59  ;;  %v4756_v58 = vsel %vm2842_vm9, %v23863_v60, %v18442_v45  ;;  %v4771_v42 = vrot.slane %v23867_v43, 2  ;;  %v5641_v44 = vrot.slane %v23703_v50, 6  ;;  %v4788_v8 = vsel %vm2848_vm11, %v4787_v2, %v4786_v5  ;;  %v4102_v2 = vpop.f32.mrf.mxu1 }
 0x3d9   :  { %23864 = vst [vmem:[#allocation10_spill] sm:$0xff] %v18595_v6  ;;  %v4758_v33 = vsel %vm2845_vm10, %v4757_v63, %v4756_v58  ;;  %v4768_v23 = vsel %vm2839_vm8, %v23866_v46, %v4766_v31  ;;  %v4769_v45 = vrot.slane %v23868_v10, 3  ;;  %v4798_v60 = vsel %vm2842_vm9, %v4797_v26, %v4796_v27  ;;  %v23870_v46 = vld [vmem:[#allocation103_spill] sm:$0xff] }
 0x3da   :  { %v4801_v19 = vrot.slane %v18577_v17, 1  ;;  %v4800_v59 = vsel %vm2845_vm10, %v4799_v38, %v4798_v60  ;;  %v5468_v63 = vpack.c.bf16 %v18091_v41, %v18091_v41  ;;  %v23869_v58 = vmax.f32 %v17465_v28, 0.0  ;;  %v4160_v60 = vpop.f32.mrf.mxu0 }
 0x3db   :  { %v23871_v35 = vrot.slane %v23691_v56, 7  ;;  %v4760_v5 = vsel %vm2848_vm11, %v4759_v24, %v4758_v33  ;;  %v4770_v27 = vsel %vm2842_vm9, %v4769_v45, %v4768_v23  ;;  %v4773_v26 = vrot.slane %v18595_v6, 1  ;;  %v23885_v6 = vld [vmem:[#allocation98_spill] sm:$0xff] }
 0x3dc   :  { %v5437_v31 = vperm.slane %v23869_v58, 2  ;;  %v23872_v38 = vrot.slane %v23707_v0, 5  ;;  %v18624_v28 = vpack.c.b16 %v4788_v8, %v4760_v5  ;;  %v4772_v58 = vsel %vm2845_vm10, %v4771_v42, %v4770_v27  ;;  %v4186_v24 = vpop.f32.mrf.mxu2 }
 0x3dd   :  { %v5640_v7 = vsel %vm2830_vm5, %v23871_v35, %v23870_v46  ;;  %v5633_v17 = vrot.slane %v23717_v29, 3  ;;  %v5643_v35 = vrot.slane %v23712_v62, 5  ;;  %v4128_v46 = vpop.f32.mrf.mxu3  ;;  %v4802_v33 = vsel %vm2848_vm11, %v4801_v19, %v4800_v59 }
 0x3de   :  { %v5630_v41 = vsel %vm2836_vm7, %v23872_v38, %v18203_v34  ;;  %23873 = vst [vmem:[#allocation4_spill] sm:$0xff] %v18624_v28  ;;  %v5631_v23 = vrot.slane %v23718_v61, 4  ;;  %v23874_v45 = vrot.slane %v23654_v15, 5  ;;  %v5642_v8 = vsel %vm2833_vm6, %v5641_v44, %v5640_v7  ;;  %5000 = vmatmul.bf16.gmra.mxu1 %v18624_v28  ;;  %5058 = vmatmul.bf16.gmra.mxu0 %v18624_v28  ;;  %v23878_v44 = vld [vmem:[#allocation12_spill] sm:$0xff] }
 0x3df   :  { %v18636_v5 = vadd.f32 %v4128_v46, %v4099_v51  ;;  %v18638_v42 = vadd.f32 %v4186_v24, %v4157_v12  ;;  %v18641_v27 = vunpack.c.l.b16 %v5468_v63  ;;  %v5469_v38 = vpack.c.bf16 %v5437_v31, %v5437_v31  ;;  %v23879_v46 = vld [vmem:[#allocation28_spill] sm:$0xff] }
 0x3e0   :  { %v5616_v34 = vsel %vm2836_vm7, %v23874_v45, %v18054_v20  ;;  %v4774_v59 = vsel %vm2848_vm11, %v4773_v26, %v4772_v58  ;;  %v5632_v19 = vsel %vm2839_vm8, %v5631_v23, %v5630_v41  ;;  %v5635_v3 = vrot.slane %v17982_v22, 2  ;;  %v23880_v58 = vld [vmem:[#allocation67_spill] sm:$0xff] }
 0x3e1   :  { %23875 = vst [vmem:[#allocation93_spill] sm:$0xff] %v18636_v5  ;;  %v5617_v20 = vrot.slane %v23657_v36, 4  ;;  %v18648_v7 = vpack.c.b16 %v4802_v33, %v4774_v59  ;;  %v5634_v51 = vsel %vm2842_vm9, %v5633_v17, %v5632_v19  ;;  %v5644_v12 = vsel %vm2836_vm7, %v5643_v35, %v5642_v8  ;;  %v23881_v45 = vld [vmem:[#allocation111_spill] sm:$0xff]  ;;  %v23882_v33 = vld [vmem:[#allocation150_spill] sm:$0xff]  ;;  %v4104_v19 = vpop.f32.mrf.mxu1  ;;  %v23926_v5 = vld [vmem:[#allocation136_spill] sm:$0xff] }
 0x3e2   :  { %23876 = vst [vmem:[#allocation96_spill] sm:$0xff] %v18638_v42  ;;  %v5647_v63 = vrot.slane %v23878_v44, 3  ;;  %v5607_v31 = vrot.slane %v23879_v46, 2  ;;  %v5621_v24 = vrot.slane %v23880_v58, 2  ;;  %v5645_v41 = vrot.slane %v23881_v45, 4  ;;  %v4162_v1 = vpop.f32.mrf.mxu0 }
 0x3e3   :  { %23877 = vst [vmem:[#allocation95_spill] sm:$0xff] %v18648_v7  ;;  %v5618_v26 = vsel %vm2839_vm8, %v5617_v20, %v5616_v34  ;;  %11384 = vmatmul.msk.bf16.gmra.mxu3 %vm3222_vm12, %v18648_v7  ;;  %11388 = vmatmul.msk.bf16.gmra.mxu2 %vm3222_vm12, %v18648_v7  ;;  %v23883_v17 = vrot.slane %v23655_v39, 3  ;;  %v5637_v23 = vrot.slane %v18641_v27, 1  ;;  %v18666_v8 = vunpack.c.l.b16 %v5469_v38  ;;  %v23893_v7 = vld [vmem:[#allocation38_spill] sm:$0xff] }
 0x3e4   :  { %v23884_v34 = vrot.slane %v23664_v30, 3  ;;  %v5553_v20 = vrot.slane %v17800_v9, 1  ;;  %v5636_v14 = vsel %vm2845_vm10, %v5635_v3, %v5634_v51  ;;  %v5646_v49 = vsel %vm2839_vm8, %v5645_v41, %v5644_v12  ;;  %v4189_v9 = vpop.f32.mrf.mxu2 }
 0x3e5   :  { %v5606_v35 = vsel %vm2842_vm9, %v23883_v17, %v23882_v33  ;;  %v23886_v33 = vrot.slane %v23758_v11, 2  ;;  %v5609_v17 = vrot.slane %v18401_v16, 1  ;;  %v5648_v43 = vsel %vm2842_vm9, %v5647_v63, %v5646_v49  ;;  %v4131_v10 = vpop.f32.mrf.mxu3 }
 0x3e6   :  { %v5620_v59 = vsel %vm2842_vm9, %v23884_v34, %v5618_v26  ;;  %v23887_v26 = vld [vmem:[#allocation34_spill] sm:$0xff]  ;;  %v23889_v3 = vrot.slane %v23792_v53, 1  ;;  %v5608_v12 = vsel %vm2845_vm10, %v5607_v31, %v5606_v35  ;;  %v5623_v11 = vrot.slane %v18523_v32, 1  ;;  %v23894_v53 = vld [vmem:[#allocation15_spill] sm:$0xff] }
 0x3e7   :  { %v5552_v38 = vsel %vm2845_vm10, %v23886_v33, %v23885_v6  ;;  %v5653_v34 = vrot.slane %v23887_v26, 7  ;;  %v5622_v41 = vsel %vm2845_vm10, %v5621_v24, %v5620_v59  ;;  %v18689_v6 = vadd.f32 %v4131_v10, %v4102_v2  ;;  %v23897_v24 = vld [vmem:[#allocation17_spill] sm:$0xff] }
 0x3e8   :  { %v5582_v51 = vsel %vm2848_vm11, %v23889_v3, %v23888_v25  ;;  %v18691_v33 = vadd.f32 %v4189_v9, %v4160_v60  ;;  %v5638_v49 = vsel %vm2848_vm11, %v5637_v23, %v5636_v14  ;;  %v5651_v63 = vrot.slane %v18666_v8, 1  ;;  %v23895_v25 = vld [vmem:[#allocation45_spill] sm:$0xff]  ;;  %v23898_v60 = vld [vmem:[#allocation120_spill] sm:$0xff] }
 0x3e9   :  { %23890 = vst [vmem:[#allocation83_spill] sm:$0xff] %v18689_v6  ;;  %v18697_v54 = vadd.f32 %v23893_v7, %v23892_v52  ;;  %v18701_v3 = vadd.f32 %v23895_v25, %v23894_v53  ;;  %v5650_v31 = vsel %vm2845_vm10, %v5649_v57, %v5648_v43  ;;  %v5655_v35 = vrot.slane %v23897_v24, 6  ;;  %v23899_v23 = vld [vmem:[#allocation57_spill] sm:$0xff]  ;;  %v23903_v57 = vld [vmem:[#allocation90_spill] sm:$0xff]  ;;  %v23923_v24 = vld [vmem:[#allocation91_spill] sm:$0xff] }
 0x3ea   :  { %23891 = vst [vmem:[#allocation3_spill] sm:$0xff] %v18691_v33  ;;  %v5554_v10 = vsel %vm2848_vm11, %v5553_v20, %v5552_v38  ;;  %v5610_v2 = vsel %vm2848_vm11, %v5609_v17, %v5608_v12  ;;  %v5654_v14 = vsel %vm2830_vm5, %v5653_v34, %v23898_v60  ;;  %v23900_v59 = vmax.f32 %v23899_v23, 0.0  ;;  %v23904_v20 = vld [vmem:[#allocation122_spill] sm:$0xff]  ;;  %v23905_v17 = vld [vmem:[#allocation124_spill] sm:$0xff]  ;;  %v23906_v34 = vld [vmem:[#allocation33_spill] sm:$0xff] }
 0x3eb   :  { %23896 = vst [vmem:[#allocation100_spill] sm:$0xff] %v18701_v3  ;;  %v18711_v52 = vpack.c.b16 %v5582_v51, %v5554_v10  ;;  %v18713_v7 = vpack.c.b16 %v5638_v49, %v5610_v2  ;;  %v18716_v53 = vsel %vm2848_vm11, %v5623_v11, %v5622_v41  ;;  %v6559_v43 = vrot.slane %v23903_v57, 7  ;;  %v4353_v3 = vpop.f32.mrf.mxu1  ;;  %v23910_v2 = vld [vmem:[#allocation18_spill] sm:$0xff] }
 0x3ec   :  { %v6396_v9 = vperm.slane %v23900_v59, 0  ;;  %v18720_v25 = vsel %vm2848_vm11, %v5651_v63, %v5650_v31  ;;  %v5657_v38 = vrot.slane %v23904_v20, 5  ;;  %v5667_v60 = vrot.slane %v23906_v34, 7  ;;  %v23907_v59 = vld [vmem:[#allocation71_spill] sm:$0xff]  ;;  %v23911_v31 = vld [vmem:[#allocation166_spill] sm:$0xff]  ;;  %v23913_v34 = vld [vmem:[#allocation92_spill] sm:$0xff]  ;;  %v4191_v33 = vpop.f32.mrf.mxu2 }
 0x3ed   :  { %23901 = vst [vmem:[#allocation102_spill] sm:$0xff] %v18711_v52  ;;  %v23908_v51 = vmax.f32 %v23907_v59, 0.0  ;;  %v5656_v49 = vsel %vm2833_vm6, %v5655_v35, %v5654_v14  ;;  %v4354_v57 = vadd.f32 %v4353_v3, %v23911_v31  ;;  %v23912_v52 = vld [vmem:[#allocation123_spill] sm:$0xff]  ;;  %v6561_v40 = vrot.slane %v23913_v34, 6  ;;  %v4133_v28 = vpop.f32.mrf.mxu3  ;;  %v23915_v6 = vld [vmem:[#allocation126_spill] sm:$0xff] }
 0x3ee   :  { %23902 = vst [vmem:[#allocation117_spill] sm:$0xff] %v18713_v7  ;;  %v4411_v7 = vpop.f32.mrf.mxu0  ;;  %v6428_v4 = vpack.c.bf16 %v6396_v9, %v6396_v9  ;;  %v18743_v63 = vadd.f32 %v4133_v28, %v4104_v19  ;;  %v18745_v3 = vadd.f32 %v4191_v33, %v4162_v1  ;;  %v23920_v31 = vld [vmem:[#allocation22_spill] sm:$0xff]  ;;  %v23921_v9 = vld [vmem:[#allocation75_spill] sm:$0xff]  ;;  %v6573_v42 = vrot.slane %v23923_v24, 7 }
 0x3ef   :  { %v18727_v10 = vperm.slane %v23908_v51, 0  ;;  %v23909_v41 = vmov %v23908_v51  ;;  %v23914_v51 = vld [vmem:[#allocation40_spill] sm:$0xff]  ;;  %5298 = vmatmul.bf16.vlgmr.msrb.gmra.mxu1 %v23920_v31  ;;  %v23922_v12 = vmax.f32 %v23921_v9, 0.0  ;;  %5356 = vmatmul.bf16.vlgmr.msrb.gmra.mxu0 %v23920_v31  ;;  %v23925_v59 = vld [vmem:[#allocation134_spill] sm:$0xff]  ;;  %v6565_v31 = vrot.slane %v23655_v39, 4  ;;  %v23932_v35 = vld [vmem:[#allocation115_spill] sm:$0xff] }
 0x3f0   :  { %v18732_v11 = vperm.slane %v23909_v41, 2  ;;  %v4412_v26 = vadd.f32 %v4411_v7, %v23914_v51  ;;  %v23917_v41 = vld [vmem:[#allocation6_spill] sm:$0xff]  ;;  %23918 = vst [vmem:[#allocation130_spill] sm:$0xff] %v18743_v63  ;;  %v23931_v51 = vmax.f32 %v23899_v23, 0.0  ;;  %v6577_v19 = vrot.slane %v23657_v36, 5  ;;  %v23935_v28 = vld [vmem:[#allocation87_spill] sm:$0xff] }
 0x3f1   :  { %v6560_v20 = vsel %vm2830_vm5, %v6559_v43, %v23917_v41  ;;  %23919 = vst [vmem:[#allocation131_spill] sm:$0xff] %v18745_v3  ;;  %v18750_v34 = vperm.slane %v23922_v12, 0  ;;  %v23928_v1 = vmov %v23922_v12  ;;  %v18762_v41 = vunpack.c.l.b16 %v6428_v4  ;;  %v23930_v3 = vld [vmem:[#allocation94_spill] sm:$0xff]  ;;  %v13550_v39 = vld [vmem:[%s22653_s4 + $0x344] sm:$0xf0]  ;;  %v23933_v4 = vld [vmem:[#allocation121_spill] sm:$0xff] }
 0x3f2   :  { %v18760_v33 = vperm.slane %v23928_v1, 2  ;;  %v6562_v12 = vsel %vm2833_vm6, %v6561_v40, %v6560_v20  ;;  %v6563_v24 = vrot.slane %v23930_v3, 5  ;;  %v18769_v63 = vperm.slane %v23931_v51, 2  ;;  %v11635_v40 = vld [vmem:[%s22653_s4 + $0x340] sm:$0xf]  ;;  %v23934_v20 = vld [vmem:[#allocation5_spill] sm:$0xff] }
 0x3f3   :  { %v6575_v43 = vrot.slane %v23654_v15, 6  ;;  %11539 = vmatmul.msk.bf16.vlgmr.msrb.gmra.mxu3 %vm3222_vm12, %v23932_v35  ;;  %11543 = vmatmul.msk.bf16.vlgmr.msrb.gmra.mxu2 %vm3222_vm12, %v23932_v35  ;;  %v13549_v15 = vld [vmem:[%s22653_s4 + $0x344] sm:$0xf]  ;;  %v5658_v36 = vsel %vm2836_vm7, %v5657_v38, %v5656_v49  ;;  %v5668_v23 = vsel %vm2830_vm5, %v5667_v60, %v23933_v4  ;;  %v6574_v35 = vsel %vm2830_vm5, %v6573_v42, %v23934_v20  ;;  %v4355_v3 = vpop.f32.mrf.mxu1  ;;  %v11637_v51 = vld [vmem:[%s22653_s4 + $0x348] sm:$0xf0]  ;;  %v23936_v20 = vld [vmem:[#allocation88_spill] sm:$0xff] }
 0x3f4   :  { %23929 = vst [vmem:[#allocation143_spill] sm:$0xff] %v18760_v33  ;;  %v11636_v9 = vor.u32 %v13550_v39, %v11635_v40  ;;  %v6564_v1 = vsel %vm2836_vm7, %v6563_v24, %v6562_v12  ;;  %v6567_v33 = vrot.slane %v23879_v46, 3  ;;  %v18798_v38 = vadd.f32 %v4355_v3, %v23935_v28  ;;  %v4440_v39 = vpop.f32.mrf.mxu2  ;;  %v23937_v12 = vld [vmem:[#allocation48_spill] sm:$0xff]  ;;  %v23938_v46 = vld [vmem:[#allocation106_spill] sm:$0xff] }
 0x3f5   :  { %v11640_v60 = vor.u32 %v13549_v15, %v11637_v51  ;;  %v6569_v4 = vrot.slane %v18401_v16, 2  ;;  %v4382_v40 = vpop.f32.mrf.mxu3  ;;  %v1929_v24 = vmax.f32 %v23937_v12, 0.0  ;;  %v6587_v14 = vrot.slane %v23938_v46, 7  ;;  %v11627_v15 = vld [vmem:[%s22653_s4 + $0x330] sm:$0xf] }
 0x3f6   :  { %v4413_v49 = vpop.f32.mrf.mxu0  ;;  %5939 = vmatpush.bf16.msra.mxu1 %v11636_v9  ;;  %v6589_v7 = vrot.slane %v23707_v0, 6  ;;  %v18808_v28 = vadd.f32 %v4382_v40, %v4354_v57  ;;  %v18810_v3 = vadd.f32 %v4440_v39, %v4412_v26  ;;  %v13548_v51 = vld [vmem:[%s22653_s4 + $0x334] sm:$0xf0]  ;;  %v11691_v9 = vld [vmem:[%s22653_s4 + $0x3b0] sm:$0xf]  ;;  %v6576_v0 = vsel %vm2833_vm6, %v6575_v43, %v6574_v35 }
 0x3f7   :  { %v18803_v21 = vadd.f32 %v4413_v49, %v23936_v20  ;;  %5997 = vmatpush.bf16.msra.mxu0 %v11640_v60  ;;  %v6566_v49 = vsel %vm2839_vm8, %v6565_v31, %v6564_v1  ;;  %v11628_v57 = vor.u32 %v13548_v51, %v11627_v15  ;;  %v13564_v26 = vld [vmem:[%s22653_s4 + $0x3b4] sm:$0xf0]  ;;  %v13547_v60 = vld [vmem:[%s22653_s4 + $0x334] sm:$0xf]  ;;  %v11629_v40 = vld [vmem:[%s22653_s4 + $0x338] sm:$0xf0]  ;;  %v18834_v39 = vpack.c.b16 %v18720_v25, %v18716_v53 }
 0x3f8   :  { %23939 = vst [vmem:[#allocation105_spill] sm:$0xff] %v18808_v28  ;;  %v23942_v31 = vld [vmem:[#allocation104_spill] sm:$0xff]  ;;  %v11692_v1 = vor.u32 %v13564_v26, %v11691_v9  ;;  %v11632_v20 = vor.u32 %v13547_v60, %v11629_v40  ;;  %v11693_v46 = vld [vmem:[%s22653_s4 + $0x3b8] sm:$0xf0]  ;;  %v11619_v53 = vld [vmem:[%s22653_s4 + $0x320] sm:$0xf]  ;;  %v6568_v40 = vsel %vm2842_vm9, %v6567_v33, %v6566_v49 }
 0x3f9   :  { %23940 = vst [vmem:[#allocation11_spill] sm:$0xff] %v18810_v3  ;;  %v6588_v35 = vsel %vm2830_vm5, %v6587_v14, %v23942_v31  ;;  %v13563_v12 = vld [vmem:[%s22653_s4 + $0x3b4] sm:$0xf]  ;;  %v23943_v25 = vrot.slane %v23905_v17, 4  ;;  %v23944_v14 = vrot.slane %v23910_v2, 6  ;;  %v24069_v28 = vld [vmem:[#allocation69_spill] sm:$0xff] }
 0x3fa   :  { %23941 = vst [vmem:[#allocation7_spill] sm:$0xff] %v18834_v39  ;;  %5940 = vmatpush.bf16.msra.mxu1 %v11628_v57  ;;  %v11696_v9 = vor.u32 %v13563_v12, %v11693_v46  ;;  %v13546_v26 = vld [vmem:[%s22653_s4 + $0x324] sm:$0xf0]  ;;  %v11683_v60 = vld [vmem:[%s22653_s4 + $0x3a0] sm:$0xf]  ;;  %v18872_v57 = vsel %vm2836_vm7, %v6577_v19, %v6576_v0  ;;  %5969 = vmatpush.bf16.msra.mxu3 %v11692_v1 }
 0x3fb   :  { %v18852_v15 = vsel %vm2839_vm8, %v23943_v25, %v5658_v36  ;;  %v18857_v51 = vsel %vm2833_vm6, %v23944_v14, %v5668_v23  ;;  %v13562_v36 = vld [vmem:[%s22653_s4 + $0x3a4] sm:$0xf0]  ;;  %5998 = vmatpush.bf16.msra.mxu0 %v11632_v20  ;;  %v11620_v31 = vor.u32 %v13546_v26, %v11619_v53  ;;  %v13545_v46 = vld [vmem:[%s22653_s4 + $0x324] sm:$0xf]  ;;  %v11621_v25 = vld [vmem:[%s22653_s4 + $0x328] sm:$0xf0]  ;;  %v6590_v49 = vsel %vm2833_vm6, %v6589_v7, %v6588_v35  ;;  %v4358_v19 = vpop.f32.mrf.mxu1 }
 0x3fc   :  { %v11684_v12 = vor.u32 %v13562_v36, %v11683_v60  ;;  %v13561_v33 = vld [vmem:[%s22653_s4 + $0x3a4] sm:$0xf]  ;;  %6027 = vmatpush.bf16.msra.mxu2 %v11696_v9  ;;  %v11624_v0 = vor.u32 %v13545_v46, %v11621_v25  ;;  %v11685_v1 = vld [vmem:[%s22653_s4 + $0x3a8] sm:$0xf0]  ;;  %v6398_v20 = vperm.slane %v1929_v24, 0  ;;  %v6591_v53 = vrot.slane %v23718_v61, 5  ;;  %v4442_v9 = vpop.f32.mrf.mxu2 }
 0x3fd   :  { %v6593_v14 = vrot.slane %v23717_v29, 4  ;;  %v23945_v26 = vld [vmem:[#allocation43_spill] sm:$0xff]  ;;  %v11688_v43 = vor.u32 %v13561_v33, %v11685_v1  ;;  %v18892_v23 = vperm.slane %v1929_v24, 2  ;;  %v6601_v7 = vrot.slane %v23703_v50, 7  ;;  %v4384_v35 = vpop.f32.mrf.mxu3  ;;  %v23946_v46 = vld [vmem:[#allocation53_spill] sm:$0xff] }
 0x3fe   :  { %v18890_v60 = vadd.f32 %v4358_v19, %v23945_v26  ;;  %v4416_v36 = vpop.f32.mrf.mxu0  ;;  %5941 = vmatpush.bf16.msra.mxu1 %v11620_v31  ;;  %v6430_v42 = vpack.c.bf16 %v6398_v20, %v6398_v20  ;;  %v6592_v61 = vsel %vm2836_vm7, %v6591_v53, %v6590_v49  ;;  %v6595_v29 = vrot.slane %v17982_v22, 3  ;;  %v23949_v24 = vld [vmem:[#allocation31_spill] sm:$0xff]  ;;  %5970 = vmatpush.bf16.msra.mxu3 %v11684_v12  ;;  %v11611_v50 = vld [vmem:[%s22653_s4 + $0x310] sm:$0xf]  ;;  %v13544_v31 = vld [vmem:[%s22653_s4 + $0x314] sm:$0xf0] }
 0x3ff   :  { %v18896_v25 = vadd.f32 %v4416_v36, %v23946_v46  ;;  %v18901_v19 = vadd.f32 %v4384_v35, %v18798_v38  ;;  %v18904_v33 = vadd.f32 %v4442_v9, %v18803_v21  ;;  %5303 = vmatmul.bf16.gmra.mxu1 %v23949_v24  ;;  %v11675_v22 = vld [vmem:[%s22653_s4 + $0x390] sm:$0xf]  ;;  %v6594_v38 = vsel %vm2839_vm8, %v6593_v14, %v6592_v61  ;;  %v13560_v12 = vld [vmem:[%s22653_s4 + $0x394] sm:$0xf0]  ;;  %v13543_v49 = vld [vmem:[%s22653_s4 + $0x314] sm:$0xf] }
 0x400   :  { %5361 = vmatmul.bf16.gmra.mxu0 %v23949_v24  ;;  %6028 = vmatpush.bf16.msra.mxu2 %v11688_v43  ;;  %v11612_v21 = vor.u32 %v13544_v31, %v11611_v50  ;;  %v11613_v1 = vld [vmem:[%s22653_s4 + $0x318] sm:$0xf0]  ;;  %v6493_v20 = vunpack.c.l.b16 %v6430_v42  ;;  %v6570_v53 = vsel %vm2845_vm10, %v6569_v4, %v6568_v40  ;;  %v6596_v43 = vsel %vm2842_vm9, %v6595_v29, %v6594_v38  ;;  %v13559_v36 = vld [vmem:[%s22653_s4 + $0x394] sm:$0xf]  ;;  %v23950_v46 = vld [vmem:[#allocation14_spill] sm:$0xff] }
 0x401   :  { %23947 = vst [vmem:[#allocation8_spill] sm:$0xff] %v18901_v19  ;;  %5999 = vmatpush.bf16.msra.mxu0 %v11624_v0  ;;  %v11676_v14 = vor.u32 %v13560_v12, %v11675_v22  ;;  %v11616_v26 = vor.u32 %v13543_v49, %v11613_v1  ;;  %v11677_v35 = vld [vmem:[%s22653_s4 + $0x398] sm:$0xf0]  ;;  %v6597_v9 = vrot.slane %v18641_v27, 2  ;;  %v6581_v42 = vrot.slane %v23880_v58, 3 }
 0x402   :  { %23948 = vst [vmem:[#allocation107_spill] sm:$0xff] %v18904_v33  ;;  %5942 = vmatpush.bf16.msra.mxu1 %v11612_v21  ;;  %v11680_v16 = vor.u32 %v13559_v36, %v11677_v35  ;;  %v6599_v4 = vrot.slane %v6493_v20, 1  ;;  %v6583_v40 = vrot.slane %v18523_v32, 2  ;;  %v6603_v0 = vrot.slane %v23712_v62, 6  ;;  %v11603_v61 = vld [vmem:[%s22653_s4 + $0x300] sm:$0xf] }
 0x403   :  { %11540 = vmatmul.msk.bf16.gmra.mxu3 %vm3222_vm12, %v23950_v46  ;;  %11544 = vmatmul.msk.bf16.gmra.mxu2 %vm3222_vm12, %v23950_v46  ;;  %v13542_v27 = vld [vmem:[%s22653_s4 + $0x304] sm:$0xf0]  ;;  %v11667_v29 = vld [vmem:[%s22653_s4 + $0x380] sm:$0xf]  ;;  %v23951_v62 = vrot.slane %v18762_v41, 1  ;;  %v6598_v50 = vsel %vm2845_vm10, %v6597_v9, %v6596_v43  ;;  %v6431_v31 = vpack.c.bf16 %v18892_v23, %v18892_v23  ;;  %v4360_v22 = vpop.f32.mrf.mxu1  ;;  %v6602_v23 = vsel %vm2830_vm5, %v6601_v7, %v23691_v56 }
 0x404   :  { %5971 = vmatpush.bf16.msra.mxu3 %v11676_v14  ;;  %6029 = vmatpush.bf16.msra.mxu2 %v11680_v16  ;;  %v11604_v38 = vor.u32 %v13542_v27, %v11603_v61  ;;  %v13558_v21 = vld [vmem:[%s22653_s4 + $0x384] sm:$0xf0]  ;;  %v13541_v12 = vld [vmem:[%s22653_s4 + $0x304] sm:$0xf]  ;;  %v11605_v41 = vld [vmem:[%s22653_s4 + $0x308] sm:$0xf0]  ;;  %v6600_v49 = vsel %vm2848_vm11, %v6599_v4, %v6598_v50  ;;  %v18973_v1 = vadd.f32 %v4360_v22, %v18486_v47  ;;  %v4445_v16 = vpop.f32.mrf.mxu2 }
 0x405   :  { %v6572_v24 = vsel %vm2848_vm11, %v23951_v62, %v6570_v53  ;;  %6000 = vmatpush.bf16.msra.mxu0 %v11616_v26  ;;  %v11668_v53 = vor.u32 %v13558_v21, %v11667_v29  ;;  %v11608_v43 = vor.u32 %v13541_v12, %v11605_v41  ;;  %v13557_v14 = vld [vmem:[%s22653_s4 + $0x384] sm:$0xf]  ;;  %v11669_v36 = vld [vmem:[%s22653_s4 + $0x388] sm:$0xf0]  ;;  %v4387_v9 = vpop.f32.mrf.mxu3  ;;  %v6605_v7 = vrot.slane %v23881_v45, 5 }
 0x406   :  { %v4418_v20 = vpop.f32.mrf.mxu0  ;;  %v18981_v35 = vpack.c.b16 %v6600_v49, %v6572_v24  ;;  %5943 = vmatpush.bf16.msra.mxu1 %v11604_v38  ;;  %v11672_v47 = vor.u32 %v13557_v14, %v11669_v36  ;;  %v6607_v26 = vrot.slane %v23878_v44, 4  ;;  %v18989_v4 = vadd.f32 %v4387_v9, %v18890_v60  ;;  %v11595_v61 = vld [vmem:[%s22653_s4 + $0x2f0] sm:$0xf]  ;;  %v13556_v29 = vld [vmem:[%s22653_s4 + $0x374] sm:$0xf0]  ;;  %v24003_v33 = vld [vmem:[#allocation3_spill] sm:$0xff] }
 0x407   :  { %v18984_v56 = vadd.f32 %v4418_v20, %v18489_v13  ;;  %v18992_v46 = vadd.f32 %v4445_v16, %v18896_v25  ;;  %v13540_v13 = vld [vmem:[%s22653_s4 + $0x2f4] sm:$0xf0]  ;;  %v11659_v45 = vld [vmem:[%s22653_s4 + $0x370] sm:$0xf]  ;;  %v23955_v44 = vrot.slane %v23664_v30, 4  ;;  %v6604_v25 = vsel %vm2833_vm6, %v6603_v0, %v6602_v23 }
 0x408   :  { %23952 = vst [vmem:[#allocation56_spill] sm:$0xff] %v18981_v35  ;;  %5972 = vmatpush.bf16.msra.mxu3 %v11668_v53  ;;  %6030 = vmatpush.bf16.msra.mxu2 %v11672_v47  ;;  %v11596_v27 = vor.u32 %v13540_v13, %v11595_v61  ;;  %v13539_v62 = vld [vmem:[%s22653_s4 + $0x2f4] sm:$0xf]  ;;  %v11597_v24 = vld [vmem:[%s22653_s4 + $0x2f8] sm:$0xf0]  ;;  %v23956_v30 = vrot.slane %v23915_v6, 3  ;;  %v5471_v0 = vpack.c.bf16 %v18732_v11, %v18732_v11 }
 0x409   :  { %23953 = vst [vmem:[#allocation51_spill] sm:$0xff] %v18989_v4  ;;  %v6580_v60 = vsel %vm2839_vm8, %v23955_v44, %v18872_v57  ;;  %6001 = vmatpush.bf16.msra.mxu0 %v11608_v43  ;;  %v11660_v50 = vor.u32 %v13556_v29, %v11659_v45  ;;  %v11600_v22 = vor.u32 %v13539_v62, %v11597_v24  ;;  %v13555_v38 = vld [vmem:[%s22653_s4 + $0x374] sm:$0xf]  ;;  %v11661_v21 = vld [vmem:[%s22653_s4 + $0x378] sm:$0xf0]  ;;  %v6609_v29 = vrot.slane %v17999_v55, 3 }
 0x40a   :  { %23954 = vst [vmem:[#allocation101_spill] sm:$0xff] %v18992_v46  ;;  %v19021_v57 = vsel %vm2842_vm9, %v23956_v30, %v18852_v15  ;;  %v11587_v12 = vld [vmem:[%s22653_s4 + $0x2e0] sm:$0xf]  ;;  %v23957_v15 = vrot.slane %v23912_v52, 5  ;;  %v23958_v49 = vpack.c.bf16 %v18769_v63, %v18769_v63  ;;  %5944 = vmatpush.bf16.msra.mxu1 %v11596_v27  ;;  %v11664_v20 = vor.u32 %v13555_v38, %v11661_v21  ;;  %v13538_v53 = vld [vmem:[%s22653_s4 + $0x2e4] sm:$0xf0] }
 0x40b   :  { %v11651_v43 = vld [vmem:[%s22653_s4 + $0x360] sm:$0xf]  ;;  %v13554_v14 = vld [vmem:[%s22653_s4 + $0x364] sm:$0xf0]  ;;  %v6582_v63 = vsel %vm2842_vm9, %v6581_v42, %v6580_v60  ;;  %v6606_v36 = vsel %vm2836_vm7, %v6605_v7, %v6604_v25  ;;  %v11588_v9 = vor.u32 %v13538_v53, %v11587_v12  ;;  %v13537_v16 = vld [vmem:[%s22653_s4 + $0x2e4] sm:$0xf]  ;;  %v5472_v58 = vpack.c.bf16 %v18750_v34, %v18750_v34  ;;  %v4363_v45 = vpop.f32.mrf.mxu1 }
 0x40c   :  { %v19038_v41 = vsel %vm2836_vm7, %v23957_v15, %v18857_v51  ;;  %v6492_v23 = vunpack.c.l.b16 %v23958_v49  ;;  %v6494_v51 = vunpack.c.l.b16 %v6431_v31  ;;  %v11589_v47 = vld [vmem:[%s22653_s4 + $0x2e8] sm:$0xf0]  ;;  %v13553_v61 = vld [vmem:[%s22653_s4 + $0x364] sm:$0xf]  ;;  %v23959_v31 = vld [vmem:[#allocation132_spill] sm:$0xff]  ;;  %v23960_v42 = vrot.slane %v23925_v59, 7  ;;  %5973 = vmatpush.bf16.msra.mxu3 %v11660_v50  ;;  %6031 = vmatpush.bf16.msra.mxu2 %v11664_v20  ;;  %v4447_v21 = vpop.f32.mrf.mxu2 }
 0x40d   :  { %v6608_v13 = vsel %vm2839_vm8, %v6607_v26, %v6606_v36  ;;  %v11652_v44 = vor.u32 %v13554_v14, %v11651_v43  ;;  %v11653_v60 = vld [vmem:[%s22653_s4 + $0x368] sm:$0xf0]  ;;  %v6611_v34 = vrot.slane %v18666_v8, 2  ;;  %v19079_v62 = vadd.f32 %v4363_v45, %v18583_v48  ;;  %6002 = vmatpush.bf16.msra.mxu0 %v11600_v22  ;;  %v4389_v38 = vpop.f32.mrf.mxu3  ;;  %v11579_v32 = vld [vmem:[%s22653_s4 + $0x2d0] sm:$0xf]  ;;  %v23997_v36 = vld [vmem:[#allocation73_spill] sm:$0xff] }
 0x40e   :  { %v5682_v7 = vsel %vm2830_vm5, %v23960_v42, %v23959_v31  ;;  %v23961_v25 = vld [vmem:[#allocation135_spill] sm:$0xff]  ;;  %v4421_v24 = vpop.f32.mrf.mxu0  ;;  %v11592_v26 = vor.u32 %v13537_v16, %v11589_v47  ;;  %v11656_v30 = vor.u32 %v13553_v61, %v11653_v60  ;;  %v6584_v50 = vsel %vm2845_vm10, %v6583_v40, %v6582_v63  ;;  %5945 = vmatpush.bf16.msra.mxu1 %v11588_v9  ;;  %v11643_v40 = vld [vmem:[%s22653_s4 + $0x350] sm:$0xf]  ;;  %v13552_v20 = vld [vmem:[%s22653_s4 + $0x354] sm:$0xf0] }
 0x40f   :  { %v5695_v27 = vrot.slane %v23961_v25, 7  ;;  %v4422_v12 = vadd.f32 %v4421_v24, %v18586_v18  ;;  %v6585_v15 = vrot.slane %v6492_v23, 1  ;;  %v6610_v55 = vsel %vm2842_vm9, %v6609_v29, %v6608_v13  ;;  %5308 = vmatmul.bf16.gmra.mxu1 %v18372_v37  ;;  %v13536_v18 = vld [vmem:[%s22653_s4 + $0x2d4] sm:$0xf0]  ;;  %v13535_v53 = vld [vmem:[%s22653_s4 + $0x2d4] sm:$0xf] }
 0x410   :  { %v6613_v8 = vrot.slane %v6494_v51, 1  ;;  %v19087_v48 = vadd.f32 %v4389_v38, %v18973_v1  ;;  %v19090_v22 = vadd.f32 %v4447_v21, %v18984_v56  ;;  %v23964_v1 = vrot.slane %v23926_v5, 6  ;;  %5366 = vmatmul.bf16.gmra.mxu0 %v18372_v37  ;;  %5974 = vmatpush.bf16.msra.mxu3 %v11652_v44  ;;  %v11581_v43 = vld [vmem:[%s22653_s4 + $0x2d8] sm:$0xf0]  ;;  %v13551_v47 = vld [vmem:[%s22653_s4 + $0x354] sm:$0xf] }
 0x411   :  { %v6612_v56 = vsel %vm2845_vm10, %v6611_v34, %v6610_v55  ;;  %v11580_v23 = vor.u32 %v13536_v18, %v11579_v32  ;;  %v23965_v14 = vpack.c.bf16 %v18727_v10, %v18727_v10  ;;  %v6586_v37 = vsel %vm2848_vm11, %v6585_v15, %v6584_v50  ;;  %6003 = vmatpush.bf16.msra.mxu0 %v11592_v26  ;;  %v11645_v10 = vld [vmem:[%s22653_s4 + $0x358] sm:$0xf0]  ;;  %v23970_v29 = vld [vmem:[#allocation39_spill] sm:$0xff]  ;;  %v23971_v24 = vld [vmem:[#allocation138_spill] sm:$0xff] }
 0x412   :  { %23962 = vst [vmem:[#allocation108_spill] sm:$0xff] %v19087_v48  ;;  %v5684_v49 = vsel %vm2833_vm6, %v23964_v1, %v5682_v7  ;;  %v6614_v63 = vsel %vm2848_vm11, %v6613_v8, %v6612_v56  ;;  %6032 = vmatpush.bf16.msra.mxu2 %v11656_v30  ;;  %v11644_v9 = vor.u32 %v13552_v20, %v11643_v40  ;;  %v19135_v42 = vunpack.c.l.b16 %v5471_v0  ;;  %v23967_v7 = vld [vmem:[#allocation125_spill] sm:$0xff]  ;;  %v23973_v0 = vld [vmem:[#allocation24_spill] sm:$0xff]  ;;  %v23978_v18 = vld [vmem:[#allocation143_spill] sm:$0xff] }
 0x413   :  { %23963 = vst [vmem:[#allocation50_spill] sm:$0xff] %v19090_v22  ;;  %v19119_v51 = vunpack.c.l.b16 %v23965_v14  ;;  %v11584_v16 = vor.u32 %v13535_v53, %v11581_v43  ;;  %v19130_v61 = vpack.c.b16 %v6614_v63, %v6586_v37  ;;  %5946 = vmatpush.bf16.msra.mxu1 %v11580_v23  ;;  %v11648_v31 = vor.u32 %v13551_v47, %v11645_v10  ;;  %v23969_v44 = vld [vmem:[#allocation137_spill] sm:$0xff]  ;;  %v23977_v8 = vld [vmem:[#allocation140_spill] sm:$0xff]  ;;  %v23981_v20 = vld [vmem:[#allocation139_spill] sm:$0xff] }
 0x414   :  { %v23968_v13 = vrot.slane %v23967_v7, 4  ;;  %v5697_v60 = vrot.slane %v23969_v44, 6  ;;  %11541 = vmatmul.msk.bf16.gmra.mxu3 %vm3222_vm12, %v23970_v29  ;;  %11545 = vmatmul.msk.bf16.gmra.mxu2 %vm3222_vm12, %v23970_v29  ;;  %v19146_v34 = vunpack.c.l.b16 %v5472_v58  ;;  %v23972_v26 = vrot.slane %v23971_v24, 5  ;;  %v23974_v50 = vld [vmem:[#allocation133_spill] sm:$0xff]  ;;  %v23982_v43 = vld [vmem:[#allocation82_spill] sm:$0xff]  ;;  %v4450_v63 = vpop.f32.mrf.mxu2  ;;  %v24001_v22 = vld [vmem:[#allocation83_spill] sm:$0xff] }
 0x415   :  { %23966 = vst [vmem:[#allocation52_spill] sm:$0xff] %v19130_v61  ;;  %v5689_v30 = vrot.slane %v23973_v0, 3  ;;  %v5696_v38 = vsel %vm2830_vm5, %v5695_v27, %v23974_v50  ;;  %5975 = vmatpush.bf16.msra.mxu3 %v11644_v9  ;;  %v23975_v21 = vld [vmem:[#allocation37_spill] sm:$0xff]  ;;  %v5687_v32 = vrot.slane %v23977_v8, 4  ;;  %v5473_v40 = vpack.c.bf16 %v23978_v18, %v23978_v18  ;;  %6004 = vmatpush.bf16.msra.mxu0 %v11584_v16  ;;  %v4392_v37 = vpop.f32.mrf.mxu3  ;;  %v23984_v9 = vld [vmem:[#allocation96_spill] sm:$0xff] }
 0x416   :  { %v5674_v45 = vsel %vm2839_vm8, %v23968_v13, %v19038_v41  ;;  %v5686_v11 = vsel %vm2836_vm7, %v23972_v26, %v5684_v49  ;;  %v4365_v41 = vpop.f32.mrf.mxu1  ;;  %v23976_v15 = vrot.slane %v23975_v21, 2  ;;  %v23979_v1 = vld [vmem:[#allocation93_spill] sm:$0xff]  ;;  %v4423_v56 = vpop.f32.mrf.mxu0  ;;  %6033 = vmatpush.bf16.msra.mxu2 %v11648_v31  ;;  %v5699_v53 = vrot.slane %v23981_v20, 5  ;;  %v23985_v13 = vld [vmem:[#allocation128_spill] sm:$0xff] }
 0x417   :  { %v4366_v49 = vadd.f32 %v4365_v41, %v23979_v1  ;;  %v23980_v27 = vld [vmem:[#allocation165_spill] sm:$0xff]  ;;  %v23983_v14 = vmax.f32 %v23982_v43, 0.0  ;;  %v4424_v47 = vadd.f32 %v4423_v56, %v23984_v9  ;;  %v5688_v10 = vsel %vm2839_vm8, %v5687_v32, %v5686_v11  ;;  %v23988_v41 = vld [vmem:[#allocation152_spill] sm:$0xff]  ;;  %v23995_v11 = vld [vmem:[#allocation147_spill] sm:$0xff] }
 0x418   :  { %v19158_v55 = vsel %vm2845_vm10, %v23976_v15, %v19021_v57  ;;  %v5691_v23 = vrot.slane %v23980_v27, 2  ;;  %v5675_v29 = vrot.slane %v23985_v13, 3  ;;  %v5698_v26 = vsel %vm2833_vm6, %v5697_v60, %v5696_v38  ;;  %v23989_v56 = vld [vmem:[#allocation21_spill] sm:$0xff]  ;;  %v23990_v60 = vld [vmem:[#allocation142_spill] sm:$0xff] }
 0x419   :  { %v5442_v57 = vperm.slane %v23983_v14, 0  ;;  %v19174_v16 = vadd.f32 %v4392_v37, %v19079_v62  ;;  %v19176_v31 = vadd.f32 %v4450_v63, %v4422_v12  ;;  %v5690_v50 = vsel %vm2842_vm9, %v5689_v30, %v5688_v10  ;;  %v23991_v37 = vld [vmem:[#allocation17_spill] sm:$0xff]  ;;  %v23994_v14 = vld [vmem:[#allocation86_spill] sm:$0xff] }
 0x41a   :  { %v5709_v15 = vrot.slane %v23988_v41, 7  ;;  %v19181_v1 = vunpack.c.l.b16 %v5473_v40  ;;  %v5700_v32 = vsel %vm2836_vm7, %v5699_v53, %v5698_v26  ;;  %v5703_v38 = vrot.slane %v23990_v60, 3  ;;  %v23992_v9 = vld [vmem:[#allocation141_spill] sm:$0xff] }
 0x41b   :  { %23986 = vst [vmem:[#allocation109_spill] sm:$0xff] %v19174_v16  ;;  %v5474_v62 = vpack.c.bf16 %v5442_v57, %v5442_v57  ;;  %v6615_v12 = vrot.slane %v23991_v37, 7  ;;  %v19189_v63 = vsel %vm2845_vm10, %v5691_v23, %v5690_v50  ;;  %v19192_v30 = vsel %vm2842_vm9, %v5675_v29, %v5674_v45  ;;  %v23993_v10 = vld [vmem:[#allocation153_spill] sm:$0xff]  ;;  %v23999_v29 = vld [vmem:[#allocation26_spill] sm:$0xff]  ;;  %v24004_v45 = vld [vmem:[#allocation27_spill] sm:$0xff] }
 0x41c   :  { %23987 = vst [vmem:[#allocation13_spill] sm:$0xff] %v19176_v31  ;;  %v5701_v40 = vrot.slane %v23992_v9, 4  ;;  %v5711_v18 = vrot.slane %v23993_v10, 6  ;;  %v5705_v58 = vrot.slane %v23994_v14, 2  ;;  %v5710_v53 = vsel %vm2830_vm5, %v5709_v15, %v23995_v11  ;;  %v24000_v31 = vld [vmem:[#allocation122_spill] sm:$0xff]  ;;  %v4452_v4 = vpop.f32.mrf.mxu2 }
 0x41d   :  { %v23996_v26 = vmax.f32 %v23982_v43, 0.0  ;;  %v23998_v37 = vmax.f32 %v23997_v36, 0.0  ;;  %v5723_v35 = vrot.slane %v23999_v29, 7  ;;  %v6617_v16 = vrot.slane %v24000_v31, 6  ;;  %v24002_v43 = vld [vmem:[#allocation34_spill] sm:$0xff] }
 0x41e   :  { %v4368_v23 = vpop.f32.mrf.mxu1  ;;  %v5702_v50 = vsel %vm2839_vm8, %v5701_v40, %v5700_v32  ;;  %v4426_v46 = vpop.f32.mrf.mxu0  ;;  %v19209_v11 = vunpack.c.l.b16 %v5474_v62  ;;  %v5712_v40 = vsel %vm2833_vm6, %v5711_v18, %v5710_v53  ;;  %v5713_v19 = vrot.slane %v24004_v45, 5  ;;  %v24017_v53 = vld [vmem:[#allocation36_spill] sm:$0xff] }
 0x41f   :  { %v5443_v57 = vperm.slane %v23996_v26, 2  ;;  %v6400_v61 = vperm.slane %v23998_v37, 0  ;;  %v4369_v48 = vadd.f32 %v4368_v23, %v24001_v22  ;;  %v5704_v15 = vsel %vm2842_vm9, %v5703_v38, %v5702_v50  ;;  %v4394_v37 = vpop.f32.mrf.mxu3  ;;  %v24007_v38 = vld [vmem:[#allocation4_spill] sm:$0xff] }
 0x420   :  { %v6616_v26 = vsel %vm2830_vm5, %v6615_v12, %v24002_v43  ;;  %v4427_v32 = vadd.f32 %v4426_v46, %v24003_v33  ;;  %v6629_v31 = vrot.slane %v23910_v2, 7  ;;  %v19217_v3 = vadd.f32 %v4394_v37, %v4366_v49  ;;  %5313 = vmatmul.bf16.gmra.mxu1 %v24007_v38  ;;  %5371 = vmatmul.bf16.gmra.mxu0 %v24007_v38  ;;  %v24009_v49 = vld [vmem:[#allocation155_spill] sm:$0xff]  ;;  %v24012_v43 = vld [vmem:[#allocation33_spill] sm:$0xff] }
 0x421   :  { %v19219_v22 = vadd.f32 %v4452_v4, %v4424_v47  ;;  %v5475_v62 = vpack.c.bf16 %v5443_v57, %v5443_v57  ;;  %v6432_v23 = vpack.c.bf16 %v6400_v61, %v6400_v61  ;;  %v19224_v12 = vsel %vm2845_vm10, %v5705_v58, %v5704_v15  ;;  %v24010_v4 = vld [vmem:[#allocation157_spill] sm:$0xff]  ;;  %v24011_v58 = vld [vmem:[#allocation42_spill] sm:$0xff] }
 0x422   :  { %24005 = vst [vmem:[#allocation110_spill] sm:$0xff] %v19217_v3  ;;  %v6618_v33 = vsel %vm2833_vm6, %v6617_v16, %v6616_v26  ;;  %v6621_v46 = vrot.slane %v23915_v6, 4  ;;  %v24008_v18 = vmax.f32 %v23997_v36, 0.0  ;;  %v6619_v50 = vrot.slane %v23905_v17, 5  ;;  %v24013_v36 = vld [vmem:[#allocation95_spill] sm:$0xff]  ;;  %v24014_v17 = vld [vmem:[#allocation148_spill] sm:$0xff] }
 0x423   :  { %24006 = vst [vmem:[#allocation55_spill] sm:$0xff] %v19219_v22  ;;  %v6631_v61 = vrot.slane %v23912_v52, 6  ;;  %v19235_v57 = vsel %vm2836_vm7, %v5713_v19, %v5712_v40  ;;  %v6630_v6 = vsel %vm2830_vm5, %v6629_v31, %v24012_v43  ;;  %v19245_v26 = vunpack.c.l.b16 %v5475_v62  ;;  %v24015_v16 = vld [vmem:[#allocation130_spill] sm:$0xff]  ;;  %v24056_v3 = vld [vmem:[#allocation16_spill] sm:$0xff] }
 0x424   :  { %v6401_v2 = vperm.slane %v24008_v18, 2  ;;  %11542 = vmatmul.msk.bf16.gmra.mxu3 %vm3222_vm12, %v24013_v36  ;;  %11546 = vmatmul.msk.bf16.gmra.mxu2 %vm3222_vm12, %v24013_v36  ;;  %v19249_v52 = vsel %vm2830_vm5, %v5723_v35, %v24014_v17  ;;  %v19251_v19 = vunpack.c.l.b16 %v6432_v23  ;;  %v6620_v37 = vsel %vm2836_vm7, %v6619_v50, %v6618_v33  ;;  %v4455_v47 = vpop.f32.mrf.mxu2  ;;  %v24016_v33 = vld [vmem:[#allocation131_spill] sm:$0xff] }
 0x425   :  { %v6622_v38 = vsel %vm2839_vm8, %v6621_v46, %v6620_v37  ;;  %v6633_v18 = vrot.slane %v23967_v7, 5  ;;  %v6635_v43 = vrot.slane %v23985_v13, 4  ;;  %v6623_v15 = vrot.slane %v23975_v21, 3 }
 0x426   :  { %v4370_v40 = vpop.f32.mrf.mxu1  ;;  %v6433_v31 = vpack.c.bf16 %v6401_v2, %v6401_v2  ;;  %v4428_v62 = vpop.f32.mrf.mxu0  ;;  %v6625_v35 = vrot.slane %v19119_v51, 2  ;;  %v6632_v23 = vsel %vm2833_vm6, %v6631_v61, %v6630_v6  ;;  %v1953_v46 = vmax.f32 %v24017_v53, 0.0 }
 0x427   :  { %v4371_v36 = vadd.f32 %v4370_v40, %v24015_v16  ;;  %v4397_v17 = vpop.f32.mrf.mxu3  ;;  %v4429_v50 = vadd.f32 %v4428_v62, %v24016_v33  ;;  %v6643_v2 = vrot.slane %v23926_v5, 7  ;;  %v6645_v7 = vrot.slane %v23971_v24, 6 }
 0x428   :  { %v19265_v13 = vadd.f32 %v4397_v17, %v4369_v48  ;;  %v19267_v16 = vadd.f32 %v4455_v47, %v4427_v32  ;;  %v6627_v21 = vrot.slane %v19251_v19, 1  ;;  %v6657_v37 = vrot.slane %v23969_v44, 7 }
 0x429   :  { %v6402_v40 = vperm.slane %v1953_v46, 0  ;;  %v6644_v61 = vsel %vm2830_vm5, %v6643_v2, %v23925_v59  ;;  %v6403_v6 = vperm.slane %v1953_v46, 2  ;;  %v6659_v62 = vrot.slane %v23981_v20, 6 }
 0x42a   :  { %24018 = vst [vmem:[#allocation114_spill] sm:$0xff] %v19265_v13  ;;  %v6624_v53 = vsel %vm2842_vm9, %v6623_v15, %v6622_v38  ;;  %v6634_v5 = vsel %vm2836_vm7, %v6633_v18, %v6632_v23  ;;  %v6637_v48 = vrot.slane %v23989_v56, 3  ;;  %v6658_v24 = vsel %vm2830_vm5, %v6657_v37, %v23961_v25  ;;  %v24055_v13 = vld [vmem:[#allocation176_spill] sm:$0xff] }
 0x42b   :  { %24019 = vst [vmem:[#allocation116_spill] sm:$0xff] %v19267_v16  ;;  %v6434_v32 = vpack.c.bf16 %v6402_v40, %v6402_v40  ;;  %v6646_v47 = vsel %vm2833_vm6, %v6645_v7, %v6644_v61  ;;  %v6435_v44 = vpack.c.bf16 %v6403_v6, %v6403_v6  ;;  %v6636_v19 = vsel %vm2839_vm8, %v6635_v43, %v6634_v5 }
 0x42c   :  { %v6647_v59 = vrot.slane %v23977_v8, 5  ;;  %v6496_v17 = vunpack.c.l.b16 %v6433_v31  ;;  %v6639_v20 = vrot.slane %v19135_v42, 2  ;;  %v6660_v15 = vsel %vm2833_vm6, %v6659_v62, %v6658_v24  ;;  %v4457_v37 = vpop.f32.mrf.mxu2 }
 0x42d   :  { %v6497_v18 = vunpack.c.l.b16 %v6434_v32  ;;  %v6649_v23 = vrot.slane %v23973_v0, 4  ;;  %v6661_v33 = vrot.slane %v23992_v9, 5  ;;  %v6663_v25 = vrot.slane %v23990_v60, 4 }
 0x42e   :  { %v4986_v38 = vpop.f32.mrf.mxu1  ;;  %v5044_v46 = vpop.f32.mrf.mxu0  ;;  %v6626_v2 = vsel %vm2845_vm10, %v6625_v35, %v6624_v53  ;;  %v6648_v43 = vsel %vm2836_vm7, %v6647_v59, %v6646_v47  ;;  %v6498_v7 = vunpack.c.l.b16 %v6435_v44  ;;  %v6638_v8 = vsel %vm2842_vm9, %v6637_v48, %v6636_v19  ;;  %v24022_v35 = vld [vmem:[#allocation102_spill] sm:$0xff]  ;;  %v24023_v44 = vld [vmem:[#allocation167_spill] sm:$0xff] }
 0x42f   :  { %v4399_v31 = vpop.f32.mrf.mxu3  ;;  %v6650_v40 = vsel %vm2839_vm8, %v6649_v23, %v6648_v43  ;;  %v6651_v61 = vrot.slane %v23980_v27, 3  ;;  %v6653_v0 = vrot.slane %v19146_v34, 2  ;;  %v6662_v9 = vsel %vm2836_vm7, %v6661_v33, %v6660_v15  ;;  %v24024_v23 = vld [vmem:[#allocation160_spill] sm:$0xff] }
 0x430   :  { %v19294_v6 = vadd.f32 %v4399_v31, %v4371_v36  ;;  %v19296_v60 = vadd.f32 %v4457_v37, %v4429_v50  ;;  %5947 = vmatmul.bf16.vlgmr.msra.gmra.mxu1 %v24022_v35  ;;  %v6664_v62 = vsel %vm2839_vm8, %v6663_v25, %v6662_v9  ;;  %v6665_v53 = vrot.slane %v23994_v14, 3  ;;  %6005 = vmatmul.bf16.vlgmr.msra.gmra.mxu0 %v24022_v35  ;;  %v24027_v37 = vld [vmem:[#allocation25_spill] sm:$0xff] }
 0x431   :  { %v6652_v5 = vsel %vm2842_vm9, %v6651_v61, %v6650_v40  ;;  %v6655_v48 = vrot.slane %v6497_v18, 1  ;;  %v6640_v27 = vsel %vm2845_vm10, %v6639_v20, %v6638_v8  ;;  %v6667_v24 = vrot.slane %v19181_v1, 2  ;;  %v13580_v20 = vld [vmem:[%s22654_s5 + $0x344] sm:$0xf0] }
 0x432   :  { %24020 = vst [vmem:[#allocation119_spill] sm:$0xff] %v19294_v6  ;;  %v6654_v36 = vsel %vm2845_vm10, %v6653_v0, %v6652_v5  ;;  %v6641_v32 = vrot.slane %v6496_v17, 1  ;;  %v6666_v50 = vsel %vm2842_vm9, %v6665_v53, %v6664_v62  ;;  %v6669_v47 = vrot.slane %v6498_v7, 1  ;;  %v11793_v17 = vld [vmem:[%s22654_s5 + $0x340] sm:$0xf]  ;;  %v24030_v5 = vld [vmem:[#allocation156_spill] sm:$0xff] }
 0x433   :  { %24021 = vst [vmem:[#allocation20_spill] sm:$0xff] %v19296_v60  ;;  %v5737_v19 = vrot.slane %v24023_v44, 7  ;;  %v6628_v59 = vsel %vm2848_vm11, %v6627_v21, %v6626_v2  ;;  %v6656_v14 = vsel %vm2848_vm11, %v6655_v48, %v6654_v36  ;;  %v6668_v15 = vsel %vm2845_vm10, %v6667_v24, %v6666_v50  ;;  %v13579_v21 = vld [vmem:[%s22654_s5 + $0x344] sm:$0xf]  ;;  %v11795_v7 = vld [vmem:[%s22654_s5 + $0x348] sm:$0xf0] }
 0x434   :  { %11697 = vmatmul.msk.bf16.vlgmr.msra.gmra.mxu3 %vm3222_vm12, %v24024_v23  ;;  %11701 = vmatmul.msk.bf16.vlgmr.msra.gmra.mxu2 %vm3222_vm12, %v24024_v23  ;;  %v19324_v18 = vpack.c.b16 %v6656_v14, %v6628_v59  ;;  %v6642_v33 = vsel %vm2848_vm11, %v6641_v32, %v6640_v27  ;;  %v6670_v25 = vsel %vm2848_vm11, %v6669_v47, %v6668_v15  ;;  %v24026_v8 = vmax.f32 %v18697_v54, 0.0  ;;  %v24029_v62 = vld [vmem:[#allocation154_spill] sm:$0xff]  ;;  %v5073_v32 = vpop.f32.mrf.mxu2  ;;  %v24032_v50 = vld [vmem:[#allocation169_spill] sm:$0xff] }
 0x435   :  { %v11794_v43 = vor.u32 %v13580_v20, %v11793_v17  ;;  %v5725_v40 = vrot.slane %v24027_v37, 6  ;;  %v19336_v61 = vpack.c.b16 %v6670_v25, %v6642_v33  ;;  %v11798_v9 = vor.u32 %v13579_v21, %v11795_v7  ;;  %v24031_v27 = vld [vmem:[#allocation30_spill] sm:$0xff]  ;;  %v24034_v17 = vld [vmem:[#allocation168_spill] sm:$0xff] }
 0x436   :  { %24025 = vst [vmem:[#allocation23_spill] sm:$0xff] %v19324_v18  ;;  %v19328_v2 = vpop.f32.mrf.mxu1  ;;  %v5444_v31 = vperm.slane %v24026_v8, 0  ;;  %v19338_v0 = vpop.f32.mrf.mxu0  ;;  %v5727_v53 = vrot.slane %v24029_v62, 5  ;;  %v5739_v47 = vrot.slane %v24032_v50, 6  ;;  %v24033_v59 = vld [vmem:[#allocation10_spill] sm:$0xff]  ;;  %v5751_v20 = vrot.slane %v24034_v17, 7 }
 0x437   :  { %24028 = vst [vmem:[#allocation74_spill] sm:$0xff] %v19336_v61  ;;  %v5015_v36 = vpop.f32.mrf.mxu3  ;;  %6252 = vmatpush.bf16.msrb.mxu1 %v11794_v43  ;;  %v5074_v25 = vadd.f32 %v5073_v32, %v5044_v46  ;;  %6310 = vmatpush.bf16.msrb.mxu0 %v11798_v9  ;;  %v24035_v21 = vld [vmem:[#allocation162_spill] sm:$0xff]  ;;  %v24036_v8 = vld [vmem:[#allocation171_spill] sm:$0xff]  ;;  %v24037_v61 = vld [vmem:[#allocation173_spill] sm:$0xff]  ;;  %v24038_v43 = vmax.f32 %v18697_v54, 0.0  ;;  %v5726_v32 = vsel %vm2833_vm6, %v5725_v40, %v19249_v52  ;;  %v5759_v22 = vrot.slane %v24055_v13, 3 }
 0x438   :  { %v5016_v33 = vadd.f32 %v5015_v36, %v4986_v38  ;;  %v5738_v7 = vsel %vm2830_vm5, %v5737_v19, %v24035_v21  ;;  %v5741_v48 = vrot.slane %v24036_v8, 5  ;;  %v5476_v24 = vpack.c.bf16 %v5444_v31, %v5444_v31  ;;  %v24039_v14 = vld [vmem:[#allocation170_spill] sm:$0xff]  ;;  %v11785_v54 = vld [vmem:[%s22654_s5 + $0x330] sm:$0xf]  ;;  %v13578_v31 = vld [vmem:[%s22654_s5 + $0x334] sm:$0xf0] }
 0x439   :  { %v19353_v60 = vperm.slane %v24038_v43, 2  ;;  %v5753_v6 = vrot.slane %v24039_v14, 6  ;;  %v24040_v15 = vld [vmem:[#allocation46_spill] sm:$0xff]  ;;  %v24044_v19 = vrot.slane %v19119_v51, 1  ;;  %v11849_v36 = vld [vmem:[%s22654_s5 + $0x3b0] sm:$0xf] }
 0x43a   :  { %v19357_v16 = vadd.f32 %v5016_v33, %v24040_v15  ;;  %v24042_v38 = vld [vmem:[#allocation54_spill] sm:$0xff]  ;;  %v24045_v51 = vrot.slane %v19146_v34, 1  ;;  %v24046_v15 = vrot.slane %v23989_v56, 2  ;;  %v13594_v21 = vld [vmem:[%s22654_s5 + $0x3b4] sm:$0xf0]  ;;  %v24047_v56 = vrot.slane %v19181_v1, 1 }
 0x43b   :  { %v19360_v46 = vadd.f32 %v5074_v25, %v24042_v38  ;;  %v19366_v9 = vsel %vm2848_vm11, %v24044_v19, %v19158_v55  ;;  %v11786_v25 = vor.u32 %v13578_v31, %v11785_v54  ;;  %v13577_v52 = vld [vmem:[%s22654_s5 + $0x334] sm:$0xf]  ;;  %v11787_v34 = vld [vmem:[%s22654_s5 + $0x338] sm:$0xf0]  ;;  %v11850_v40 = vor.u32 %v13594_v21, %v11849_v36  ;;  %v13576_v31 = vld [vmem:[%s22654_s5 + $0x324] sm:$0xf0] }
 0x43c   :  { %24041 = vst [vmem:[#allocation65_spill] sm:$0xff] %v19357_v16  ;;  %v19383_v55 = vsel %vm2848_vm11, %v24045_v51, %v19189_v63  ;;  %v19389_v33 = vsel %vm2845_vm10, %v24046_v15, %v19192_v30  ;;  %v5740_v63 = vsel %vm2833_vm6, %v5739_v47, %v5738_v7  ;;  %v19405_v30 = vsel %vm2848_vm11, %v24047_v56, %v19224_v12  ;;  %v13593_v38 = vld [vmem:[%s22654_s5 + $0x3b4] sm:$0xf]  ;;  %v11851_v19 = vld [vmem:[%s22654_s5 + $0x3b8] sm:$0xf0]  ;;  %v24049_v21 = vld [vmem:[#allocation163_spill] sm:$0xff] }
 0x43d   :  { %24043 = vst [vmem:[#allocation76_spill] sm:$0xff] %v19360_v46  ;;  %v11790_v43 = vor.u32 %v13577_v52, %v11787_v34  ;;  %v11777_v47 = vld [vmem:[%s22654_s5 + $0x320] sm:$0xf]  ;;  %v24048_v1 = vrot.slane %v24009_v49, 4  ;;  %6253 = vmatpush.bf16.msrb.mxu1 %v11786_v25  ;;  %v11854_v54 = vor.u32 %v13593_v38, %v11851_v19  ;;  %v13592_v51 = vld [vmem:[%s22654_s5 + $0x3a4] sm:$0xf0]  ;;  %v19431_v15 = vunpack.c.l.b16 %v5476_v24  ;;  %6282 = vmatpush.bf16.msrb.mxu3 %v11850_v40  ;;  %v5075_v19 = vpop.f32.mrf.mxu2 }
 0x43e   :  { %v19420_v7 = vpop.f32.mrf.mxu1  ;;  %v11841_v36 = vld [vmem:[%s22654_s5 + $0x3a0] sm:$0xf]  ;;  %v5752_v25 = vsel %vm2830_vm5, %v5751_v20, %v24049_v21  ;;  %v19436_v52 = vpop.f32.mrf.mxu0  ;;  %v11778_v34 = vor.u32 %v13576_v31, %v11777_v47  ;;  %v13575_v38 = vld [vmem:[%s22654_s5 + $0x324] sm:$0xf]  ;;  %v11779_v24 = vld [vmem:[%s22654_s5 + $0x328] sm:$0xf0]  ;;  %v5742_v20 = vsel %vm2836_vm7, %v5741_v48, %v5740_v63  ;;  %v5477_v31 = vpack.c.bf16 %v19353_v60, %v19353_v60 }
 0x43f   :  { %v5716_v12 = vsel %vm2839_vm8, %v24048_v1, %v19235_v57  ;;  %v5728_v57 = vsel %vm2836_vm7, %v5727_v53, %v5726_v32  ;;  %6311 = vmatpush.bf16.msrb.mxu0 %v11790_v43  ;;  %v11842_v56 = vor.u32 %v13592_v51, %v11841_v36  ;;  %v13591_v53 = vld [vmem:[%s22654_s5 + $0x3a4] sm:$0xf]  ;;  %v5017_v32 = vpop.f32.mrf.mxu3  ;;  %6340 = vmatpush.bf16.msrb.mxu2 %v11854_v54  ;;  %v11843_v43 = vld [vmem:[%s22654_s5 + $0x3a8] sm:$0xf0]  ;;  %v24051_v36 = vld [vmem:[#allocation172_spill] sm:$0xff] }
 0x440   :  { %v11782_v40 = vor.u32 %v13575_v38, %v11779_v24  ;;  %v24050_v47 = vld [vmem:[#allocation175_spill] sm:$0xff]  ;;  %v5755_v51 = vrot.slane %v24051_v36, 5  ;;  %v5018_v21 = vadd.f32 %v5017_v32, %v19328_v2  ;;  %v5076_v18 = vadd.f32 %v5075_v19, %v19338_v0  ;;  %v24052_v48 = vld [vmem:[#allocation117_spill] sm:$0xff]  ;;  %v24053_v38 = vld [vmem:[#allocation2_spill] sm:$0xff] }
 0x441   :  { %v5745_v1 = vrot.slane %v24050_v47, 3  ;;  %5952 = vmatmul.bf16.gmra.mxu1 %v24052_v48  ;;  %v11846_v63 = vor.u32 %v13591_v53, %v11843_v43  ;;  %v5754_v54 = vsel %vm2833_vm6, %v5753_v6, %v5752_v25  ;;  %6010 = vmatmul.bf16.gmra.mxu0 %v24052_v48  ;;  %v24054_v16 = vld [vmem:[#allocation174_spill] sm:$0xff]  ;;  %v24058_v0 = vld [vmem:[#allocation29_spill] sm:$0xff]  ;;  %v11769_v6 = vld [vmem:[%s22654_s5 + $0x310] sm:$0xf]  ;;  %v19491_v43 = vunpack.c.l.b16 %v5477_v31 }
 0x442   :  { %6254 = vmatpush.bf16.msrb.mxu1 %v11778_v34  ;;  %v5757_v60 = vrot.slane %v24054_v16, 4  ;;  %v19465_v2 = vadd.f32 %v5018_v21, %v24056_v3  ;;  %v19468_v32 = vadd.f32 %v5076_v18, %v24058_v0  ;;  %6283 = vmatpush.bf16.msrb.mxu3 %v11842_v56  ;;  %v13574_v25 = vld [vmem:[%s22654_s5 + $0x314] sm:$0xf0]  ;;  %v11833_v34 = vld [vmem:[%s22654_s5 + $0x390] sm:$0xf]  ;;  %v24060_v3 = vrot.slane %v24010_v4, 3 }
 0x443   :  { %6312 = vmatpush.bf16.msrb.mxu0 %v11782_v40  ;;  %6341 = vmatpush.bf16.msrb.mxu2 %v11846_v63  ;;  %v11770_v18 = vor.u32 %v13574_v25, %v11769_v6  ;;  %v13590_v56 = vld [vmem:[%s22654_s5 + $0x394] sm:$0xf0]  ;;  %v13573_v19 = vld [vmem:[%s22654_s5 + $0x314] sm:$0xf]  ;;  %v11771_v40 = vld [vmem:[%s22654_s5 + $0x318] sm:$0xf0]  ;;  %v5756_v63 = vsel %vm2836_vm7, %v5755_v51, %v5754_v54 }
 0x444   :  { %24057 = vst [vmem:[#allocation72_spill] sm:$0xff] %v19465_v2  ;;  %v5718_v53 = vsel %vm2842_vm9, %v24060_v3, %v5716_v12  ;;  %v24061_v21 = vrot.slane %v24030_v5, 4  ;;  %11698 = vmatmul.msk.bf16.gmra.mxu3 %vm3222_vm12, %v18834_v39  ;;  %11702 = vmatmul.msk.bf16.gmra.mxu2 %vm3222_vm12, %v18834_v39  ;;  %v11834_v0 = vor.u32 %v13590_v56, %v11833_v34  ;;  %v13589_v25 = vld [vmem:[%s22654_s5 + $0x394] sm:$0xf]  ;;  %v11835_v31 = vld [vmem:[%s22654_s5 + $0x398] sm:$0xf0] }
 0x445   :  { %24059 = vst [vmem:[#allocation78_spill] sm:$0xff] %v19468_v32  ;;  %v11774_v6 = vor.u32 %v13573_v19, %v11771_v40  ;;  %v11761_v54 = vld [vmem:[%s22654_s5 + $0x300] sm:$0xf]  ;;  %v11838_v34 = vor.u32 %v13589_v25, %v11835_v31  ;;  %v24063_v56 = vrot.slane %v24011_v58, 2  ;;  %v13571_v31 = vld [vmem:[%s22654_s5 + $0x304] sm:$0xf]  ;;  %v5078_v24 = vpop.f32.mrf.mxu2 }
 0x446   :  { %v5730_v12 = vsel %vm2839_vm8, %v24061_v21, %v5728_v57  ;;  %v24062_v57 = vrot.slane %v24037_v61, 4  ;;  %v19513_v3 = vpop.f32.mrf.mxu1  ;;  %6255 = vmatpush.bf16.msrb.mxu1 %v11770_v18  ;;  %v24064_v21 = vrot.slane %v24031_v27, 3  ;;  %v13588_v18 = vld [vmem:[%s22654_s5 + $0x384] sm:$0xf0]  ;;  %v19531_v25 = vpop.f32.mrf.mxu0  ;;  %6284 = vmatpush.bf16.msrb.mxu3 %v11834_v0  ;;  %v6671_v2 = vrot.slane %v23993_v10, 7 }
 0x447   :  { %v5720_v19 = vsel %vm2845_vm10, %v24063_v56, %v5718_v53  ;;  %6313 = vmatpush.bf16.msrb.mxu0 %v11774_v6  ;;  %v13587_v56 = vld [vmem:[%s22654_s5 + $0x384] sm:$0xf]  ;;  %6342 = vmatpush.bf16.msrb.mxu2 %v11838_v34  ;;  %v5763_v6 = vrot.slane %v19491_v43, 1  ;;  %v24066_v34 = vld [vmem:[#allocation47_spill] sm:$0xff]  ;;  %v6685_v48 = vrot.slane %v24027_v37, 7  ;;  %v24071_v10 = vrot.slane %v24053_v38, 2 }
 0x448   :  { %v5744_v51 = vsel %vm2839_vm8, %v24062_v57, %v5742_v20  ;;  %v5732_v46 = vsel %vm2842_vm9, %v24064_v21, %v5730_v12  ;;  %v13572_v20 = vld [vmem:[%s22654_s5 + $0x304] sm:$0xf0]  ;;  %v11825_v57 = vld [vmem:[%s22654_s5 + $0x380] sm:$0xf]  ;;  %v5020_v21 = vpop.f32.mrf.mxu3  ;;  %v24067_v39 = vmax.f32 %v24066_v34, 0.0  ;;  %v19582_v37 = vpack.c.b16 %v19383_v55, %v19366_v9 }
 0x449   :  { %v5746_v40 = vsel %vm2842_vm9, %v5745_v1, %v5744_v51  ;;  %v5758_v1 = vsel %vm2839_vm8, %v5757_v60, %v5756_v63  ;;  %v11762_v53 = vor.u32 %v13572_v20, %v11761_v54  ;;  %v11826_v12 = vor.u32 %v13588_v18, %v11825_v57  ;;  %v11763_v51 = vld [vmem:[%s22654_s5 + $0x308] sm:$0xf0]  ;;  %v24065_v60 = vld [vmem:[#allocation9_spill] sm:$0xff] }
 0x44a   :  { %v5760_v0 = vsel %vm2842_vm9, %v5759_v22, %v5758_v1  ;;  %v5761_v63 = vrot.slane %v24065_v60, 2  ;;  %v11766_v54 = vor.u32 %v13571_v31, %v11763_v51  ;;  %v11827_v20 = vld [vmem:[%s22654_s5 + $0x388] sm:$0xf0]  ;;  %v5021_v57 = vadd.f32 %v5020_v21, %v19420_v7  ;;  %v11755_v9 = vld [vmem:[%s22654_s5 + $0x2f8] sm:$0xf0] }
 0x44b   :  { %v5079_v18 = vadd.f32 %v5078_v24, %v19436_v52  ;;  %v11830_v32 = vor.u32 %v13587_v56, %v11827_v20  ;;  %6256 = vmatpush.bf16.msrb.mxu1 %v11762_v53  ;;  %v19554_v22 = vperm.slane %v24067_v39, 0  ;;  %v6673_v1 = vrot.slane %v24004_v45, 6  ;;  %v24070_v52 = vld [vmem:[#allocation97_spill] sm:$0xff]  ;;  %6285 = vmatpush.bf16.msrb.mxu3 %v11826_v12  ;;  %v13569_v20 = vld [vmem:[%s22654_s5 + $0x2f4] sm:$0xf] }
 0x44c   :  { %v24068_v31 = vmov %v24067_v39  ;;  %v19563_v7 = vadd.f32 %v5021_v57, %v24069_v28  ;;  %v5748_v53 = vsel %vm2845_vm10, %v24071_v10, %v5746_v40  ;;  %6314 = vmatpush.bf16.msrb.mxu0 %v11766_v54  ;;  %v11753_v39 = vld [vmem:[%s22654_s5 + $0x2f0] sm:$0xf]  ;;  %v13570_v45 = vld [vmem:[%s22654_s5 + $0x2f4] sm:$0xf0]  ;;  %v24072_v40 = vrot.slane %v19135_v42, 1 }
 0x44d   :  { %v19559_v51 = vperm.slane %v24068_v31, 2  ;;  %v19566_v24 = vadd.f32 %v5079_v18, %v24070_v52  ;;  %v11817_v28 = vld [vmem:[%s22654_s5 + $0x370] sm:$0xf]  ;;  %v5762_v56 = vsel %vm2845_vm10, %v5761_v63, %v5760_v0  ;;  %6343 = vmatpush.bf16.msrb.mxu2 %v11830_v32  ;;  %v11754_v21 = vor.u32 %v13570_v45, %v11753_v39  ;;  %v13586_v54 = vld [vmem:[%s22654_s5 + $0x374] sm:$0xf0] }
 0x44e   :  { %v5680_v12 = vsel %vm2848_vm11, %v24072_v40, %v19389_v33  ;;  %v11818_v55 = vor.u32 %v13586_v54, %v11817_v28  ;;  %v11758_v33 = vor.u32 %v13569_v20, %v11755_v9  ;;  %v13585_v32 = vld [vmem:[%s22654_s5 + $0x374] sm:$0xf]  ;;  %v11819_v0 = vld [vmem:[%s22654_s5 + $0x378] sm:$0xf0]  ;;  %v11745_v63 = vld [vmem:[%s22654_s5 + $0x2e0] sm:$0xf]  ;;  %v6672_v57 = vsel %vm2830_vm5, %v6671_v2, %v23988_v41  ;;  %v19612_v18 = vpop.f32.mrf.mxu1  ;;  %v19632_v28 = vpop.f32.mrf.mxu0 }
 0x44f   :  { %v19599_v42 = vpack.c.b16 %v19405_v30, %v5680_v12  ;;  %v24073_v30 = vrot.slane %v19209_v11, 1  ;;  %v24074_v31 = vrot.slane %v19431_v15, 1  ;;  %v24075_v10 = vrot.slane %v24033_v59, 2  ;;  %6257 = vmatpush.bf16.msrb.mxu1 %v11754_v21  ;;  %v13568_v41 = vld [vmem:[%s22654_s5 + $0x2e4] sm:$0xf0]  ;;  %v5080_v9 = vpop.f32.mrf.mxu2 }
 0x450   :  { %v11822_v45 = vor.u32 %v13585_v32, %v11819_v0  ;;  %v11809_v2 = vld [vmem:[%s22654_s5 + $0x360] sm:$0xf]  ;;  %6286 = vmatpush.bf16.msrb.mxu3 %v11818_v55  ;;  %6315 = vmatpush.bf16.msrb.mxu0 %v11758_v33  ;;  %v13567_v12 = vld [vmem:[%s22654_s5 + $0x2e4] sm:$0xf]  ;;  %v11747_v21 = vld [vmem:[%s22654_s5 + $0x2e8] sm:$0xf0]  ;;  %v5022_v20 = vpop.f32.mrf.mxu3  ;;  %v6674_v55 = vsel %vm2833_vm6, %v6673_v1, %v6672_v57  ;;  %v6436_v1 = vpack.c.bf16 %v19554_v22, %v19554_v22 }
 0x451   :  { %v5722_v34 = vsel %vm2848_vm11, %v24073_v30, %v5720_v19  ;;  %v5750_v52 = vsel %vm2848_vm11, %v24074_v31, %v5748_v53  ;;  %v5734_v39 = vsel %vm2845_vm10, %v24075_v10, %v5732_v46  ;;  %v13584_v19 = vld [vmem:[%s22654_s5 + $0x364] sm:$0xf0]  ;;  %v5764_v53 = vsel %vm2848_vm11, %v5763_v6, %v5762_v56  ;;  %v13583_v54 = vld [vmem:[%s22654_s5 + $0x364] sm:$0xf]  ;;  %v11811_v56 = vld [vmem:[%s22654_s5 + $0x368] sm:$0xf0]  ;;  %5957 = vmatmul.bf16.gmra.mxu1 %v19582_v37 }
 0x452   :  { %v11746_v46 = vor.u32 %v13568_v41, %v11745_v63  ;;  %v11810_v40 = vor.u32 %v13584_v19, %v11809_v2  ;;  %6344 = vmatpush.bf16.msrb.mxu2 %v11822_v45  ;;  %v11750_v6 = vor.u32 %v13567_v12, %v11747_v21  ;;  %v6675_v33 = vrot.slane %v24009_v49, 5  ;;  %6015 = vmatmul.bf16.gmra.mxu0 %v19582_v37  ;;  %v24077_v10 = vld [vmem:[#allocation149_spill] sm:$0xff]  ;;  %v11801_v22 = vld [vmem:[%s22654_s5 + $0x350] sm:$0xf]  ;;  %v13565_v19 = vld [vmem:[%s22654_s5 + $0x2d4] sm:$0xf] }
 0x453   :  { %v6687_v32 = vrot.slane %v24029_v62, 6  ;;  %v5023_v0 = vadd.f32 %v5022_v20, %v19513_v3  ;;  %v5081_v63 = vadd.f32 %v5080_v9, %v19531_v25  ;;  %v11814_v30 = vor.u32 %v13583_v54, %v11811_v56  ;;  %v24076_v25 = vld [vmem:[#allocation113_spill] sm:$0xff] }
 0x454   :  { %v6686_v31 = vsel %vm2830_vm5, %v6685_v48, %v23999_v29  ;;  %6258 = vmatpush.bf16.msrb.mxu1 %v11746_v46  ;;  %v6677_v49 = vrot.slane %v24010_v4, 4  ;;  %v6437_v62 = vpack.c.bf16 %v19559_v51, %v19559_v51  ;;  %v6691_v3 = vrot.slane %v24031_v27, 4  ;;  %6287 = vmatpush.bf16.msrb.mxu3 %v11810_v40  ;;  %v11737_v4 = vld [vmem:[%s22654_s5 + $0x2d0] sm:$0xf]  ;;  %v13566_v27 = vld [vmem:[%s22654_s5 + $0x2d4] sm:$0xf0] }
 0x455   :  { %v19663_v57 = vadd.f32 %v5023_v0, %v24076_v25  ;;  %v19666_v45 = vadd.f32 %v5081_v63, %v24077_v10  ;;  %v24078_v29 = vrot.slane %v19245_v26, 1  ;;  %6316 = vmatpush.bf16.msrb.mxu0 %v11750_v6  ;;  %v19680_v51 = vpack.c.b16 %v5750_v52, %v5722_v34  ;;  %v13582_v2 = vld [vmem:[%s22654_s5 + $0x354] sm:$0xf0]  ;;  %v11739_v46 = vld [vmem:[%s22654_s5 + $0x2d8] sm:$0xf0]  ;;  %11699 = vmatmul.msk.bf16.gmra.mxu3 %vm3222_vm12, %v19599_v42 }
 0x456   :  { %6345 = vmatpush.bf16.msrb.mxu2 %v11814_v30  ;;  %v6688_v40 = vsel %vm2833_vm6, %v6687_v32, %v6686_v31  ;;  %v11802_v34 = vor.u32 %v13582_v2, %v11801_v22  ;;  %v11742_v52 = vor.u32 %v13565_v19, %v11739_v46  ;;  %v11803_v12 = vld [vmem:[%s22654_s5 + $0x358] sm:$0xf0]  ;;  %v6676_v21 = vsel %vm2836_vm7, %v6675_v33, %v6674_v55  ;;  %v4998_v20 = vpop.f32.mrf.mxu1  ;;  %v5056_v0 = vpop.f32.mrf.mxu0 }
 0x457   :  { %v5736_v48 = vsel %vm2848_vm11, %v24078_v29, %v5734_v39  ;;  %v11738_v39 = vor.u32 %v13566_v27, %v11737_v4  ;;  %11703 = vmatmul.msk.bf16.gmra.mxu2 %vm3222_vm12, %v19599_v42  ;;  %v6689_v54 = vrot.slane %v24030_v5, 5  ;;  %v19706_v6 = vunpack.c.l.b16 %v6436_v1  ;;  %v5083_v31 = vpop.f32.mrf.mxu2  ;;  %v24079_v1 = vld [vmem:[#allocation100_spill] sm:$0xff] }
 0x458   :  { %v19682_v41 = vpack.c.b16 %v5764_v53, %v5736_v48  ;;  %v13581_v53 = vld [vmem:[%s22654_s5 + $0x354] sm:$0xf]  ;;  %v6679_v56 = vrot.slane %v24011_v58, 3  ;;  %v19709_v32 = vunpack.c.l.b16 %v6437_v62  ;;  %6288 = vmatpush.bf16.msrb.mxu3 %v11802_v34  ;;  %v6678_v63 = vsel %vm2839_vm8, %v6677_v49, %v6676_v21  ;;  %v5025_v33 = vpop.f32.mrf.mxu3 }
 0x459   :  { %6259 = vmatpush.bf16.msrb.mxu1 %v11738_v39  ;;  %v11806_v9 = vor.u32 %v13581_v53, %v11803_v12  ;;  %6317 = vmatpush.bf16.msrb.mxu0 %v11742_v52  ;;  %v6681_v30 = vrot.slane %v19209_v11, 2  ;;  %v6690_v55 = vsel %vm2836_vm7, %v6689_v54, %v6688_v40  ;;  %v6693_v5 = vrot.slane %v24033_v59, 3 }
 0x45a   :  { %v1977_v25 = vmax.f32 %v24079_v1, 0.0  ;;  %v6699_v58 = vrot.slane %v24032_v50, 7  ;;  %v6701_v62 = vrot.slane %v24036_v8, 6  ;;  %v6692_v10 = vsel %vm2839_vm8, %v6691_v3, %v6690_v55  ;;  %v24080_v50 = vld [vmem:[#allocation127_spill] sm:$0xff] }
 0x45b   :  { %6346 = vmatpush.bf16.msrb.mxu2 %v11806_v9  ;;  %v5026_v29 = vadd.f32 %v5025_v33, %v19612_v18  ;;  %v5084_v49 = vadd.f32 %v5083_v31, %v19632_v28  ;;  %v6713_v11 = vrot.slane %v24039_v14, 7  ;;  %v6715_v48 = vrot.slane %v24051_v36, 6  ;;  %v24081_v8 = vld [vmem:[#allocation19_spill] sm:$0xff] }
 0x45c   :  { %v6406_v59 = vperm.slane %v1977_v25, 0  ;;  %v6680_v4 = vsel %vm2842_vm9, %v6679_v56, %v6678_v63  ;;  %v6700_v27 = vsel %vm2830_vm5, %v6699_v58, %v24023_v44  ;;  %v6407_v22 = vperm.slane %v1977_v25, 2  ;;  %v24082_v58 = vld [vmem:[#allocation151_spill] sm:$0xff] }
 0x45d   :  { %v19727_v39 = vadd.f32 %v5026_v29, %v24080_v50  ;;  %v19730_v3 = vadd.f32 %v5084_v49, %v24081_v8  ;;  %v6695_v18 = vrot.slane %v19245_v26, 2  ;;  %v6714_v14 = vsel %vm2830_vm5, %v6713_v11, %v24034_v17 }
 0x45e   :  { %v6438_v28 = vpack.c.bf16 %v6406_v59, %v6406_v59  ;;  %v6702_v36 = vsel %vm2833_vm6, %v6701_v62, %v6700_v27  ;;  %v6439_v2 = vpack.c.bf16 %v6407_v22, %v6407_v22  ;;  %v6694_v19 = vsel %vm2842_vm9, %v6693_v5, %v6692_v10  ;;  %v5001_v52 = vpop.f32.mrf.mxu1  ;;  %v5059_v21 = vpop.f32.mrf.mxu0  ;;  %v24083_v62 = vld [vmem:[#allocation177_spill] sm:$0xff] }
 0x45f   :  { %v6683_v44 = vrot.slane %v19706_v6, 1  ;;  %v6703_v46 = vrot.slane %v24037_v61, 5  ;;  %v6716_v40 = vsel %vm2833_vm6, %v6715_v48, %v6714_v14  ;;  %v6717_v34 = vrot.slane %v24054_v16, 5  ;;  %v5085_v63 = vpop.f32.mrf.mxu2  ;;  %v24084_v14 = vld [vmem:[#allocation60_spill] sm:$0xff] }
 0x460   :  { %v6501_v53 = vunpack.c.l.b16 %v6438_v28  ;;  %v6705_v26 = vrot.slane %v24050_v47, 4  ;;  %v6502_v12 = vunpack.c.l.b16 %v6439_v2  ;;  %v6719_v17 = vrot.slane %v24055_v13, 4  ;;  %v5027_v56 = vpop.f32.mrf.mxu3 }
 0x461   :  { %v6682_v54 = vsel %vm2845_vm10, %v6681_v30, %v6680_v4  ;;  %v6704_v9 = vsel %vm2836_vm7, %v6703_v46, %v6702_v36  ;;  %v6696_v6 = vsel %vm2845_vm10, %v6695_v18, %v6694_v19  ;;  %v6697_v61 = vrot.slane %v19709_v32, 1  ;;  %5962 = vmatmul.bf16.gmra.mxu1 %v19680_v51  ;;  %v24085_v36 = vld [vmem:[#allocation99_spill] sm:$0xff] }
 0x462   :  { %v6706_v16 = vsel %vm2839_vm8, %v6705_v26, %v6704_v9  ;;  %v6707_v55 = vrot.slane %v24053_v38, 3  ;;  %v6709_v47 = vrot.slane %v19431_v15, 2  ;;  %v6718_v5 = vsel %vm2836_vm7, %v6717_v34, %v6716_v40  ;;  %6020 = vmatmul.bf16.gmra.mxu0 %v19680_v51  ;;  %v24086_v26 = vld [vmem:[#allocation58_spill] sm:$0xff] }
 0x463   :  { %v5028_v13 = vadd.f32 %v5027_v56, %v4998_v20  ;;  %v5086_v33 = vadd.f32 %v5085_v63, %v5056_v0  ;;  %v6720_v30 = vsel %vm2839_vm8, %v6719_v17, %v6718_v5  ;;  %v6721_v31 = vrot.slane %v24065_v60, 3  ;;  %v24088_v5 = vld [vmem:[#allocation105_spill] sm:$0xff] }
 0x464   :  { %v6708_v32 = vsel %vm2842_vm9, %v6707_v55, %v6706_v16  ;;  %v6711_v1 = vrot.slane %v6501_v53, 1  ;;  %v6723_v25 = vrot.slane %v19491_v43, 2  ;;  %v6725_v38 = vrot.slane %v6502_v12, 1 }
 0x465   :  { %v19758_v15 = vadd.f32 %v5028_v13, %v24082_v58  ;;  %v19761_v20 = vadd.f32 %v5086_v33, %v24083_v62  ;;  %v6710_v0 = vsel %vm2845_vm10, %v6709_v47, %v6708_v32  ;;  %v6722_v10 = vsel %vm2842_vm9, %v6721_v31, %v6720_v30  ;;  %11700 = vmatmul.msk.bf16.gmra.mxu3 %vm3222_vm12, %v19682_v41  ;;  %v24089_v33 = vld [vmem:[#allocation11_spill] sm:$0xff]  ;;  %v11943_v31 = vld [vmem:[%s22653_s4 + $0x420] sm:$0xf]  ;;  %v13607_v58 = vld [vmem:[%s22653_s4 + $0x424] sm:$0xf] }
 0x466   :  { %v6684_v60 = vsel %vm2848_vm11, %v6683_v44, %v6682_v54  ;;  %v6712_v29 = vsel %vm2848_vm11, %v6711_v1, %v6710_v0  ;;  %v6724_v49 = vsel %vm2845_vm10, %v6723_v25, %v6722_v10  ;;  %v6698_v11 = vsel %vm2848_vm11, %v6697_v61, %v6696_v6  ;;  %v5003_v59 = vpop.f32.mrf.mxu1  ;;  %v5061_v27 = vpop.f32.mrf.mxu0  ;;  %v13609_v54 = vld [vmem:[%s22653_s4 + $0x434] sm:$0xf]  ;;  %v11953_v61 = vld [vmem:[%s22653_s4 + $0x438] sm:$0xf0]  ;;  %v13608_v32 = vld [vmem:[%s22653_s4 + $0x424] sm:$0xf0] }
 0x467   :  { %11704 = vmatmul.msk.bf16.gmra.mxu2 %vm3222_vm12, %v19682_v41  ;;  %v19772_v43 = vpack.c.b16 %v6712_v29, %v6684_v60  ;;  %v6726_v48 = vsel %vm2848_vm11, %v6725_v38, %v6724_v49  ;;  %v5088_v50 = vpop.f32.mrf.mxu2  ;;  %v12007_v1 = vld [vmem:[%s22653_s4 + $0x4a0] sm:$0xf]  ;;  %v11944_v25 = vor.u32 %v13608_v32, %v11943_v31  ;;  %v13624_v38 = vld [vmem:[%s22653_s4 + $0x4a4] sm:$0xf0]  ;;  %v11945_v62 = vld [vmem:[%s22653_s4 + $0x428] sm:$0xf0] }
 0x468   :  { %v19776_v4 = vpack.c.b16 %v6726_v48, %v6698_v11  ;;  %v5030_v22 = vpop.f32.mrf.mxu3  ;;  %v5089_v18 = vadd.f32 %v5088_v50, %v5059_v21  ;;  %v11951_v21 = vld [vmem:[%s22653_s4 + $0x430] sm:$0xf]  ;;  %v12008_v0 = vor.u32 %v13624_v38, %v12007_v1  ;;  %v11948_v10 = vor.u32 %v13607_v58, %v11945_v62  ;;  %v13623_v60 = vld [vmem:[%s22653_s4 + $0x4a4] sm:$0xf]  ;;  %v12009_v29 = vld [vmem:[%s22653_s4 + $0x4a8] sm:$0xf0] }
 0x469   :  { %v5031_v8 = vadd.f32 %v5030_v22, %v5001_v52  ;;  %v24087_v52 = vld [vmem:[#allocation164_spill] sm:$0xff]  ;;  %v12012_v48 = vor.u32 %v13623_v60, %v12009_v29  ;;  %v13622_v22 = vld [vmem:[%s22653_s4 + $0x494] sm:$0xf0]  ;;  %v13619_v32 = vld [vmem:[%s22653_s4 + $0x484] sm:$0xf] }
 0x46a   :  { %v19782_v2 = vadd.f32 %v5089_v18, %v24085_v36  ;;  %v11935_v49 = vld [vmem:[%s22653_s4 + $0x410] sm:$0xf]  ;;  %6931 = vmatpush.bf16.msra.mxu3 %v12008_v0  ;;  %v11937_v36 = vld [vmem:[%s22653_s4 + $0x418] sm:$0xf0]  ;;  %v11993_v1 = vld [vmem:[%s22653_s4 + $0x488] sm:$0xf0] }
 0x46b   :  { %v19779_v28 = vadd.f32 %v5031_v8, %v24084_v14  ;;  %v13605_v14 = vld [vmem:[%s22653_s4 + $0x414] sm:$0xf]  ;;  %6989 = vmatpush.bf16.msra.mxu2 %v12012_v48  ;;  %v11996_v58 = vor.u32 %v13619_v32, %v11993_v1  ;;  %v13602_v62 = vld [vmem:[%s22653_s4 + $0x3f4] sm:$0xf0]  ;;  %v11983_v0 = vld [vmem:[%s22653_s4 + $0x470] sm:$0xf] }
 0x46c   :  { %v13601_v48 = vld [vmem:[%s22653_s4 + $0x3f4] sm:$0xf] }
 0x46e   :  { %v5299_v19 = vpop.f32.mrf.mxu1  ;;  %v5357_v44 = vpop.f32.mrf.mxu0 }
 0x46f   :  { %v5090_v40 = vpop.f32.mrf.mxu2 }
 0x470   :  { %v5032_v46 = vpop.f32.mrf.mxu3  ;;  %v5091_v53 = vadd.f32 %v5090_v40, %v5061_v27  ;;  %v11999_v27 = vld [vmem:[%s22653_s4 + $0x490] sm:$0xf]  ;;  %v11940_v40 = vor.u32 %v13605_v14, %v11937_v36  ;;  %v11985_v14 = vld [vmem:[%s22653_s4 + $0x478] sm:$0xf0] }
 0x471   :  { %v5033_v34 = vadd.f32 %v5032_v46, %v5003_v59  ;;  %6260 = vmatmul.bf16.vlgmr.msrb.gmra.mxu1 %v24022_v35  ;;  %v13606_v59 = vld [vmem:[%s22653_s4 + $0x414] sm:$0xf0]  ;;  %v12000_v18 = vor.u32 %v13622_v22, %v11999_v27  ;;  %v13617_v27 = vld [vmem:[%s22653_s4 + $0x474] sm:$0xf] }
 0x472   :  { %6318 = vmatmul.bf16.vlgmr.msrb.gmra.mxu0 %v24022_v35  ;;  %v19790_v17 = vadd.f32 %v5091_v53, %v24087_v52  ;;  %v13610_v35 = vld [vmem:[%s22653_s4 + $0x434] sm:$0xf0]  ;;  %v11936_v8 = vor.u32 %v13606_v59, %v11935_v49  ;;  %v11921_v59 = vld [vmem:[%s22653_s4 + $0x3f8] sm:$0xf0] }
 0x473   :  { %v19787_v12 = vadd.f32 %v5033_v34, %v24086_v26  ;;  %v11952_v6 = vor.u32 %v13610_v35, %v11951_v21  ;;  %v12001_v34 = vld [vmem:[%s22653_s4 + $0x498] sm:$0xf0]  ;;  %v24091_v35 = vld [vmem:[#allocation8_spill] sm:$0xff]  ;;  %6932 = vmatpush.bf16.msra.mxu3 %v12000_v18  ;;  %v11924_v18 = vor.u32 %v13601_v48, %v11921_v59 }
 0x474   :  { %v24090_v52 = vld [vmem:[#allocation117_spill] sm:$0xff] }
 0x475   :  { %11855 = vmatmul.msk.bf16.vlgmr.msrb.gmra.mxu3 %vm3222_vm12, %v24024_v23  ;;  %6901 = vmatpush.bf16.msra.mxu1 %v11952_v6  ;;  %v24092_v6 = vld [vmem:[#allocation107_spill] sm:$0xff]  ;;  %v11969_v48 = vld [vmem:[%s22653_s4 + $0x458] sm:$0xf0] }
 0x476   :  { %v5301_v9 = vpop.f32.mrf.mxu1  ;;  %v5359_v56 = vpop.f32.mrf.mxu0 }
 0x477   :  { %11859 = vmatmul.msk.bf16.vlgmr.msrb.gmra.mxu2 %vm3222_vm12, %v24024_v23  ;;  %v11956_v23 = vor.u32 %v13609_v54, %v11953_v61  ;;  %v5386_v16 = vpop.f32.mrf.mxu2 }
 0x478   :  { %v5328_v63 = vpop.f32.mrf.mxu3  ;;  %v5387_v47 = vadd.f32 %v5386_v16, %v5357_v44  ;;  %v13620_v16 = vld [vmem:[%s22653_s4 + $0x484] sm:$0xf0] }
 0x479   :  { %v5329_v55 = vadd.f32 %v5328_v63, %v5299_v19  ;;  %6959 = vmatpush.bf16.msra.mxu0 %v11956_v23  ;;  %6902 = vmatpush.bf16.msra.mxu1 %v11944_v25  ;;  %v13621_v19 = vld [vmem:[%s22653_s4 + $0x494] sm:$0xf]  ;;  %v11927_v23 = vld [vmem:[%s22653_s4 + $0x400] sm:$0xf]  ;;  %v11919_v25 = vld [vmem:[%s22653_s4 + $0x3f0] sm:$0xf] }
 0x47a   :  { %v19812_v30 = vadd.f32 %v5387_v47, %v24089_v33  ;;  %v12004_v21 = vor.u32 %v13621_v19, %v12001_v34  ;;  %v11929_v47 = vld [vmem:[%s22653_s4 + $0x408] sm:$0xf0]  ;;  %v11920_v29 = vor.u32 %v13602_v62, %v11919_v25  ;;  %v24095_v34 = vld [vmem:[#allocation101_spill] sm:$0xff] }
 0x47b   :  { %v19809_v13 = vadd.f32 %v5329_v55, %v24088_v5  ;;  %v13603_v55 = vld [vmem:[%s22653_s4 + $0x404] sm:$0xf]  ;;  %v24093_v5 = vld [vmem:[#allocation7_spill] sm:$0xff]  ;;  %v11905_v62 = vld [vmem:[%s22653_s4 + $0x3d8] sm:$0xf0] }
 0x47c   :  { %6990 = vmatpush.bf16.msra.mxu2 %v12004_v21  ;;  %v11932_v31 = vor.u32 %v13603_v55, %v11929_v47  ;;  %v13616_v21 = vld [vmem:[%s22653_s4 + $0x464] sm:$0xf0] }
 0x47d   :  { %6960 = vmatpush.bf16.msra.mxu0 %v11948_v10  ;;  %6903 = vmatpush.bf16.msra.mxu1 %v11936_v8  ;;  %v13618_v10 = vld [vmem:[%s22653_s4 + $0x474] sm:$0xf0] }
 0x47e   :  { %v19841_v11 = vpop.f32.mrf.mxu1  ;;  %v5362_v50 = vpop.f32.mrf.mxu0  ;;  %v11984_v49 = vor.u32 %v13618_v10, %v11983_v0  ;;  %v13613_v0 = vld [vmem:[%s22653_s4 + $0x454] sm:$0xf] }
 0x47f   :  { %v5388_v46 = vpop.f32.mrf.mxu2 }
 0x480   :  { %v5330_v44 = vpop.f32.mrf.mxu3  ;;  %v5389_v26 = vadd.f32 %v5388_v46, %v5359_v56  ;;  %v11991_v56 = vld [vmem:[%s22653_s4 + $0x480] sm:$0xf]  ;;  %6991 = vmatpush.bf16.msra.mxu2 %v11996_v58  ;;  %v24094_v46 = vld [vmem:[#allocation51_spill] sm:$0xff]  ;;  %v13597_v58 = vld [vmem:[%s22653_s4 + $0x3d4] sm:$0xf] }
 0x481   :  { %v5331_v53 = vadd.f32 %v5330_v44, %v5301_v9  ;;  %6265 = vmatmul.bf16.gmra.mxu1 %v24090_v52  ;;  %6961 = vmatpush.bf16.msra.mxu0 %v11940_v40  ;;  %v13604_v9 = vld [vmem:[%s22653_s4 + $0x404] sm:$0xf0]  ;;  %v11992_v33 = vor.u32 %v13620_v16, %v11991_v56  ;;  %v11988_v44 = vor.u32 %v13617_v27, %v11985_v14  ;;  %v13615_v56 = vld [vmem:[%s22653_s4 + $0x464] sm:$0xf]  ;;  %v11903_v16 = vld [vmem:[%s22653_s4 + $0x3d0] sm:$0xf] }
 0x482   :  { %6323 = vmatmul.bf16.gmra.mxu0 %v24090_v52  ;;  %v19870_v61 = vadd.f32 %v5389_v26, %v24092_v6  ;;  %v11928_v63 = vor.u32 %v13604_v9, %v11927_v23  ;;  %v11911_v26 = vld [vmem:[%s22653_s4 + $0x3e0] sm:$0xf]  ;;  %v13600_v52 = vld [vmem:[%s22653_s4 + $0x3e4] sm:$0xf0]  ;;  %v11913_v6 = vld [vmem:[%s22653_s4 + $0x3e8] sm:$0xf0] }
 0x483   :  { %v19867_v54 = vadd.f32 %v5331_v53, %v24091_v35  ;;  %6933 = vmatpush.bf16.msra.mxu3 %v11992_v33  ;;  %v13599_v35 = vld [vmem:[%s22653_s4 + $0x3e4] sm:$0xf]  ;;  %v11967_v33 = vld [vmem:[%s22653_s4 + $0x450] sm:$0xf] }
 0x484   :  { %6904 = vmatpush.bf16.msra.mxu1 %v11928_v63  ;;  %6992 = vmatpush.bf16.msra.mxu2 %v11988_v44  ;;  %v11916_v9 = vor.u32 %v13599_v35, %v11913_v6  ;;  %v11977_v63 = vld [vmem:[%s22653_s4 + $0x468] sm:$0xf0]  ;;  %v24097_v14 = vld [vmem:[#allocation50_spill] sm:$0xff]  ;;  %v13612_v44 = vld [vmem:[%s22653_s4 + $0x444] sm:$0xf0] }
 0x485   :  { %11856 = vmatmul.msk.bf16.gmra.mxu3 %vm3222_vm12, %v24093_v5  ;;  %6962 = vmatpush.bf16.msra.mxu0 %v11932_v31  ;;  %v11980_v47 = vor.u32 %v13615_v56, %v11977_v63  ;;  %v13614_v31 = vld [vmem:[%s22653_s4 + $0x454] sm:$0xf0] }
 0x486   :  { %v5306_v38 = vpop.f32.mrf.mxu1  ;;  %v5364_v60 = vpop.f32.mrf.mxu0  ;;  %v11968_v25 = vor.u32 %v13614_v31, %v11967_v33  ;;  %v24098_v63 = vld [vmem:[#allocation109_spill] sm:$0xff] }
 0x487   :  { %11860 = vmatmul.msk.bf16.gmra.mxu2 %vm3222_vm12, %v24093_v5  ;;  %v5391_v8 = vpop.f32.mrf.mxu2  ;;  %6934 = vmatpush.bf16.msra.mxu3 %v11984_v49  ;;  %v13598_v5 = vld [vmem:[%s22653_s4 + $0x3d4] sm:$0xf0]  ;;  %v11908_v49 = vor.u32 %v13597_v58, %v11905_v62 }
 0x488   :  { %v5333_v22 = vpop.f32.mrf.mxu3  ;;  %v5392_v19 = vadd.f32 %v5391_v8, %v5362_v50  ;;  %6905 = vmatpush.bf16.msra.mxu1 %v11920_v29  ;;  %v11912_v50 = vor.u32 %v13600_v52, %v11911_v26  ;;  %v11904_v1 = vor.u32 %v13598_v5, %v11903_v16  ;;  %6993 = vmatpush.bf16.msra.mxu2 %v11980_v47  ;;  %v24096_v8 = vld [vmem:[#allocation108_spill] sm:$0xff]  ;;  %v24099_v47 = vld [vmem:[#allocation13_spill] sm:$0xff] }
 0x489   :  { %v5334_v36 = vadd.f32 %v5333_v22, %v19841_v11  ;;  %6963 = vmatpush.bf16.msra.mxu0 %v11924_v18  ;;  %v11975_v11 = vld [vmem:[%s22653_s4 + $0x460] sm:$0xf]  ;;  %v11972_v22 = vor.u32 %v13613_v0, %v11969_v48 }
 0x48a   :  { %v19929_v53 = vadd.f32 %v5392_v19, %v24095_v34  ;;  %v11976_v23 = vor.u32 %v13616_v21, %v11975_v11  ;;  %v11895_v19 = vld [vmem:[%s22653_s4 + $0x3c0] sm:$0xf]  ;;  %v11897_v34 = vld [vmem:[%s22653_s4 + $0x3c8] sm:$0xf0]  ;;  %v13611_v11 = vld [vmem:[%s22653_s4 + $0x444] sm:$0xf] }
 0x48b   :  { %v19926_v40 = vadd.f32 %v5334_v36, %v24094_v46  ;;  %v13595_v46 = vld [vmem:[%s22653_s4 + $0x3c4] sm:$0xf] }
 0x48c   :  { %6906 = vmatpush.bf16.msra.mxu1 %v11912_v50  ;;  %6935 = vmatpush.bf16.msra.mxu3 %v11976_v23  ;;  %v11900_v52 = vor.u32 %v13595_v46, %v11897_v34  ;;  %v11961_v50 = vld [vmem:[%s22653_s4 + $0x448] sm:$0xf0]  ;;  %v24100_v0 = vld [vmem:[#allocation110_spill] sm:$0xff] }
 0x48d   :  { %6964 = vmatpush.bf16.msra.mxu0 %v11916_v9  ;;  %6994 = vmatpush.bf16.msra.mxu2 %v11972_v22  ;;  %v11964_v35 = vor.u32 %v13611_v11, %v11961_v50  ;;  %v24107_v11 = vld [vmem:[#allocation20_spill] sm:$0xff] }
 0x48e   :  { %v5309_v55 = vpop.f32.mrf.mxu1  ;;  %v5367_v32 = vpop.f32.mrf.mxu0 }
 0x48f   :  { %v5393_v29 = vpop.f32.mrf.mxu2 }
 0x490   :  { %v5335_v10 = vpop.f32.mrf.mxu3  ;;  %v5394_v27 = vadd.f32 %v5393_v29, %v5364_v60  ;;  %6907 = vmatpush.bf16.msra.mxu1 %v11904_v1  ;;  %6936 = vmatpush.bf16.msra.mxu3 %v11968_v25 }
 0x491   :  { %v5336_v59 = vadd.f32 %v5335_v10, %v5306_v38  ;;  %6270 = vmatmul.bf16.gmra.mxu1 %v19582_v37  ;;  %6965 = vmatpush.bf16.msra.mxu0 %v11908_v49  ;;  %v13596_v38 = vld [vmem:[%s22653_s4 + $0x3c4] sm:$0xf0] }
 0x492   :  { %6328 = vmatmul.bf16.gmra.mxu0 %v19582_v37  ;;  %v19985_v36 = vadd.f32 %v5394_v27, %v24097_v14  ;;  %v11959_v37 = vld [vmem:[%s22653_s4 + $0x440] sm:$0xf]  ;;  %v11896_v60 = vor.u32 %v13596_v38, %v11895_v19  ;;  %6995 = vmatpush.bf16.msra.mxu2 %v11964_v35  ;;  %v24103_v14 = vld [vmem:[#allocation116_spill] sm:$0xff] }
 0x493   :  { %v19982_v18 = vadd.f32 %v5336_v59, %v24096_v8  ;;  %v11960_v26 = vor.u32 %v13612_v44, %v11959_v37  ;;  %v24102_v8 = vld [vmem:[#allocation114_spill] sm:$0xff]  ;;  %v12109_v35 = vld [vmem:[%s22654_s5 + $0x430] sm:$0xf] }
 0x494   :  { %6908 = vmatpush.bf16.msra.mxu1 %v11896_v60 }
 0x495   :  { %11857 = vmatmul.msk.bf16.gmra.mxu3 %vm3222_vm12, %v19599_v42  ;;  %6966 = vmatpush.bf16.msra.mxu0 %v11900_v52 }
 0x496   :  { %v5311_v21 = vpop.f32.mrf.mxu1  ;;  %v5369_v6 = vpop.f32.mrf.mxu0  ;;  %6937 = vmatpush.bf16.msra.mxu3 %v11960_v26  ;;  %v24104_v26 = vld [vmem:[#allocation49_spill] sm:$0xff] }
 0x497   :  { %11861 = vmatmul.msk.bf16.gmra.mxu2 %vm3222_vm12, %v19599_v42  ;;  %v5396_v9 = vpop.f32.mrf.mxu2 }
 0x498   :  { %v5338_v23 = vpop.f32.mrf.mxu3  ;;  %v5397_v56 = vadd.f32 %v5396_v9, %v5367_v32 }
 0x499   :  { %v5339_v42 = vadd.f32 %v5338_v23, %v5309_v55  ;;  %v24101_v55 = vld [vmem:[#allocation55_spill] sm:$0xff]  ;;  %v13639_v23 = vld [vmem:[%s22654_s5 + $0x434] sm:$0xf] }
 0x49a   :  { %v20019_v5 = vadd.f32 %v5397_v56, %v24099_v47  ;;  %v12111_v56 = vld [vmem:[%s22654_s5 + $0x438] sm:$0xf0] }
 0x49b   :  { %v20016_v16 = vadd.f32 %v5339_v42, %v24098_v63  ;;  %v12114_v47 = vor.u32 %v13639_v23, %v12111_v56  ;;  %v13635_v56 = vld [vmem:[%s22654_s5 + $0x414] sm:$0xf] }
 0x49d   :  { %7272 = vmatpush.bf16.msrb.mxu0 %v12114_v47  ;;  %v12095_v47 = vld [vmem:[%s22654_s5 + $0x418] sm:$0xf0] }
 0x49e   :  { %v5314_v33 = vpop.f32.mrf.mxu1  ;;  %v5372_v31 = vpop.f32.mrf.mxu0 }
 0x49f   :  { %v5398_v25 = vpop.f32.mrf.mxu2 }
 0x4a0   :  { %v5340_v1 = vpop.f32.mrf.mxu3  ;;  %v5399_v62 = vadd.f32 %v5398_v25, %v5369_v6  ;;  %v13640_v6 = vld [vmem:[%s22654_s5 + $0x434] sm:$0xf0] }
 0x4a1   :  { %v5341_v58 = vadd.f32 %v5340_v1, %v5311_v21  ;;  %6275 = vmatmul.bf16.gmra.mxu1 %v19680_v51  ;;  %v24109_v21 = vld [vmem:[#allocation89_spill] sm:$0xff]  ;;  %v12110_v42 = vor.u32 %v13640_v6, %v12109_v35 }
 0x4a2   :  { %6333 = vmatmul.bf16.gmra.mxu0 %v19680_v51  ;;  %v20027_v32 = vadd.f32 %v5399_v62, %v24101_v55  ;;  %v13652_v35 = vld [vmem:[%s22654_s5 + $0x494] sm:$0xf0] }
 0x4a3   :  { %v20024_v10 = vadd.f32 %v5341_v58, %v24100_v0  ;;  %7214 = vmatpush.bf16.msrb.mxu1 %v12110_v42  ;;  %v24110_v58 = vld [vmem:[#allocation65_spill] sm:$0xff]  ;;  %v24111_v0 = vld [vmem:[#allocation76_spill] sm:$0xff] }
 0x4a5   :  { %11858 = vmatmul.msk.bf16.gmra.mxu3 %vm3222_vm12, %v19682_v41 }
 0x4a6   :  { %v5316_v29 = vpop.f32.mrf.mxu1  ;;  %v5374_v49 = vpop.f32.mrf.mxu0 }
 0x4a7   :  { %11862 = vmatmul.msk.bf16.gmra.mxu2 %vm3222_vm12, %v19682_v41  ;;  %v5401_v59 = vpop.f32.mrf.mxu2  ;;  %v24105_v41 = vld [vmem:[#allocation119_spill] sm:$0xff] }
 0x4a8   :  { %v5343_v48 = vpop.f32.mrf.mxu3  ;;  %v5402_v22 = vadd.f32 %v5401_v59, %v5372_v31 }
 0x4a9   :  { %v5344_v27 = vadd.f32 %v5343_v48, %v5314_v33  ;;  %v12165_v48 = vld [vmem:[%s22654_s5 + $0x4a0] sm:$0xf] }
 0x4aa   :  { %v20037_v19 = vadd.f32 %v5402_v22, %v24103_v14  ;;  %v13637_v22 = vld [vmem:[%s22654_s5 + $0x424] sm:$0xf] }
 0x4ab   :  { %v20034_v51 = vadd.f32 %v5344_v27, %v24102_v8  ;;  %v13654_v27 = vld [vmem:[%s22654_s5 + $0x4a4] sm:$0xf0]  ;;  %v12103_v8 = vld [vmem:[%s22654_s5 + $0x428] sm:$0xf0] }
 0x4ac   :  { %v12166_v14 = vor.u32 %v13654_v27, %v12165_v48 }
 0x4ae   :  { %v5948_v38 = vpop.f32.mrf.mxu1  ;;  %v6006_v37 = vpop.f32.mrf.mxu0  ;;  %7244 = vmatpush.bf16.msrb.mxu3 %v12166_v14  ;;  %v12085_v14 = vld [vmem:[%s22654_s5 + $0x400] sm:$0xf] }
 0x4af   :  { %v5403_v44 = vpop.f32.mrf.mxu2 }
 0x4b0   :  { %v5345_v60 = vpop.f32.mrf.mxu3  ;;  %v5404_v34 = vadd.f32 %v5403_v44, %v5374_v49  ;;  %v13638_v49 = vld [vmem:[%s22654_s5 + $0x424] sm:$0xf0]  ;;  %v12093_v44 = vld [vmem:[%s22654_s5 + $0x410] sm:$0xf] }
 0x4b1   :  { %v5346_v46 = vadd.f32 %v5345_v60, %v5316_v29  ;;  %6909 = vmatmul.bf16.vlgmr.msra.gmra.mxu1 %v24104_v26  ;;  %v12101_v29 = vld [vmem:[%s22654_s5 + $0x420] sm:$0xf]  ;;  %v12167_v60 = vld [vmem:[%s22654_s5 + $0x4a8] sm:$0xf0] }
 0x4b2   :  { %6967 = vmatmul.bf16.vlgmr.msra.gmra.mxu0 %v24104_v26  ;;  %v20045_v50 = vadd.f32 %v5404_v34, %v24107_v11  ;;  %v12102_v59 = vor.u32 %v13638_v49, %v12101_v29  ;;  %v12157_v11 = vld [vmem:[%s22654_s5 + $0x490] sm:$0xf] }
 0x4b3   :  { %v20042_v52 = vadd.f32 %v5346_v46, %v24105_v41  ;;  %v13636_v41 = vld [vmem:[%s22654_s5 + $0x414] sm:$0xf0]  ;;  %v12158_v42 = vor.u32 %v13652_v35, %v12157_v11  ;;  %v24112_v49 = vld [vmem:[#allocation56_spill] sm:$0xff]  ;;  %v13649_v35 = vld [vmem:[%s22654_s5 + $0x484] sm:$0xf] }
 0x4b4   :  { %24108 = vst [vmem:[#allocation80_spill] sm:$0xff] %v20045_v50  ;;  %7215 = vmatpush.bf16.msrb.mxu1 %v12102_v59  ;;  %v12094_v23 = vor.u32 %v13636_v41, %v12093_v44  ;;  %v24113_v59 = vld [vmem:[#allocation72_spill] sm:$0xff]  ;;  %v12087_v44 = vld [vmem:[%s22654_s5 + $0x408] sm:$0xf0] }
 0x4b5   :  { %24106 = vst [vmem:[#allocation129_spill] sm:$0xff] %v20042_v52  ;;  %12013 = vmatmul.msk.bf16.vlgmr.msra.gmra.mxu3 %vm3222_vm12, %v24109_v21 }
 0x4b6   :  { %v5950_v9 = vpop.f32.mrf.mxu1  ;;  %v6008_v63 = vpop.f32.mrf.mxu0  ;;  %7245 = vmatpush.bf16.msrb.mxu3 %v12158_v42  ;;  %v12077_v42 = vld [vmem:[%s22654_s5 + $0x3f0] sm:$0xf] }
 0x4b7   :  { %12017 = vmatmul.msk.bf16.vlgmr.msra.gmra.mxu2 %vm3222_vm12, %v24109_v21  ;;  %v6035_v31 = vpop.f32.mrf.mxu2 }
 0x4b8   :  { %v5977_v33 = vpop.f32.mrf.mxu3  ;;  %v6036_v25 = vadd.f32 %v6035_v31, %v6006_v37  ;;  %v13653_v37 = vld [vmem:[%s22654_s5 + $0x4a4] sm:$0xf]  ;;  %7216 = vmatpush.bf16.msrb.mxu1 %v12094_v23  ;;  %v12151_v23 = vld [vmem:[%s22654_s5 + $0x488] sm:$0xf0] }
 0x4b9   :  { %v5978_v1 = vadd.f32 %v5977_v33, %v5948_v38  ;;  %v12106_v38 = vor.u32 %v13637_v22, %v12103_v8  ;;  %v12170_v34 = vor.u32 %v13653_v37, %v12167_v60  ;;  %v13651_v33 = vld [vmem:[%s22654_s5 + $0x494] sm:$0xf]  ;;  %v24114_v22 = vld [vmem:[#allocation78_spill] sm:$0xff]  ;;  %v13650_v37 = vld [vmem:[%s22654_s5 + $0x484] sm:$0xf0] }
 0x4ba   :  { %v20067_v55 = vadd.f32 %v6036_v25, %v24111_v0  ;;  %v12098_v25 = vor.u32 %v13635_v56, %v12095_v47  ;;  %v13633_v60 = vld [vmem:[%s22654_s5 + $0x404] sm:$0xf]  ;;  %v12154_v47 = vor.u32 %v13649_v35, %v12151_v23  ;;  %v13630_v35 = vld [vmem:[%s22654_s5 + $0x3e4] sm:$0xf0]  ;;  %v12071_v23 = vld [vmem:[%s22654_s5 + $0x3e8] sm:$0xf0] }
 0x4bb   :  { %v20064_v62 = vadd.f32 %v5978_v1, %v24110_v58  ;;  %7273 = vmatpush.bf16.msrb.mxu0 %v12106_v38  ;;  %7302 = vmatpush.bf16.msrb.mxu2 %v12170_v34  ;;  %v12159_v58 = vld [vmem:[%s22654_s5 + $0x498] sm:$0xf0]  ;;  %v24115_v34 = vld [vmem:[#allocation52_spill] sm:$0xff]  ;;  %v12090_v11 = vor.u32 %v13633_v60, %v12087_v44 }
 0x4bc   :  { %v12162_v48 = vor.u32 %v13651_v33, %v12159_v58  ;;  %v13632_v33 = vld [vmem:[%s22654_s5 + $0x3f4] sm:$0xf0] }
 0x4bd   :  { %v12078_v58 = vor.u32 %v13632_v33, %v12077_v42  ;;  %v13645_v33 = vld [vmem:[%s22654_s5 + $0x464] sm:$0xf] }
 0x4be   :  { %v20096_v46 = vpop.f32.mrf.mxu1  ;;  %v6011_v6 = vpop.f32.mrf.mxu0 }
 0x4bf   :  { %v6037_v1 = vpop.f32.mrf.mxu2  ;;  %7274 = vmatpush.bf16.msrb.mxu0 %v12098_v25  ;;  %7303 = vmatpush.bf16.msrb.mxu2 %v12162_v48  ;;  %v12079_v48 = vld [vmem:[%s22654_s5 + $0x3f8] sm:$0xf0] }
 0x4c0   :  { %v5979_v31 = vpop.f32.mrf.mxu3  ;;  %v6038_v29 = vadd.f32 %v6037_v1, %v6008_v63  ;;  %v12149_v63 = vld [vmem:[%s22654_s5 + $0x480] sm:$0xf]  ;;  %v13648_v1 = vld [vmem:[%s22654_s5 + $0x474] sm:$0xf0] }
 0x4c1   :  { %v5980_v0 = vadd.f32 %v5979_v31, %v5950_v9  ;;  %6914 = vmatmul.bf16.gmra.mxu1 %v24112_v49  ;;  %v13634_v9 = vld [vmem:[%s22654_s5 + $0x404] sm:$0xf0]  ;;  %v12150_v41 = vor.u32 %v13650_v37, %v12149_v63  ;;  %v12141_v31 = vld [vmem:[%s22654_s5 + $0x470] sm:$0xf]  ;;  %v12143_v63 = vld [vmem:[%s22654_s5 + $0x478] sm:$0xf0] }
 0x4c2   :  { %6972 = vmatmul.bf16.gmra.mxu0 %v24112_v49  ;;  %v20125_v8 = vadd.f32 %v6038_v29, %v24114_v22  ;;  %v12086_v38 = vor.u32 %v13634_v9, %v12085_v14  ;;  %v13631_v29 = vld [vmem:[%s22654_s5 + $0x3f4] sm:$0xf] }
 0x4c3   :  { %v20122_v27 = vadd.f32 %v5980_v0, %v24113_v59  ;;  %7246 = vmatpush.bf16.msrb.mxu3 %v12150_v41  ;;  %7275 = vmatpush.bf16.msrb.mxu0 %v12090_v11  ;;  %v12142_v0 = vor.u32 %v13648_v1, %v12141_v31  ;;  %v13647_v59 = vld [vmem:[%s22654_s5 + $0x474] sm:$0xf]  ;;  %v12082_v9 = vor.u32 %v13631_v29, %v12079_v48  ;;  %v12069_v11 = vld [vmem:[%s22654_s5 + $0x3e0] sm:$0xf]  ;;  %v12135_v31 = vld [vmem:[%s22654_s5 + $0x468] sm:$0xf0] }
 0x4c4   :  { %7217 = vmatpush.bf16.msrb.mxu1 %v12086_v38  ;;  %7304 = vmatpush.bf16.msrb.mxu2 %v12154_v47  ;;  %v12146_v60 = vor.u32 %v13647_v59, %v12143_v63  ;;  %v12061_v1 = vld [vmem:[%s22654_s5 + $0x3d0] sm:$0xf]  ;;  %v13628_v29 = vld [vmem:[%s22654_s5 + $0x3d4] sm:$0xf0]  ;;  %v13627_v63 = vld [vmem:[%s22654_s5 + $0x3d4] sm:$0xf] }
 0x4c5   :  { %12014 = vmatmul.msk.bf16.gmra.mxu3 %vm3222_vm12, %v24115_v34  ;;  %v12125_v48 = vld [vmem:[%s22654_s5 + $0x450] sm:$0xf]  ;;  %v13644_v59 = vld [vmem:[%s22654_s5 + $0x454] sm:$0xf0] }
 0x4c6   :  { %v5955_v56 = vpop.f32.mrf.mxu1  ;;  %v6013_v25 = vpop.f32.mrf.mxu0 }
 0x4c7   :  { %12018 = vmatmul.msk.bf16.gmra.mxu2 %vm3222_vm12, %v24115_v34  ;;  %v6040_v14 = vpop.f32.mrf.mxu2  ;;  %7247 = vmatpush.bf16.msrb.mxu3 %v12142_v0  ;;  %v12138_v0 = vor.u32 %v13645_v33, %v12135_v31  ;;  %v12053_v33 = vld [vmem:[%s22654_s5 + $0x3c0] sm:$0xf]  ;;  %v13625_v31 = vld [vmem:[%s22654_s5 + $0x3c4] sm:$0xf] }
 0x4c8   :  { %v5982_v22 = vpop.f32.mrf.mxu3  ;;  %v6041_v37 = vadd.f32 %v6040_v14, %v6011_v6  ;;  %7218 = vmatpush.bf16.msrb.mxu1 %v12078_v58  ;;  %7276 = vmatpush.bf16.msrb.mxu0 %v12082_v9  ;;  %v13629_v6 = vld [vmem:[%s22654_s5 + $0x3e4] sm:$0xf]  ;;  %v12062_v14 = vor.u32 %v13628_v29, %v12061_v1  ;;  %v12126_v9 = vor.u32 %v13644_v59, %v12125_v48  ;;  %v12055_v1 = vld [vmem:[%s22654_s5 + $0x3c8] sm:$0xf0] }
 0x4c9   :  { %v5983_v38 = vadd.f32 %v5982_v22, %v20096_v46  ;;  %v12133_v46 = vld [vmem:[%s22654_s5 + $0x460] sm:$0xf]  ;;  %7305 = vmatpush.bf16.msrb.mxu2 %v12146_v60  ;;  %v12074_v47 = vor.u32 %v13629_v6, %v12071_v23  ;;  %v24116_v6 = vld [vmem:[#allocation23_spill] sm:$0xff]  ;;  %v12058_v48 = vor.u32 %v13625_v31, %v12055_v1  ;;  %v13641_v59 = vld [vmem:[%s22654_s5 + $0x444] sm:$0xf] }
 0x4ca   :  { %v20184_v41 = vadd.f32 %v6041_v37, %v19566_v24  ;;  %v13646_v24 = vld [vmem:[%s22654_s5 + $0x464] sm:$0xf0]  ;;  %v13643_v37 = vld [vmem:[%s22654_s5 + $0x454] sm:$0xf] }
 0x4cb   :  { %v20181_v44 = vadd.f32 %v5983_v38, %v19563_v7  ;;  %v12070_v7 = vor.u32 %v13630_v35, %v12069_v11  ;;  %v12134_v42 = vor.u32 %v13646_v24, %v12133_v46  ;;  %v12063_v38 = vld [vmem:[%s22654_s5 + $0x3d8] sm:$0xf0] }
 0x4cc   :  { %7277 = vmatpush.bf16.msrb.mxu0 %v12074_v47  ;;  %v12066_v35 = vor.u32 %v13627_v63, %v12063_v38  ;;  %v12127_v46 = vld [vmem:[%s22654_s5 + $0x458] sm:$0xf0] }
 0x4cd   :  { %7219 = vmatpush.bf16.msrb.mxu1 %v12070_v7  ;;  %7248 = vmatpush.bf16.msrb.mxu3 %v12134_v42  ;;  %v12130_v23 = vor.u32 %v13643_v37, %v12127_v46 }
 0x4ce   :  { %v5958_v58 = vpop.f32.mrf.mxu1  ;;  %7306 = vmatpush.bf16.msrb.mxu2 %v12138_v0  ;;  %v24117_v0 = vld [vmem:[#allocation74_spill] sm:$0xff] }
 0x4cf   :  { %v6016_v22 = vpop.f32.mrf.mxu0  ;;  %v6042_v11 = vpop.f32.mrf.mxu2 }
 0x4d0   :  { %v5984_v60 = vpop.f32.mrf.mxu3  ;;  %v6043_v24 = vadd.f32 %v6042_v11, %v6013_v25  ;;  %7278 = vmatpush.bf16.msrb.mxu0 %v12066_v35  ;;  %v12117_v25 = vld [vmem:[%s22654_s5 + $0x440] sm:$0xf] }
 0x4d1   :  { %v5985_v7 = vadd.f32 %v5984_v60, %v5955_v56  ;;  %6919 = vmatmul.bf16.gmra.mxu1 %v24116_v6  ;;  %7249 = vmatpush.bf16.msrb.mxu3 %v12126_v9  ;;  %v13626_v56 = vld [vmem:[%s22654_s5 + $0x3c4] sm:$0xf0] }
 0x4d2   :  { %6977 = vmatmul.bf16.gmra.mxu0 %v24116_v6  ;;  %7220 = vmatpush.bf16.msrb.mxu1 %v12062_v14  ;;  %v20240_v47 = vadd.f32 %v6043_v24, %v19666_v45  ;;  %v13642_v45 = vld [vmem:[%s22654_s5 + $0x444] sm:$0xf0]  ;;  %v12119_v14 = vld [vmem:[%s22654_s5 + $0x448] sm:$0xf0] }
 0x4d3   :  { %v20237_v42 = vadd.f32 %v5985_v7, %v19663_v57  ;;  %7307 = vmatpush.bf16.msrb.mxu2 %v12130_v23  ;;  %v12054_v57 = vor.u32 %v13626_v56, %v12053_v33  ;;  %v12118_v29 = vor.u32 %v13642_v45, %v12117_v25  ;;  %v12122_v63 = vor.u32 %v13641_v59, %v12119_v14 }
 0x4d4   :  { %7279 = vmatpush.bf16.msrb.mxu0 %v12058_v48 }
 0x4d5   :  { %12015 = vmatmul.msk.bf16.gmra.mxu3 %vm3222_vm12, %v24117_v0 }
 0x4d6   :  { %v5960_v9 = vpop.f32.mrf.mxu1  ;;  %7221 = vmatpush.bf16.msrb.mxu1 %v12054_v57  ;;  %7250 = vmatpush.bf16.msrb.mxu3 %v12118_v29 }
 0x4d7   :  { %12019 = vmatmul.msk.bf16.gmra.mxu2 %vm3222_vm12, %v24117_v0  ;;  %v6018_v38 = vpop.f32.mrf.mxu0 }
 0x4d8   :  { %v5987_v37 = vpop.f32.mrf.mxu3  ;;  %7308 = vmatpush.bf16.msrb.mxu2 %v12122_v63 }
 0x4d9   :  { %v5988_v11 = vadd.f32 %v5987_v37, %v5958_v58 }
 0x4da   :  { %v6045_v60 = vpop.f32.mrf.mxu2 }
 0x4db   :  { %v6046_v35 = vadd.f32 %v6045_v60, %v6016_v22  ;;  %v20271_v46 = vadd.f32 %v5988_v11, %v19727_v39 }
 0x4dd   :  { %v20274_v7 = vadd.f32 %v6046_v35, %v19730_v3 }
 0x4de   :  { %v5963_v24 = vpop.f32.mrf.mxu1 }
 0x4df   :  { %v6021_v23 = vpop.f32.mrf.mxu0 }
 0x4e0   :  { %v5989_v33 = vpop.f32.mrf.mxu3 }
 0x4e1   :  { %v5990_v25 = vadd.f32 %v5989_v33, %v5960_v9  ;;  %6924 = vmatmul.bf16.gmra.mxu1 %v19772_v43 }
 0x4e2   :  { %v6047_v56 = vpop.f32.mrf.mxu2  ;;  %6982 = vmatmul.bf16.gmra.mxu0 %v19772_v43 }
 0x4e3   :  { %v6048_v57 = vadd.f32 %v6047_v56, %v6018_v38  ;;  %v20279_v45 = vadd.f32 %v5990_v25, %v19758_v15 }
 0x4e5   :  { %24118 = vst [vmem:[#allocation84_spill] sm:$0xff] %v20279_v45  ;;  %v20282_v58 = vadd.f32 %v6048_v57, %v19761_v20  ;;  %12016 = vmatmul.msk.bf16.gmra.mxu3 %vm3222_vm12, %v19776_v4 }
 0x4e6   :  { %v5965_v39 = vpop.f32.mrf.mxu1 }
 0x4e7   :  { %24119 = vst [vmem:[#allocation41_spill] sm:$0xff] %v20282_v58  ;;  %12020 = vmatmul.msk.bf16.gmra.mxu2 %vm3222_vm12, %v19776_v4  ;;  %v6023_v3 = vpop.f32.mrf.mxu0 }
 0x4e8   :  { %v5992_v22 = vpop.f32.mrf.mxu3 }
 0x4e9   :  { %v5993_v1 = vadd.f32 %v5992_v22, %v5963_v24 }
 0x4ea   :  { %v6050_v31 = vpop.f32.mrf.mxu2 }
 0x4eb   :  { %v6051_v29 = vadd.f32 %v6050_v31, %v6021_v23  ;;  %v20289_v48 = vadd.f32 %v5993_v1, %v19779_v28 }
 0x4ed   :  { %v20292_v15 = vadd.f32 %v6051_v29, %v19782_v2 }
 0x4ee   :  { %v6261_v20 = vpop.f32.mrf.mxu1 }
 0x4ef   :  { %v6319_v59 = vpop.f32.mrf.mxu0 }
 0x4f0   :  { %v5994_v14 = vpop.f32.mrf.mxu3 }
 0x4f1   :  { %v5995_v63 = vadd.f32 %v5994_v14, %v5965_v39  ;;  %7222 = vmatmul.bf16.vlgmr.msrb.gmra.mxu1 %v24104_v26 }
 0x4f2   :  { %v6052_v9 = vpop.f32.mrf.mxu2  ;;  %7280 = vmatmul.bf16.vlgmr.msrb.gmra.mxu0 %v24104_v26 }
 0x4f3   :  { %v6053_v38 = vadd.f32 %v6052_v9, %v6023_v3  ;;  %v20297_v37 = vadd.f32 %v5995_v63, %v19787_v12 }
 0x4f5   :  { %24120 = vst [vmem:[#allocation145_spill] sm:$0xff] %v20297_v37  ;;  %v20300_v60 = vadd.f32 %v6053_v38, %v19790_v17  ;;  %12171 = vmatmul.msk.bf16.vlgmr.msrb.gmra.mxu3 %vm3222_vm12, %v24109_v21 }
 0x4f6   :  { %v20306_v28 = vpop.f32.mrf.mxu1 }
 0x4f7   :  { %24121 = vst [vmem:[#allocation62_spill] sm:$0xff] %v20300_v60  ;;  %12175 = vmatmul.msk.bf16.vlgmr.msrb.gmra.mxu2 %vm3222_vm12, %v24109_v21  ;;  %v20308_v2 = vpop.f32.mrf.mxu0 }
 0x4f8   :  { %v6290_v11 = vpop.f32.mrf.mxu3 }
 0x4f9   :  { %v6291_v24 = vadd.f32 %v6290_v11, %v6261_v20 }
 0x4fa   :  { %v6348_v35 = vpop.f32.mrf.mxu2 }
 0x4fb   :  { %v6349_v26 = vadd.f32 %v6348_v35, %v6319_v59  ;;  %v20311_v12 = vadd.f32 %v6291_v24, %v19809_v13 }
 0x4fd   :  { %v20314_v17 = vadd.f32 %v6349_v26, %v19812_v30 }
 0x4fe   :  { %v6266_v23 = vpop.f32.mrf.mxu1 }
 0x4ff   :  { %v6324_v33 = vpop.f32.mrf.mxu0 }
 0x500   :  { %v20316_v56 = vpop.f32.mrf.mxu3 }
 0x501   :  { %7227 = vmatmul.bf16.gmra.mxu1 %v24112_v49 }
 0x502   :  { %v20318_v25 = vpop.f32.mrf.mxu2  ;;  %7285 = vmatmul.bf16.gmra.mxu0 %v24112_v49 }
 0x505   :  { %12172 = vmatmul.msk.bf16.gmra.mxu3 %vm3222_vm12, %v24115_v34 }
 0x506   :  { %v20326_v13 = vpop.f32.mrf.mxu1 }
 0x507   :  { %12176 = vmatmul.msk.bf16.gmra.mxu2 %vm3222_vm12, %v24115_v34  ;;  %v20328_v30 = vpop.f32.mrf.mxu0 }
 0x508   :  { %v6295_v21 = vpop.f32.mrf.mxu3 }
 0x509   :  { %v6296_v39 = vadd.f32 %v6295_v21, %v6266_v23 }
 0x50a   :  { %v6353_v57 = vpop.f32.mrf.mxu2 }
 0x50b   :  { %v6354_v3 = vadd.f32 %v6353_v57, %v6324_v33  ;;  %v20331_v22 = vadd.f32 %v6296_v39, %v19926_v40 }
 0x50d   :  { %v20334_v31 = vadd.f32 %v6354_v3, %v19929_v53 }
 0x50e   :  { %v6271_v49 = vpop.f32.mrf.mxu1 }
 0x50f   :  { %v6329_v1 = vpop.f32.mrf.mxu0 }
 0x510   :  { %v20336_v29 = vpop.f32.mrf.mxu3 }
 0x511   :  { %7232 = vmatmul.bf16.gmra.mxu1 %v24116_v6 }
 0x512   :  { %v20338_v20 = vpop.f32.mrf.mxu2  ;;  %7290 = vmatmul.bf16.gmra.mxu0 %v24116_v6 }
 0x515   :  { %12173 = vmatmul.msk.bf16.gmra.mxu3 %vm3222_vm12, %v24117_v0 }
 0x516   :  { %v20346_v40 = vpop.f32.mrf.mxu1 }
 0x517   :  { %12177 = vmatmul.msk.bf16.gmra.mxu2 %vm3222_vm12, %v24117_v0  ;;  %v20348_v53 = vpop.f32.mrf.mxu0 }
 0x518   :  { %v6300_v34 = vpop.f32.mrf.mxu3 }
 0x519   :  { %v6301_v14 = vadd.f32 %v6300_v34, %v6271_v49 }
 0x51a   :  { %v6358_v59 = vpop.f32.mrf.mxu2 }
 0x51b   :  { %v6359_v9 = vadd.f32 %v6358_v59, %v6329_v1  ;;  %v20351_v63 = vadd.f32 %v6301_v14, %v20016_v16 }
 0x51d   :  { %v20354_v38 = vadd.f32 %v6359_v9, %v20019_v5 }
 0x51e   :  { %v6276_v6 = vpop.f32.mrf.mxu1 }
 0x51f   :  { %v6334_v11 = vpop.f32.mrf.mxu0 }
 0x520   :  { %v20356_v35 = vpop.f32.mrf.mxu3 }
 0x521   :  { %7237 = vmatmul.bf16.gmra.mxu1 %v19772_v43 }
 0x522   :  { %v20358_v24 = vpop.f32.mrf.mxu2  ;;  %7295 = vmatmul.bf16.gmra.mxu0 %v19772_v43 }
 0x525   :  { %12174 = vmatmul.msk.bf16.gmra.mxu3 %vm3222_vm12, %v19776_v4 }
 0x526   :  { %v20366_v16 = vpop.f32.mrf.mxu1 }
 0x527   :  { %12178 = vmatmul.msk.bf16.gmra.mxu2 %vm3222_vm12, %v19776_v4  ;;  %24122 = vst [vmem:[#allocation44_spill] sm:$0xff] %v20366_v16  ;;  %v20368_v5 = vpop.f32.mrf.mxu0 }
 0x528   :  { %24123 = vst [vmem:[#allocation59_spill] sm:$0xff] %v20368_v5  ;;  %v6305_v0 = vpop.f32.mrf.mxu3 }
 0x529   :  { %v6306_v23 = vadd.f32 %v6305_v0, %v6276_v6 }
 0x52a   :  { %v6363_v26 = vpop.f32.mrf.mxu2 }
 0x52b   :  { %v6364_v33 = vadd.f32 %v6363_v26, %v6334_v11  ;;  %v20371_v21 = vadd.f32 %v6306_v23, %v20034_v51 }
 0x52d   :  { %24124 = vst [vmem:[#allocation158_spill] sm:$0xff] %v20371_v21  ;;  %v20374_v57 = vadd.f32 %v6364_v33, %v20037_v19 }
 0x52e   :  { %v6910_v43 = vpop.f32.mrf.mxu1 }
 0x52f   :  { %24125 = vst [vmem:[#allocation32_spill] sm:$0xff] %v20374_v57  ;;  %v6968_v39 = vpop.f32.mrf.mxu0 }
 0x530   :  { %v20376_v3 = vpop.f32.mrf.mxu3 }
 0x531   :  { %24126 = vst [vmem:[#allocation146_spill] sm:$0xff] %v20376_v3 }
 0x532   :  { %v20378_v49 = vpop.f32.mrf.mxu2 }
 0x533   :  { %24127 = vst [vmem:[#allocation118_spill] sm:$0xff] %v20378_v49 }
 0x536   :  { %v6912_v4 = vpop.f32.mrf.mxu1 }
 0x537   :  { %v6970_v1 = vpop.f32.mrf.mxu0 }
 0x538   :  { %v6939_v34 = vpop.f32.mrf.mxu3 }
 0x539   :  { %v6940_v14 = vadd.f32 %v6939_v34, %v6910_v43 }
 0x53a   :  { %v6997_v59 = vpop.f32.mrf.mxu2 }
 0x53b   :  { %v6998_v9 = vadd.f32 %v6997_v59, %v6968_v39  ;;  %v7017_v6 = vadd.f32 %v6940_v14, %v20064_v62 }
 0x53d   :  { %v7018_v51 = vadd.f32 %v6998_v9, %v20067_v55 }
 0x53e   :  { %v6915_v11 = vpop.f32.mrf.mxu1 }
 0x53f   :  { %v6973_v0 = vpop.f32.mrf.mxu0 }
 0x540   :  { %v6941_v19 = vpop.f32.mrf.mxu3 }
 0x542   :  { %v6999_v26 = vpop.f32.mrf.mxu2 }
 0x546   :  { %v20382_v23 = vpop.f32.mrf.mxu1 }
 0x547   :  { %v20384_v33 = vpop.f32.mrf.mxu0 }
 0x548   :  { %v6944_v57 = vpop.f32.mrf.mxu3 }
 0x549   :  { %v6945_v60 = vadd.f32 %v6944_v57, %v6915_v11 }
 0x54a   :  { %v7002_v21 = vpop.f32.mrf.mxu2 }
 0x54b   :  { %v7003_v37 = vadd.f32 %v7002_v21, %v6973_v0  ;;  %v20387_v50 = vadd.f32 %v6945_v60, %v20181_v44 }
 0x54d   :  { %v20390_v43 = vadd.f32 %v7003_v37, %v20184_v41 }
 0x54e   :  { %v6920_v62 = vpop.f32.mrf.mxu1 }
 0x54f   :  { %v6978_v55 = vpop.f32.mrf.mxu0 }
 0x550   :  { %v20392_v39 = vpop.f32.mrf.mxu3 }
 0x552   :  { %v20394_v34 = vpop.f32.mrf.mxu2 }
 0x556   :  { %v20396_v49 = vpop.f32.mrf.mxu1 }
 0x557   :  { %v20398_v57 = vpop.f32.mrf.mxu0 }
 0x558   :  { %v6949_v59 = vpop.f32.mrf.mxu3 }
 0x559   :  { %v6950_v9 = vadd.f32 %v6949_v59, %v6920_v62 }
 0x55a   :  { %v7007_v14 = vpop.f32.mrf.mxu2 }
 0x55b   :  { %v7008_v52 = vadd.f32 %v7007_v14, %v6978_v55  ;;  %v20401_v44 = vadd.f32 %v6950_v9, %v20271_v46 }
 0x55d   :  { %v20404_v41 = vadd.f32 %v7008_v52, %v20274_v7 }
 0x55e   :  { %v6925_v21 = vpop.f32.mrf.mxu1 }
 0x55f   :  { %v6983_v11 = vpop.f32.mrf.mxu0 }
 0x560   :  { %v20406_v37 = vpop.f32.mrf.mxu3 }
 0x562   :  { %v20408_v60 = vpop.f32.mrf.mxu2 }
 0x566   :  { %v20416_v46 = vpop.f32.mrf.mxu1 }
 0x567   :  { %v20418_v52 = vpop.f32.mrf.mxu0 }
 0x568   :  { %v6954_v0 = vpop.f32.mrf.mxu3  ;;  %24130 = vst [vmem:[#allocation61_spill] sm:$0xff] %v20418_v52 }
 0x569   :  { %v6955_v62 = vadd.f32 %v6954_v0, %v6925_v21 }
 0x56a   :  { %v7012_v5 = vpop.f32.mrf.mxu2 }
 0x56b   :  { %v7013_v55 = vadd.f32 %v7012_v5, %v6983_v11  ;;  %v20411_v59 = vadd.f32 %v6955_v62, %v20289_v48  ;;  %v7602_v48 = vld [vmem:[%s22655_s6] sm:$0x3] }
 0x56c   :  { %v7605_v0 = vperm.slane %v7602_v48, 1 }
 0x56d   :  { %24128 = vst [vmem:[#allocation77_spill] sm:$0xff] %v20411_v59  ;;  %v20414_v14 = vadd.f32 %v7013_v55, %v20292_v15  ;;  %v6351_v59 = vadd.f32 %v20318_v25, %v20308_v2 }
 0x56e   :  { %v7223_v3 = vpop.f32.mrf.mxu1 }
 0x56f   :  { %24129 = vst [vmem:[#allocation161_spill] sm:$0xff] %v20414_v14  ;;  %v7281_v16 = vpop.f32.mrf.mxu0  ;;  %v6293_v14 = vadd.f32 %v20316_v56, %v20306_v28  ;;  %v6371_v2 = vadd.f32 %v6351_v59, %v19870_v61 }
 0x570   :  { %v20420_v7 = vpop.f32.mrf.mxu3 }
 0x571   :  { %24131 = vst [vmem:[#allocation79_spill] sm:$0xff] %v20420_v7  ;;  %v6370_v28 = vadd.f32 %v6293_v14, %v19867_v54 }
 0x572   :  { %v20422_v9 = vpop.f32.mrf.mxu2 }
 0x573   :  { %24132 = vst [vmem:[#allocation81_spill] sm:$0xff] %v20422_v9 }
 0x576   :  { %v7225_v56 = vpop.f32.mrf.mxu1 }
 0x578   :  { %v7252_v58 = vpop.f32.mrf.mxu3 }
 0x579   :  { %v7253_v21 = vadd.f32 %v7252_v58, %v7223_v3  ;;  %v6942_v58 = vadd.f32 %v6941_v19, %v6912_v4  ;;  %v7606_v3 = vrot.slane %v7605_v0, 6 }
 0x57a   :  { %v7310_v45 = vpop.f32.mrf.mxu2 }
 0x57b   :  { %v7311_v5 = vadd.f32 %v7310_v45, %v7281_v16  ;;  %v7330_v15 = vadd.f32 %v7253_v21, %v20311_v12  ;;  %v7000_v45 = vadd.f32 %v6999_v26, %v6970_v1  ;;  %v7604_v16 = vperm.slane %v7602_v48, 0  ;;  %v7283_v21 = vpop.f32.mrf.mxu0 }
 0x57c   :  { %v7019_v19 = vadd.f32 %v6942_v58, %v20122_v27 }
 0x57d   :  { %v7331_v11 = vadd.f32 %v7311_v5, %v20314_v17  ;;  %v7346_v62 = vmax.f32 %v7017_v6, %v7330_v15  ;;  %v7020_v26 = vadd.f32 %v7000_v45, %v20125_v8  ;;  %v7608_v48 = vsel %vm1113_vm3, %v7604_v16, %v7606_v3 }
 0x57e   :  { %v20443_v54 = vsel %vm1111_vm2, %v7604_v16, %v7606_v3  ;;  %v7610_v58 = vsel %vm1116_vm4, %v7604_v16, %v7606_v3 }
 0x57f   :  { %v7347_v55 = vmax.f32 %v7018_v51, %v7331_v11  ;;  %v20448_v8 = vrot.slane %v20443_v54, 1 }
 0x580   :  { %v7254_v52 = vpop.f32.mrf.mxu3 }
 0x581   :  { %v7378_v9 = vrot.slane %v7347_v55, 6  ;;  %v7255_v4 = vadd.f32 %v7254_v52, %v7225_v56  ;;  %v20445_v52 = vrot.slane %v7608_v48, 2 }
 0x582   :  { %v7312_v7 = vpop.f32.mrf.mxu2 }
 0x583   :  { %v7386_v12 = vsel %vm1111_vm2, %v7346_v62, %v7378_v9  ;;  %v7387_v17 = vsel %vm1113_vm3, %v7346_v62, %v7378_v9  ;;  %v7389_v6 = vsel %vm1116_vm4, %v7346_v62, %v7378_v9  ;;  %v7391_v51 = vsel %vm320_vm0, %v7378_v9, %v7346_v62 }
 0x584   :  { %v7388_v25 = vrot.slane %v7387_v17, 2  ;;  %v7313_v1 = vadd.f32 %v7312_v7, %v7283_v21  ;;  %v7390_v5 = vrot.slane %v7389_v6, 4  ;;  %v7392_v15 = vrot.slane %v7391_v51, 6 }
 0x585   :  { %v12179_v11 = vrot.slane %v7386_v12, 9  ;;  %v7332_v0 = vadd.f32 %v7255_v4, %v6370_v28  ;;  %v20455_v21 = vrot.slane %v20445_v52, 1 }
 0x586   :  { %v7333_v9 = vadd.f32 %v7313_v1, %v6371_v2  ;;  %v12180_v62 = vrot.slane %v7388_v25, 9  ;;  %v12181_v59 = vrot.slane %v7390_v5, 9  ;;  %v12182_v7 = vrot.slane %v7392_v15, 9 }
 0x587   :  { %v7348_v14 = vmax.f32 %v7019_v19, %v7332_v0  ;;  %v7570_v27 = vmax.f32 %v7386_v12, %v12179_v11  ;;  %24133 = vst [vmem:[#allocation64_spill] sm:$0xff] %v20455_v21  ;;  %v20460_v1 = vrot.slane %v7610_v58, 4  ;;  %v7228_v19 = vpop.f32.mrf.mxu1 }
 0x588   :  { %v7349_v61 = vmax.f32 %v7020_v26, %v7333_v9  ;;  %v7571_v45 = vmax.f32 %v7388_v25, %v12180_v62  ;;  %v7257_v28 = vpop.f32.mrf.mxu3  ;;  %v7572_v56 = vmax.f32 %v7390_v5, %v12181_v59  ;;  %v7573_v12 = vmax.f32 %v7392_v15, %v12182_v7  ;;  %v7286_v26 = vpop.f32.mrf.mxu0 }
 0x589   :  { %v20458_v4 = vadd.f32 %v20443_v54, %v7570_v27  ;;  %v7612_v25 = vsel %vm320_vm0, %v7606_v3, %v7604_v16  ;;  %v7258_v48 = vadd.f32 %v7257_v28, %v7228_v19  ;;  %v20476_v16 = vrot.slane %v20460_v1, 1 }
 0x58a   :  { %v7379_v55 = vrot.slane %v7349_v61, 6  ;;  %v7315_v2 = vpop.f32.mrf.mxu2  ;;  %v20464_v11 = vadd.f32 %v20448_v8, %v7571_v45  ;;  %v20467_v5 = vadd.f32 %v20445_v52, %v7572_v56  ;;  %v20469_v62 = vrot.slane %v7612_v25, 6 }
 0x58b   :  { %24134 = vst [vmem:[#allocation85_spill] sm:$0xff] %v20458_v4  ;;  %v7316_v0 = vadd.f32 %v7315_v2, %v7286_v26  ;;  %v20472_v15 = vadd.f32 %v20455_v21, %v7573_v12  ;;  %v23038_v61 = vmax.f32 %v20458_v4, 0.0  ;;  %v7334_v58 = vadd.f32 %v7258_v48, %v20331_v22 }
 0x58c   :  { %v7393_v17 = vsel %vm1111_vm2, %v7348_v14, %v7379_v55  ;;  %v7394_v6 = vsel %vm1113_vm3, %v7348_v14, %v7379_v55  ;;  %v7396_v51 = vsel %vm1116_vm4, %v7348_v14, %v7379_v55  ;;  %24135 = vst [vmem:[#allocation66_spill] sm:$0xff] %v20464_v11  ;;  %v7398_v3 = vsel %vm320_vm0, %v7379_v55, %v7348_v14 }
 0x58d   :  { %24136 = vst [vmem:[#allocation144_spill] sm:$0xff] %v20467_v5  ;;  %v7395_v9 = vrot.slane %v7394_v6, 2  ;;  %v7397_v59 = vrot.slane %v7396_v51, 4  ;;  %v12183_v7 = vrot.slane %v7393_v17, 9  ;;  %v23037_v45 = vmax.f32 %v20464_v11, 0.0 }
 0x58e   :  { %24137 = vst [vmem:[#allocation35_spill] sm:$0xff] %v20472_v15  ;;  %v7399_v6 = vrot.slane %v7398_v3, 6  ;;  %v7335_v56 = vadd.f32 %v7316_v0, %v20334_v31  ;;  %v23036_v2 = vmax.f32 %v20467_v5, 0.0  ;;  %v7350_v51 = vmax.f32 %v20387_v50, %v7334_v58 }
 0x58f   :  { %v12184_v27 = vrot.slane %v7395_v9, 9  ;;  %v12185_v28 = vrot.slane %v7397_v59, 9  ;;  %v7574_v12 = vmax.f32 %v7393_v17, %v12183_v7  ;;  %v20485_v14 = vrot.slane %v20469_v62, 1 }
 0x590   :  { %v12186_v19 = vrot.slane %v7399_v6, 9  ;;  %v7351_v55 = vmax.f32 %v20390_v43, %v7335_v56  ;;  %v6298_v22 = vadd.f32 %v20336_v29, %v20326_v13  ;;  %v23040_v48 = vmax.f32 %v20472_v15, 0.0 }
 0x591   :  { %v7575_v25 = vmax.f32 %v7395_v9, %v12184_v27  ;;  %v7576_v26 = vmax.f32 %v7397_v59, %v12185_v28  ;;  %24138 = vst [vmem:[#allocation159_spill] sm:$0xff] %v20485_v14  ;;  %v20492_v31 = vadd.f32 %v20460_v1, %v7574_v12  ;;  %v7699_v50 = vperm.slane %v23038_v61, 2 }
 0x592   :  { %v7577_v0 = vmax.f32 %v7399_v6, %v12186_v19  ;;  %v7380_v59 = vrot.slane %v7351_v55, 6  ;;  %v7805_v43 = vperm.slane %v23037_v45, 2  ;;  %v8778_v13 = vperm.slane %v23036_v2, 2 }
 0x593   :  { %v20495_v17 = vadd.f32 %v20476_v16, %v7575_v25  ;;  %v20500_v9 = vadd.f32 %v20469_v62, %v7576_v26  ;;  %v23039_v29 = vmax.f32 %v20492_v31, 0.0  ;;  %v6356_v28 = vadd.f32 %v20338_v20, %v20328_v30 }
 0x594   :  { %v20509_v7 = vadd.f32 %v20485_v14, %v7577_v0  ;;  %v7400_v58 = vsel %vm1111_vm2, %v7350_v51, %v7380_v59  ;;  %v7401_v6 = vsel %vm1113_vm3, %v7350_v51, %v7380_v59  ;;  %v7731_v25 = vpack.c.bf16 %v7699_v50, %v7699_v50 }
 0x595   :  { %v23041_v3 = vmax.f32 %v20495_v17, 0.0  ;;  %v23045_v27 = vmax.f32 %v20500_v9, 0.0  ;;  %v7701_v56 = vperm.slane %v23039_v29, 2  ;;  %v9321_v19 = vperm.slane %v23040_v48, 2 }
 0x596   :  { %24139 = vst [vmem:[#allocation70_spill] sm:$0xff] %v20509_v7  ;;  %v23047_v26 = vmax.f32 %v20509_v7, 0.0  ;;  %v7837_v0 = vpack.c.bf16 %v7805_v43, %v7805_v43  ;;  %v6374_v30 = vadd.f32 %v6298_v22, %v19982_v18  ;;  %v8810_v20 = vpack.c.bf16 %v8778_v13, %v8778_v13 }
 0x597   :  { %v7807_v12 = vperm.slane %v23041_v3, 2  ;;  %v8780_v55 = vperm.slane %v23045_v27, 2  ;;  %v7733_v2 = vpack.c.bf16 %v7701_v56, %v7701_v56  ;;  %v6375_v50 = vadd.f32 %v6356_v28, %v19985_v36  ;;  %v7259_v36 = vpop.f32.mrf.mxu3 }
 0x598   :  { %v9323_v29 = vperm.slane %v23047_v26, 2  ;;  %v6947_v48 = vadd.f32 %v20392_v39, %v20382_v23  ;;  %v8354_v5 = vunpack.c.l.b16 %v7731_v25  ;;  %v9353_v11 = vpack.c.bf16 %v9321_v19, %v9321_v19  ;;  %v7288_v25 = vpop.f32.mrf.mxu0 }
 0x599   :  { %v7839_v45 = vpack.c.bf16 %v7807_v12, %v7807_v12  ;;  %v8812_v61 = vpack.c.bf16 %v8780_v55, %v8780_v55  ;;  %v8356_v15 = vunpack.c.l.b16 %v7733_v2  ;;  %v7920_v56 = vunpack.c.l.b16 %v7837_v0 }
 0x59a   :  { %v9355_v43 = vpack.c.bf16 %v9323_v29, %v9323_v29  ;;  %v7402_v18 = vrot.slane %v7401_v6, 2  ;;  %v7005_v22 = vadd.f32 %v20394_v34, %v20384_v33  ;;  %v8893_v13 = vunpack.c.l.b16 %v8810_v20  ;;  %v7230_v29 = vpop.f32.mrf.mxu1 }
 0x59b   :  { %v7922_v3 = vunpack.c.l.b16 %v7839_v45  ;;  %v8895_v27 = vunpack.c.l.b16 %v8812_v61  ;;  %v8383_v4 = vrot.slane %v8356_v15, 7  ;;  %v7403_v39 = vsel %vm1116_vm4, %v7350_v51, %v7380_v59  ;;  %v7317_v45 = vpop.f32.mrf.mxu2 }
 0x59c   :  { %v9438_v26 = vunpack.c.l.b16 %v9355_v43  ;;  %v7405_v61 = vsel %vm320_vm0, %v7380_v59, %v7350_v51  ;;  %v9436_v15 = vunpack.c.l.b16 %v9353_v11  ;;  %v7404_v34 = vrot.slane %v7403_v39, 4 }
 0x59d   :  { %v7949_v12 = vrot.slane %v7922_v3, 7  ;;  %v8922_v55 = vrot.slane %v8895_v27, 7  ;;  %v20537_v23 = vsel %vm2830_vm5, %v8383_v4, %v8354_v5  ;;  %v7406_v3 = vrot.slane %v7405_v61, 6 }
 0x59e   :  { %v9465_v33 = vrot.slane %v9438_v26, 7  ;;  %v12187_v27 = vrot.slane %v7400_v58, 9  ;;  %v12188_v6 = vrot.slane %v7402_v18, 9  ;;  %v7260_v19 = vadd.f32 %v7259_v36, %v7230_v29 }
 0x59f   :  { %v20534_v28 = vsel %vm2830_vm5, %v7949_v12, %v7920_v56  ;;  %v20542_v2 = vsel %vm2830_vm5, %v8922_v55, %v8893_v13  ;;  %v7023_v4 = vadd.f32 %v6947_v48, %v20237_v42  ;;  %v12189_v0 = vrot.slane %v7404_v34, 9 }
 0x5a0   :  { %v9466_v5 = vsel %vm2830_vm5, %v9465_v33, %v9436_v15  ;;  %v7318_v20 = vadd.f32 %v7317_v45, %v7288_v25  ;;  %v12190_v51 = vrot.slane %v7406_v3, 9  ;;  %v7578_v59 = vmax.f32 %v7400_v58, %v12187_v27  ;;  %v13731_v58 = vld [vmem:[%s22656_s7 + $0x274] sm:$0xf] }
 0x5a1   :  { %v7579_v11 = vmax.f32 %v7402_v18, %v12188_v6  ;;  %v7336_v43 = vadd.f32 %v7260_v19, %v6374_v30  ;;  %v7024_v56 = vadd.f32 %v7005_v22, %v20240_v47  ;;  %v7580_v26 = vmax.f32 %v7404_v34, %v12189_v0  ;;  %v12377_v47 = vld [vmem:[%s22656_s7 + $0x280] sm:$0xf0] }
 0x5a2   :  { %v7337_v12 = vadd.f32 %v7318_v20, %v6375_v50  ;;  %v7581_v13 = vmax.f32 %v7406_v3, %v12190_v51  ;;  %v20548_v55 = vadd.f32 %v20443_v54, %v7578_v59  ;;  %v12380_v22 = vor.u32 %v13731_v58, %v12377_v47 }
 0x5a3   :  { %v20551_v36 = vadd.f32 %v20448_v8, %v7579_v11  ;;  %v7352_v42 = vmax.f32 %v7023_v4, %v7336_v43  ;;  %v20554_v48 = vadd.f32 %v20445_v52, %v7580_v26  ;;  %v7262_v4 = vpop.f32.mrf.mxu3  ;;  %v7320_v20 = vpop.f32.mrf.mxu2 }
 0x5a4   :  { %v7353_v39 = vmax.f32 %v7024_v56, %v7337_v12  ;;  %v20563_v30 = vadd.f32 %v20455_v21, %v7581_v13  ;;  %v7666_v50 = vmax.f32 %v20548_v55, 0.0  ;;  %8259 = vmatpush.bf16.msra.mxu0 %v12380_v22  ;;  %v7233_v43 = vpop.f32.mrf.mxu1  ;;  %v7291_v26 = vpop.f32.mrf.mxu0 }
 0x5a5   :  { %v7667_v18 = vmax.f32 %v20551_v36, 0.0  ;;  %v7668_v61 = vmax.f32 %v20554_v48, 0.0  ;;  %v7263_v12 = vadd.f32 %v7262_v4, %v7233_v43  ;;  %v7321_v47 = vadd.f32 %v7320_v20, %v7291_v26 }
 0x5a6   :  { %24140 = vst [vmem:[#allocation63_spill] sm:$0xff] %v20563_v30  ;;  %v7381_v45 = vrot.slane %v7353_v39, 6  ;;  %v23049_v15 = vmax.f32 %v20563_v30, 0.0  ;;  %v7703_v33 = vperm.slane %v7666_v50, 2 }
 0x5a7   :  { %v7809_v34 = vperm.slane %v7667_v18, 2  ;;  %v8782_v29 = vperm.slane %v7668_v61, 2 }
 0x5a8   :  { %v7407_v3 = vsel %vm1111_vm2, %v7352_v42, %v7381_v45  ;;  %v7735_v27 = vpack.c.bf16 %v7703_v33, %v7703_v33  ;;  %v9325_v19 = vperm.slane %v23049_v15, 2  ;;  %v7408_v33 = vsel %vm1113_vm3, %v7352_v42, %v7381_v45 }
 0x5a9   :  { %v7841_v6 = vpack.c.bf16 %v7809_v34, %v7809_v34  ;;  %v8814_v25 = vpack.c.bf16 %v8782_v29, %v8782_v29  ;;  %v7410_v34 = vsel %vm1116_vm4, %v7352_v42, %v7381_v45  ;;  %v7412_v4 = vsel %vm320_vm0, %v7381_v45, %v7352_v42  ;;  %v13727_v42 = vld [vmem:[%s22656_s7 + $0x254] sm:$0xf] }
 0x5aa   :  { %v8358_v0 = vunpack.c.l.b16 %v7735_v27  ;;  %v9357_v11 = vpack.c.bf16 %v9325_v19, %v9325_v19  ;;  %v7411_v19 = vrot.slane %v7410_v34, 4 }
 0x5ab   :  { %v7924_v51 = vunpack.c.l.b16 %v7841_v6  ;;  %v8897_v59 = vunpack.c.l.b16 %v8814_v25  ;;  %v7409_v25 = vrot.slane %v7408_v33, 2 }
 0x5ac   :  { %v8385_v56 = vrot.slane %v8358_v0, 6  ;;  %v9440_v58 = vunpack.c.l.b16 %v9357_v11  ;;  %v12191_v0 = vrot.slane %v7407_v3, 9  ;;  %v12193_v11 = vrot.slane %v7411_v19, 9  ;;  %v7293_v15 = vpop.f32.mrf.mxu0 }
 0x5ad   :  { %v7951_v13 = vrot.slane %v7924_v51, 6  ;;  %v8924_v39 = vrot.slane %v8897_v59, 6  ;;  %v7413_v51 = vrot.slane %v7412_v4, 6  ;;  %v12192_v59 = vrot.slane %v7409_v25, 9 }
 0x5ae   :  { %v20580_v22 = vsel %vm2833_vm6, %v8385_v56, %v20537_v23  ;;  %v9467_v6 = vrot.slane %v9440_v58, 6  ;;  %v7338_v23 = vadd.f32 %v7263_v12, %v20351_v63  ;;  %v7582_v43 = vmax.f32 %v7407_v3, %v12191_v0  ;;  %v12361_v63 = vld [vmem:[%s22656_s7 + $0x260] sm:$0xf0] }
 0x5af   :  { %v20586_v29 = vsel %vm2833_vm6, %v7951_v13, %v20534_v28  ;;  %v20590_v27 = vsel %vm2833_vm6, %v8924_v39, %v20542_v2  ;;  %v7339_v28 = vadd.f32 %v7321_v47, %v20354_v38  ;;  %v12194_v56 = vrot.slane %v7413_v51, 9 }
 0x5b0   :  { %v20595_v20 = vsel %vm2833_vm6, %v9467_v6, %v9466_v5  ;;  %v7354_v2 = vmax.f32 %v20401_v44, %v7338_v23  ;;  %v7583_v26 = vmax.f32 %v7409_v25, %v12192_v59  ;;  %v7584_v5 = vmax.f32 %v7411_v19, %v12193_v11  ;;  %v13723_v44 = vld [vmem:[%s22656_s7 + $0x234] sm:$0xf] }
 0x5b1   :  { %v7355_v13 = vmax.f32 %v20404_v41, %v7339_v28  ;;  %v20607_v45 = vadd.f32 %v20460_v1, %v7582_v43  ;;  %v12364_v38 = vor.u32 %v13727_v42, %v12361_v63  ;;  %v12345_v41 = vld [vmem:[%s22656_s7 + $0x240] sm:$0xf0]  ;;  %v7585_v3 = vmax.f32 %v7413_v51, %v12194_v56  ;;  %v7264_v63 = vpop.f32.mrf.mxu3 }
 0x5b2   :  { %v20616_v12 = vadd.f32 %v20476_v16, %v7583_v26  ;;  %v20619_v58 = vadd.f32 %v20469_v62, %v7584_v5  ;;  %v12348_v33 = vor.u32 %v13723_v44, %v12345_v41  ;;  %v6303_v26 = vadd.f32 %v20356_v35, %v20346_v40  ;;  %v7322_v5 = vpop.f32.mrf.mxu2 }
 0x5b3   :  { %v7382_v39 = vrot.slane %v7355_v13, 6  ;;  %v7670_v47 = vmax.f32 %v20607_v45, 0.0  ;;  %8260 = vmatpush.bf16.msra.mxu0 %v12364_v38  ;;  %v20623_v34 = vadd.f32 %v20485_v14, %v7585_v3  ;;  %v6361_v38 = vadd.f32 %v20358_v24, %v20348_v53 }
 0x5b4   :  { %v7671_v6 = vmax.f32 %v20616_v12, 0.0  ;;  %v23050_v4 = vmax.f32 %v20619_v58, 0.0  ;;  %v6952_v3 = vadd.f32 %v20406_v37, %v20396_v49  ;;  %v24167_v45 = vmax.f32 %v20619_v58, 0.0  ;;  %v12343_v58 = vld [vmem:[%s22656_s7 + $0x230] sm:$0xf] }
 0x5b5   :  { %24141 = vst [vmem:[#allocation103_spill] sm:$0xff] %v20623_v34  ;;  %v20627_v25 = vsel %vm1111_vm2, %v7354_v2, %v7382_v39  ;;  %v20630_v19 = vsel %vm1113_vm3, %v7354_v2, %v7382_v39  ;;  %v7705_v0 = vperm.slane %v7670_v47, 2  ;;  %v23048_v23 = vmax.f32 %v20623_v34, 0.0 }
 0x5b6   :  { %v7811_v51 = vperm.slane %v7671_v6, 2  ;;  %v20639_v59 = vsel %vm1116_vm4, %v7354_v2, %v7382_v39  ;;  %v8784_v11 = vperm.slane %v23050_v4, 2  ;;  %v6378_v4 = vadd.f32 %v6303_v26, %v20024_v10 }
 0x5b7   :  { %v7737_v28 = vpack.c.bf16 %v7705_v0, %v7705_v0  ;;  %8261 = vmatpush.bf16.msra.mxu0 %v12348_v33  ;;  %v9327_v56 = vperm.slane %v23048_v23, 2  ;;  %v7010_v33 = vadd.f32 %v20408_v60, %v20398_v57  ;;  %v7235_v23 = vpop.f32.mrf.mxu1  ;;  %v6379_v49 = vadd.f32 %v6361_v38, %v20027_v32 }
 0x5b8   :  { %v7843_v43 = vpack.c.bf16 %v7811_v51, %v7811_v51  ;;  %v8816_v42 = vpack.c.bf16 %v8784_v11, %v8784_v11  ;;  %v7323_v11 = vadd.f32 %v7322_v5, %v7293_v15  ;;  %v20664_v60 = vsel %vm320_vm0, %v7382_v39, %v7354_v2  ;;  %v24145_v15 = vld [vmem:[#allocation41_spill] sm:$0xff]  ;;  %v13733_v2 = vld [vmem:[%s22656_s7 + $0x27c] sm:$0xf0] }
 0x5b9   :  { %v8360_v13 = vunpack.c.l.b16 %v7737_v28  ;;  %v9359_v41 = vpack.c.bf16 %v9327_v56, %v9327_v56  ;;  %v7265_v28 = vadd.f32 %v7264_v63, %v7235_v23  ;;  %24142 = vst [vmem:[#allocation12_spill] sm:$0xff] %v20664_v60  ;;  %v24147_v39 = vmax.f32 %v20495_v17, 0.0  ;;  %v12383_v17 = vld [vmem:[%s22656_s7 + $0x278] sm:$0xf] }
 0x5ba   :  { %v7926_v44 = vunpack.c.l.b16 %v7843_v43  ;;  %v8899_v51 = vunpack.c.l.b16 %v8816_v42  ;;  %v24143_v43 = vld [vmem:[#allocation84_spill] sm:$0xff]  ;;  %v7341_v26 = vadd.f32 %v7323_v11, %v6379_v49 }
 0x5bb   :  { %v8387_v0 = vrot.slane %v8360_v13, 5  ;;  %v9442_v35 = vunpack.c.l.b16 %v9359_v41  ;;  %v7027_v23 = vadd.f32 %v6952_v3, %v24143_v43  ;;  %v7340_v32 = vadd.f32 %v7265_v28, %v6378_v4  ;;  %v12329_v4 = vld [vmem:[%s22656_s7 + $0x220] sm:$0xf0]  ;;  %v24148_v41 = vld [vmem:[#allocation44_spill] sm:$0xff] }
 0x5bc   :  { %v7953_v40 = vrot.slane %v7926_v44, 5  ;;  %v8926_v24 = vrot.slane %v8899_v51, 5  ;;  %v7416_v13 = vrot.slane %v20630_v19, 2  ;;  %v13734_v19 = vld [vmem:[%s22656_s7 + $0x284] sm:$0xf0]  ;;  %v24149_v3 = vld [vmem:[#allocation146_spill] sm:$0xff] }
 0x5bd   :  { %v20656_v53 = vsel %vm2836_vm7, %v8387_v0, %v20580_v22  ;;  %v9469_v37 = vrot.slane %v9442_v35, 5  ;;  %v7028_v22 = vadd.f32 %v7010_v33, %v24145_v15  ;;  %v20691_v63 = vmax.f32 %v7027_v23, %v7340_v32  ;;  %v12359_v44 = vld [vmem:[%s22656_s7 + $0x250] sm:$0xf]  ;;  %v24150_v0 = vld [vmem:[#allocation59_spill] sm:$0xff]  ;;  %v24151_v51 = vld [vmem:[#allocation118_spill] sm:$0xff] }
 0x5be   :  { %v20661_v57 = vsel %vm2836_vm7, %v7953_v40, %v20586_v29  ;;  %v20669_v10 = vsel %vm2836_vm7, %v8926_v24, %v20590_v27  ;;  %v12375_v29 = vld [vmem:[%s22656_s7 + $0x270] sm:$0xf]  ;;  %v7806_v27 = vperm.slane %v24147_v39, 0  ;;  %v6308_v33 = vadd.f32 %v24149_v3, %v24148_v41  ;;  %v24152_v35 = vld [vmem:[#allocation79_spill] sm:$0xff]  ;;  %v13729_v24 = vld [vmem:[%s22656_s7 + $0x25c] sm:$0xf0] }
 0x5bf   :  { %24144 = vst [vmem:[#allocation28_spill] sm:$0xff] %v20669_v10  ;;  %v20674_v56 = vsel %vm2836_vm7, %v9469_v37, %v20595_v20  ;;  %v12376_v42 = vor.u32 %v13733_v2, %v12375_v29  ;;  %v13719_v20 = vld [vmem:[%s22656_s7 + $0x214] sm:$0xf]  ;;  %v7357_v5 = vmax.f32 %v7028_v22, %v7341_v26  ;;  %v6366_v40 = vadd.f32 %v24151_v51, %v24150_v0  ;;  %v12313_v37 = vld [vmem:[%s22656_s7 + $0x200] sm:$0xf0]  ;;  %v24157_v3 = vld [vmem:[#allocation129_spill] sm:$0xff] }
 0x5c0   :  { %24146 = vst [vmem:[#allocation67_spill] sm:$0xff] %v20674_v56  ;;  %v12332_v38 = vor.u32 %v13719_v20, %v12329_v4  ;;  %v6957_v28 = vadd.f32 %v24152_v35, %v20416_v46  ;;  %v12384_v11 = vor.u32 %v13734_v19, %v12383_v17  ;;  %v13715_v49 = vld [vmem:[%s22656_s7 + $0x1f4] sm:$0xf]  ;;  %v24153_v43 = vmax.f32 %v20492_v31, 0.0  ;;  %v12367_v32 = vld [vmem:[%s22656_s7 + $0x258] sm:$0xf] }
 0x5c1   :  { %8233 = vmatpush.bf16.msra.mxu1 %v12376_v42  ;;  %v7383_v15 = vrot.slane %v7357_v5, 6  ;;  %v12360_v46 = vor.u32 %v13729_v24, %v12359_v44  ;;  %v12316_v22 = vor.u32 %v13715_v49, %v12313_v37  ;;  %v13730_v26 = vld [vmem:[%s22656_s7 + $0x264] sm:$0xf0]  ;;  %v24154_v29 = vmax.f32 %v20500_v9, 0.0  ;;  %v24155_v9 = vld [vmem:[#allocation61_spill] sm:$0xff]  ;;  %v24158_v51 = vld [vmem:[#allocation80_spill] sm:$0xff] }
 0x5c2   :  { %v7700_v23 = vperm.slane %v24153_v43, 0  ;;  %8262 = vmatpush.bf16.msra.mxu0 %v12332_v38  ;;  %v7418_v39 = vrot.slane %v20639_v59, 4  ;;  %v12196_v42 = vrot.slane %v7416_v13, 9  ;;  %8285 = vmatpush.bf16.msra.mxu2 %v12384_v11  ;;  %v12368_v31 = vor.u32 %v13730_v26, %v12367_v32  ;;  %v24156_v17 = vld [vmem:[#allocation81_spill] sm:$0xff]  ;;  %v12311_v56 = vld [vmem:[%s22656_s7 + $0x1f0] sm:$0xf] }
 0x5c3   :  { %v8779_v2 = vperm.slane %v24154_v29, 0  ;;  %v12195_v20 = vrot.slane %v20627_v25, 9  ;;  %v20731_v4 = vsel %vm1111_vm2, %v20691_v63, %v7383_v15  ;;  %v7422_v5 = vsel %vm1113_vm3, %v20691_v63, %v7383_v15  ;;  %v24159_v49 = vld [vmem:[#allocation145_spill] sm:$0xff]  ;;  %v13742_v10 = vld [vmem:[%s22656_s7 + $0x2c4] sm:$0xf0] }
 0x5c4   :  { %v20737_v38 = vsel %vm1116_vm4, %v20691_v63, %v7383_v15  ;;  %v7015_v19 = vadd.f32 %v24156_v17, %v24155_v9  ;;  %v7838_v59 = vpack.c.bf16 %v7806_v27, %v7806_v27  ;;  %v7702_v44 = vperm.slane %v7666_v50, 0  ;;  %v24160_v50 = vld [vmem:[#allocation62_spill] sm:$0xff]  ;;  %v7267_v17 = vpop.f32.mrf.mxu3 }
 0x5c5   :  { %8234 = vmatpush.bf16.msra.mxu1 %v12360_v46  ;;  %v7808_v41 = vperm.slane %v7667_v18, 0  ;;  %v20746_v0 = vadd.f32 %v6308_v33, %v24157_v3  ;;  %v20749_v35 = vadd.f32 %v6366_v40, %v24158_v51  ;;  %v12197_v11 = vrot.slane %v7418_v39, 9  ;;  %v24161_v18 = vld [vmem:[#allocation85_spill] sm:$0xff]  ;;  %v24163_v40 = vld [vmem:[#allocation66_spill] sm:$0xff]  ;;  %v7238_v3 = vpop.f32.mrf.mxu1 }
 0x5c6   :  { %8263 = vmatpush.bf16.msra.mxu0 %v12316_v22  ;;  %v7587_v24 = vmax.f32 %v7416_v13, %v12196_v42  ;;  %8286 = vmatpush.bf16.msra.mxu2 %v12368_v31  ;;  %v20752_v37 = vadd.f32 %v6957_v28, %v24159_v49  ;;  %v7732_v27 = vpack.c.bf16 %v7700_v23, %v7700_v23  ;;  %v24162_v46 = vmax.f32 %v24161_v18, 0.0  ;;  %v24168_v18 = vld [vmem:[#allocation158_spill] sm:$0xff] }
 0x5c7   :  { %v8811_v43 = vpack.c.bf16 %v8779_v2, %v8779_v2  ;;  %v7586_v55 = vmax.f32 %v20627_v25, %v12195_v20  ;;  %v20756_v36 = vadd.f32 %v7015_v19, %v24160_v50  ;;  %v20762_v22 = vunpack.c.l.b16 %v7838_v59  ;;  %v24165_v25 = vld [vmem:[#allocation144_spill] sm:$0xff]  ;;  %v7325_v59 = vpop.f32.mrf.mxu2 }
 0x5c8   :  { %v20760_v33 = vperm.slane %v24162_v46, 0  ;;  %v8781_v13 = vperm.slane %v7668_v61, 0  ;;  %v24164_v32 = vmax.f32 %v24163_v40, 0.0  ;;  %v7734_v23 = vpack.c.bf16 %v7702_v44, %v7702_v44  ;;  %v13711_v40 = vld [vmem:[%s22656_s7 + $0x1d4] sm:$0xf] }
 0x5c9   :  { %v7840_v26 = vpack.c.bf16 %v7808_v41, %v7808_v41  ;;  %v7423_v29 = vrot.slane %v7422_v5, 2  ;;  %v24166_v2 = vmax.f32 %v24165_v25, 0.0  ;;  %v7704_v31 = vperm.slane %v7670_v47, 0  ;;  %v24169_v25 = vld [vmem:[#allocation32_spill] sm:$0xff] }
 0x5ca   :  { %v20768_v28 = vperm.slane %v24164_v32, 0  ;;  %v7588_v20 = vmax.f32 %v7418_v39, %v12197_v11  ;;  %v7643_v9 = vadd.f32 %v20448_v8, %v7587_v24  ;;  %v20777_v48 = vunpack.c.l.b16 %v7732_v27  ;;  %v12297_v32 = vld [vmem:[%s22656_s7 + $0x1e0] sm:$0xf0] }
 0x5cb   :  { %v20772_v42 = vperm.slane %v24166_v2, 0  ;;  %v20779_v61 = vunpack.c.l.b16 %v8811_v43  ;;  %v7810_v19 = vperm.slane %v7671_v6, 0  ;;  %v7642_v5 = vadd.f32 %v20443_v54, %v7586_v55  ;;  %v7296_v6 = vpop.f32.mrf.mxu0 }
 0x5cc   :  { %v8813_v41 = vpack.c.bf16 %v8781_v13, %v8781_v13  ;;  %v8783_v47 = vperm.slane %v24167_v45, 0  ;;  %v20789_v39 = vsel %vm320_vm0, %v7383_v15, %v20691_v63  ;;  %v20791_v51 = vunpack.c.l.b16 %v7840_v26  ;;  %v13725_v63 = vld [vmem:[%s22656_s7 + $0x23c] sm:$0xf0] }
 0x5cd   :  { %v20793_v11 = vunpack.c.l.b16 %v7734_v23  ;;  %v12200_v12 = vrot.slane %v7423_v29, 9  ;;  %v7268_v24 = vadd.f32 %v7267_v17, %v7238_v3  ;;  %v7736_v49 = vpack.c.bf16 %v7704_v31, %v7704_v31  ;;  %v12327_v17 = vld [vmem:[%s22656_s7 + $0x210] sm:$0xf]  ;;  %v7240_v21 = vpop.f32.mrf.mxu1 }
 0x5ce   :  { %v7644_v27 = vadd.f32 %v20445_v52, %v7588_v20  ;;  %v7675_v43 = vmax.f32 %v7643_v9, 0.0  ;;  %v7326_v55 = vadd.f32 %v7325_v59, %v7296_v6  ;;  %v7842_v15 = vpack.c.bf16 %v7810_v19, %v7810_v19  ;;  %v12351_v20 = vld [vmem:[%s22656_s7 + $0x238] sm:$0xf]  ;;  %v13726_v9 = vld [vmem:[%s22656_s7 + $0x244] sm:$0xf0] }
 0x5cf   :  { %v7674_v50 = vmax.f32 %v7642_v5, 0.0  ;;  %v7342_v46 = vadd.f32 %v7268_v24, %v24168_v18  ;;  %v12344_v13 = vor.u32 %v13725_v63, %v12343_v58  ;;  %v8815_v23 = vpack.c.bf16 %v8783_v47, %v8783_v47  ;;  %v13721_v47 = vld [vmem:[%s22656_s7 + $0x21c] sm:$0xf0]  ;;  %v24171_v6 = vld [vmem:[#allocation161_spill] sm:$0xff]  ;;  %v7327_v44 = vpop.f32.mrf.mxu2 }
 0x5d0   :  { %v7591_v26 = vmax.f32 %v7423_v29, %v12200_v12  ;;  %v7343_v2 = vadd.f32 %v7326_v55, %v24169_v25  ;;  %v12300_v31 = vor.u32 %v13711_v40, %v12297_v32  ;;  %v24170_v29 = vld [vmem:[#allocation77_spill] sm:$0xff]  ;;  %v12352_v45 = vor.u32 %v13726_v9, %v12351_v20 }
 0x5d1   :  { %v7358_v59 = vmax.f32 %v24170_v29, %v7342_v46  ;;  %8235 = vmatpush.bf16.msra.mxu1 %v12344_v13  ;;  %v7676_v3 = vmax.f32 %v7644_v27, 0.0  ;;  %v7812_v12 = vperm.slane %v7675_v43, 0  ;;  %v12328_v55 = vor.u32 %v13721_v47, %v12327_v17  ;;  %v20833_v46 = vld [vmem:[%s22656_s7 + $0x310] sm:$0xff] }
 0x5d2   :  { %v7359_v24 = vmax.f32 %v24171_v6, %v7343_v2  ;;  %8264 = vmatpush.bf16.msra.mxu0 %v12300_v31  ;;  %v20828_v18 = vunpack.c.l.b16 %v8813_v41  ;;  %v7706_v40 = vperm.slane %v7674_v50, 0  ;;  %8287 = vmatpush.bf16.msra.mxu2 %v12352_v45  ;;  %v20835_v13 = vunpack.c.l.b16 %v7842_v15  ;;  %v13707_v6 = vld [vmem:[%s22656_s7 + $0x1b4] sm:$0xf] }
 0x5d3   :  { %v20837_v27 = vunpack.c.l.b16 %v7736_v49  ;;  %v20839_v32 = vunpack.c.l.b16 %v8815_v23  ;;  %v20842_v25 = vadd.f32 %v20476_v16, %v7591_v26  ;;  %v23051_v2 = vrot.slane %v20664_v60, 6  ;;  %v7298_v30 = vpop.f32.mrf.mxu0 }
 0x5d4   :  { %v7707_v41 = vperm.slane %v7674_v50, 2  ;;  %v7813_v31 = vperm.slane %v7675_v43, 2  ;;  %v7425_v20 = vrot.slane %v20737_v38, 4  ;;  %v7844_v9 = vpack.c.bf16 %v7812_v12, %v7812_v12  ;;  %v12281_v43 = vld [vmem:[%s22656_s7 + $0x1c0] sm:$0xf0] }
 0x5d5   :  { %24172 = vst [vmem:[#allocation111_spill] sm:$0xff] %v20839_v32  ;;  %8236 = vmatpush.bf16.msra.mxu1 %v12328_v55  ;;  %v8785_v17 = vperm.slane %v7676_v3, 0  ;;  %v8786_v29 = vperm.slane %v7676_v3, 2  ;;  %v8112_v15 = vunpack.c.l.b16 %v20833_v46  ;;  %v7738_v45 = vpack.c.bf16 %v7706_v40, %v7706_v40 }
 0x5d6   :  { %v12199_v23 = vrot.slane %v20731_v4, 9  ;;  %v7384_v47 = vrot.slane %v7359_v24, 6  ;;  %v23052_v38 = vmax.f32 %v20842_v25, 0.0  ;;  %v20855_v50 = vrot.slane %v23051_v2, 9 }
 0x5d7   :  { %v7739_v3 = vpack.c.bf16 %v7707_v41, %v7707_v41  ;;  %v7845_v12 = vpack.c.bf16 %v7813_v31, %v7813_v31  ;;  %v12201_v55 = vrot.slane %v7425_v20, 9  ;;  %v20857_v49 = vunpack.c.l.b16 %v7844_v9  ;;  %v12335_v31 = vld [vmem:[%s22656_s7 + $0x218] sm:$0xf]  ;;  %v13722_v9 = vld [vmem:[%s22656_s7 + $0x224] sm:$0xf0] }
 0x5d8   :  { %24173 = vst [vmem:[#allocation150_spill] sm:$0xff] %v20855_v50  ;;  %v8817_v40 = vpack.c.bf16 %v8785_v17, %v8785_v17  ;;  %v8818_v5 = vpack.c.bf16 %v8786_v29, %v8786_v29  ;;  %v8164_v24 = vpack.c.b16 %v8112_v15, %v8112_v15  ;;  %v20865_v63 = vunpack.c.l.b16 %v7738_v45  ;;  %v7269_v45 = vpop.f32.mrf.mxu3 }
 0x5d9   :  { %v7590_v2 = vmax.f32 %v20731_v4, %v12199_v23  ;;  %v7428_v41 = vsel %vm1111_vm2, %v7358_v59, %v7384_v47  ;;  %v20877_v17 = vperm.slane %v23052_v38, 2  ;;  %v7429_v29 = vsel %vm1113_vm3, %v7358_v59, %v7384_v47  ;;  %v13717_v38 = vld [vmem:[%s22656_s7 + $0x1fc] sm:$0xf0] }
 0x5da   :  { %v7431_v15 = vsel %vm1116_vm4, %v7358_v59, %v7384_v47  ;;  %v20882_v4 = vsel %vm320_vm0, %v7384_v47, %v7358_v59  ;;  %v20884_v23 = vunpack.c.l.b16 %v7739_v3  ;;  %v7592_v19 = vmax.f32 %v7425_v20, %v12201_v55  ;;  %v12439_v20 = vld [vmem:[%s22656_s7 + $0x2f0] sm:$0xf]  ;;  %v13749_v3 = vld [vmem:[%s22656_s7 + $0x2fc] sm:$0xf0] }
 0x5db   :  { %24174 = vst [vmem:[#allocation98_spill] sm:$0xff] %v20882_v4  ;;  %v7430_v26 = vrot.slane %v7429_v29, 2  ;;  %v7432_v58 = vrot.slane %v7431_v15, 4  ;;  %v12203_v14 = vrot.slane %v7428_v41, 9  ;;  %v8222_v59 = vsel %vm8220_vm13, %v8164_v24, 0 }
 0x5dc   :  { %v12284_v47 = vor.u32 %v13707_v6, %v12281_v43  ;;  %v12336_v34 = vor.u32 %v13722_v9, %v12335_v31  ;;  %v20899_v55 = vunpack.c.l.b16 %v7845_v12  ;;  %8249 = vmatpush.bf16.msra.mxu3 %v8222_v59  ;;  %v7270_v4 = vadd.f32 %v7269_v45, %v7240_v21  ;;  %v13703_v6 = vld [vmem:[%s22656_s7 + $0x194] sm:$0xf]  ;;  %v12265_v43 = vld [vmem:[%s22656_s7 + $0x1a0] sm:$0xf0]  ;;  %v12319_v21 = vld [vmem:[%s22656_s7 + $0x1f8] sm:$0xf] }
 0x5dd   :  { %v12204_v29 = vrot.slane %v7430_v26, 9  ;;  %v12205_v15 = vrot.slane %v7432_v58, 9  ;;  %v20907_v24 = vunpack.c.l.b16 %v8817_v40  ;;  %v7646_v31 = vadd.f32 %v20460_v1, %v7590_v2  ;;  %v13718_v40 = vld [vmem:[%s22656_s7 + $0x204] sm:$0xf0]  ;;  %v13713_v2 = vld [vmem:[%s22656_s7 + $0x1dc] sm:$0xf0] }
 0x5de   :  { %8265 = vmatpush.bf16.msra.mxu0 %v12284_v47  ;;  %8288 = vmatpush.bf16.msra.mxu2 %v12336_v34  ;;  %v7328_v12 = vadd.f32 %v7327_v44, %v7298_v30  ;;  %v12312_v9 = vor.u32 %v13717_v38, %v12311_v56  ;;  %v20913_v45 = vunpack.c.l.b16 %v8818_v5  ;;  %v7648_v59 = vadd.f32 %v20469_v62, %v7592_v19  ;;  %v12571_v30 = vld [vmem:[%s22656_s7 + $0xe0] sm:$0xf]  ;;  %v13685_v34 = vld [vmem:[%s22656_s7 + $0xec] sm:$0xf0] }
 0x5df   :  { %24175 = vst [vmem:[#allocation112_spill] sm:$0xff] %v20907_v24  ;;  %v7595_v60 = vmax.f32 %v7430_v26, %v12204_v29  ;;  %v7344_v50 = vadd.f32 %v7270_v4, %v20746_v0  ;;  %v12440_v19 = vor.u32 %v13749_v3, %v12439_v20  ;;  %v12268_v5 = vor.u32 %v13703_v6, %v12265_v43  ;;  %v12295_v0 = vld [vmem:[%s22656_s7 + $0x1d0] sm:$0xf]  ;;  %v13745_v20 = vld [vmem:[%s22656_s7 + $0x2dc] sm:$0xf0] }
 0x5e0   :  { %24176 = vst [vmem:[#allocation68_spill] sm:$0xff] %v20913_v45  ;;  %v7345_v44 = vadd.f32 %v7328_v12, %v20749_v35  ;;  %8237 = vmatpush.bf16.msra.mxu1 %v12312_v9  ;;  %v7847_v26 = vpack.c.bf16 %v20877_v17, %v20877_v17  ;;  %v7594_v38 = vmax.f32 %v7428_v41, %v12203_v14  ;;  %v12423_v35 = vld [vmem:[%s22656_s7 + $0x2d0] sm:$0xf]  ;;  %v7678_v3 = vmax.f32 %v7646_v31, 0.0  ;;  %v12539_v17 = vld [vmem:[%s22656_s7 + $0xa0] sm:$0xf] }
 0x5e1   :  { %v7596_v4 = vmax.f32 %v7432_v58, %v12205_v15  ;;  %v7360_v47 = vmax.f32 %v20752_v37, %v7344_v50  ;;  %8250 = vmatpush.bf16.msra.mxu3 %v12440_v19  ;;  %v12320_v6 = vor.u32 %v13718_v40, %v12319_v21  ;;  %v12572_v43 = vor.u32 %v13685_v34, %v12571_v30  ;;  %v12263_v56 = vld [vmem:[%s22656_s7 + $0x190] sm:$0xf]  ;;  %v12409_v45 = vld [vmem:[%s22656_s7 + $0x2c0] sm:$0xf0]  ;;  %v21189_v24 = vld [vmem:[%s22656_s7 + $0x20] sm:$0xf] }
 0x5e2   :  { %v7361_v29 = vmax.f32 %v20756_v36, %v7345_v44  ;;  %8266 = vmatpush.bf16.msra.mxu0 %v12268_v5  ;;  %v7680_v58 = vmax.f32 %v7648_v59, 0.0  ;;  %v20946_v37 = vadd.f32 %v20448_v8, %v7595_v60  ;;  %v12296_v50 = vor.u32 %v13713_v2, %v12295_v0  ;;  %v12303_v5 = vld [vmem:[%s22656_s7 + $0x1d8] sm:$0xf] }
 0x5e3   :  { %8289 = vmatpush.bf16.msra.mxu2 %v12320_v6  ;;  %v12424_v31 = vor.u32 %v13745_v20, %v12423_v35  ;;  %v20952_v9 = vunpack.c.l.b16 %v7847_v26  ;;  %v7650_v21 = vadd.f32 %v20443_v54, %v7594_v38  ;;  %v20955_v8 = vperm.slane %v7678_v3, 0  ;;  %v12555_v38 = vld [vmem:[%s22656_s7 + $0xc0] sm:$0xf]  ;;  %v13677_v6 = vld [vmem:[%s22656_s7 + $0xac] sm:$0xf0] }
 0x5e4   :  { %v7385_v15 = vrot.slane %v7361_v29, 6  ;;  %8238 = vmatpush.bf16.msra.mxu1 %v12296_v50  ;;  %v20957_v60 = vperm.slane %v7678_v3, 2  ;;  %v24177_v59 = vmax.f32 %v20842_v25, 0.0  ;;  %v20964_v30 = vadd.f32 %v20445_v52, %v7596_v4  ;;  %v13714_v25 = vld [vmem:[%s22656_s7 + $0x1e4] sm:$0xf0]  ;;  %v21010_v50 = vld [vmem:[%s22656_s7 + $0x318] sm:$0xff] }
 0x5e5   :  { %8251 = vmatpush.bf16.msra.mxu3 %v12424_v31  ;;  %v20966_v34 = vperm.slane %v7680_v58, 0  ;;  %v23060_v44 = vmax.f32 %v20946_v37, 0.0  ;;  %v7730_v52 = vpack.c.bf16 %v20760_v33, %v20760_v33  ;;  %v20979_v0 = vperm.slane %v7680_v58, 2  ;;  %v13681_v4 = vld [vmem:[%s22656_s7 + $0xcc] sm:$0xf0] }
 0x5e6   :  { %8665 = vmatpush.bf16.msrb.mxu0 %v12572_v43  ;;  %v20961_v40 = vperm.slane %v24177_v59, 0  ;;  %v7435_v19 = vsel %vm1111_vm2, %v7360_v47, %v7385_v15  ;;  %v7436_v54 = vsel %vm1113_vm3, %v7360_v47, %v7385_v15  ;;  %v20982_v26 = vsel %vm1116_vm4, %v7360_v47, %v7385_v15  ;;  %v12279_v33 = vld [vmem:[%s22656_s7 + $0x1b0] sm:$0xf]  ;;  %v13709_v29 = vld [vmem:[%s22656_s7 + $0x1bc] sm:$0xf0] }
 0x5e7   :  { %v7437_v2 = vrot.slane %v7436_v54, 2  ;;  %v7682_v20 = vmax.f32 %v7650_v21, 0.0  ;;  %v20992_v3 = vsel %vm320_vm0, %v7385_v15, %v7360_v47  ;;  %v12207_v43 = vrot.slane %v7435_v19, 9  ;;  %v12407_v58 = vld [vmem:[%s22656_s7 + $0x2b0] sm:$0xf] }
 0x5e8   :  { %24178 = vst [vmem:[#allocation38_spill] sm:$0xff] %v20992_v3  ;;  %v13741_v47 = vld [vmem:[%s22656_s7 + $0x2bc] sm:$0xf0]  ;;  %v21014_v15 = vperm.slane %v23060_v44, 2  ;;  %v12287_v21 = vld [vmem:[%s22656_s7 + $0x1b8] sm:$0xf]  ;;  %v21024_v12 = vunpack.c.l.b16 %v7730_v52  ;;  %v12304_v14 = vor.u32 %v13714_v25, %v12303_v5  ;;  %v12556_v41 = vor.u32 %v13681_v4, %v12555_v38 }
 0x5e9   :  { %v12208_v31 = vrot.slane %v7437_v2, 9  ;;  %v13710_v59 = vld [vmem:[%s22656_s7 + $0x1c4] sm:$0xf0]  ;;  %v7598_v36 = vmax.f32 %v7435_v19, %v12207_v43  ;;  %v12280_v44 = vor.u32 %v13709_v29, %v12279_v33  ;;  %v13705_v19 = vld [vmem:[%s22656_s7 + $0x19c] sm:$0xf0]  ;;  %v8113_v52 = vunpack.c.h.b16 %v20833_v46 }
 0x5ea   :  { %v12391_v5 = vld [vmem:[%s22656_s7 + $0x290] sm:$0xf]  ;;  %v13737_v25 = vld [vmem:[%s22656_s7 + $0x29c] sm:$0xf0]  ;;  %v21045_v43 = vperm.slane %v7682_v20, 0  ;;  %8290 = vmatpush.bf16.msra.mxu2 %v12304_v14  ;;  %v12408_v38 = vor.u32 %v13741_v47, %v12407_v58  ;;  %v12288_v4 = vor.u32 %v13710_v59, %v12287_v21  ;;  %v21050_v33 = vperm.slane %v7682_v20, 2  ;;  %8666 = vmatpush.bf16.msrb.mxu0 %v12556_v41 }
 0x5eb   :  { %v7599_v35 = vmax.f32 %v7437_v2, %v12208_v31  ;;  %v21048_v2 = vadd.f32 %v20460_v1, %v7598_v36  ;;  %8239 = vmatpush.bf16.msra.mxu1 %v12280_v44  ;;  %v12540_v31 = vor.u32 %v13677_v6, %v12539_v17  ;;  %v12271_v46 = vld [vmem:[%s22656_s7 + $0x198] sm:$0xf]  ;;  %v13706_v1 = vld [vmem:[%s22656_s7 + $0x1a4] sm:$0xf0]  ;;  %v8114_v14 = vunpack.c.l.b16 %v21010_v50  ;;  %v21065_v36 = vld [vmem:[%s22656_s7 + $0x180] sm:$0xff] }
 0x5ec   :  { %v7849_v41 = vpack.c.bf16 %v21014_v15, %v21014_v15  ;;  %8252 = vmatpush.bf16.msra.mxu3 %v12408_v38  ;;  %v12264_v17 = vor.u32 %v13705_v19, %v12263_v56  ;;  %v12392_v44 = vor.u32 %v13737_v25, %v12391_v5  ;;  %v13673_v20 = vld [vmem:[%s22656_s7 + $0x8c] sm:$0xf0]  ;;  %v13747_v6 = vld [vmem:[%s22656_s7 + $0x2f4] sm:$0xf]  ;;  %v7740_v58 = vpack.c.bf16 %v20955_v8, %v20955_v8  ;;  %v12441_v21 = vld [vmem:[%s22656_s7 + $0x300] sm:$0xf0] }
 0x5ed   :  { %v21053_v29 = vadd.f32 %v20476_v16, %v7599_v35  ;;  %v12523_v35 = vld [vmem:[%s22656_s7 + $0x80] sm:$0xf]  ;;  %v8165_v15 = vpack.c.b16 %v8113_v52, %v8113_v52  ;;  %v21090_v59 = vld [vmem:[%s22656_s7 + $0x2f8] sm:$0xf]  ;;  %v7741_v19 = vpack.c.bf16 %v20957_v60, %v20957_v60  ;;  %v7846_v8 = vpack.c.bf16 %v20961_v40, %v20961_v40  ;;  %v13750_v52 = vld [vmem:[%s22656_s7 + $0x304] sm:$0xf0] }
 0x5ee   :  { %8291 = vmatpush.bf16.msra.mxu2 %v12288_v4  ;;  %v12272_v5 = vor.u32 %v13706_v1, %v12271_v46  ;;  %v8166_v25 = vpack.c.b16 %v8114_v14, %v8114_v14  ;;  %v21102_v38 = vld [vmem:[%s22656_s7 + $0x60] sm:$0xf]  ;;  %v21107_v16 = vld [vmem:[%s22656_s7 + $0x6c] sm:$0xf0]  ;;  %8667 = vmatpush.bf16.msrb.mxu0 %v12540_v31  ;;  %v12524_v4 = vor.u32 %v13673_v20, %v12523_v35  ;;  %v8546_v46 = vunpack.c.l.b16 %v21065_v36  ;;  %v13743_v54 = vld [vmem:[%s22656_s7 + $0x2d4] sm:$0xf] }
 0x5ef   :  { %v23061_v56 = vmax.f32 %v21053_v29, 0.0  ;;  %8240 = vmatpush.bf16.msra.mxu1 %v12264_v17  ;;  %v8225_v40 = vsel %vm8220_vm13, %v8165_v15, 0  ;;  %v12635_v1 = vld [vmem:[%s22656_s7 + $0x160] sm:$0xf]  ;;  %v13701_v14 = vld [vmem:[%s22656_s7 + $0x16c] sm:$0xf0]  ;;  %v21125_v17 = vunpack.c.l.b16 %v7849_v41  ;;  %v12444_v15 = vor.u32 %v13747_v6, %v12441_v21 }
 0x5f0   :  { %v12425_v31 = vld [vmem:[%s22656_s7 + $0x2e0] sm:$0xf0]  ;;  %8253 = vmatpush.bf16.msra.mxu3 %v12392_v44  ;;  %v8228_v20 = vsel %vm8220_vm13, %v8166_v25, 0  ;;  %v13746_v47 = vld [vmem:[%s22656_s7 + $0x2e4] sm:$0xf0]  ;;  %v24179_v3 = vmax.f32 %v21048_v2, 0.0  ;;  %v8598_v35 = vpack.c.b16 %v8546_v46, %v8546_v46  ;;  %v12448_v44 = vor.u32 %v13750_v52, %v21090_v59 }
 0x5f1   :  { %v7819_v60 = vperm.slane %v23061_v56, 2  ;;  %v12431_v56 = vld [vmem:[%s22656_s7 + $0x2d8] sm:$0xf]  ;;  %v12491_v6 = vld [vmem:[%s22656_s7 + $0x40] sm:$0xf]  ;;  %v24180_v59 = vpack.c.bf16 %v20768_v28, %v20768_v28  ;;  %v12508_v46 = vor.u32 %v21107_v16, %v21102_v38  ;;  %v7929_v32 = vunpack.c.l.b16 %v7846_v8 }
 0x5f2   :  { %v21137_v7 = vperm.slane %v24179_v3, 2  ;;  %v13665_v21 = vld [vmem:[%s22656_s7 + $0x4c] sm:$0xf0]  ;;  %v21149_v25 = vld [vmem:[%s22656_s7 + $0x140] sm:$0xf]  ;;  %8292 = vmatpush.bf16.msra.mxu2 %v12272_v5  ;;  %8668 = vmatpush.bf16.msrb.mxu0 %v12524_v4  ;;  %v8654_v5 = vsel %vm8220_vm13, %v8598_v35, 0  ;;  %v12636_v4 = vor.u32 %v13701_v14, %v12635_v1  ;;  %v12428_v35 = vor.u32 %v13743_v54, %v12425_v31 }
 0x5f3   :  { %8275 = vmatpush.bf16.msrb.mxu1 %v8225_v40  ;;  %v7851_v41 = vpack.c.bf16 %v7819_v60, %v7819_v60  ;;  %v21154_v3 = vld [vmem:[%s22656_s7 + $0x14c] sm:$0xf0]  ;;  %v7919_v52 = vunpack.c.l.b16 %v24180_v59  ;;  %v21159_v60 = vunpack.c.l.b16 %v7740_v58  ;;  %v21161_v40 = vunpack.c.l.b16 %v7741_v19  ;;  %v21174_v28 = vld [vmem:[%s22656_s7 + $0x2b8] sm:$0xf]  ;;  %v21201_v38 = vld [vmem:[%s22656_s7 + $0x120] sm:$0xf] }
 0x5f4   :  { %8301 = vmatpush.bf16.msrb.mxu3 %v8228_v20  ;;  %v13739_v20 = vld [vmem:[%s22656_s7 + $0x2b4] sm:$0xf]  ;;  %v24181_v58 = vmax.f32 %v20946_v37, 0.0  ;;  %v21196_v16 = vld [vmem:[%s22656_s7 + $0x2c] sm:$0xf0]  ;;  %v7959_v54 = vrot.slane %v21125_v17, 2  ;;  %v12432_v31 = vor.u32 %v13746_v47, %v12431_v56  ;;  %v12620_v37 = vor.u32 %v21154_v3, %v21149_v25 }
 0x5f5   :  { %v21178_v59 = vunpack.c.l.b16 %v7851_v41  ;;  %v21206_v8 = vld [vmem:[%s22656_s7 + $0x12c] sm:$0xf0]  ;;  %v24182_v1 = vrot.slane %v20982_v26, 4  ;;  %v7745_v41 = vpack.c.bf16 %v21137_v7, %v21137_v7  ;;  %v12393_v17 = vld [vmem:[%s22656_s7 + $0x2a0] sm:$0xf0]  ;;  %v12416_v47 = vor.u32 %v13742_v10, %v21174_v28 }
 0x5f6   :  { %v7816_v19 = vperm.slane %v24181_v58, 0  ;;  %8681 = vmatpush.bf16.msrb.mxu2 %v8654_v5  ;;  %v12492_v5 = vor.u32 %v13665_v21, %v12491_v6  ;;  %8669 = vmatpush.bf16.msrb.mxu0 %v12508_v46  ;;  %v12476_v7 = vor.u32 %v21196_v16, %v21189_v24  ;;  %v12604_v56 = vor.u32 %v21206_v8, %v21201_v38 }
 0x5f7   :  { %8276 = vmatpush.bf16.msrb.mxu1 %v12444_v15  ;;  %v7743_v15 = vpack.c.bf16 %v21050_v33, %v21050_v33  ;;  %v12209_v14 = vrot.slane %v24182_v1, 9  ;;  %v7961_v58 = vrot.slane %v21178_v59, 1  ;;  %v13735_v33 = vld [vmem:[%s22656_s7 + $0x294] sm:$0xf]  ;;  %v24183_v6 = vmax.f32 %v21053_v29, 0.0 }
 0x5f8   :  { %8302 = vmatpush.bf16.msrb.mxu3 %v12448_v44  ;;  %v12412_v44 = vor.u32 %v13739_v20, %v12409_v45  ;;  %v7848_v25 = vpack.c.bf16 %v7816_v19, %v7816_v19  ;;  %v24184_v3 = vrot.slane %v20762_v22, 7  ;;  %v7943_v46 = vrot.slane %v7929_v32, 3  ;;  %v12399_v29 = vld [vmem:[%s22656_s7 + $0x298] sm:$0xf]  ;;  %v13738_v22 = vld [vmem:[%s22656_s7 + $0x2a4] sm:$0xf0] }
 0x5f9   :  { %v7818_v21 = vperm.slane %v24183_v6, 0  ;;  %v12396_v45 = vor.u32 %v13735_v33, %v12393_v17  ;;  %v24185_v10 = vrot.slane %v20791_v51, 6  ;;  %v24186_v20 = vrot.slane %v20899_v55, 4  ;;  %v12587_v1 = vld [vmem:[%s22656_s7 + $0x100] sm:$0xf] }
 0x5fa   :  { %8682 = vmatpush.bf16.msrb.mxu2 %v12636_v4  ;;  %v7936_v59 = vsel %vm2830_vm5, %v24184_v3, %v7919_v52  ;;  %v7931_v52 = vunpack.c.l.b16 %v7848_v25  ;;  %v24187_v51 = vrot.slane %v20835_v13, 5  ;;  %v24188_v4 = vrot.slane %v20952_v9, 3  ;;  %8670 = vmatpush.bf16.msrb.mxu0 %v12492_v5  ;;  %v13657_v9 = vld [vmem:[%s22656_s7 + $0xc] sm:$0xf0]  ;;  %v12385_v6 = vld [vmem:[%s22656_s7 + $0x288] sm:$0xf0] }
 0x5fb   :  { %8277 = vmatpush.bf16.msrb.mxu1 %v12428_v35  ;;  %v7938_v24 = vsel %vm2833_vm6, %v24185_v10, %v7936_v59  ;;  %v7956_v28 = vsel %vm2839_vm8, %v24186_v20, %v20661_v57  ;;  %v7850_v32 = vpack.c.bf16 %v7818_v21, %v7818_v21  ;;  %v12459_v57 = vld [vmem:[%s22656_s7] sm:$0xf]  ;;  %v24189_v35 = vrot.slane %v20857_v49, 4  ;;  %v13781_v3 = vld [vmem:[%s22656_s7 + $0x40c] sm:$0xf0] }
 0x5fc   :  { %8303 = vmatpush.bf16.msrb.mxu3 %v12432_v31  ;;  %v7940_v19 = vsel %vm2836_vm7, %v24187_v51, %v7938_v24  ;;  %v7958_v55 = vsel %vm2842_vm9, %v24188_v4, %v7956_v28  ;;  %v8115_v8 = vunpack.c.h.b16 %v21010_v50  ;;  %v8547_v13 = vunpack.c.h.b16 %v21065_v36  ;;  %v12817_v25 = vld [vmem:[%s22656_s7 + $0x400] sm:$0xf]  ;;  %v21301_v10 = vld [vmem:[%s22656_s7 + $0x25c] sm:$0xf]  ;;  %v21306_v24 = vld [vmem:[%s22656_s7 + $0x268] sm:$0xf0] }
 0x5fd   :  { %v7942_v16 = vsel %vm2839_vm8, %v24189_v35, %v7940_v19  ;;  %v7960_v38 = vsel %vm2845_vm10, %v7959_v54, %v7958_v55  ;;  %v7933_v31 = vunpack.c.l.b16 %v7850_v32  ;;  %v7945_v5 = vrot.slane %v7931_v52, 2  ;;  %v13699_v4 = vld [vmem:[%s22656_s7 + $0x164] sm:$0xf] }
 0x5fe   :  { %8683 = vmatpush.bf16.msrb.mxu2 %v12620_v37  ;;  %v7944_v49 = vsel %vm2842_vm9, %v7943_v46, %v7942_v16  ;;  %v7962_v54 = vsel %vm2848_vm11, %v7961_v58, %v7960_v38  ;;  %v24190_v50 = vrot.slane %v20982_v26, 4  ;;  %v12400_v36 = vor.u32 %v13738_v22, %v12399_v29  ;;  %v13689_v37 = vld [vmem:[%s22656_s7 + $0x10c] sm:$0xf0]  ;;  %8671 = vmatpush.bf16.msrb.mxu0 %v12476_v7  ;;  %v13748_v29 = vld [vmem:[%s22656_s7 + $0x2fc] sm:$0xf] }
 0x5ff   :  { %8278 = vmatpush.bf16.msrb.mxu1 %v12412_v44  ;;  %v21275_v17 = vpack.c.b16 %v7962_v54, %v7962_v54  ;;  %v13732_v44 = vld [vmem:[%s22656_s7 + $0x27c] sm:$0xf]  ;;  %v8167_v58 = vpack.c.b16 %v8115_v8, %v8115_v8  ;;  %v21283_v21 = vunpack.c.l.b16 %v7743_v15  ;;  %v21285_v26 = vunpack.c.l.b16 %v7745_v41  ;;  %v12449_v22 = vld [vmem:[%s22656_s7 + $0x308] sm:$0xf0]  ;;  %v12801_v8 = vld [vmem:[%s22656_s7 + $0x3e0] sm:$0xf] }
 0x600   :  { %v7600_v33 = vmax.f32 %v24190_v50, %v12209_v14  ;;  %8304 = vmatpush.bf16.msrb.mxu3 %v12416_v47  ;;  %v7946_v14 = vsel %vm2845_vm10, %v7945_v5, %v7944_v49  ;;  %v7947_v47 = vrot.slane %v7933_v31, 1  ;;  %v8377_v59 = vrot.slane %v21159_v60, 3  ;;  %v13744_v54 = vld [vmem:[%s22656_s7 + $0x2dc] sm:$0xf]  ;;  %v12433_v50 = vld [vmem:[%s22656_s7 + $0x2e8] sm:$0xf0] }
 0x601   :  { %v12460_v46 = vor.u32 %v13657_v9, %v12459_v57  ;;  %12453 = vmatmul.msk.bf16.vlgmr.msra.gmra.mxu3 %vm8216_vm14, %v21275_v17  ;;  %v8231_v15 = vsel %vm8220_vm13, %v8167_v58, 0  ;;  %v8599_v41 = vpack.c.b16 %v8547_v13, %v8547_v13  ;;  %v8391_v20 = vrot.slane %v21161_v40, 3  ;;  %v13777_v13 = vld [vmem:[%s22656_s7 + $0x3ec] sm:$0xf0]  ;;  %v12417_v60 = vld [vmem:[%s22656_s7 + $0x2c8] sm:$0xf0] }
 0x602   :  { %8684 = vmatpush.bf16.msrb.mxu2 %v12604_v56  ;;  %v12588_v7 = vor.u32 %v13689_v37, %v12587_v1  ;;  %v7948_v28 = vsel %vm2848_vm11, %v7947_v47, %v7946_v14  ;;  %v24191_v32 = vpack.c.bf16 %v21045_v43, %v21045_v43  ;;  %v24192_v51 = vmax.f32 %v20964_v30, 0.0  ;;  %v12637_v43 = vld [vmem:[%s22656_s7 + $0x170] sm:$0xf0] }
 0x603   :  { %8279 = vmatpush.bf16.msrb.mxu1 %v12396_v45  ;;  %v21324_v56 = vadd.f32 %v20469_v62, %v7600_v33  ;;  %v21326_v45 = vpack.c.b16 %v7948_v28, %v7948_v28  ;;  %v12388_v19 = vor.u32 %v13732_v44, %v12385_v6  ;;  %v8393_v55 = vrot.slane %v21283_v21, 2  ;;  %8672 = vmatpush.bf16.msrb.mxu0 %v12460_v46  ;;  %v12785_v46 = vld [vmem:[%s22656_s7 + $0x3c0] sm:$0xf] }
 0x604   :  { %v8365_v52 = vunpack.c.l.b16 %v24191_v32  ;;  %v21321_v40 = vperm.slane %v24192_v51, 0  ;;  %8305 = vmatpush.bf16.msrb.mxu3 %v12400_v36  ;;  %v8395_v57 = vrot.slane %v21285_v26, 1  ;;  %v12818_v35 = vor.u32 %v13781_v3, %v12817_v25  ;;  %v13695_v26 = vld [vmem:[%s22656_s7 + $0x144] sm:$0xf]  ;;  %v12621_v3 = vld [vmem:[%s22656_s7 + $0x150] sm:$0xf0] }
 0x605   :  { %v12372_v62 = vor.u32 %v21301_v10, %v21306_v24  ;;  %8241 = vmatmul.bf16.vlgmr.msra.gmra.mxu1 %v21326_v45  ;;  %v8657_v16 = vsel %vm8220_vm13, %v8599_v41, 0  ;;  %v12452_v38 = vor.u32 %v13748_v29, %v12449_v22  ;;  %v24193_v9 = vmax.f32 %v21048_v2, 0.0  ;;  %8267 = vmatmul.bf16.vlgmr.msra.gmra.mxu0 %v21326_v45  ;;  %v13740_v22 = vld [vmem:[%s22656_s7 + $0x2bc] sm:$0xf] }
 0x606   :  { %v24194_v31 = vrot.slane %v20777_v48, 7  ;;  %8685 = vmatpush.bf16.msrb.mxu2 %v12588_v7  ;;  %v12640_v5 = vor.u32 %v13699_v4, %v12637_v43  ;;  %v24195_v2 = vrot.slane %v20793_v11, 6  ;;  %v8379_v36 = vrot.slane %v8365_v52, 2  ;;  %v13720_v4 = vld [vmem:[%s22656_s7 + $0x21c] sm:$0xf] }
 0x607   :  { %v7712_v1 = vperm.slane %v24193_v9, 0  ;;  %v24196_v48 = vrot.slane %v20884_v23, 4  ;;  %v7688_v37 = vmax.f32 %v21324_v56, 0.0  ;;  %8293 = vmatmul.bf16.vlgmr.msra.gmra.mxu2 %v21326_v45  ;;  %8311 = vmatpush.bf16.msra.mxu1 %v12388_v19  ;;  %v24197_v6 = vrot.slane %v20837_v27, 5  ;;  %v13724_v23 = vld [vmem:[%s22656_s7 + $0x23c] sm:$0xf] }
 0x608   :  { %8327 = vmatpush.bf16.msra.mxu3 %v8231_v15  ;;  %v8370_v49 = vsel %vm2830_vm5, %v24194_v31, %v21024_v12  ;;  %9204 = vmatpush.bf16.msra.mxu0 %v12818_v35  ;;  %v12802_v21 = vor.u32 %v13777_v13, %v12801_v8  ;;  %v24198_v27 = vrot.slane %v20865_v63, 4  ;;  %v12436_v25 = vor.u32 %v13744_v54, %v12433_v50  ;;  %v13773_v15 = vld [vmem:[%s22656_s7 + $0x3cc] sm:$0xf0]  ;;  %v12337_v43 = vld [vmem:[%s22656_s7 + $0x228] sm:$0xf0] }
 0x609   :  { %v8372_v33 = vsel %vm2833_vm6, %v24195_v2, %v8370_v49  ;;  %v8390_v12 = vsel %vm2839_vm8, %v24196_v48, %v20656_v53  ;;  %v7744_v44 = vpack.c.bf16 %v7712_v1, %v7712_v1  ;;  %v12353_v53 = vld [vmem:[%s22656_s7 + $0x248] sm:$0xf0]  ;;  %v24199_v24 = vpack.c.bf16 %v20772_v42, %v20772_v42  ;;  %v13769_v8 = vld [vmem:[%s22656_s7 + $0x3ac] sm:$0xf0]  ;;  %v21447_v1 = vld [vmem:[%s22656_s7 + $0x1fc] sm:$0xf] }
 0x60a   :  { %v8374_v58 = vsel %vm2836_vm7, %v24197_v6, %v8372_v33  ;;  %v8392_v11 = vsel %vm2842_vm9, %v8391_v20, %v8390_v12  ;;  %8707 = vmatpush.bf16.msra.mxu2 %v8657_v16  ;;  %v7427_v7 = vrot.slane %v20789_v39, 6  ;;  %v24200_v28 = vmov %v24192_v51  ;;  %v12605_v16 = vld [vmem:[%s22656_s7 + $0x130] sm:$0xf0]  ;;  %v13736_v31 = vld [vmem:[%s22656_s7 + $0x29c] sm:$0xf] }
 0x60b   :  { %v8376_v14 = vsel %vm2839_vm8, %v24198_v27, %v8374_v58  ;;  %v8394_v47 = vsel %vm2845_vm10, %v8393_v55, %v8392_v11  ;;  %v8367_v41 = vunpack.c.l.b16 %v7744_v44  ;;  %v8892_v20 = vunpack.c.l.b16 %v24199_v24  ;;  %8312 = vmatpush.bf16.msra.mxu1 %v12372_v62  ;;  %v12401_v49 = vld [vmem:[%s22656_s7 + $0x2a8] sm:$0xf0]  ;;  %v13683_v50 = vld [vmem:[%s22656_s7 + $0xe4] sm:$0xf]  ;;  %v12573_v2 = vld [vmem:[%s22656_s7 + $0xf0] sm:$0xf0] }
 0x60c   :  { %8328 = vmatpush.bf16.msra.mxu3 %v12452_v38  ;;  %v8378_v63 = vsel %vm2842_vm9, %v8377_v59, %v8376_v14  ;;  %v21398_v10 = vsel %vm2848_vm11, %v8395_v57, %v8394_v47  ;;  %v8790_v29 = vperm.slane %v24200_v28, 2  ;;  %v8820_v32 = vpack.c.bf16 %v20979_v0, %v20979_v0  ;;  %9205 = vmatpush.bf16.msra.mxu0 %v12802_v21  ;;  %v13691_v0 = vld [vmem:[%s22656_s7 + $0x124] sm:$0xf]  ;;  %v12769_v38 = vld [vmem:[%s22656_s7 + $0x3a0] sm:$0xf] }
 0x60d   :  { %v8380_v59 = vsel %vm2845_vm10, %v8379_v36, %v8378_v63  ;;  %v8792_v42 = vperm.slane %v7688_v37, 2  ;;  %v12356_v52 = vor.u32 %v13724_v23, %v12353_v53  ;;  %v8381_v30 = vrot.slane %v8367_v41, 1  ;;  %v13687_v58 = vld [vmem:[%s22656_s7 + $0x104] sm:$0xf]  ;;  %v12589_v11 = vld [vmem:[%s22656_s7 + $0x110] sm:$0xf0] }
 0x60e   :  { %8708 = vmatpush.bf16.msra.mxu2 %v12640_v5  ;;  %v12624_v51 = vor.u32 %v13695_v26, %v12621_v3  ;;  %v12786_v19 = vor.u32 %v13773_v15, %v12785_v46  ;;  %v8821_v55 = vpack.c.bf16 %v21321_v40, %v21321_v40  ;;  %v24201_v57 = vpack.c.bf16 %v20966_v34, %v20966_v34  ;;  %v12753_v23 = vld [vmem:[%s22656_s7 + $0x380] sm:$0xf]  ;;  %v13765_v53 = vld [vmem:[%s22656_s7 + $0x38c] sm:$0xf0]  ;;  %v24204_v26 = vld [vmem:[#allocation111_spill] sm:$0xff] }
 0x60f   :  { %v12420_v62 = vor.u32 %v13740_v22, %v12417_v60  ;;  %v8382_v40 = vsel %vm2848_vm11, %v8381_v30, %v8380_v59  ;;  %v24202_v13 = vrot.slane %v20779_v61, 7  ;;  %v8822_v9 = vpack.c.bf16 %v8790_v29, %v8790_v29  ;;  %8313 = vmatpush.bf16.msra.mxu1 %v12356_v52  ;;  %v12321_v61 = vld [vmem:[%s22656_s7 + $0x208] sm:$0xf0]  ;;  %v12581_v46 = vld [vmem:[%s22656_s7 + $0xf8] sm:$0xf0]  ;;  %v24206_v41 = vld [vmem:[#allocation112_spill] sm:$0xff] }
 0x610   :  { %v8902_v35 = vunpack.c.l.b16 %v24201_v57  ;;  %8329 = vmatpush.bf16.msra.mxu3 %v12436_v25  ;;  %v8824_v5 = vpack.c.bf16 %v8792_v42, %v8792_v42  ;;  %v12340_v54 = vor.u32 %v13720_v4, %v12337_v43  ;;  %v8904_v33 = vunpack.c.l.b16 %v8821_v55  ;;  %9206 = vmatpush.bf16.msra.mxu0 %v12786_v19  ;;  %v13679_v22 = vld [vmem:[%s22656_s7 + $0xc4] sm:$0xf]  ;;  %v12557_v60 = vld [vmem:[%s22656_s7 + $0xd0] sm:$0xf0]  ;;  %v13712_v52 = vld [vmem:[%s22656_s7 + $0x1dc] sm:$0xf] }
 0x611   :  { %v8909_v34 = vsel %vm2830_vm5, %v24202_v13, %v8892_v20  ;;  %v24203_v36 = vrot.slane %v20828_v18, 6  ;;  %v21467_v12 = vunpack.c.l.b16 %v8820_v32  ;;  %v12608_v44 = vor.u32 %v13691_v0, %v12605_v16  ;;  %12455 = vmatmul.msk.bf16.vlgmr.msrb.gmra.mxu3 %vm8216_vm14, %v21275_v17  ;;  %v12305_v30 = vld [vmem:[%s22656_s7 + $0x1e8] sm:$0xf0]  ;;  %v12737_v55 = vld [vmem:[%s22656_s7 + $0x360] sm:$0xf] }
 0x612   :  { %8709 = vmatpush.bf16.msra.mxu2 %v12624_v51  ;;  %v12770_v6 = vor.u32 %v13769_v8, %v12769_v38  ;;  %v8791_v21 = vperm.slane %v7688_v37, 0  ;;  %v12404_v18 = vor.u32 %v13736_v31, %v12401_v49  ;;  %v24205_v27 = vrot.slane %v24204_v26, 5  ;;  %v13684_v37 = vld [vmem:[%s22656_s7 + $0xec] sm:$0xf]  ;;  %v13761_v57 = vld [vmem:[%s22656_s7 + $0x36c] sm:$0xf0] }
 0x613   :  { %v8911_v48 = vsel %vm2833_vm6, %v24203_v36, %v8909_v34  ;;  %v8916_v47 = vrot.slane %v8902_v35, 3  ;;  %v8918_v25 = vrot.slane %v8904_v33, 2  ;;  %v21486_v3 = vunpack.c.l.b16 %v8822_v9  ;;  %8314 = vmatpush.bf16.msra.mxu1 %v12340_v54  ;;  %v21535_v35 = vld [vmem:[%s22656_s7 + $0x4a8] sm:$0xff]  ;;  %v12565_v38 = vld [vmem:[%s22656_s7 + $0xd8] sm:$0xf0] }
 0x614   :  { %8330 = vmatpush.bf16.msra.mxu3 %v12420_v62  ;;  %v8913_v14 = vsel %vm2836_vm7, %v24205_v27, %v8911_v48  ;;  %v12576_v56 = vor.u32 %v13683_v50, %v12573_v2  ;;  %v8823_v15 = vpack.c.bf16 %v8791_v21, %v8791_v21  ;;  %v24207_v63 = vrot.slane %v24206_v41, 4  ;;  %9207 = vmatpush.bf16.msra.mxu0 %v12770_v6  ;;  %v13680_v16 = vld [vmem:[%s22656_s7 + $0xcc] sm:$0xf]  ;;  %v13675_v9 = vld [vmem:[%s22656_s7 + $0xa4] sm:$0xf]  ;;  %v24208_v50 = vld [vmem:[#allocation28_spill] sm:$0xff] }
 0x615   :  { %v21499_v20 = vunpack.c.l.b16 %v8824_v5  ;;  %v12324_v28 = vor.u32 %v21447_v1, %v12321_v61  ;;  %v12592_v29 = vor.u32 %v13687_v58, %v12589_v11  ;;  %v21509_v32 = vpack.c.b16 %v8382_v40, %v8382_v40  ;;  %12454 = vmatmul.msk.bf16.vlgmr.msrb.gmra.mxu1 %vm8216_vm14, %v21275_v17  ;;  %v12541_v1 = vld [vmem:[%s22656_s7 + $0xb0] sm:$0xf0]  ;;  %v13708_v49 = vld [vmem:[%s22656_s7 + $0x1bc] sm:$0xf]  ;;  %v12289_v5 = vld [vmem:[%s22656_s7 + $0x1c8] sm:$0xf0] }
 0x616   :  { %v8915_v24 = vsel %vm2839_vm8, %v24207_v63, %v8913_v14  ;;  %8710 = vmatpush.bf16.msra.mxu2 %v12608_v44  ;;  %v12754_v42 = vor.u32 %v13765_v53, %v12753_v23  ;;  %v8906_v51 = vunpack.c.l.b16 %v8823_v15  ;;  %v12202_v4 = vrot.slane %v7427_v7, 9  ;;  %v24209_v2 = vld [vmem:[#allocation68_spill] sm:$0xff]  ;;  %v24211_v48 = vld [vmem:[#allocation70_spill] sm:$0xff]  ;;  %v13676_v27 = vld [vmem:[%s22656_s7 + $0xac] sm:$0xf] }
 0x617   :  { %v8917_v59 = vsel %vm2842_vm9, %v8916_v47, %v8915_v24  ;;  %v21524_v43 = vpack.c.b16 %v21398_v10, %v21398_v10  ;;  %v12584_v0 = vor.u32 %v13684_v37, %v12581_v46  ;;  %v8930_v62 = vrot.slane %v21467_v12, 3  ;;  %8673 = vmatmul.bf16.vlgmr.msrb.gmra.mxu0 %v21509_v32  ;;  %8315 = vmatpush.bf16.msra.mxu1 %v12324_v28  ;;  %v12721_v58 = vld [vmem:[%s22656_s7 + $0x340] sm:$0xf]  ;;  %v13757_v11 = vld [vmem:[%s22656_s7 + $0x34c] sm:$0xf0] }
 0x618   :  { %v8919_v19 = vsel %vm2845_vm10, %v8918_v25, %v8917_v59  ;;  %8331 = vmatpush.bf16.msra.mxu3 %v12404_v18  ;;  %v12560_v10 = vor.u32 %v13679_v22, %v12557_v60  ;;  %v8920_v8 = vrot.slane %v8906_v51, 1  ;;  %v8932_v40 = vrot.slane %v21486_v3, 2  ;;  %9208 = vmatpush.bf16.msra.mxu0 %v12754_v42  ;;  %v24213_v21 = vld [vmem:[#allocation150_spill] sm:$0xff]  ;;  %v24214_v18 = vld [vmem:[#allocation12_spill] sm:$0xff]  ;;  %v12549_v14 = vld [vmem:[%s22656_s7 + $0xb8] sm:$0xf0] }
 0x619   :  { %v8934_v13 = vrot.slane %v21499_v20, 1  ;;  %12649 = vmatmul.msk.bf16.vlgmr.msrb.gmra.mxu2 %vm8216_vm14, %v21524_v43  ;;  %v12308_v34 = vor.u32 %v13712_v52, %v12305_v30  ;;  %v12738_v31 = vor.u32 %v13761_v57, %v12737_v55  ;;  %v9087_v54 = vunpack.c.l.b16 %v21535_v35  ;;  %v24216_v3 = vld [vmem:[#allocation98_spill] sm:$0xff]  ;;  %v12525_v15 = vld [vmem:[%s22656_s7 + $0x90] sm:$0xf0]  ;;  %v13704_v39 = vld [vmem:[%s22656_s7 + $0x19c] sm:$0xf] }
 0x61a   :  { %8711 = vmatpush.bf16.msra.mxu2 %v12592_v29  ;;  %v21563_v61 = vsel %vm2848_vm11, %v8920_v8, %v8919_v19  ;;  %v24210_v33 = vrot.slane %v24209_v2, 4  ;;  %v24212_v12 = vmax.f32 %v24211_v48, 0.0  ;;  %v12568_v6 = vor.u32 %v13680_v16, %v12565_v38  ;;  %v13671_v46 = vld [vmem:[%s22656_s7 + $0x84] sm:$0xf]  ;;  %v12705_v24 = vld [vmem:[%s22656_s7 + $0x320] sm:$0xf] }
 0x61b   :  { %v24215_v23 = vrot.slane %v24214_v18, 6  ;;  %v12544_v26 = vor.u32 %v13675_v9, %v12541_v1  ;;  %v7593_v25 = vmax.f32 %v7427_v7, %v12202_v4  ;;  %8316 = vmatpush.bf16.msra.mxu1 %v12308_v34  ;;  %v12292_v37 = vor.u32 %v13708_v49, %v12289_v5  ;;  %v12273_v7 = vld [vmem:[%s22656_s7 + $0x1a8] sm:$0xf0]  ;;  %v13753_v60 = vld [vmem:[%s22656_s7 + $0x32c] sm:$0xf0]  ;;  %v24223_v1 = vld [vmem:[#allocation38_spill] sm:$0xff] }
 0x61c   :  { %8691 = vmatpush.bf16.msrb.mxu3 %v12576_v56  ;;  %v8929_v36 = vsel %vm2839_vm8, %v24210_v33, %v24208_v50  ;;  %v9322_v44 = vperm.slane %v24212_v12, 0  ;;  %v7434_v56 = vrot.slane %v24216_v3, 6  ;;  %9209 = vmatpush.bf16.msra.mxu0 %v12738_v31  ;;  %v12722_v63 = vor.u32 %v13757_v11, %v12721_v58  ;;  %v12579_v59 = vld [vmem:[%s22656_s7 + $0xe8] sm:$0xf]  ;;  %v13686_v42 = vld [vmem:[%s22656_s7 + $0xf4] sm:$0xf0] }
 0x61d   :  { %v7589_v53 = vmax.f32 %v24215_v23, %v24213_v21  ;;  %v8931_v47 = vsel %vm2842_vm9, %v8930_v62, %v8929_v36  ;;  %v9139_v20 = vpack.c.b16 %v9087_v54, %v9087_v54  ;;  %v12552_v22 = vor.u32 %v13676_v27, %v12549_v14  ;;  %v24217_v52 = vld [vmem:[#allocation63_spill] sm:$0xff]  ;;  %v12533_v62 = vld [vmem:[%s22656_s7 + $0x98] sm:$0xf0]  ;;  %v13667_v34 = vld [vmem:[%s22656_s7 + $0x64] sm:$0xf] }
 0x61e   :  { %8743 = vmatpush.bf16.msrb.mxu2 %v12584_v0  ;;  %v8933_v41 = vsel %vm2845_vm10, %v8932_v40, %v8931_v47  ;;  %v9354_v29 = vpack.c.bf16 %v9322_v44, %v9322_v44  ;;  %v24218_v30 = vmax.f32 %v24217_v52, 0.0  ;;  %v24219_v19 = vld [vmem:[#allocation103_spill] sm:$0xff]  ;;  %v12528_v55 = vor.u32 %v13671_v46, %v12525_v15  ;;  %v12509_v9 = vld [vmem:[%s22656_s7 + $0x70] sm:$0xf0]  ;;  %v13682_v36 = vld [vmem:[%s22656_s7 + $0xd4] sm:$0xf0] }
 0x61f   :  { %v21607_v28 = vsel %vm2848_vm11, %v8934_v13, %v8933_v41  ;;  %v24220_v4 = vmax.f32 %v24219_v19, 0.0  ;;  %v13672_v57 = vld [vmem:[%s22656_s7 + $0x8c] sm:$0xf]  ;;  %v12206_v40 = vrot.slane %v7434_v56, 9  ;;  %8317 = vmatpush.bf16.msra.mxu1 %v12292_v37  ;;  %v12276_v13 = vor.u32 %v13704_v39, %v12273_v7  ;;  %v12563_v33 = vld [vmem:[%s22656_s7 + $0xc8] sm:$0xf] }
 0x620   :  { %8692 = vmatpush.bf16.msrb.mxu3 %v12560_v10  ;;  %v21620_v51 = vperm.slane %v24218_v30, 0  ;;  %v24221_v10 = vld [vmem:[#allocation64_spill] sm:$0xff]  ;;  %v24222_v38 = vld [vmem:[#allocation159_spill] sm:$0xff]  ;;  %v7441_v31 = vrot.slane %v24223_v1, 6  ;;  %9210 = vmatpush.bf16.msra.mxu0 %v12722_v63  ;;  %v12706_v49 = vor.u32 %v13753_v60, %v12705_v24  ;;  %v12580_v5 = vor.u32 %v13686_v42, %v12579_v59  ;;  %v12517_v44 = vld [vmem:[%s22656_s7 + $0x78] sm:$0xf0] }
 0x621   :  { %v21624_v0 = vperm.slane %v24220_v4, 0  ;;  %v21633_v16 = vadd.f32 %v24221_v10, %v7589_v53  ;;  %v21636_v8 = vadd.f32 %v24222_v38, %v7593_v25  ;;  %v9199_v54 = vsel %vm8220_vm13, %v9139_v20, 0  ;;  %v13668_v48 = vld [vmem:[%s22656_s7 + $0x6c] sm:$0xf]  ;;  %v13798_v58 = vld [vmem:[%s22656_s7 + $0x494] sm:$0xf0]  ;;  %12456 = vmatmul.msk.bf16.vlgmr.msra.gmra.mxu3 %vm8216_vm14, %v21275_v17 }
 0x622   :  { %8744 = vmatpush.bf16.msrb.mxu2 %v12568_v6  ;;  %v21646_v50 = vunpack.c.l.b16 %v9354_v29  ;;  %v12536_v2 = vor.u32 %v13672_v57, %v12533_v62  ;;  %v12512_v12 = vor.u32 %v13667_v34, %v12509_v9  ;;  %v12889_v6 = vld [vmem:[%s22656_s7 + $0x488] sm:$0xf]  ;;  %v13663_v18 = vld [vmem:[%s22656_s7 + $0x44] sm:$0xf]  ;;  %v12493_v23 = vld [vmem:[%s22656_s7 + $0x50] sm:$0xf0]  ;;  %v7597_v14 = vmax.f32 %v7434_v56, %v12206_v40 }
 0x623   :  { %v7677_v11 = vmax.f32 %v21633_v16, 0.0  ;;  %v7681_v21 = vmax.f32 %v21636_v8, 0.0  ;;  %8318 = vmatpush.bf16.msra.mxu1 %v12276_v13  ;;  %v24224_v53 = vld [vmem:[#allocation35_spill] sm:$0xff]  ;;  %v12210_v47 = vrot.slane %v7441_v31, 9  ;;  %v12564_v25 = vor.u32 %v13682_v36, %v12563_v33  ;;  %v13678_v56 = vld [vmem:[%s22656_s7 + $0xb4] sm:$0xf0] }
 0x624   :  { %8693 = vmatpush.bf16.msrb.mxu3 %v12544_v26  ;;  %v24225_v26 = vmax.f32 %v24224_v53, 0.0  ;;  %9211 = vmatpush.bf16.msra.mxu0 %v12706_v49  ;;  %v12547_v17 = vld [vmem:[%s22656_s7 + $0xa8] sm:$0xf]  ;;  %v9451_v3 = vrot.slane %v21646_v50, 7  ;;  %v21686_v37 = vpack.c.b16 %v21563_v61, %v21563_v61  ;;  %v12520_v46 = vor.u32 %v13668_v48, %v12517_v44  ;;  %v13664_v41 = vld [vmem:[%s22656_s7 + $0x4c] sm:$0xf] }
 0x625   :  { %v12890_v15 = vor.u32 %v13798_v58, %v12889_v6  ;;  %v21697_v63 = vld [vmem:[%s22656_s7 + $0x188] sm:$0xff]  ;;  %v12496_v61 = vor.u32 %v13663_v18, %v12493_v23  ;;  %v12501_v39 = vld [vmem:[%s22656_s7 + $0x58] sm:$0xf0]  ;;  %v13794_v24 = vld [vmem:[%s22656_s7 + $0x474] sm:$0xf0]  ;;  %v9356_v20 = vpack.c.bf16 %v21620_v51, %v21620_v51  ;;  %v9328_v29 = vperm.slane %v7677_v11, 0 }
 0x626   :  { %8745 = vmatpush.bf16.msrb.mxu2 %v12552_v22  ;;  %v21678_v27 = vperm.slane %v24225_v26, 0  ;;  %8319 = vmatmul.bf16.vlgmr.msra.gmra.mxu1 %v21326_v45  ;;  %v12873_v7 = vld [vmem:[%s22656_s7 + $0x468] sm:$0xf]  ;;  %v9358_v45 = vpack.c.bf16 %v21624_v0, %v21624_v0  ;;  %v21717_v22 = vperm.slane %v7681_v21, 0  ;;  %v13659_v60 = vld [vmem:[%s22656_s7 + $0x24] sm:$0xf]  ;;  %v21729_v42 = vadd.f32 %v24221_v10, %v7597_v14 }
 0x627   :  { %8717 = vmatpush.bf16.msrb.mxu1 %v12580_v5  ;;  %9212 = vmatmul.bf16.vlgmr.msra.gmra.mxu0 %v21686_v37  ;;  %v12477_v59 = vld [vmem:[%s22656_s7 + $0x30] sm:$0xf0]  ;;  %v7601_v52 = vmax.f32 %v7441_v31, %v12210_v47  ;;  %v12548_v30 = vor.u32 %v13678_v56, %v12547_v17  ;;  %v8549_v51 = vunpack.c.h.b16 %v21697_v63  ;;  %v21735_v19 = vld [vmem:[%s22656_s7 + $0x4a0] sm:$0xff]  ;;  %v12504_v4 = vor.u32 %v13664_v41, %v12501_v39  ;;  %v13674_v57 = vld [vmem:[%s22656_s7 + $0x94] sm:$0xf0] }
 0x628   :  { %8694 = vmatpush.bf16.msrb.mxu3 %v12528_v55  ;;  %9272 = vmatpush.bf16.msrb.mxu0 %v9199_v54  ;;  %v12874_v0 = vor.u32 %v13794_v24, %v12873_v7  ;;  %v12531_v55 = vld [vmem:[%s22656_s7 + $0x88] sm:$0xf]  ;;  %v13660_v62 = vld [vmem:[%s22656_s7 + $0x2c] sm:$0xf]  ;;  %v12480_v10 = vor.u32 %v13659_v60, %v12477_v59  ;;  %v12485_v40 = vld [vmem:[%s22656_s7 + $0x38] sm:$0xf0]  ;;  %v21755_v9 = vunpack.c.l.b16 %v9356_v20  ;;  %v21757_v1 = vunpack.c.l.b16 %v9358_v45 }
 0x629   :  { %12650 = vmatmul.msk.bf16.vlgmr.msra.gmra.mxu2 %vm8216_vm14, %v21524_v43  ;;  %v12857_v13 = vld [vmem:[%s22656_s7 + $0x448] sm:$0xf]  ;;  %v13790_v34 = vld [vmem:[%s22656_s7 + $0x454] sm:$0xf0]  ;;  %v9360_v31 = vpack.c.bf16 %v9328_v29, %v9328_v29  ;;  %v13655_v49 = vld [vmem:[%s22656_s7 + $0x4] sm:$0xf]  ;;  %v9086_v54 = vunpack.c.h.b16 %v21735_v19  ;;  %v21768_v33 = vadd.f32 %v24222_v38, %v7601_v52  ;;  %v12532_v36 = vor.u32 %v13674_v57, %v12531_v55 }
 0x62a   :  { %8746 = vmatpush.bf16.msrb.mxu2 %v12536_v2  ;;  %v12461_v5 = vld [vmem:[%s22656_s7 + $0x10] sm:$0xf0]  ;;  %v7685_v2 = vmax.f32 %v21729_v42, 0.0  ;;  %v8601_v48 = vpack.c.b16 %v8549_v51, %v8549_v51  ;;  %v12858_v44 = vor.u32 %v13790_v34, %v12857_v13  ;;  %v12515_v6 = vld [vmem:[%s22656_s7 + $0x68] sm:$0xf]  ;;  %v9352_v18 = vpack.c.bf16 %v21678_v27, %v21678_v27 }
 0x62b   :  { %8718 = vmatpush.bf16.msrb.mxu1 %v12564_v25  ;;  %v13670_v58 = vld [vmem:[%s22656_s7 + $0x74] sm:$0xf0]  ;;  %v13656_v38 = vld [vmem:[%s22656_s7 + $0xc] sm:$0xf]  ;;  %v9362_v23 = vpack.c.bf16 %v21717_v22, %v21717_v22  ;;  %v12464_v53 = vor.u32 %v13655_v49, %v12461_v5  ;;  %v12469_v26 = vld [vmem:[%s22656_s7 + $0x18] sm:$0xf0]  ;;  %v21794_v17 = vunpack.c.l.b16 %v9360_v31  ;;  %v21844_v16 = vpack.c.b16 %v21607_v28, %v21607_v28 }
 0x62c   :  { %8695 = vmatpush.bf16.msrb.mxu3 %v12512_v12  ;;  %9273 = vmatpush.bf16.msrb.mxu0 %v12890_v15  ;;  %v12488_v12 = vor.u32 %v13660_v62, %v12485_v40  ;;  %v12841_v14 = vld [vmem:[%s22656_s7 + $0x428] sm:$0xf]  ;;  %v13786_v47 = vld [vmem:[%s22656_s7 + $0x434] sm:$0xf0]  ;;  %v9453_v25 = vrot.slane %v21755_v9, 6  ;;  %v9455_v27 = vrot.slane %v21757_v1, 5  ;;  %v12516_v39 = vor.u32 %v13670_v58, %v12515_v6 }
 0x62d   :  { %v13063_v15 = vld [vmem:[%s22656_s7 + $0x590] sm:$0xf]  ;;  %v13829_v56 = vld [vmem:[%s22656_s7 + $0x59c] sm:$0xf0]  ;;  %v9332_v41 = vperm.slane %v7685_v2, 0  ;;  %v8663_v7 = vsel %vm8220_vm13, %v8601_v48, 0  ;;  %v12472_v24 = vor.u32 %v13656_v38, %v12469_v26  ;;  %v12842_v20 = vor.u32 %v13786_v47, %v12841_v14 }
 0x62e   :  { %8747 = vmatpush.bf16.msrb.mxu2 %v12520_v46  ;;  %v9138_v46 = vpack.c.b16 %v9086_v54, %v9086_v54  ;;  %v12499_v45 = vld [vmem:[%s22656_s7 + $0x48] sm:$0xf]  ;;  %v13666_v29 = vld [vmem:[%s22656_s7 + $0x54] sm:$0xf0]  ;;  %v13700_v22 = vld [vmem:[%s22656_s7 + $0x16c] sm:$0xf]  ;;  %v21815_v60 = vunpack.c.l.b16 %v9362_v23  ;;  %v13064_v59 = vor.u32 %v13829_v56, %v13063_v15  ;;  %v8548_v28 = vunpack.c.l.b16 %v21697_v63 }
 0x62f   :  { %8719 = vmatpush.bf16.msrb.mxu1 %v12548_v30  ;;  %v12645_v52 = vld [vmem:[%s22656_s7 + $0x178] sm:$0xf0]  ;;  %v13795_v30 = vld [vmem:[%s22656_s7 + $0x484] sm:$0xf]  ;;  %v12883_v51 = vld [vmem:[%s22656_s7 + $0x490] sm:$0xf0] }
 0x630   :  { %8696 = vmatpush.bf16.msrb.mxu3 %v12496_v61  ;;  %9274 = vmatpush.bf16.msrb.mxu0 %v12874_v0  ;;  %v7689_v61 = vmax.f32 %v21768_v33, 0.0  ;;  %v21828_v0 = vperm.slane %v7677_v11, 2  ;;  %v9196_v55 = vsel %vm8220_vm13, %v9138_v46, 0  ;;  %v13047_v57 = vld [vmem:[%s22656_s7 + $0x570] sm:$0xf]  ;;  %v21840_v40 = vperm.slane %v7681_v21, 2 }
 0x631   :  { %v13825_v62 = vld [vmem:[%s22656_s7 + $0x57c] sm:$0xf0]  ;;  %v12500_v11 = vor.u32 %v13666_v29, %v12499_v45  ;;  %v12483_v13 = vld [vmem:[%s22656_s7 + $0x28] sm:$0xf]  ;;  %v12648_v34 = vor.u32 %v13700_v22, %v12645_v52  ;;  %v12886_v9 = vor.u32 %v13795_v30, %v12883_v51  ;;  %v13662_v8 = vld [vmem:[%s22656_s7 + $0x34] sm:$0xf0] }
 0x632   :  { %8748 = vmatpush.bf16.msrb.mxu2 %v12504_v4  ;;  %v9435_v4 = vunpack.c.l.b16 %v9352_v18  ;;  %v13696_v21 = vld [vmem:[%s22656_s7 + $0x14c] sm:$0xf]  ;;  %v9334_v31 = vperm.slane %v7689_v61, 0  ;;  %v13048_v49 = vor.u32 %v13825_v62, %v13047_v57  ;;  %v12629_v5 = vld [vmem:[%s22656_s7 + $0x158] sm:$0xf0]  ;;  %v9459_v63 = vrot.slane %v21815_v60, 3 }
 0x633   :  { %8720 = vmatpush.bf16.msrb.mxu1 %v12532_v36  ;;  %v13791_v54 = vld [vmem:[%s22656_s7 + $0x464] sm:$0xf]  ;;  %v9364_v36 = vpack.c.bf16 %v9332_v41, %v9332_v41  ;;  %v13031_v6 = vld [vmem:[%s22656_s7 + $0x550] sm:$0xf]  ;;  %v13821_v50 = vld [vmem:[%s22656_s7 + $0x55c] sm:$0xf0]  ;;  %v12484_v18 = vor.u32 %v13662_v8, %v12483_v13  ;;  %v12632_v26 = vor.u32 %v13696_v21, %v12629_v5 }
 0x634   :  { %8697 = vmatpush.bf16.msrb.mxu3 %v12480_v10  ;;  %9275 = vmatpush.bf16.msrb.mxu0 %v12858_v44  ;;  %v9457_v10 = vrot.slane %v21794_v17, 4  ;;  %v9452_v48 = vsel %vm2830_vm5, %v9451_v3, %v9435_v4  ;;  %v12867_v44 = vld [vmem:[%s22656_s7 + $0x470] sm:$0xf0]  ;;  %v9366_v3 = vpack.c.bf16 %v9334_v31, %v9334_v31  ;;  %v9333_v38 = vperm.slane %v7685_v2, 2  ;;  %v12467_v14 = vld [vmem:[%s22656_s7 + $0x8] sm:$0xf] }
 0x635   :  { %v9454_v58 = vsel %vm2833_vm6, %v9453_v25, %v9452_v48  ;;  %v9447_v23 = vunpack.c.l.b16 %v9364_v36  ;;  %v13658_v42 = vld [vmem:[%s22656_s7 + $0x14] sm:$0xf0]  ;;  %v8600_v2 = vpack.c.b16 %v8548_v28, %v8548_v28  ;;  %v12870_v1 = vor.u32 %v13791_v54, %v12867_v44  ;;  %v12613_v46 = vld [vmem:[%s22656_s7 + $0x138] sm:$0xf0]  ;;  %v13015_v45 = vld [vmem:[%s22656_s7 + $0x530] sm:$0xf] }
 0x636   :  { %8749 = vmatpush.bf16.msrb.mxu2 %v12488_v12  ;;  %v9361_v12 = vpack.c.bf16 %v21828_v0, %v21828_v0  ;;  %v9449_v47 = vunpack.c.l.b16 %v9366_v3  ;;  %v13032_v17 = vor.u32 %v13821_v50, %v13031_v6  ;;  %v9335_v41 = vperm.slane %v7689_v61, 2  ;;  %v13817_v33 = vld [vmem:[%s22656_s7 + $0x53c] sm:$0xf0]  ;;  %v13702_v0 = vld [vmem:[%s22656_s7 + $0x174] sm:$0xf0] }
 0x637   :  { %8721 = vmatpush.bf16.msrb.mxu1 %v12516_v39  ;;  %v9461_v56 = vrot.slane %v9447_v23, 2  ;;  %v13787_v39 = vld [vmem:[%s22656_s7 + $0x444] sm:$0xf]  ;;  %v12468_v29 = vor.u32 %v13658_v42, %v12467_v14  ;;  %v8660_v22 = vsel %vm8220_vm13, %v8600_v2, 0  ;;  %v9365_v51 = vpack.c.bf16 %v9333_v38, %v9333_v38  ;;  %v12597_v57 = vld [vmem:[%s22656_s7 + $0x118] sm:$0xf0] }
 0x638   :  { %8698 = vmatpush.bf16.msrb.mxu3 %v12464_v53  ;;  %9276 = vmatpush.bf16.msrb.mxu0 %v12842_v20  ;;  %v9456_v53 = vsel %vm2836_vm7, %v9455_v27, %v9454_v58  ;;  %v13692_v27 = vld [vmem:[%s22656_s7 + $0x12c] sm:$0xf]  ;;  %v9363_v20 = vpack.c.bf16 %v21840_v40, %v21840_v40  ;;  %v21927_v30 = vunpack.c.l.b16 %v9361_v12  ;;  %v9367_v62 = vpack.c.bf16 %v9335_v41, %v9335_v41  ;;  %v13783_v40 = vld [vmem:[%s22656_s7 + $0x424] sm:$0xf]  ;;  %v12999_v13 = vld [vmem:[%s22656_s7 + $0x510] sm:$0xf] }
 0x639   :  { %v9458_v25 = vsel %vm2839_vm8, %v9457_v10, %v9456_v53  ;;  %v12616_v60 = vor.u32 %v13692_v27, %v12613_v46  ;;  %v13016_v10 = vor.u32 %v13817_v33, %v13015_v45  ;;  %v12819_v8 = vld [vmem:[%s22656_s7 + $0x410] sm:$0xf0]  ;;  %v13780_v31 = vld [vmem:[%s22656_s7 + $0x40c] sm:$0xf]  ;;  %v9448_v54 = vunpack.c.l.b16 %v9365_v51  ;;  %v12627_v6 = vld [vmem:[%s22656_s7 + $0x148] sm:$0xf] }
 0x63a   :  { %8750 = vmatpush.bf16.msrb.mxu2 %v12472_v24  ;;  %v9460_v15 = vsel %vm2842_vm9, %v9459_v63, %v9458_v25  ;;  %v9463_v24 = vrot.slane %v9449_v47, 1  ;;  %v9446_v21 = vunpack.c.l.b16 %v9363_v20  ;;  %v9471_v5 = vrot.slane %v21927_v30, 4  ;;  %v13698_v50 = vld [vmem:[%s22656_s7 + $0x154] sm:$0xf0]  ;;  %v12983_v3 = vld [vmem:[%s22656_s7 + $0x4f0] sm:$0xf] }
 0x63b   :  { %8699 = vmatmul.bf16.vlgmr.msrb.gmra.mxu3 %v21509_v32  ;;  %12897 = vmatmul.msk.bf16.vlgmr.msrb.gmra.mxu0 %vm8216_vm14, %v21844_v16  ;;  %v9462_v61 = vsel %vm2845_vm10, %v9461_v56, %v9460_v15  ;;  %v9450_v63 = vunpack.c.l.b16 %v9367_v62  ;;  %v13809_v38 = vld [vmem:[%s22656_s7 + $0x4fc] sm:$0xf0]  ;;  %v12803_v23 = vld [vmem:[%s22656_s7 + $0x3f0] sm:$0xf0]  ;;  %v9475_v14 = vrot.slane %v9448_v54, 2  ;;  %v12628_v42 = vor.u32 %v13698_v50, %v12627_v6  ;;  %v22000_v46 = vld [vmem:[%s22656_s7 + $0x638] sm:$0xff] }
 0x63c   :  { %8759 = vmatpush.bf16.msra.mxu3 %v8663_v7  ;;  %9747 = vmatpush.bf16.msra.mxu0 %v13064_v59  ;;  %v12851_v7 = vld [vmem:[%s22656_s7 + $0x450] sm:$0xf0]  ;;  %v12643_v59 = vld [vmem:[%s22656_s7 + $0x168] sm:$0xf]  ;;  %v21925_v52 = vsel %vm2848_vm11, %v9463_v24, %v9462_v61  ;;  %v9473_v53 = vrot.slane %v9446_v21, 3  ;;  %v12984_v25 = vor.u32 %v13809_v38, %v12983_v3  ;;  %vm10250_vm0 = vcmask 818176  }
 0x63d   :  { %8751 = vmatmul.bf16.vlgmr.msrb.gmra.mxu2 %v21509_v32  ;;  %8722 = vmatpush.bf16.msrb.mxu1 %v12500_v11  ;;  %v12854_v4 = vor.u32 %v13787_v39, %v12851_v7  ;;  %v12835_v11 = vld [vmem:[%s22656_s7 + $0x430] sm:$0xf0]  ;;  %v12644_v36 = vor.u32 %v13702_v0, %v12643_v59  ;;  %v12611_v2 = vld [vmem:[%s22656_s7 + $0x128] sm:$0xf]  ;;  %v9477_v47 = vrot.slane %v9450_v63, 1  ;;  %v9085_v7 = vunpack.c.l.b16 %v21735_v19 }
 0x63e   :  { %9246 = vmatpush.bf16.msra.mxu2 %v9196_v55  ;;  %v13688_v55 = vld [vmem:[%s22656_s7 + $0x10c] sm:$0xf]  ;;  %v12838_v48 = vor.u32 %v13783_v40, %v12835_v11  ;;  %v12967_v27 = vld [vmem:[%s22656_s7 + $0x4d0] sm:$0xf]  ;;  %v13805_v56 = vld [vmem:[%s22656_s7 + $0x4dc] sm:$0xf0]  ;;  %v9630_v19 = vunpack.c.l.b16 %v22000_v46  ;;  %v22082_v3 = vpack.c.b16 %v21925_v52, %v21925_v52 }
 0x63f   :  { %v12600_v28 = vor.u32 %v13688_v55, %v12597_v57  ;;  %v13771_v41 = vld [vmem:[%s22656_s7 + $0x3c4] sm:$0xf]  ;;  %v12787_v39 = vld [vmem:[%s22656_s7 + $0x3d0] sm:$0xf0]  ;;  %v24226_v24 = vld [vmem:[#allocation67_spill] sm:$0xff]  ;;  %v9137_v62 = vpack.c.b16 %v9085_v7, %v9085_v7 }
 0x640   :  { %8760 = vmatpush.bf16.msra.mxu3 %v12648_v34  ;;  %9748 = vmatpush.bf16.msra.mxu0 %v13048_v49  ;;  %v13813_v34 = vld [vmem:[%s22656_s7 + $0x51c] sm:$0xf0]  ;;  %v12827_v49 = vld [vmem:[%s22656_s7 + $0x418] sm:$0xf0]  ;;  %v9472_v20 = vsel %vm2839_vm8, %v9471_v5, %v24226_v24  ;;  %v13772_v45 = vld [vmem:[%s22656_s7 + $0x3cc] sm:$0xf]  ;;  %v12790_v59 = vor.u32 %v13771_v41, %v12787_v39 }
 0x641   :  { %8723 = vmatpush.bf16.msrb.mxu1 %v12484_v18  ;;  %v13000_v12 = vor.u32 %v13813_v34, %v12999_v13  ;;  %v12830_v58 = vor.u32 %v13780_v31, %v12827_v49  ;;  %v13775_v18 = vld [vmem:[%s22656_s7 + $0x3e4] sm:$0xf]  ;;  %v12795_v33 = vld [vmem:[%s22656_s7 + $0x3d8] sm:$0xf0]  ;;  %v9474_v61 = vsel %vm2842_vm9, %v9473_v53, %v9472_v20  ;;  %v12595_v30 = vld [vmem:[%s22656_s7 + $0x108] sm:$0xf] }
 0x642   :  { %9247 = vmatpush.bf16.msra.mxu2 %v12886_v9  ;;  %v13779_v9 = vld [vmem:[%s22656_s7 + $0x404] sm:$0xf]  ;;  %v13690_v51 = vld [vmem:[%s22656_s7 + $0x114] sm:$0xf0]  ;;  %v12798_v0 = vor.u32 %v13772_v45, %v12795_v33  ;;  %v12951_v55 = vld [vmem:[%s22656_s7 + $0x4b0] sm:$0xf] }
 0x643   :  { %v12822_v44 = vor.u32 %v13779_v9, %v12819_v8  ;;  %v13801_v57 = vld [vmem:[%s22656_s7 + $0x4bc] sm:$0xf0]  ;;  %v12771_v40 = vld [vmem:[%s22656_s7 + $0x3b0] sm:$0xf0]  ;;  %v13768_v11 = vld [vmem:[%s22656_s7 + $0x3ac] sm:$0xf]  ;;  %v12596_v34 = vor.u32 %v13690_v51, %v12595_v30  ;;  %v9682_v9 = vpack.c.b16 %v9630_v19, %v9630_v19 }
 0x644   :  { %8761 = vmatpush.bf16.msra.mxu3 %v12632_v26  ;;  %9749 = vmatpush.bf16.msra.mxu0 %v13032_v17  ;;  %v13776_v26 = vld [vmem:[%s22656_s7 + $0x3ec] sm:$0xf]  ;;  %v13694_v17 = vld [vmem:[%s22656_s7 + $0x134] sm:$0xf0]  ;;  %v12779_v13 = vld [vmem:[%s22656_s7 + $0x3b8] sm:$0xf0]  ;;  %v12952_v8 = vor.u32 %v13801_v57, %v12951_v55 }
 0x645   :  { %8724 = vmatpush.bf16.msrb.mxu1 %v12468_v29  ;;  %v12612_v29 = vor.u32 %v13694_v17, %v12611_v2  ;;  %v12881_v21 = vld [vmem:[%s22656_s7 + $0x480] sm:$0xf]  ;;  %v12782_v49 = vor.u32 %v13768_v11, %v12779_v13  ;;  %v13797_v5 = vld [vmem:[%s22656_s7 + $0x48c] sm:$0xf0]  ;;  %v13763_v54 = vld [vmem:[%s22656_s7 + $0x384] sm:$0xf] }
 0x646   :  { %9248 = vmatpush.bf16.msra.mxu2 %v12870_v1  ;;  %v12806_v1 = vor.u32 %v13775_v18, %v12803_v23  ;;  %v12763_v63 = vld [vmem:[%s22656_s7 + $0x398] sm:$0xf0]  ;;  %v13846_v6 = vld [vmem:[%s22656_s7 + $0x624] sm:$0xf0]  ;;  %v12882_v50 = vor.u32 %v13797_v5, %v12881_v21  ;;  %v12865_v18 = vld [vmem:[%s22656_s7 + $0x460] sm:$0xf] }
 0x647   :  { %v13793_v23 = vld [vmem:[%s22656_s7 + $0x46c] sm:$0xf0]  ;;  %v13759_v53 = vld [vmem:[%s22656_s7 + $0x364] sm:$0xf]  ;;  %v12723_v41 = vld [vmem:[%s22656_s7 + $0x350] sm:$0xf0] }
 0x648   :  { %8762 = vmatpush.bf16.msra.mxu3 %v12616_v60  ;;  %9750 = vmatpush.bf16.msra.mxu0 %v13016_v10  ;;  %v12968_v60 = vor.u32 %v13805_v56, %v12967_v27  ;;  %v13767_v10 = vld [vmem:[%s22656_s7 + $0x3a4] sm:$0xf]  ;;  %v12866_v2 = vor.u32 %v13793_v23, %v12865_v18  ;;  %v13789_v17 = vld [vmem:[%s22656_s7 + $0x44c] sm:$0xf0]  ;;  %v13756_v39 = vld [vmem:[%s22656_s7 + $0x34c] sm:$0xf] }
 0x649   :  { %8733 = vmatpush.bf16.msra.mxu1 %v8660_v22  ;;  %v9476_v22 = vsel %vm2845_vm10, %v9475_v14, %v9474_v61  ;;  %v12774_v31 = vor.u32 %v13767_v10, %v12771_v40  ;;  %v12747_v14 = vld [vmem:[%s22656_s7 + $0x378] sm:$0xf0]  ;;  %v13755_v27 = vld [vmem:[%s22656_s7 + $0x344] sm:$0xf]  ;;  %v13103_v24 = vld [vmem:[%s22656_s7 + $0x5d8] sm:$0xf]  ;;  %v9088_v61 = vunpack.c.h.b16 %v21535_v35 }
 0x64a   :  { %9249 = vmatpush.bf16.msra.mxu2 %v12854_v4  ;;  %8725 = vmatmul.bf16.vlgmr.msrb.gmra.mxu1 %v21509_v32  ;;  %v12811_v32 = vld [vmem:[%s22656_s7 + $0x3f8] sm:$0xf0]  ;;  %v22034_v4 = vsel %vm2848_vm11, %v9477_v47, %v9476_v22  ;;  %v12849_v47 = vld [vmem:[%s22656_s7 + $0x440] sm:$0xf]  ;;  %v13838_v20 = vld [vmem:[%s22656_s7 + $0x5e4] sm:$0xf0]  ;;  %v12726_v19 = vor.u32 %v13755_v27, %v12723_v41 }
 0x64b   :  { %v12814_v15 = vor.u32 %v13776_v26, %v12811_v32  ;;  %v12739_v26 = vld [vmem:[%s22656_s7 + $0x370] sm:$0xf0]  ;;  %v13760_v32 = vld [vmem:[%s22656_s7 + $0x36c] sm:$0xf]  ;;  %v12731_v7 = vld [vmem:[%s22656_s7 + $0x358] sm:$0xf0]  ;;  %v12850_v45 = vor.u32 %v13789_v17, %v12849_v47  ;;  %v13104_v35 = vor.u32 %v13838_v20, %v13103_v24  ;;  %v9140_v11 = vpack.c.b16 %v9088_v61, %v9088_v61 }
 0x64c   :  { %8763 = vmatpush.bf16.msra.mxu3 %v12600_v28  ;;  %9751 = vmatpush.bf16.msra.mxu0 %v13000_v12  ;;  %v9193_v28 = vsel %vm8220_vm13, %v9137_v62, 0  ;;  %v9742_v12 = vsel %vm8220_vm13, %v9682_v9, 0  ;;  %v12833_v33 = vld [vmem:[%s22656_s7 + $0x420] sm:$0xf]  ;;  %v12734_v22 = vor.u32 %v13756_v39, %v12731_v7  ;;  %v12707_v30 = vld [vmem:[%s22656_s7 + $0x330] sm:$0xf0] }
 0x64d   :  { %8734 = vmatpush.bf16.msra.mxu1 %v12644_v36  ;;  %v12755_v36 = vld [vmem:[%s22656_s7 + $0x390] sm:$0xf0]  ;;  %v13752_v51 = vld [vmem:[%s22656_s7 + $0x32c] sm:$0xf]  ;;  %v13087_v55 = vld [vmem:[%s22656_s7 + $0x5b8] sm:$0xf] }
 0x64e   :  { %9250 = vmatpush.bf16.msra.mxu2 %v12838_v48  ;;  %v13764_v48 = vld [vmem:[%s22656_s7 + $0x38c] sm:$0xf]  ;;  %v13834_v57 = vld [vmem:[%s22656_s7 + $0x5c4] sm:$0xf0]  ;;  %v13782_v10 = vld [vmem:[%s22656_s7 + $0x414] sm:$0xf0] }
 0x64f   :  { %12652 = vmatmul.msk.bf16.vlgmr.msra.gmra.mxu3 %vm8216_vm14, %v21524_v43  ;;  %v12766_v38 = vor.u32 %v13764_v48, %v12763_v63  ;;  %v12825_v62 = vld [vmem:[%s22656_s7 + $0x408] sm:$0xf]  ;;  %v12891_v5 = vld [vmem:[%s22656_s7 + $0x498] sm:$0xf0]  ;;  %v13843_v48 = vld [vmem:[%s22656_s7 + $0x614] sm:$0xf] }
 0x650   :  { %9230 = vmatpush.bf16.msrb.mxu3 %v12822_v44  ;;  %9752 = vmatpush.bf16.msra.mxu0 %v12984_v25  ;;  %v13135_v44 = vld [vmem:[%s22656_s7 + $0x618] sm:$0xf]  ;;  %v12742_v25 = vor.u32 %v13759_v53, %v12739_v26  ;;  %v12826_v21 = vor.u32 %v13782_v10, %v12825_v62  ;;  %v13129_v63 = vld [vmem:[%s22656_s7 + $0x620] sm:$0xf0]  ;;  %v13792_v18 = vld [vmem:[%s22656_s7 + $0x46c] sm:$0xf] }
 0x651   :  { %12896 = vmatmul.msk.bf16.vlgmr.msra.gmra.mxu2 %vm8216_vm14, %v21844_v16  ;;  %8735 = vmatpush.bf16.msra.mxu1 %v12628_v42  ;;  %v13136_v52 = vor.u32 %v13846_v6, %v13135_v44  ;;  %v13119_v42 = vld [vmem:[%s22656_s7 + $0x5f8] sm:$0xf]  ;;  %v22194_v44 = vpack.c.b16 %v22034_v4, %v22034_v4  ;;  %v12875_v4 = vld [vmem:[%s22656_s7 + $0x478] sm:$0xf0]  ;;  %v13839_v23 = vld [vmem:[%s22656_s7 + $0x5f4] sm:$0xf] }
 0x652   :  { %9282 = vmatpush.bf16.msrb.mxu2 %v12830_v58  ;;  %v12758_v58 = vor.u32 %v13763_v54, %v12755_v36  ;;  %v9202_v54 = vsel %vm8220_vm13, %v9140_v11, 0  ;;  %v13113_v53 = vld [vmem:[%s22656_s7 + $0x600] sm:$0xf0]  ;;  %v12878_v26 = vor.u32 %v13792_v18, %v12875_v4  ;;  %v13835_v47 = vld [vmem:[%s22656_s7 + $0x5d4] sm:$0xf] }
 0x653   :  { %v12761_v17 = vld [vmem:[%s22656_s7 + $0x388] sm:$0xf]  ;;  %v13766_v41 = vld [vmem:[%s22656_s7 + $0x394] sm:$0xf0]  ;;  %v13784_v39 = vld [vmem:[%s22656_s7 + $0x42c] sm:$0xf] }
 0x654   :  { %9231 = vmatpush.bf16.msrb.mxu3 %v12806_v1  ;;  %9753 = vmatpush.bf16.msra.mxu0 %v12968_v60  ;;  %v12750_v1 = vor.u32 %v13760_v32, %v12747_v14  ;;  %v13785_v60 = vld [vmem:[%s22656_s7 + $0x42c] sm:$0xf0]  ;;  %v13116_v32 = vor.u32 %v13839_v23, %v13113_v53  ;;  %v12777_v14 = vld [vmem:[%s22656_s7 + $0x3a8] sm:$0xf]  ;;  %v12843_v7 = vld [vmem:[%s22656_s7 + $0x438] sm:$0xf0] }
 0x655   :  { %8736 = vmatpush.bf16.msra.mxu1 %v12612_v29  ;;  %v12834_v40 = vor.u32 %v13785_v60, %v12833_v33  ;;  %v13831_v24 = vld [vmem:[%s22656_s7 + $0x5b4] sm:$0xf]  ;;  %v13081_v20 = vld [vmem:[%s22656_s7 + $0x5c0] sm:$0xf0]  ;;  %v13828_v61 = vld [vmem:[%s22656_s7 + $0x59c] sm:$0xf] }
 0x656   :  { %9283 = vmatpush.bf16.msrb.mxu2 %v12814_v15  ;;  %v22123_v15 = vld [vmem:[%s22656_s7 + $0x630] sm:$0xff]  ;;  %v13065_v33 = vld [vmem:[%s22656_s7 + $0x5a0] sm:$0xf0]  ;;  %v13084_v60 = vor.u32 %v13831_v24, %v13081_v20  ;;  %v13057_v62 = vld [vmem:[%s22656_s7 + $0x588] sm:$0xf0] }
 0x657   :  { %v9629_v29 = vunpack.c.h.b16 %v22123_v15  ;;  %v13845_v18 = vld [vmem:[%s22656_s7 + $0x61c] sm:$0xf0]  ;;  %v13811_v53 = vld [vmem:[%s22656_s7 + $0x514] sm:$0xf] }
 0x658   :  { %9232 = vmatpush.bf16.msrb.mxu3 %v12790_v59  ;;  %9754 = vmatpush.bf16.msra.mxu0 %v12952_v8  ;;  %v13751_v59 = vld [vmem:[%s22656_s7 + $0x324] sm:$0xf]  ;;  %v13088_v8 = vor.u32 %v13834_v57, %v13087_v55  ;;  %v13824_v57 = vld [vmem:[%s22656_s7 + $0x57c] sm:$0xf] }
 0x659   :  { %8737 = vmatpush.bf16.msra.mxu1 %v12596_v34  ;;  %v9681_v13 = vpack.c.b16 %v9629_v29, %v9629_v29  ;;  %v12710_v34 = vor.u32 %v13751_v59, %v12707_v30  ;;  %v13073_v29 = vld [vmem:[%s22656_s7 + $0x5a8] sm:$0xf0]  ;;  %v13049_v55 = vld [vmem:[%s22656_s7 + $0x580] sm:$0xf0]  ;;  %v13060_v11 = vor.u32 %v13824_v57, %v13057_v62  ;;  %v13833_v57 = vld [vmem:[%s22656_s7 + $0x5bc] sm:$0xf0] }
 0x65a   :  { %9284 = vmatpush.bf16.msrb.mxu2 %v12798_v0  ;;  %v12715_v0 = vld [vmem:[%s22656_s7 + $0x338] sm:$0xf0]  ;;  %v13076_v30 = vor.u32 %v13828_v61, %v13073_v29  ;;  %v13803_v61 = vld [vmem:[%s22656_s7 + $0x4d4] sm:$0xf]  ;;  %v12969_v29 = vld [vmem:[%s22656_s7 + $0x4e0] sm:$0xf0] }
 0x65b   :  { %9755 = vmatmul.bf16.vlgmr.msra.gmra.mxu0 %v22082_v3  ;;  %v12718_v9 = vor.u32 %v13752_v51, %v12715_v0  ;;  %v9739_v36 = vsel %vm8220_vm13, %v9681_v13, 0  ;;  %v13762_v51 = vld [vmem:[%s22656_s7 + $0x374] sm:$0xf0]  ;;  %v13823_v0 = vld [vmem:[%s22656_s7 + $0x574] sm:$0xf] }
 0x65c   :  { %9233 = vmatpush.bf16.msrb.mxu3 %v12774_v31  ;;  %9815 = vmatpush.bf16.msrb.mxu0 %v9742_v12  ;;  %v13778_v31 = vld [vmem:[%s22656_s7 + $0x3f4] sm:$0xf0]  ;;  %v12729_v13 = vld [vmem:[%s22656_s7 + $0x348] sm:$0xf] }
 0x65d   :  { %9220 = vmatpush.bf16.msrb.mxu1 %v9193_v28  ;;  %v12809_v28 = vld [vmem:[%s22656_s7 + $0x3e8] sm:$0xf] }
 0x65e   :  { %9285 = vmatpush.bf16.msrb.mxu2 %v12782_v49  ;;  %12651 = vmatmul.msk.bf16.vlgmr.msra.gmra.mxu1 %vm8216_vm14, %v21524_v43  ;;  %v13842_v43 = vld [vmem:[%s22656_s7 + $0x604] sm:$0xf0]  ;;  %v13796_v49 = vld [vmem:[%s22656_s7 + $0x48c] sm:$0xf]  ;;  %v12810_v12 = vor.u32 %v13778_v31, %v12809_v28  ;;  %v9628_v31 = vunpack.c.l.b16 %v22123_v15  ;;  %v13754_v15 = vld [vmem:[%s22656_s7 + $0x334] sm:$0xf0] }
 0x65f   :  { %v13120_v56 = vor.u32 %v13842_v43, %v13119_v42  ;;  %v12894_v6 = vor.u32 %v13796_v49, %v12891_v5  ;;  %v13770_v42 = vld [vmem:[%s22656_s7 + $0x3b4] sm:$0xf0]  ;;  %v13788_v43 = vld [vmem:[%s22656_s7 + $0x44c] sm:$0xf] }
 0x660   :  { %9234 = vmatpush.bf16.msrb.mxu3 %v12758_v58  ;;  %9816 = vmatpush.bf16.msrb.mxu0 %v13136_v52  ;;  %v12793_v58 = vld [vmem:[%s22656_s7 + $0x3c8] sm:$0xf]  ;;  %v13041_v28 = vld [vmem:[%s22656_s7 + $0x568] sm:$0xf0] }
 0x661   :  { %9221 = vmatpush.bf16.msrb.mxu1 %v12882_v50  ;;  %v13132_v50 = vor.u32 %v13843_v48, %v13129_v63  ;;  %v9680_v48 = vpack.c.b16 %v9628_v31, %v9628_v31  ;;  %v13017_v63 = vld [vmem:[%s22656_s7 + $0x540] sm:$0xf0] }
 0x662   :  { %9286 = vmatpush.bf16.msrb.mxu2 %v12766_v38  ;;  %v13774_v38 = vld [vmem:[%s22656_s7 + $0x3d4] sm:$0xf0] }
 0x663   :  { %v12794_v52 = vor.u32 %v13774_v38, %v12793_v58  ;;  %v13127_v38 = vld [vmem:[%s22656_s7 + $0x610] sm:$0xf]  ;;  %v9736_v4 = vsel %vm8220_vm13, %v9680_v48, 0 }
 0x664   :  { %9235 = vmatpush.bf16.msrb.mxu3 %v12742_v25  ;;  %9817 = vmatpush.bf16.msrb.mxu0 %v13120_v56  ;;  %v13097_v25 = vld [vmem:[%s22656_s7 + $0x5e0] sm:$0xf0] }
 0x665   :  { %9222 = vmatpush.bf16.msrb.mxu1 %v12866_v2  ;;  %v12859_v2 = vld [vmem:[%s22656_s7 + $0x458] sm:$0xf0]  ;;  %v13100_v56 = vor.u32 %v13835_v47, %v13097_v25  ;;  %v13111_v47 = vld [vmem:[%s22656_s7 + $0x5f0] sm:$0xf] }
 0x666   :  { %9287 = vmatpush.bf16.msrb.mxu2 %v12750_v1  ;;  %v12778_v1 = vor.u32 %v13770_v42, %v12777_v14  ;;  %v12862_v27 = vor.u32 %v13788_v43, %v12859_v2  ;;  %v13128_v43 = vor.u32 %v13845_v18, %v13127_v38  ;;  %v13039_v18 = vld [vmem:[%s22656_s7 + $0x558] sm:$0xf] }
 0x668   :  { %9236 = vmatpush.bf16.msrb.mxu3 %v12726_v19  ;;  %9818 = vmatpush.bf16.msrb.mxu0 %v13104_v35  ;;  %v12762_v19 = vor.u32 %v13766_v41, %v12761_v17  ;;  %v12745_v35 = vld [vmem:[%s22656_s7 + $0x368] sm:$0xf]  ;;  %v13807_v17 = vld [vmem:[%s22656_s7 + $0x4f4] sm:$0xf]  ;;  %v13808_v41 = vld [vmem:[%s22656_s7 + $0x4fc] sm:$0xf] }
 0x669   :  { %9223 = vmatpush.bf16.msrb.mxu1 %v12850_v45  ;;  %v13827_v45 = vld [vmem:[%s22656_s7 + $0x594] sm:$0xf]  ;;  %v12746_v10 = vor.u32 %v13762_v51, %v12745_v35 }
 0x66a   :  { %9288 = vmatpush.bf16.msrb.mxu2 %v12734_v22  ;;  %v12846_v22 = vor.u32 %v13784_v39, %v12843_v7  ;;  %v13068_v59 = vor.u32 %v13827_v45, %v13065_v33  ;;  %v12993_v39 = vld [vmem:[%s22656_s7 + $0x508] sm:$0xf0]  ;;  %v13095_v45 = vld [vmem:[%s22656_s7 + $0x5d0] sm:$0xf] }
 0x66b   :  { %v12996_v33 = vor.u32 %v13808_v41, %v12993_v39  ;;  %v13007_v39 = vld [vmem:[%s22656_s7 + $0x518] sm:$0xf] }
 0x66c   :  { %9237 = vmatpush.bf16.msrb.mxu3 %v12710_v34  ;;  %9819 = vmatpush.bf16.msrb.mxu0 %v13088_v8  ;;  %v13758_v34 = vld [vmem:[%s22656_s7 + $0x354] sm:$0xf0]  ;;  %v13033_v8 = vld [vmem:[%s22656_s7 + $0x560] sm:$0xf0] }
 0x66d   :  { %9224 = vmatpush.bf16.msrb.mxu1 %v12834_v40  ;;  %v13052_v40 = vor.u32 %v13823_v0, %v13049_v55  ;;  %v12730_v49 = vor.u32 %v13758_v34, %v12729_v13  ;;  %v12972_v0 = vor.u32 %v13803_v61, %v12969_v29  ;;  %v13079_v55 = vld [vmem:[%s22656_s7 + $0x5b0] sm:$0xf]  ;;  %v12961_v13 = vld [vmem:[%s22656_s7 + $0x4c8] sm:$0xf0]  ;;  %v13071_v34 = vld [vmem:[%s22656_s7 + $0x598] sm:$0xf] }
 0x66e   :  { %9289 = vmatpush.bf16.msrb.mxu2 %v12718_v9  ;;  %v13819_v9 = vld [vmem:[%s22656_s7 + $0x554] sm:$0xf]  ;;  %v12991_v61 = vld [vmem:[%s22656_s7 + $0x4f8] sm:$0xf]  ;;  %v13810_v29 = vld [vmem:[%s22656_s7 + $0x504] sm:$0xf0] }
 0x66f   :  { %9238 = vmatmul.bf16.vlgmr.msrb.gmra.mxu3 %v21686_v37  ;;  %13143 = vmatmul.msk.bf16.vlgmr.msrb.gmra.mxu0 %vm8216_vm14, %v22194_v44  ;;  %v13036_v5 = vor.u32 %v13819_v9, %v13033_v8  ;;  %v13830_v9 = vld [vmem:[%s22656_s7 + $0x5a4] sm:$0xf0] }
 0x670   :  { %9298 = vmatpush.bf16.msra.mxu3 %v9202_v54  ;;  %12895 = vmatmul.msk.bf16.vlgmr.msrb.gmra.mxu1 %vm8216_vm14, %v21844_v16 }
 0x671   :  { %9256 = vmatpush.bf16.msra.mxu1 %v12826_v21  ;;  %9290 = vmatmul.bf16.vlgmr.msrb.gmra.mxu2 %v21686_v37  ;;  %v13820_v21 = vld [vmem:[%s22656_s7 + $0x55c] sm:$0xf] }
 0x672   :  { %9789 = vmatpush.bf16.msra.mxu2 %v9739_v36  ;;  %v13044_v54 = vor.u32 %v13820_v21, %v13041_v28  ;;  %v12713_v36 = vld [vmem:[%s22656_s7 + $0x328] sm:$0xf]  ;;  %v13080_v21 = vor.u32 %v13833_v57, %v13079_v55  ;;  %v12959_v57 = vld [vmem:[%s22656_s7 + $0x4b8] sm:$0xf] }
 0x674   :  { %9299 = vmatpush.bf16.msra.mxu3 %v12894_v6  ;;  %v13025_v6 = vld [vmem:[%s22656_s7 + $0x548] sm:$0xf0] }
 0x675   :  { %9257 = vmatpush.bf16.msra.mxu1 %v12810_v12  ;;  %v13816_v12 = vld [vmem:[%s22656_s7 + $0x53c] sm:$0xf] }
 0x676   :  { %9790 = vmatpush.bf16.msra.mxu2 %v13132_v50  ;;  %v12714_v50 = vor.u32 %v13754_v15, %v12713_v36  ;;  %v13028_v23 = vor.u32 %v13816_v12, %v13025_v6 }
 0x678   :  { %9300 = vmatpush.bf16.msra.mxu3 %v12878_v26  ;;  %v13812_v26 = vld [vmem:[%s22656_s7 + $0x51c] sm:$0xf] }
 0x679   :  { %9258 = vmatpush.bf16.msra.mxu1 %v12794_v52  ;;  %v13001_v52 = vld [vmem:[%s22656_s7 + $0x520] sm:$0xf0] }
 0x67a   :  { %9791 = vmatpush.bf16.msra.mxu2 %v13116_v32  ;;  %v13009_v32 = vld [vmem:[%s22656_s7 + $0x528] sm:$0xf0]  ;;  %v13004_v2 = vor.u32 %v13811_v53, %v13001_v52  ;;  %v13840_v53 = vld [vmem:[%s22656_s7 + $0x5fc] sm:$0xf] }
 0x67b   :  { %v13012_v25 = vor.u32 %v13812_v26, %v13009_v32  ;;  %v13121_v52 = vld [vmem:[%s22656_s7 + $0x608] sm:$0xf0] }
 0x67c   :  { %9301 = vmatpush.bf16.msra.mxu3 %v12862_v27  ;;  %v12985_v27 = vld [vmem:[%s22656_s7 + $0x500] sm:$0xf0] }
 0x67d   :  { %9259 = vmatpush.bf16.msra.mxu1 %v12778_v1  ;;  %v13841_v1 = vld [vmem:[%s22656_s7 + $0x5fc] sm:$0xf0]  ;;  %v12988_v20 = vor.u32 %v13807_v17, %v12985_v27 }
 0x67e   :  { %9792 = vmatpush.bf16.msra.mxu2 %v13100_v56  ;;  %v13112_v24 = vor.u32 %v13841_v1, %v13111_v47  ;;  %v13105_v1 = vld [vmem:[%s22656_s7 + $0x5e8] sm:$0xf0] }
 0x680   :  { %9302 = vmatpush.bf16.msra.mxu3 %v12846_v22  ;;  %v12977_v22 = vld [vmem:[%s22656_s7 + $0x4e8] sm:$0xf0] }
 0x681   :  { %9260 = vmatpush.bf16.msra.mxu1 %v12762_v19  ;;  %v13804_v19 = vld [vmem:[%s22656_s7 + $0x4dc] sm:$0xf] }
 0x682   :  { %9793 = vmatpush.bf16.msra.mxu2 %v13084_v60  ;;  %v8242_v14 = vpop.f32.mrf.mxu1  ;;  %v8268_v42 = vpop.f32.mrf.mxu0  ;;  %v12980_v62 = vor.u32 %v13804_v19, %v12977_v22 }
 0x683   :  { %12898 = vmatmul.msk.bf16.vlgmr.msra.gmra.mxu3 %vm8216_vm14, %v21844_v16  ;;  %v13815_v16 = vld [vmem:[%s22656_s7 + $0x534] sm:$0xf] }
 0x684   :  { %9773 = vmatpush.bf16.msrb.mxu3 %v13068_v59  ;;  %v13020_v58 = vor.u32 %v13815_v16, %v13017_v63  ;;  %v8255_v56 = vpop.f32.mrf.mxu3  ;;  %v13844_v16 = vld [vmem:[%s22656_s7 + $0x61c] sm:$0xf]  ;;  %v13137_v63 = vld [vmem:[%s22656_s7 + $0x628] sm:$0xf0] }
 0x685   :  { %13142 = vmatmul.msk.bf16.vlgmr.msra.gmra.mxu2 %vm8216_vm14, %v22194_v44  ;;  %9261 = vmatpush.bf16.msra.mxu1 %v12746_v10  ;;  %v8256_v7 = vadd.f32 %v8255_v56, %v8242_v14  ;;  %v13799_v10 = vld [vmem:[%s22656_s7 + $0x4b4] sm:$0xf]  ;;  %v13140_v38 = vor.u32 %v13844_v16, %v13137_v63  ;;  %v13124_v14 = vor.u32 %v13840_v53, %v13121_v52 }
 0x686   :  { %9825 = vmatpush.bf16.msrb.mxu2 %v13076_v30  ;;  %v9631_v30 = vunpack.c.h.b16 %v22000_v46  ;;  %v12953_v46 = vld [vmem:[%s22656_s7 + $0x4c0] sm:$0xf0] }
 0x687   :  { %v12956_v28 = vor.u32 %v13799_v10, %v12953_v46 }
 0x688   :  { %9774 = vmatpush.bf16.msrb.mxu3 %v13052_v40  ;;  %v13800_v40 = vld [vmem:[%s22656_s7 + $0x4bc] sm:$0xf]  ;;  %v9683_v8 = vpack.c.b16 %v9631_v30, %v9631_v30  ;;  %v12975_v30 = vld [vmem:[%s22656_s7 + $0x4d8] sm:$0xf] }
 0x689   :  { %9262 = vmatpush.bf16.msra.mxu1 %v12730_v49  ;;  %v12964_v31 = vor.u32 %v13800_v40, %v12961_v13  ;;  %v13072_v49 = vor.u32 %v13830_v9, %v13071_v34 }
 0x68a   :  { %9826 = vmatpush.bf16.msrb.mxu2 %v13060_v11  ;;  %v8294_v60 = vpop.f32.mrf.mxu2  ;;  %v8244_v59 = vpop.f32.mrf.mxu1  ;;  %v9745_v36 = vsel %vm8220_vm13, %v9683_v8, 0 }
 0x68b   :  { %v8270_v35 = vpop.f32.mrf.mxu0  ;;  %v12992_v59 = vor.u32 %v13810_v29, %v12991_v61  ;;  %v13849_v61 = vld [vmem:[%s22658_s9 + $0x10] sm:$0xff]  ;;  %v13858_v29 = vld [vmem:[%s22658_s9 + $0x58] sm:$0xff] }
 0x68c   :  { %9775 = vmatpush.bf16.msrb.mxu3 %v13036_v5  ;;  %v8257_v11 = vpop.f32.mrf.mxu3  ;;  %v13055_v5 = vld [vmem:[%s22656_s7 + $0x578] sm:$0xf]  ;;  %v13806_v35 = vld [vmem:[%s22656_s7 + $0x4e4] sm:$0xf0] }
 0x68d   :  { %9263 = vmatpush.bf16.msra.mxu1 %v12714_v50  ;;  %v12976_v55 = vor.u32 %v13806_v35, %v12975_v30 }
 0x68e   :  { %9827 = vmatpush.bf16.msrb.mxu2 %v13044_v54  ;;  %v13826_v54 = vld [vmem:[%s22656_s7 + $0x584] sm:$0xf0] }
 0x690   :  { %9776 = vmatpush.bf16.msrb.mxu3 %v13020_v58  ;;  %9264 = vmatmul.bf16.vlgmr.msra.gmra.mxu1 %v21686_v37  ;;  %v13837_v37 = vld [vmem:[%s22656_s7 + $0x5dc] sm:$0xf0]  ;;  %v13056_v58 = vor.u32 %v13826_v54, %v13055_v5 }
 0x691   :  { %9763 = vmatpush.bf16.msrb.mxu1 %v9736_v4  ;;  %v13096_v51 = vor.u32 %v13837_v37, %v13095_v45  ;;  %v13822_v4 = vld [vmem:[%s22656_s7 + $0x564] sm:$0xf0]  ;;  %v13089_v45 = vld [vmem:[%s22656_s7 + $0x5c8] sm:$0xf0] }
 0x692   :  { %9828 = vmatpush.bf16.msrb.mxu2 %v13028_v23  ;;  %v8296_v15 = vpop.f32.mrf.mxu2  ;;  %v8281_v48 = vpop.f32.mrf.mxu1  ;;  %v13040_v32 = vor.u32 %v13822_v4, %v13039_v18 }
 0x693   :  { %v22421_v12 = vadd.f32 %v8281_v48, %v8268_v42  ;;  %v13023_v42 = vld [vmem:[%s22656_s7 + $0x538] sm:$0xf] }
 0x694   :  { %9777 = vmatpush.bf16.msrb.mxu3 %v13004_v2  ;;  %v8674_v6 = vpop.f32.mrf.mxu0  ;;  %v8307_v23 = vpop.f32.mrf.mxu3 }
 0x695   :  { %9764 = vmatpush.bf16.msrb.mxu1 %v13128_v43  ;;  %v8675_v50 = vadd.f32 %v8674_v6, %v8256_v7  ;;  %v8308_v26 = vadd.f32 %v8307_v23, %v8294_v60  ;;  %v13818_v43 = vld [vmem:[%s22656_s7 + $0x544] sm:$0xf0]  ;;  %v13854_v23 = vld [vmem:[%s22658_s9 + $0x38] sm:$0xff] }
 0x696   :  { %9829 = vmatpush.bf16.msrb.mxu2 %v13012_v25  ;;  %v13836_v25 = vld [vmem:[%s22656_s7 + $0x5dc] sm:$0xf]  ;;  %v13024_v56 = vor.u32 %v13818_v43, %v13023_v42  ;;  %v13814_v7 = vld [vmem:[%s22656_s7 + $0x524] sm:$0xf0]  ;;  %10140 = vmatpush.bf16.msra.mxu0 %v13854_v23  ;;  %v13871_v23 = vld [vmem:[%s22658_s9 + $0xc0] sm:$0xff] }
 0x697   :  { %v13108_v41 = vor.u32 %v13836_v25, %v13105_v1  ;;  %v13852_v43 = vld [vmem:[%s22658_s9 + $0x28] sm:$0xff] }
 0x698   :  { %9778 = vmatpush.bf16.msrb.mxu3 %v12988_v20  ;;  %v13832_v20 = vld [vmem:[%s22656_s7 + $0x5bc] sm:$0xf] }
 0x699   :  { %9765 = vmatpush.bf16.msrb.mxu1 %v13112_v24  ;;  %v13092_v37 = vor.u32 %v13832_v20, %v13089_v45 }
 0x69a   :  { %9830 = vmatpush.bf16.msrb.mxu2 %v12996_v33  ;;  %v8283_v47 = vpop.f32.mrf.mxu1  ;;  %v13008_v33 = vor.u32 %v13814_v7, %v13007_v39  ;;  %v13850_v7 = vld [vmem:[%s22658_s9 + $0x18] sm:$0xff] }
 0x69c   :  { %9779 = vmatpush.bf16.msrb.mxu3 %v12972_v0  ;;  %v8687_v2 = vpop.f32.mrf.mxu2  ;;  %v8676_v27 = vpop.f32.mrf.mxu0 }
 0x69d   :  { %9766 = vmatpush.bf16.msrb.mxu1 %v13096_v51  ;;  %v22451_v17 = vadd.f32 %v8687_v2, %v8675_v50  ;;  %v8309_v24 = vpop.f32.mrf.mxu3  ;;  %v13861_v2 = vld [vmem:[%s22658_s9 + $0x70] sm:$0xff]  ;;  %v13860_v27 = vld [vmem:[%s22658_s9 + $0x68] sm:$0xff] }
 0x69e   :  { %9831 = vmatpush.bf16.msrb.mxu2 %v12980_v62  ;;  %v13802_v62 = vld [vmem:[%s22656_s7 + $0x4c4] sm:$0xf0]  ;;  %v13859_v24 = vld [vmem:[%s22658_s9 + $0x60] sm:$0xff] }
 0x69f   :  { %v12960_v11 = vor.u32 %v13802_v62, %v12959_v57  ;;  %v13870_v57 = vld [vmem:[%s22658_s9 + $0xb8] sm:$0xff] }
 0x6a0   :  { %9780 = vmatpush.bf16.msrb.mxu3 %v12956_v28 }
 0x6a1   :  { %9767 = vmatpush.bf16.msrb.mxu1 %v13080_v21 }
 0x6a2   :  { %9832 = vmatpush.bf16.msrb.mxu2 %v12964_v31 }
 0x6a3   :  { %9781 = vmatmul.bf16.vlgmr.msrb.gmra.mxu3 %v22082_v3  ;;  %v8320_v22 = vpop.f32.mrf.mxu1 }
 0x6a4   :  { %9841 = vmatpush.bf16.msra.mxu3 %v9745_v36  ;;  %13141 = vmatmul.msk.bf16.vlgmr.msrb.gmra.mxu1 %vm8216_vm14, %v22194_v44  ;;  %v8689_v19 = vpop.f32.mrf.mxu2  ;;  %v9213_v60 = vpop.f32.mrf.mxu0 }
 0x6a5   :  { %9799 = vmatpush.bf16.msra.mxu1 %v13072_v49  ;;  %9833 = vmatmul.bf16.vlgmr.msrb.gmra.mxu2 %v22082_v3  ;;  %v8333_v51 = vpop.f32.mrf.mxu3  ;;  %v9939_v19 = vld [vmem:[%s22658_s9 + $0xf8] sm:$0x3] }
 0x6a6   :  { %v8334_v0 = vadd.f32 %v8333_v51, %v8320_v22  ;;  %v10069_v22 = vunpack.c.l.b16 %v9939_v19  ;;  %v13857_v51 = vld [vmem:[%s22658_s9 + $0x50] sm:$0xff] }
 0x6a8   :  { %9842 = vmatpush.bf16.msra.mxu3 %v13140_v38 }
 0x6a9   :  { %9800 = vmatpush.bf16.msra.mxu1 %v13056_v58 }
 0x6ab   :  { %v8322_v46 = vpop.f32.mrf.mxu1 }
 0x6ac   :  { %9843 = vmatpush.bf16.msra.mxu3 %v13124_v14  ;;  %v8713_v10 = vpop.f32.mrf.mxu2  ;;  %v9215_v40 = vpop.f32.mrf.mxu0  ;;  %v13862_v14 = vld [vmem:[%s22658_s9 + $0x78] sm:$0xff]  ;;  %v13856_v46 = vld [vmem:[%s22658_s9 + $0x48] sm:$0xff] }
 0x6ad   :  { %9801 = vmatpush.bf16.msra.mxu1 %v13040_v32  ;;  %v8335_v13 = vpop.f32.mrf.mxu3  ;;  %v13853_v32 = vld [vmem:[%s22658_s9 + $0x30] sm:$0xff] }
 0x6ae   :  { %10141 = vmatpush.bf16.msra.mxu0 %v13853_v32  ;;  %v13869_v40 = vld [vmem:[%s22658_s9 + $0xb0] sm:$0xff]  ;;  %v13855_v13 = vld [vmem:[%s22658_s9 + $0x40] sm:$0xff] }
 0x6b0   :  { %9844 = vmatpush.bf16.msra.mxu3 %v13108_v41 }
 0x6b1   :  { %9802 = vmatpush.bf16.msra.mxu1 %v13024_v56 }
 0x6b2   :  { %10142 = vmatpush.bf16.msra.mxu0 %v13852_v43  ;;  %v13863_v43 = vld [vmem:[%s22658_s9 + $0x80] sm:$0xff] }
 0x6b4   :  { %9845 = vmatpush.bf16.msra.mxu3 %v13092_v37  ;;  %v8715_v34 = vpop.f32.mrf.mxu2 }
 0x6b5   :  { %9803 = vmatpush.bf16.msra.mxu1 %v13008_v33  ;;  %v13868_v34 = vld [vmem:[%s22658_s9 + $0xa8] sm:$0xff] }
 0x6b7   :  { %13144 = vmatmul.msk.bf16.vlgmr.msra.gmra.mxu3 %vm8216_vm14, %v22194_v44 }
 0x6b8   :  { %v22486_v44 = vpop.f32.mrf.mxu0  ;;  %10166 = vmatpush.bf16.msrb.mxu3 %v13870_v57  ;;  %v13881_v57 = vld [vmem:[%s22661_s11 + $0x18] sm:$0xff] }
 0x6b9   :  { %9804 = vmatpush.bf16.msra.mxu1 %v12992_v59  ;;  %v10101_v59 = vpack.c.b16 %v10069_v22, %v10069_v22 }
 0x6bb   :  { %v10138_v30 = vsel %vm1111_vm2, %v10101_v59, 0 }
 0x6bc   :  { %10179 = vmatpush.bf16.msra.mxu2 %v10138_v30  ;;  %10167 = vmatpush.bf16.msrb.mxu3 %v13869_v40 }
 0x6bd   :  { %9805 = vmatpush.bf16.msra.mxu1 %v12976_v55  ;;  %v13847_v55 = vld [vmem:[%s22658_s9] sm:$0xff] }
 0x6be   :  { %v8700_v9 = vpop.f32.mrf.mxu3 }
 0x6bf   :  { %v8701_v8 = vadd.f32 %v8700_v9, %v22421_v12 }
 0x6c0   :  { %v8752_v21 = vpop.f32.mrf.mxu2  ;;  %v9280_v49 = vpop.f32.mrf.mxu0  ;;  %10168 = vmatpush.bf16.msrb.mxu3 %v13868_v34 }
 0x6c1   :  { %9806 = vmatpush.bf16.msra.mxu1 %v12960_v11  ;;  %v8753_v28 = vadd.f32 %v8752_v21, %v8334_v0  ;;  %v8714_v31 = vadd.f32 %v8713_v10, %v8701_v8  ;;  %v13877_v0 = vld [vmem:[%s22658_s9 + $0xf0] sm:$0xff]  ;;  %v13876_v11 = vld [vmem:[%s22658_s9 + $0xe8] sm:$0xff]  ;;  %v13875_v8 = vld [vmem:[%s22658_s9 + $0xe0] sm:$0xff] }
 0x6c2   :  { %10180 = vmatpush.bf16.msra.mxu2 %v13877_v0  ;;  %v13867_v21 = vld [vmem:[%s22658_s9 + $0xa0] sm:$0xff]  ;;  %v13883_v0 = vld [vmem:[%s22661_s11 + $0x28] sm:$0xff] }
 0x6c4   :  { %9807 = vmatmul.bf16.vlgmr.msra.gmra.mxu1 %v22082_v3  ;;  %10169 = vmatpush.bf16.msrb.mxu3 %v13867_v21 }
 0x6c5   :  { %10153 = vmatpush.bf16.msrb.mxu1 %v13862_v14 }
 0x6c6   :  { %v8702_v36 = vpop.f32.mrf.mxu3  ;;  %10181 = vmatpush.bf16.msra.mxu2 %v13876_v11  ;;  %v13879_v11 = vld [vmem:[%s22661_s11 + $0x8] sm:$0xff] }
 0x6c7   :  { %v8726_v5 = vpop.f32.mrf.mxu1  ;;  %v13873_v36 = vld [vmem:[%s22658_s9 + $0xd0] sm:$0xff] }
 0x6c8   :  { %v8727_v54 = vadd.f32 %v8726_v5, %v8308_v26  ;;  %v8754_v15 = vpop.f32.mrf.mxu2 }
 0x6c9   :  { %10154 = vmatpush.bf16.msrb.mxu1 %v13861_v2  ;;  %v13866_v15 = vld [vmem:[%s22658_s9 + $0x98] sm:$0xff] }
 0x6ca   :  { %10182 = vmatpush.bf16.msra.mxu2 %v13875_v8  ;;  %10170 = vmatpush.bf16.msrb.mxu3 %v13866_v15 }
 0x6cd   :  { %10155 = vmatpush.bf16.msrb.mxu1 %v13860_v27 }
 0x6cf   :  { %v8728_v48 = vpop.f32.mrf.mxu1 }
 0x6d1   :  { %10156 = vmatpush.bf16.msrb.mxu1 %v13859_v24 }
 0x6d2   :  { %v8765_v16 = vpop.f32.mrf.mxu3 }
 0x6d3   :  { %v22489_v63 = vadd.f32 %v8765_v16, %v8753_v28  ;;  %v13874_v28 = vld [vmem:[%s22658_s9 + $0xd8] sm:$0xff]  ;;  %v13872_v16 = vld [vmem:[%s22658_s9 + $0xc8] sm:$0xff] }
 0x6d4   :  { %v9252_v6 = vpop.f32.mrf.mxu2  ;;  %10183 = vmatpush.bf16.msra.mxu2 %v13874_v28 }
 0x6d5   :  { %10157 = vmatpush.bf16.msrb.mxu1 %v13858_v29 }
 0x6d8   :  { %v22493_v58 = vpop.f32.mrf.mxu0  ;;  %10184 = vmatpush.bf16.msra.mxu2 %v13873_v36 }
 0x6d9   :  { %10158 = vmatpush.bf16.msrb.mxu1 %v13857_v51 }
 0x6da   :  { %v8767_v38 = vpop.f32.mrf.mxu3 }
 0x6db   :  { %v8739_v50 = vpop.f32.mrf.mxu1 }
 0x6dc   :  { %v22491_v3 = vadd.f32 %v8739_v50, %v8727_v54  ;;  %v9254_v12 = vpop.f32.mrf.mxu2  ;;  %10185 = vmatpush.bf16.msra.mxu2 %v13872_v16  ;;  %v13885_v16 = vld [vmem:[%s22660_s12] ss:$0 sm:$0xff] }
 0x6dd   :  { %10159 = vmatpush.bf16.msrb.mxu1 %v13856_v46 }
 0x6e0   :  { %v9758_v4 = vpop.f32.mrf.mxu0  ;;  %10186 = vmatpush.bf16.msra.mxu2 %v13871_v23 }
 0x6e1   :  { %10160 = vmatpush.bf16.msrb.mxu1 %v13855_v13  ;;  %v13878_v13 = vld [vmem:[%s22661_s11] sm:$0xff] }
 0x6e3   :  { %v8741_v18 = vpop.f32.mrf.mxu1 }
 0x6ec   :  { %v22498_v26 = vpop.f32.mrf.mxu0 }
 0x6ed   :  { %v9226_v53 = vpop.f32.mrf.mxu1 }
 0x6ee   :  { %v9227_v52 = vadd.f32 %v9226_v53, %v9213_v60  ;;  %v13848_v60 = vld [vmem:[%s22658_s9 + $0x8] sm:$0xff] }
 0x6f0   :  { %v22507_v42 = vadd.f32 %v9227_v52, %v22451_v17  ;;  %v13851_v17 = vld [vmem:[%s22658_s9 + $0x20] sm:$0xff]  ;;  %v13864_v52 = vld [vmem:[%s22658_s9 + $0x88] sm:$0xff] }
 0x6f1   :  { %10143 = vmatpush.bf16.msra.mxu0 %v13851_v17 }
 0x6f2   :  { %v9239_v47 = vpop.f32.mrf.mxu3 }
 0x6f3   :  { %v9253_v25 = vadd.f32 %v9252_v6, %v9239_v47 }
 0x6f4   :  { %v22515_v1 = vpop.f32.mrf.mxu2  ;;  %v9823_v39 = vpop.f32.mrf.mxu0 }
 0x6f5   :  { %v9228_v56 = vpop.f32.mrf.mxu1  ;;  %v22523_v41 = vadd.f32 %v9253_v25, %v8714_v31  ;;  %10144 = vmatpush.bf16.msra.mxu0 %v13850_v7  ;;  %v9855_v31 = vld [vmem:[%s22659_s8] sm:$0xf] }
 0x6f6   :  { %v9857_v54 = vperm.slane %v9855_v31, 0  ;;  %v9858_v18 = vperm.slane %v9855_v31, 1  ;;  %v9860_v7 = vperm.slane %v9855_v31, 3  ;;  %v9859_v19 = vperm.slane %v9855_v31, 2 }
 0x6f9   :  { %10145 = vmatpush.bf16.msra.mxu0 %v13849_v61 }
 0x6fa   :  { %v9241_v20 = vpop.f32.mrf.mxu3 }
 0x6fc   :  { %v9293_v45 = vpop.f32.mrf.mxu2 }
 0x6fd   :  { %10146 = vmatpush.bf16.msra.mxu0 %v13848_v60 }
 0x701   :  { %10147 = vmatpush.bf16.msra.mxu0 %v13847_v55  ;;  %v13882_v55 = vld [vmem:[%s22661_s11 + $0x20] sm:$0xff] }
 0x706   :  { %v22531_v33 = vpop.f32.mrf.mxu3 }
 0x707   :  { %v9305_v27 = vadd.f32 %v22531_v33, %v22515_v1 }
 0x708   :  { %v9795_v37 = vpop.f32.mrf.mxu2 }
 0x70d   :  { %v22546_v35 = vpop.f32.mrf.mxu1 }
 0x70e   :  { %v9306_v62 = vpop.f32.mrf.mxu3  ;;  %v9279_v24 = vadd.f32 %v22486_v44, %v22546_v35  ;;  %v10206_v44 = vld [vmem:[%s22661_s11 + $0x30] sm:$0x3] }
 0x70f   :  { %v10236_v35 = vunpack.c.l.b16 %v10206_v44 }
 0x710   :  { %v9797_v10 = vpop.f32.mrf.mxu2  ;;  %v9310_v61 = vadd.f32 %v9279_v24, %v22491_v3 }
 0x711   :  { %v10243_v3 = vpack.c.b16 %v10236_v35, %v10236_v35  ;;  %v13880_v10 = vld [vmem:[%s22661_s11 + $0x10] sm:$0xff] }
 0x715   :  { %v9267_v9 = vpop.f32.mrf.mxu1 }
 0x716   :  { %v13884_v9 = vld [vmem:[%s22657_s10] ss:$0 sm:$0xff] }
 0x721   :  { %v9769_v49 = vpop.f32.mrf.mxu1 }
 0x722   :  { %v9770_v5 = vadd.f32 %v9769_v49, %v22493_v58  ;;  %v13865_v58 = vld [vmem:[%s22658_s9 + $0x90] sm:$0xff] }
 0x723   :  { %10171 = vmatpush.bf16.msrb.mxu3 %v13865_v58 }
 0x724   :  { %v9851_v48 = vadd.f32 %v9770_v5, %v22507_v42 }
 0x726   :  { %v9865_v6 = vadd.f32 %v9857_v54, %v9851_v48  ;;  %v9782_v50 = vpop.f32.mrf.mxu3 }
 0x727   :  { %v9796_v12 = vadd.f32 %v9795_v37, %v9782_v50  ;;  %10172 = vmatpush.bf16.msrb.mxu3 %v13864_v52 }
 0x728   :  { %v9869_v38 = vmax.f32 %v9865_v6, 0.0  ;;  %v9834_v4 = vpop.f32.mrf.mxu2 }
 0x729   :  { %v9771_v53 = vpop.f32.mrf.mxu1  ;;  %v9852_v14 = vadd.f32 %v9796_v12, %v22523_v41  ;;  %v9311_v41 = vadd.f32 %v9305_v27, %v22489_v63 }
 0x72a   :  { %v9873_v32 = vpack.c.bf16 %v9869_v38, %v9869_v38 }
 0x72b   :  { %v9866_v42 = vadd.f32 %v9858_v18, %v9852_v14  ;;  %10173 = vmatpush.bf16.msrb.mxu3 %v13863_v43 }
 0x72c   :  { %10148 = vmatmul.bf16.vlgmr.msra.gmra.mxu0 %v9873_v32 }
 0x72d   :  { %v9870_v2 = vmax.f32 %v9866_v42, 0.0 }
 0x72e   :  { %v9784_v47 = vpop.f32.mrf.mxu3 }
 0x72f   :  { %v9874_v25 = vpack.c.bf16 %v9870_v2, %v9870_v2 }
 0x730   :  { %v9836_v17 = vpop.f32.mrf.mxu2 }
 0x731   :  { %10161 = vmatmul.bf16.vlgmr.msrb.gmra.mxu1 %v9874_v25 }
 0x73a   :  { %v9847_v56 = vpop.f32.mrf.mxu3 }
 0x73b   :  { %v9848_v39 = vadd.f32 %v9847_v56, %v9834_v4 }
 0x73d   :  { %v9854_v20 = vadd.f32 %v9848_v39, %v9311_v41 }
 0x73f   :  { %v9868_v45 = vadd.f32 %v9860_v7, %v9854_v20 }
 0x741   :  { %v9808_v37 = vpop.f32.mrf.mxu1  ;;  %v9872_v22 = vmax.f32 %v9868_v45, 0.0 }
 0x742   :  { %v9822_v29 = vadd.f32 %v22498_v26, %v9808_v37  ;;  %v9849_v59 = vpop.f32.mrf.mxu3  ;;  %v10255_v26 = vsel %vm1111_vm2, %v10243_v3, 0 }
 0x743   :  { %v9876_v1 = vpack.c.bf16 %v9872_v22, %v9872_v22  ;;  %10258 = vmatpush.bf16.msrb.mxu0 %v10255_v26 }
 0x744   :  { %v9853_v60 = vadd.f32 %v9822_v29, %v9310_v61 }
 0x745   :  { %13269 = vmatmul.msk.bf16.vlgmr.msra.gmra.mxu2 %vm10133_vm15, %v9876_v1 }
 0x746   :  { %v9867_v33 = vadd.f32 %v9859_v19, %v9853_v60 }
 0x747   :  { %10259 = vmatpush.bf16.msrb.mxu0 %v13883_v0 }
 0x748   :  { %v9871_v63 = vmax.f32 %v9867_v33, 0.0 }
 0x749   :  { %v9810_v30 = vpop.f32.mrf.mxu1 }
 0x74a   :  { %v9875_v51 = vpack.c.bf16 %v9871_v63, %v9871_v63 }
 0x74b   :  { %10260 = vmatpush.bf16.msrb.mxu0 %v13882_v55 }
 0x74c   :  { %10174 = vmatmul.bf16.vlgmr.msrb.gmra.mxu3 %v9875_v51 }
 0x74f   :  { %10261 = vmatpush.bf16.msrb.mxu0 %v13881_v57 }
 0x753   :  { %10262 = vmatpush.bf16.msrb.mxu0 %v13880_v10 }
 0x757   :  { %10263 = vmatpush.bf16.msrb.mxu0 %v13879_v11 }
 0x75b   :  { %10264 = vmatpush.bf16.msrb.mxu0 %v13878_v13 }
 0x7a9   :  { %v10149_v62 = vpop.f32.mrf.mxu0 }
 0x7aa   :  { %v10150_v21 = vadd.f32 %v13884_v9, %v10149_v62 }
 0x7ae   :  { %v10162_v46 = vpop.f32.mrf.mxu1 }
 0x7af   :  { %v10163_v28 = vadd.f32 %v10162_v46, %v10150_v21 }
 0x7b1   :  { %v10151_v40 = vpop.f32.mrf.mxu0 }
 0x7b6   :  { %v10164_v34 = vpop.f32.mrf.mxu1 }
 0x7c8   :  { %v10188_v8 = vpop.f32.mrf.mxu2 }
 0x7cf   :  { %v10175_v31 = vpop.f32.mrf.mxu3 }
 0x7d0   :  { %v10176_v49 = vadd.f32 %v10175_v31, %v10163_v28  ;;  %v10190_v54 = vpop.f32.mrf.mxu2 }
 0x7d2   :  { %v10189_v5 = vadd.f32 %v10188_v8, %v10176_v49 }
 0x7d4   :  { %v10192_v36 = vmax.f32 %v10189_v5, 0.0 }
 0x7d6   :  { %v10193_v15 = vpack.c.bf16 %v10192_v36, %v10192_v36 }
 0x7d7   :  { %v10177_v48 = vpop.f32.mrf.mxu3 }
 0x7d8   :  { %13294 = vmatmul.msk.bf16.vlgmr.msrb.gmra.mxu0 %vm10250_vm0, %v10193_v15 }
 0x855   :  { %v10266_v6 = vpop.f32.mrf.mxu0 }
 0x856   :  { %v10267_v50 = vadd.f32 %v13885_v16, %v10266_v6 }
 0x858   :  { %10270 = vst [vmem:[%s22662_s13] sm:$0xff] %v10267_v50 }
 0x85d   :  { %v10268_v58 = vpop.f32.mrf.mxu0 }

</bundles_post_ra>
